<compile_context>
chip_gen: v6e
topology: v6e:2x2x1
jax: 0.10.0
libtpu: 0.0.40
codegen_flags: <defaults>
</compile_context>

<pallas_src>
import functools

import jax
import jax.numpy as jnp
from jax.experimental import pallas as pl
from jax.experimental.pallas import tpu as pltpu

# ----------------------------- configuration -------------------------------
NF0 = 5                 # nf0: input edge features
CONV_RES = [16, 32]     # conv_res
INPUT_RES = 256         # input_res (number of edges)
POOL_RES = [128, 64]    # pool_res
FC_N = 32               # fc_n
NRES = 3                # nresblocks in MResConv
K = [NF0] + CONV_RES
RES = [INPUT_RES] + POOL_RES
EPS = 1e-5
N_LAYERS = len(K) - 1


# ----------------------------- Pallas kernel --------------------------------
def fused_forward_kernel(*refs, n_layers, nres):
    """Whole MeshConvNet forward for one batch sample (grid axis = batch).

    refs layout (inputs, then the single output ref):
      [x,
       adj_0 .. adj_{L-1},            (1, E_l, 4*E_l)  combined one-hot gather/sym matrices
       pool_0 .. pool_{L-1},          (E_l, E_{l+1})   1/ratio banded average-pool matrices
       (w0, wr, bn_scale, bn_shift, gn) per layer,
       fc1_wt, fc1_b, head_wt, head_b,
       out]                           (1, 4, 1)        [cda | cla | cop(2)]
    """
    x_ref = refs[0]
    adj_refs = refs[1:1 + n_layers]
    pool_refs = refs[1 + n_layers:1 + 2 * n_layers]
    base = 1 + 2 * n_layers
    layer_refs = [refs[base + 5 * l: base + 5 * (l + 1)] for l in range(n_layers)]
    fc1_wt_ref, fc1_b_ref, head_wt_ref, head_b_ref = refs[base + 5 * n_layers:
                                                          base + 5 * n_layers + 4]
    out_ref = refs[-1]

    def conv(xp, adj, w, e):
        # Gather + symmetric neighbor functions via one MXU matmul, then the 1x5 conv as a
        # single (Cout, 5*Cin) x (5*Cin, e) matmul (taps stacked along sublanes).
        g = jnp.dot(xp, adj, preferred_element_type=jnp.float32)          # (Cin, 4e)
        sym = jnp.concatenate(
            [xp,                                                          # self tap
             g[:, 0:e], g[:, e:2 * e],                                    # f1+f3, f2+f4
             jnp.abs(g[:, 2 * e:3 * e]), jnp.abs(g[:, 3 * e:4 * e])],     # |f1-f3|, |f2-f4|
            axis=0)                                                       # (5*Cin, e)
        return jnp.dot(w, sym, preferred_element_type=jnp.float32)        # (Cout, e)

    x = x_ref[0]                                                          # (C0_pad, E0)
    for l in range(n_layers):
        w0_ref, wr_ref, bns_ref, bnsh_ref, gn_ref = layer_refs[l]
        adj = adj_refs[l][0]                                              # (e, 4e)
        e = adj_refs[l].shape[1]

        # ---- MResConv: conv0 -> [relu -> BN(folded) -> conv]*nres -> relu(x + x1) ----
        y = conv(x, adj, w0_ref[...], e)
        y0 = y
        for r in range(nres):
            xp = jnp.maximum(y, 0.0) * bns_ref[r] + bnsh_ref[r]           # pre-gather ReLU+BN
            y = conv(xp, adj, wr_ref[r], e)
        y = jnp.maximum(y + y0, 0.0)

        # ---- relu(GroupNorm(num_groups=1, affine=True)(y)) ----
        mean = jnp.mean(y)
        var = jnp.mean(jnp.square(y - mean))
        y = (y - mean) * jax.lax.rsqrt(var + EPS)
        y = jnp.maximum(y * gn_ref[0] + gn_ref[1], 0.0)

        # ---- pool (E_l -> E_{l+1}) as an MXU matmul with a 1/ratio banded matrix ----
        # TODO(synk): MeshPool is topology-driven edge collapse (priority queue + rewiring);
        # approximated here by a fixed-ratio average pool along the edge axis.
        x = jnp.dot(y, pool_refs[l][...], preferred_element_type=jnp.float32)

    # ---- gp (global AvgPool1d) + fc1 + ReLU + concatenated [cda | cla | cop] heads ----
    pooled = jnp.mean(x, axis=-1, keepdims=True)                          # (C, 1)
    h = jnp.dot(fc1_wt_ref[...], pooled, preferred_element_type=jnp.float32) + fc1_b_ref[...]
    h = jnp.maximum(h, 0.0)                                               # (FC_N, 1)
    out = jnp.dot(head_wt_ref[...], h, preferred_element_type=jnp.float32) + head_b_ref[...]
    out_ref[0] = out                                                      # (4, 1)


# ----------------------------- JAX glue / wrappers --------------------------
def build_adjacency(gi, e):
    """gi: (B, e, 4) neighbor indices -> (B, e, 4e) combined one-hot gather/sym matrices.

    Columns [0:e]   : P(n1)+P(n3)   (sum tap 1)
            [e:2e]  : P(n2)+P(n4)   (sum tap 2)
            [2e:3e] : P(n1)-P(n3)   (diff tap 1, abs taken in-kernel)
            [3e:4e] : P(n2)-P(n4)   (diff tap 2, abs taken in-kernel)
    Index -1 (boundary padding on real meshes) one-hots to a zero row -> correct masking.
    """
    oh = jax.nn.one_hot(gi, e, dtype=jnp.float32)        # (B, e, 4, e): oh[b, j, k, i]
    p = jnp.transpose(oh, (0, 2, 3, 1))                  # (B, 4, e, e): p[b, k, i, j]
    return jnp.concatenate(
        [p[:, 0] + p[:, 2], p[:, 1] + p[:, 3],
         p[:, 0] - p[:, 2], p[:, 1] - p[:, 3]], axis=-1)  # (B, e, 4e)


def build_pool_matrix(e_in, e_out):
    ratio = e_in // e_out
    rows = jnp.arange(e_in)[:, None]
    cols = jnp.arange(e_out)[None, :]
    return (rows // ratio == cols).astype(jnp.float32) / float(ratio)


def _shared_spec(shape):
    zeros = (0,) * len(shape)

    def idx(bi):
        return zeros
    return pl.BlockSpec(tuple(shape), idx)


def _batched_spec(shape):
    tail = (0,) * (len(shape) - 1)

    def idx(bi):
        return (bi,) + tail
    return pl.BlockSpec((1,) + tuple(shape[1:]), idx)


def mesh_conv_net_forward(x, gis, params):
    b = x.shape[0]
    # Pad input channels (5 -> 8) so every in-kernel sublane concat is 8-aligned; the matching
    # weight columns are zero, so this is exact.
    cin_pad = params['layers'][0]['w0'].shape[1] // 5
    if x.shape[1] < cin_pad:
        x = jnp.pad(x, ((0, 0), (0, cin_pad - x.shape[1]), (0, 0)))

    adjs = [build_adjacency(gis[l], RES[l]) for l in range(N_LAYERS)]
    pools = [build_pool_matrix(RES[l], RES[l + 1]) for l in range(N_LAYERS)]

    inputs = [x] + adjs + pools
    in_specs = [_batched_spec(x.shape)]
    in_specs += [_batched_spec(a.shape) for a in adjs]
    in_specs += [_shared_spec(p.shape) for p in pools]
    for l in range(N_LAYERS):
        lp = params['layers'][l]
        for name in ('w0', 'wr', 'bn_scale', 'bn_shift', 'gn'):
            inputs.append(lp[name])
            in_specs.append(_shared_spec(lp[name].shape))
    for name in ('fc1_wt', 'fc1_b', 'head_wt', 'head_b'):
        inputs.append(params[name])
        in_specs.append(_shared_spec(params[name].shape))

    kernel = functools.partial(fused_forward_kernel, n_layers=N_LAYERS, nres=NRES)
    out = pl.pallas_call(
        kernel,
        out_shape=jax.ShapeDtypeStruct((b, 4, 1), jnp.float32),
        grid=(b,),
        in_specs=in_specs,
        out_specs=pl.BlockSpec((1, 4, 1), lambda bi: (bi, 0, 0)),
        compiler_params=pltpu.CompilerParams(dimension_semantics=("parallel",)),
    )(*inputs)

    out = out[:, :, 0]                                   # (B, 4)
    return out[:, 0:1], out[:, 1:2], out[:, 2:4]         # cda, cla, cop


# ----------------------------- parameter init -------------------------------
def _conv_w_to_mat(w, cin_pad):
    # w: (Cout, Cin, 5) -> (Cout, 5*cin_pad), kernel-tap major / cin minor, zero-padded cin.
    cout, cin, k = w.shape
    w = jnp.transpose(w, (0, 2, 1))                      # (Cout, 5, Cin)
    if cin_pad > cin:
        w = jnp.pad(w, ((0, 0), (0, 0), (0, cin_pad - cin)))
    return w.reshape(cout, k * cin_pad)


def init_params(key):
    keys = iter(jax.random.split(key, 64))
    nxt = lambda: next(keys)
    cin0_pad = ((K[0] + 7) // 8) * 8
    layers = []
    for i in range(len(K) - 1):
        cin, cout = K[i], K[i + 1]
        cin_p = cin0_pad if i == 0 else cin
        layer = {'w0': _conv_w_to_mat(
            0.2 * jax.random.normal(nxt(), (cout, cin, 5), jnp.float32), cin_p)}
        wr, bs, bsh = [], [], []
        for _ in range(NRES):
            wr.append(_conv_w_to_mat(
                0.2 * jax.random.normal(nxt(), (cout, cout, 5), jnp.float32), cout))
            gamma = 1.0 + 0.1 * jax.random.normal(nxt(), (cout,), jnp.float32)
            beta = 0.1 * jax.random.normal(nxt(), (cout,), jnp.float32)
            rmean = 0.1 * jax.random.normal(nxt(), (cout,), jnp.float32)
            rvar = 1.0 + 0.1 * jnp.abs(jax.random.normal(nxt(), (cout,), jnp.float32))
            scale = gamma * jax.lax.rsqrt(rvar + EPS)    # eval-mode BatchNorm2d folded
            shift = beta - rmean * scale
            bs.append(scale.reshape(cout, 1))
            bsh.append(shift.reshape(cout, 1))
        layer['wr'] = jnp.stack(wr)                      # (NRES, Cout, 5*Cout)
        layer['bn_scale'] = jnp.stack(bs)                # (NRES, Cout, 1)
        layer['bn_shift'] = jnp.stack(bsh)               # (NRES, Cout, 1)
        gng = (1.0 + 0.1 * jax.random.normal(nxt(), (cout,), jnp.float32)).reshape(cout, 1)
        gnb = (0.1 * jax.random.normal(nxt(), (cout,), jnp.float32)).reshape(cout, 1)
        layer['gn'] = jnp.stack([gng, gnb])              # (2, Cout, 1)
        layers.append(layer)

    params = {'layers': layers}
    fc1_w = 0.2 * jax.random.normal(nxt(), (K[-1], FC_N), jnp.float32)
    params['fc1_wt'] = fc1_w.T                           # (FC_N, K[-1])
    params['fc1_b'] = 0.1 * jax.random.normal(nxt(), (FC_N, 1), jnp.float32)
    cda_w = 0.2 * jax.random.normal(nxt(), (FC_N, 1), jnp.float32)
    cda_b = 0.1 * jax.random.normal(nxt(), (1, 1), jnp.float32)
    cla_w = 0.2 * jax.random.normal(nxt(), (FC_N, 1), jnp.float32)
    cla_b = 0.1 * jax.random.normal(nxt(), (1, 1), jnp.float32)
    cop_w = 0.2 * jax.random.normal(nxt(), (FC_N, 2), jnp.float32)
    cop_b = 0.1 * jax.random.normal(nxt(), (1, 2), jnp.float32)
    params['head_wt'] = jnp.concatenate([cda_w, cla_w, cop_w], axis=1).T   # (4, FC_N)
    params['head_b'] = jnp.concatenate([cda_b, cla_b, cop_b], axis=1).T    # (4, 1)
    return params


# ----------------------------------- main ------------------------------------
if __name__ == "__main__":
    key = jax.random.PRNGKey(0)
    k_x, k_p, k_g0, k_g1 = jax.random.split(key, 4)
    B = 2
    x = jax.random.normal(k_x, (B, NF0, INPUT_RES), jnp.float32)
    # synthetic mesh connectivity (gemm_edges): 4 neighbor edge indices per edge, per layer
    gis = [jax.random.randint(k_g0, (B, RES[0], 4), 0, RES[0], jnp.int32),
           jax.random.randint(k_g1, (B, RES[1], 4), 0, RES[1], jnp.int32)]
    params = init_params(k_p)

    fwd = jax.jit(mesh_conv_net_forward)
    cda, cla, cop = fwd(x, gis, params)
    jax.block_until_ready((cda, cla, cop))

    assert cda.shape == (B, 1) and cla.shape == (B, 1) and cop.shape == (B, 2)
    assert bool(jnp.all(jnp.isfinite(cda)) & jnp.all(jnp.isfinite(cla)) & jnp.all(jnp.isfinite(cop)))
    print("KERNEL_OK")
</pallas_src>

<mosaic_0001>
module attributes {stable_mosaic.version = 11 : i64} {
  func.func @fused_forward_kernel(%arg0: i32, %arg1: memref<1x8x256xf32, #tpu.memory_space<vmem>>, %arg2: memref<1x256x1024xf32, #tpu.memory_space<vmem>>, %arg3: memref<1x128x512xf32, #tpu.memory_space<vmem>>, %arg4: memref<256x128xf32, #tpu.memory_space<vmem>>, %arg5: memref<128x64xf32, #tpu.memory_space<vmem>>, %arg6: memref<16x40xf32, #tpu.memory_space<vmem>>, %arg7: memref<3x16x80xf32, #tpu.memory_space<vmem>>, %arg8: memref<3x16x1xf32, #tpu.memory_space<vmem>>, %arg9: memref<3x16x1xf32, #tpu.memory_space<vmem>>, %arg10: memref<2x16x1xf32, #tpu.memory_space<vmem>>, %arg11: memref<32x80xf32, #tpu.memory_space<vmem>>, %arg12: memref<3x32x160xf32, #tpu.memory_space<vmem>>, %arg13: memref<3x32x1xf32, #tpu.memory_space<vmem>>, %arg14: memref<3x32x1xf32, #tpu.memory_space<vmem>>, %arg15: memref<2x32x1xf32, #tpu.memory_space<vmem>>, %arg16: memref<32x32xf32, #tpu.memory_space<vmem>>, %arg17: memref<32x1xf32, #tpu.memory_space<vmem>>, %arg18: memref<4x32xf32, #tpu.memory_space<vmem>>, %arg19: memref<4x1xf32, #tpu.memory_space<vmem>>, %arg20: memref<1x4x1xf32, #tpu.memory_space<vmem>>) attributes {dimension_semantics = [#tpu.dimension_semantics<parallel>], iteration_bounds = array<i64: 2>, scalar_prefetch = 0 : i64, scratch_operands = 0 : i64, tpu.core_type = #tpu.core_type<tc>, window_params = [{transform_indices = @transform_0, window_bounds = array<i64: 1, 8, 256>}, {transform_indices = @transform_1, window_bounds = array<i64: 1, 256, 1024>}, {transform_indices = @transform_2, window_bounds = array<i64: 1, 128, 512>}, {pipeline_mode = #tpu.pipeline_mode<synchronous>, transform_indices = @transform_3, window_bounds = array<i64: 256, 128>}, {pipeline_mode = #tpu.pipeline_mode<synchronous>, transform_indices = @transform_4, window_bounds = array<i64: 128, 64>}, {pipeline_mode = #tpu.pipeline_mode<synchronous>, transform_indices = @transform_5, window_bounds = array<i64: 16, 40>}, {pipeline_mode = #tpu.pipeline_mode<synchronous>, transform_indices = @transform_6, window_bounds = array<i64: 3, 16, 80>}, {pipeline_mode = #tpu.pipeline_mode<synchronous>, transform_indices = @transform_7, window_bounds = array<i64: 3, 16, 1>}, {pipeline_mode = #tpu.pipeline_mode<synchronous>, transform_indices = @transform_8, window_bounds = array<i64: 3, 16, 1>}, {pipeline_mode = #tpu.pipeline_mode<synchronous>, transform_indices = @transform_9, window_bounds = array<i64: 2, 16, 1>}, {pipeline_mode = #tpu.pipeline_mode<synchronous>, transform_indices = @transform_10, window_bounds = array<i64: 32, 80>}, {pipeline_mode = #tpu.pipeline_mode<synchronous>, transform_indices = @transform_11, window_bounds = array<i64: 3, 32, 160>}, {pipeline_mode = #tpu.pipeline_mode<synchronous>, transform_indices = @transform_12, window_bounds = array<i64: 3, 32, 1>}, {pipeline_mode = #tpu.pipeline_mode<synchronous>, transform_indices = @transform_13, window_bounds = array<i64: 3, 32, 1>}, {pipeline_mode = #tpu.pipeline_mode<synchronous>, transform_indices = @transform_14, window_bounds = array<i64: 2, 32, 1>}, {pipeline_mode = #tpu.pipeline_mode<synchronous>, transform_indices = @transform_15, window_bounds = array<i64: 32, 32>}, {pipeline_mode = #tpu.pipeline_mode<synchronous>, transform_indices = @transform_16, window_bounds = array<i64: 32, 1>}, {pipeline_mode = #tpu.pipeline_mode<synchronous>, transform_indices = @transform_17, window_bounds = array<i64: 4, 32>}, {pipeline_mode = #tpu.pipeline_mode<synchronous>, transform_indices = @transform_18, window_bounds = array<i64: 4, 1>}, {transform_indices = @transform_19, window_bounds = array<i64: 1, 4, 1>}]} {
    %c0 = arith.constant 0 : index
    %c0_0 = arith.constant 0 : index
    %c0_1 = arith.constant 0 : index
    %0 = vector.load %arg1[%c0, %c0_0, %c0_1] : memref<1x8x256xf32, #tpu.memory_space<vmem>>, vector<1x8x256xf32>
    %1 = vector.shape_cast %0 : vector<1x8x256xf32> to vector<8x256xf32>
    %c0_2 = arith.constant 0 : index
    %c0_3 = arith.constant 0 : index
    %c0_4 = arith.constant 0 : index
    %2 = vector.load %arg2[%c0_2, %c0_3, %c0_4] : memref<1x256x1024xf32, #tpu.memory_space<vmem>>, vector<1x256x1024xf32>
    %3 = vector.shape_cast %2 : vector<1x256x1024xf32> to vector<256x1024xf32>
    %c0_5 = arith.constant 0 : index
    %c0_6 = arith.constant 0 : index
    %4 = vector.load %arg6[%c0_5, %c0_6] : memref<16x40xf32, #tpu.memory_space<vmem>>, vector<16x40xf32>
    %cst = arith.constant dense<0.000000e+00> : vector<8x1024xf32>
    %5 = tpu.matmul %1, %3, %cst {dimension_numbers = #tpu.dot_dimension_numbers<[1], [0], [0], [1], [0, 0, 1, 1], [], []>} : vector<8x256xf32>, vector<256x1024xf32>, vector<8x1024xf32> -> vector<8x1024xf32>
    %6 = vector.extract_strided_slice %5 {offsets = [0, 0], sizes = [8, 256], strides = [1, 1]} : vector<8x1024xf32> to vector<8x256xf32>
    %7 = vector.extract_strided_slice %5 {offsets = [0, 256], sizes = [8, 256], strides = [1, 1]} : vector<8x1024xf32> to vector<8x256xf32>
    %8 = vector.extract_strided_slice %5 {offsets = [0, 512], sizes = [8, 256], strides = [1, 1]} : vector<8x1024xf32> to vector<8x256xf32>
    %9 = math.absf %8 : vector<8x256xf32>
    %10 = vector.extract_strided_slice %5 {offsets = [0, 768], sizes = [8, 256], strides = [1, 1]} : vector<8x1024xf32> to vector<8x256xf32>
    %11 = math.absf %10 : vector<8x256xf32>
    %12 = tpu.concatenate %1, %6, %7, %9, %11 in 0 : vector<8x256xf32>, vector<8x256xf32>, vector<8x256xf32>, vector<8x256xf32>, vector<8x256xf32> -> vector<40x256xf32>
    %cst_7 = arith.constant dense<0.000000e+00> : vector<16x256xf32>
    %13 = tpu.matmul %4, %12, %cst_7 {dimension_numbers = #tpu.dot_dimension_numbers<[1], [0], [0], [1], [0, 0, 1, 1], [], []>} : vector<16x40xf32>, vector<40x256xf32>, vector<16x256xf32> -> vector<16x256xf32>
    %cst_8 = arith.constant 0.000000e+00 : f32
    %14 = vector.broadcast %cst_8 : f32 to vector<16x256xf32>
    %15 = arith.maximumf %13, %14 : vector<16x256xf32>
    %c0_9 = arith.constant 0 : index
    %c0_10 = arith.constant 0 : index
    %c0_11 = arith.constant 0 : index
    %16 = vector.load %arg8[%c0_9, %c0_10, %c0_11] : memref<3x16x1xf32, #tpu.memory_space<vmem>>, vector<1x16x1xf32>
    %17 = vector.shape_cast %16 : vector<1x16x1xf32> to vector<16x1xf32>
    %18 = vector.broadcast %17 : vector<16x1xf32> to vector<16x256xf32>
    %19 = arith.mulf %15, %18 : vector<16x256xf32>
    %c0_12 = arith.constant 0 : index
    %c0_13 = arith.constant 0 : index
    %c0_14 = arith.constant 0 : index
    %20 = vector.load %arg9[%c0_12, %c0_13, %c0_14] : memref<3x16x1xf32, #tpu.memory_space<vmem>>, vector<1x16x1xf32>
    %21 = vector.shape_cast %20 : vector<1x16x1xf32> to vector<16x1xf32>
    %22 = vector.broadcast %21 : vector<16x1xf32> to vector<16x256xf32>
    %23 = arith.addf %19, %22 : vector<16x256xf32>
    %c0_15 = arith.constant 0 : index
    %c0_16 = arith.constant 0 : index
    %c0_17 = arith.constant 0 : index
    %24 = vector.load %arg7[%c0_15, %c0_16, %c0_17] : memref<3x16x80xf32, #tpu.memory_space<vmem>>, vector<1x16x80xf32>
    %25 = vector.shape_cast %24 : vector<1x16x80xf32> to vector<16x80xf32>
    %cst_18 = arith.constant dense<0.000000e+00> : vector<16x1024xf32>
    %26 = tpu.matmul %23, %3, %cst_18 {dimension_numbers = #tpu.dot_dimension_numbers<[1], [0], [0], [1], [0, 0, 1, 1], [], []>} : vector<16x256xf32>, vector<256x1024xf32>, vector<16x1024xf32> -> vector<16x1024xf32>
    %27 = vector.extract_strided_slice %26 {offsets = [0, 0], sizes = [16, 256], strides = [1, 1]} : vector<16x1024xf32> to vector<16x256xf32>
    %28 = vector.extract_strided_slice %26 {offsets = [0, 256], sizes = [16, 256], strides = [1, 1]} : vector<16x1024xf32> to vector<16x256xf32>
    %29 = vector.extract_strided_slice %26 {offsets = [0, 512], sizes = [16, 256], strides = [1, 1]} : vector<16x1024xf32> to vector<16x256xf32>
    %30 = math.absf %29 : vector<16x256xf32>
    %31 = vector.extract_strided_slice %26 {offsets = [0, 768], sizes = [16, 256], strides = [1, 1]} : vector<16x1024xf32> to vector<16x256xf32>
    %32 = math.absf %31 : vector<16x256xf32>
    %33 = tpu.concatenate %23, %27, %28, %30, %32 in 0 : vector<16x256xf32>, vector<16x256xf32>, vector<16x256xf32>, vector<16x256xf32>, vector<16x256xf32> -> vector<80x256xf32>
    %cst_19 = arith.constant dense<0.000000e+00> : vector<16x256xf32>
    %34 = tpu.matmul %25, %33, %cst_19 {dimension_numbers = #tpu.dot_dimension_numbers<[1], [0], [0], [1], [0, 0, 1, 1], [], []>} : vector<16x80xf32>, vector<80x256xf32>, vector<16x256xf32> -> vector<16x256xf32>
    %cst_20 = arith.constant 0.000000e+00 : f32
    %35 = vector.broadcast %cst_20 : f32 to vector<16x256xf32>
    %36 = arith.maximumf %34, %35 : vector<16x256xf32>
    %c1 = arith.constant 1 : index
    %c0_21 = arith.constant 0 : index
    %c0_22 = arith.constant 0 : index
    %37 = vector.load %arg8[%c1, %c0_21, %c0_22] : memref<3x16x1xf32, #tpu.memory_space<vmem>>, vector<1x16x1xf32>
    %38 = vector.shape_cast %37 : vector<1x16x1xf32> to vector<16x1xf32>
    %39 = vector.broadcast %38 : vector<16x1xf32> to vector<16x256xf32>
    %40 = arith.mulf %36, %39 : vector<16x256xf32>
    %c1_23 = arith.constant 1 : index
    %c0_24 = arith.constant 0 : index
    %c0_25 = arith.constant 0 : index
    %41 = vector.load %arg9[%c1_23, %c0_24, %c0_25] : memref<3x16x1xf32, #tpu.memory_space<vmem>>, vector<1x16x1xf32>
    %42 = vector.shape_cast %41 : vector<1x16x1xf32> to vector<16x1xf32>
    %43 = vector.broadcast %42 : vector<16x1xf32> to vector<16x256xf32>
    %44 = arith.addf %40, %43 : vector<16x256xf32>
    %c1_26 = arith.constant 1 : index
    %c0_27 = arith.constant 0 : index
    %c0_28 = arith.constant 0 : index
    %45 = vector.load %arg7[%c1_26, %c0_27, %c0_28] : memref<3x16x80xf32, #tpu.memory_space<vmem>>, vector<1x16x80xf32>
    %46 = vector.shape_cast %45 : vector<1x16x80xf32> to vector<16x80xf32>
    %cst_29 = arith.constant dense<0.000000e+00> : vector<16x1024xf32>
    %47 = tpu.matmul %44, %3, %cst_29 {dimension_numbers = #tpu.dot_dimension_numbers<[1], [0], [0], [1], [0, 0, 1, 1], [], []>} : vector<16x256xf32>, vector<256x1024xf32>, vector<16x1024xf32> -> vector<16x1024xf32>
    %48 = vector.extract_strided_slice %47 {offsets = [0, 0], sizes = [16, 256], strides = [1, 1]} : vector<16x1024xf32> to vector<16x256xf32>
    %49 = vector.extract_strided_slice %47 {offsets = [0, 256], sizes = [16, 256], strides = [1, 1]} : vector<16x1024xf32> to vector<16x256xf32>
    %50 = vector.extract_strided_slice %47 {offsets = [0, 512], sizes = [16, 256], strides = [1, 1]} : vector<16x1024xf32> to vector<16x256xf32>
    %51 = math.absf %50 : vector<16x256xf32>
    %52 = vector.extract_strided_slice %47 {offsets = [0, 768], sizes = [16, 256], strides = [1, 1]} : vector<16x1024xf32> to vector<16x256xf32>
    %53 = math.absf %52 : vector<16x256xf32>
    %54 = tpu.concatenate %44, %48, %49, %51, %53 in 0 : vector<16x256xf32>, vector<16x256xf32>, vector<16x256xf32>, vector<16x256xf32>, vector<16x256xf32> -> vector<80x256xf32>
    %cst_30 = arith.constant dense<0.000000e+00> : vector<16x256xf32>
    %55 = tpu.matmul %46, %54, %cst_30 {dimension_numbers = #tpu.dot_dimension_numbers<[1], [0], [0], [1], [0, 0, 1, 1], [], []>} : vector<16x80xf32>, vector<80x256xf32>, vector<16x256xf32> -> vector<16x256xf32>
    %cst_31 = arith.constant 0.000000e+00 : f32
    %56 = vector.broadcast %cst_31 : f32 to vector<16x256xf32>
    %57 = arith.maximumf %55, %56 : vector<16x256xf32>
    %c2 = arith.constant 2 : index
    %c0_32 = arith.constant 0 : index
    %c0_33 = arith.constant 0 : index
    %58 = vector.load %arg8[%c2, %c0_32, %c0_33] : memref<3x16x1xf32, #tpu.memory_space<vmem>>, vector<1x16x1xf32>
    %59 = vector.shape_cast %58 : vector<1x16x1xf32> to vector<16x1xf32>
    %60 = vector.broadcast %59 : vector<16x1xf32> to vector<16x256xf32>
    %61 = arith.mulf %57, %60 : vector<16x256xf32>
    %c2_34 = arith.constant 2 : index
    %c0_35 = arith.constant 0 : index
    %c0_36 = arith.constant 0 : index
    %62 = vector.load %arg9[%c2_34, %c0_35, %c0_36] : memref<3x16x1xf32, #tpu.memory_space<vmem>>, vector<1x16x1xf32>
    %63 = vector.shape_cast %62 : vector<1x16x1xf32> to vector<16x1xf32>
    %64 = vector.broadcast %63 : vector<16x1xf32> to vector<16x256xf32>
    %65 = arith.addf %61, %64 : vector<16x256xf32>
    %c2_37 = arith.constant 2 : index
    %c0_38 = arith.constant 0 : index
    %c0_39 = arith.constant 0 : index
    %66 = vector.load %arg7[%c2_37, %c0_38, %c0_39] : memref<3x16x80xf32, #tpu.memory_space<vmem>>, vector<1x16x80xf32>
    %67 = vector.shape_cast %66 : vector<1x16x80xf32> to vector<16x80xf32>
    %cst_40 = arith.constant dense<0.000000e+00> : vector<16x1024xf32>
    %68 = tpu.matmul %65, %3, %cst_40 {dimension_numbers = #tpu.dot_dimension_numbers<[1], [0], [0], [1], [0, 0, 1, 1], [], []>} : vector<16x256xf32>, vector<256x1024xf32>, vector<16x1024xf32> -> vector<16x1024xf32>
    %69 = vector.extract_strided_slice %68 {offsets = [0, 0], sizes = [16, 256], strides = [1, 1]} : vector<16x1024xf32> to vector<16x256xf32>
    %70 = vector.extract_strided_slice %68 {offsets = [0, 256], sizes = [16, 256], strides = [1, 1]} : vector<16x1024xf32> to vector<16x256xf32>
    %71 = vector.extract_strided_slice %68 {offsets = [0, 512], sizes = [16, 256], strides = [1, 1]} : vector<16x1024xf32> to vector<16x256xf32>
    %72 = math.absf %71 : vector<16x256xf32>
    %73 = vector.extract_strided_slice %68 {offsets = [0, 768], sizes = [16, 256], strides = [1, 1]} : vector<16x1024xf32> to vector<16x256xf32>
    %74 = math.absf %73 : vector<16x256xf32>
    %75 = tpu.concatenate %65, %69, %70, %72, %74 in 0 : vector<16x256xf32>, vector<16x256xf32>, vector<16x256xf32>, vector<16x256xf32>, vector<16x256xf32> -> vector<80x256xf32>
    %cst_41 = arith.constant dense<0.000000e+00> : vector<16x256xf32>
    %76 = tpu.matmul %67, %75, %cst_41 {dimension_numbers = #tpu.dot_dimension_numbers<[1], [0], [0], [1], [0, 0, 1, 1], [], []>} : vector<16x80xf32>, vector<80x256xf32>, vector<16x256xf32> -> vector<16x256xf32>
    %77 = arith.addf %76, %13 : vector<16x256xf32>
    %cst_42 = arith.constant 0.000000e+00 : f32
    %78 = vector.broadcast %cst_42 : f32 to vector<16x256xf32>
    %79 = arith.maximumf %77, %78 : vector<16x256xf32>
    %80 = vector.shape_cast %79 : vector<16x256xf32> to vector<1x16x256xf32>
    %cst_43 = arith.constant dense<0.000000e+00> : vector<1xf32>
    %81 = vector.multi_reduction <add>, %80, %cst_43 [1, 2] : vector<1x16x256xf32> to vector<1xf32>
    %82 = vector.shape_cast %81 : vector<1xf32> to vector<1x1x1xf32>
    %83 = vector.extract %82[0, 0, 0] : f32 from vector<1x1x1xf32>
    %cst_44 = arith.constant 4.096000e+03 : f32
    %84 = arith.divf %83, %cst_44 : f32
    %85 = vector.broadcast %84 : f32 to vector<16x256xf32>
    %86 = arith.subf %79, %85 : vector<16x256xf32>
    %87 = arith.mulf %86, %86 : vector<16x256xf32>
    %88 = vector.shape_cast %87 : vector<16x256xf32> to vector<1x16x256xf32>
    %cst_45 = arith.constant dense<0.000000e+00> : vector<1xf32>
    %89 = vector.multi_reduction <add>, %88, %cst_45 [1, 2] : vector<1x16x256xf32> to vector<1xf32>
    %90 = vector.shape_cast %89 : vector<1xf32> to vector<1x1x1xf32>
    %91 = vector.extract %90[0, 0, 0] : f32 from vector<1x1x1xf32>
    %cst_46 = arith.constant 4.096000e+03 : f32
    %92 = arith.divf %91, %cst_46 : f32
    %93 = vector.broadcast %84 : f32 to vector<16x256xf32>
    %94 = arith.subf %79, %93 : vector<16x256xf32>
    %cst_47 = arith.constant 9.99999974E-6 : f32
    %95 = arith.addf %92, %cst_47 : f32
    %96 = math.rsqrt %95 : f32
    %97 = vector.broadcast %96 : f32 to vector<16x256xf32>
    %98 = arith.mulf %94, %97 : vector<16x256xf32>
    %c0_48 = arith.constant 0 : index
    %c0_49 = arith.constant 0 : index
    %c0_50 = arith.constant 0 : index
    %99 = vector.load %arg10[%c0_48, %c0_49, %c0_50] : memref<2x16x1xf32, #tpu.memory_space<vmem>>, vector<1x16x1xf32>
    %100 = vector.shape_cast %99 : vector<1x16x1xf32> to vector<16x1xf32>
    %101 = vector.broadcast %100 : vector<16x1xf32> to vector<16x256xf32>
    %102 = arith.mulf %98, %101 : vector<16x256xf32>
    %c1_51 = arith.constant 1 : index
    %c0_52 = arith.constant 0 : index
    %c0_53 = arith.constant 0 : index
    %103 = vector.load %arg10[%c1_51, %c0_52, %c0_53] : memref<2x16x1xf32, #tpu.memory_space<vmem>>, vector<1x16x1xf32>
    %104 = vector.shape_cast %103 : vector<1x16x1xf32> to vector<16x1xf32>
    %105 = vector.broadcast %104 : vector<16x1xf32> to vector<16x256xf32>
    %106 = arith.addf %102, %105 : vector<16x256xf32>
    %cst_54 = arith.constant 0.000000e+00 : f32
    %107 = vector.broadcast %cst_54 : f32 to vector<16x256xf32>
    %108 = arith.maximumf %106, %107 : vector<16x256xf32>
    %c0_55 = arith.constant 0 : index
    %c0_56 = arith.constant 0 : index
    %109 = vector.load %arg4[%c0_55, %c0_56] : memref<256x128xf32, #tpu.memory_space<vmem>>, vector<256x128xf32>
    %cst_57 = arith.constant dense<0.000000e+00> : vector<16x128xf32>
    %110 = tpu.matmul %108, %109, %cst_57 {dimension_numbers = #tpu.dot_dimension_numbers<[1], [0], [0], [1], [0, 0, 1, 1], [], []>} : vector<16x256xf32>, vector<256x128xf32>, vector<16x128xf32> -> vector<16x128xf32>
    %c0_58 = arith.constant 0 : index
    %c0_59 = arith.constant 0 : index
    %c0_60 = arith.constant 0 : index
    %111 = vector.load %arg3[%c0_58, %c0_59, %c0_60] : memref<1x128x512xf32, #tpu.memory_space<vmem>>, vector<1x128x512xf32>
    %112 = vector.shape_cast %111 : vector<1x128x512xf32> to vector<128x512xf32>
    %c0_61 = arith.constant 0 : index
    %c0_62 = arith.constant 0 : index
    %113 = vector.load %arg11[%c0_61, %c0_62] : memref<32x80xf32, #tpu.memory_space<vmem>>, vector<32x80xf32>
    %cst_63 = arith.constant dense<0.000000e+00> : vector<16x512xf32>
    %114 = tpu.matmul %110, %112, %cst_63 {dimension_numbers = #tpu.dot_dimension_numbers<[1], [0], [0], [1], [0, 0, 1, 1], [], []>} : vector<16x128xf32>, vector<128x512xf32>, vector<16x512xf32> -> vector<16x512xf32>
    %115 = vector.extract_strided_slice %114 {offsets = [0, 0], sizes = [16, 128], strides = [1, 1]} : vector<16x512xf32> to vector<16x128xf32>
    %116 = vector.extract_strided_slice %114 {offsets = [0, 128], sizes = [16, 128], strides = [1, 1]} : vector<16x512xf32> to vector<16x128xf32>
    %117 = vector.extract_strided_slice %114 {offsets = [0, 256], sizes = [16, 128], strides = [1, 1]} : vector<16x512xf32> to vector<16x128xf32>
    %118 = math.absf %117 : vector<16x128xf32>
    %119 = vector.extract_strided_slice %114 {offsets = [0, 384], sizes = [16, 128], strides = [1, 1]} : vector<16x512xf32> to vector<16x128xf32>
    %120 = math.absf %119 : vector<16x128xf32>
    %121 = tpu.concatenate %110, %115, %116, %118, %120 in 0 : vector<16x128xf32>, vector<16x128xf32>, vector<16x128xf32>, vector<16x128xf32>, vector<16x128xf32> -> vector<80x128xf32>
    %cst_64 = arith.constant dense<0.000000e+00> : vector<32x128xf32>
    %122 = tpu.matmul %113, %121, %cst_64 {dimension_numbers = #tpu.dot_dimension_numbers<[1], [0], [0], [1], [0, 0, 1, 1], [], []>} : vector<32x80xf32>, vector<80x128xf32>, vector<32x128xf32> -> vector<32x128xf32>
    %cst_65 = arith.constant 0.000000e+00 : f32
    %123 = vector.broadcast %cst_65 : f32 to vector<32x128xf32>
    %124 = arith.maximumf %122, %123 : vector<32x128xf32>
    %c0_66 = arith.constant 0 : index
    %c0_67 = arith.constant 0 : index
    %c0_68 = arith.constant 0 : index
    %125 = vector.load %arg13[%c0_66, %c0_67, %c0_68] : memref<3x32x1xf32, #tpu.memory_space<vmem>>, vector<1x32x1xf32>
    %126 = vector.shape_cast %125 : vector<1x32x1xf32> to vector<32x1xf32>
    %127 = vector.broadcast %126 : vector<32x1xf32> to vector<32x128xf32>
    %128 = arith.mulf %124, %127 : vector<32x128xf32>
    %c0_69 = arith.constant 0 : index
    %c0_70 = arith.constant 0 : index
    %c0_71 = arith.constant 0 : index
    %129 = vector.load %arg14[%c0_69, %c0_70, %c0_71] : memref<3x32x1xf32, #tpu.memory_space<vmem>>, vector<1x32x1xf32>
    %130 = vector.shape_cast %129 : vector<1x32x1xf32> to vector<32x1xf32>
    %131 = vector.broadcast %130 : vector<32x1xf32> to vector<32x128xf32>
    %132 = arith.addf %128, %131 : vector<32x128xf32>
    %c0_72 = arith.constant 0 : index
    %c0_73 = arith.constant 0 : index
    %c0_74 = arith.constant 0 : index
    %133 = vector.load %arg12[%c0_72, %c0_73, %c0_74] : memref<3x32x160xf32, #tpu.memory_space<vmem>>, vector<1x32x160xf32>
    %134 = vector.shape_cast %133 : vector<1x32x160xf32> to vector<32x160xf32>
    %cst_75 = arith.constant dense<0.000000e+00> : vector<32x512xf32>
    %135 = tpu.matmul %132, %112, %cst_75 {dimension_numbers = #tpu.dot_dimension_numbers<[1], [0], [0], [1], [0, 0, 1, 1], [], []>} : vector<32x128xf32>, vector<128x512xf32>, vector<32x512xf32> -> vector<32x512xf32>
    %136 = vector.extract_strided_slice %135 {offsets = [0, 0], sizes = [32, 128], strides = [1, 1]} : vector<32x512xf32> to vector<32x128xf32>
    %137 = vector.extract_strided_slice %135 {offsets = [0, 128], sizes = [32, 128], strides = [1, 1]} : vector<32x512xf32> to vector<32x128xf32>
    %138 = vector.extract_strided_slice %135 {offsets = [0, 256], sizes = [32, 128], strides = [1, 1]} : vector<32x512xf32> to vector<32x128xf32>
    %139 = math.absf %138 : vector<32x128xf32>
    %140 = vector.extract_strided_slice %135 {offsets = [0, 384], sizes = [32, 128], strides = [1, 1]} : vector<32x512xf32> to vector<32x128xf32>
    %141 = math.absf %140 : vector<32x128xf32>
    %142 = tpu.concatenate %132, %136, %137, %139, %141 in 0 : vector<32x128xf32>, vector<32x128xf32>, vector<32x128xf32>, vector<32x128xf32>, vector<32x128xf32> -> vector<160x128xf32>
    %cst_76 = arith.constant dense<0.000000e+00> : vector<32x128xf32>
    %143 = tpu.matmul %134, %142, %cst_76 {dimension_numbers = #tpu.dot_dimension_numbers<[1], [0], [0], [1], [0, 0, 1, 1], [], []>} : vector<32x160xf32>, vector<160x128xf32>, vector<32x128xf32> -> vector<32x128xf32>
    %cst_77 = arith.constant 0.000000e+00 : f32
    %144 = vector.broadcast %cst_77 : f32 to vector<32x128xf32>
    %145 = arith.maximumf %143, %144 : vector<32x128xf32>
    %c1_78 = arith.constant 1 : index
    %c0_79 = arith.constant 0 : index
    %c0_80 = arith.constant 0 : index
    %146 = vector.load %arg13[%c1_78, %c0_79, %c0_80] : memref<3x32x1xf32, #tpu.memory_space<vmem>>, vector<1x32x1xf32>
    %147 = vector.shape_cast %146 : vector<1x32x1xf32> to vector<32x1xf32>
    %148 = vector.broadcast %147 : vector<32x1xf32> to vector<32x128xf32>
    %149 = arith.mulf %145, %148 : vector<32x128xf32>
    %c1_81 = arith.constant 1 : index
    %c0_82 = arith.constant 0 : index
    %c0_83 = arith.constant 0 : index
    %150 = vector.load %arg14[%c1_81, %c0_82, %c0_83] : memref<3x32x1xf32, #tpu.memory_space<vmem>>, vector<1x32x1xf32>
    %151 = vector.shape_cast %150 : vector<1x32x1xf32> to vector<32x1xf32>
    %152 = vector.broadcast %151 : vector<32x1xf32> to vector<32x128xf32>
    %153 = arith.addf %149, %152 : vector<32x128xf32>
    %c1_84 = arith.constant 1 : index
    %c0_85 = arith.constant 0 : index
    %c0_86 = arith.constant 0 : index
    %154 = vector.load %arg12[%c1_84, %c0_85, %c0_86] : memref<3x32x160xf32, #tpu.memory_space<vmem>>, vector<1x32x160xf32>
    %155 = vector.shape_cast %154 : vector<1x32x160xf32> to vector<32x160xf32>
    %cst_87 = arith.constant dense<0.000000e+00> : vector<32x512xf32>
    %156 = tpu.matmul %153, %112, %cst_87 {dimension_numbers = #tpu.dot_dimension_numbers<[1], [0], [0], [1], [0, 0, 1, 1], [], []>} : vector<32x128xf32>, vector<128x512xf32>, vector<32x512xf32> -> vector<32x512xf32>
    %157 = vector.extract_strided_slice %156 {offsets = [0, 0], sizes = [32, 128], strides = [1, 1]} : vector<32x512xf32> to vector<32x128xf32>
    %158 = vector.extract_strided_slice %156 {offsets = [0, 128], sizes = [32, 128], strides = [1, 1]} : vector<32x512xf32> to vector<32x128xf32>
    %159 = vector.extract_strided_slice %156 {offsets = [0, 256], sizes = [32, 128], strides = [1, 1]} : vector<32x512xf32> to vector<32x128xf32>
    %160 = math.absf %159 : vector<32x128xf32>
    %161 = vector.extract_strided_slice %156 {offsets = [0, 384], sizes = [32, 128], strides = [1, 1]} : vector<32x512xf32> to vector<32x128xf32>
    %162 = math.absf %161 : vector<32x128xf32>
    %163 = tpu.concatenate %153, %157, %158, %160, %162 in 0 : vector<32x128xf32>, vector<32x128xf32>, vector<32x128xf32>, vector<32x128xf32>, vector<32x128xf32> -> vector<160x128xf32>
    %cst_88 = arith.constant dense<0.000000e+00> : vector<32x128xf32>
    %164 = tpu.matmul %155, %163, %cst_88 {dimension_numbers = #tpu.dot_dimension_numbers<[1], [0], [0], [1], [0, 0, 1, 1], [], []>} : vector<32x160xf32>, vector<160x128xf32>, vector<32x128xf32> -> vector<32x128xf32>
    %cst_89 = arith.constant 0.000000e+00 : f32
    %165 = vector.broadcast %cst_89 : f32 to vector<32x128xf32>
    %166 = arith.maximumf %164, %165 : vector<32x128xf32>
    %c2_90 = arith.constant 2 : index
    %c0_91 = arith.constant 0 : index
    %c0_92 = arith.constant 0 : index
    %167 = vector.load %arg13[%c2_90, %c0_91, %c0_92] : memref<3x32x1xf32, #tpu.memory_space<vmem>>, vector<1x32x1xf32>
    %168 = vector.shape_cast %167 : vector<1x32x1xf32> to vector<32x1xf32>
    %169 = vector.broadcast %168 : vector<32x1xf32> to vector<32x128xf32>
    %170 = arith.mulf %166, %169 : vector<32x128xf32>
    %c2_93 = arith.constant 2 : index
    %c0_94 = arith.constant 0 : index
    %c0_95 = arith.constant 0 : index
    %171 = vector.load %arg14[%c2_93, %c0_94, %c0_95] : memref<3x32x1xf32, #tpu.memory_space<vmem>>, vector<1x32x1xf32>
    %172 = vector.shape_cast %171 : vector<1x32x1xf32> to vector<32x1xf32>
    %173 = vector.broadcast %172 : vector<32x1xf32> to vector<32x128xf32>
    %174 = arith.addf %170, %173 : vector<32x128xf32>
    %c2_96 = arith.constant 2 : index
    %c0_97 = arith.constant 0 : index
    %c0_98 = arith.constant 0 : index
    %175 = vector.load %arg12[%c2_96, %c0_97, %c0_98] : memref<3x32x160xf32, #tpu.memory_space<vmem>>, vector<1x32x160xf32>
    %176 = vector.shape_cast %175 : vector<1x32x160xf32> to vector<32x160xf32>
    %cst_99 = arith.constant dense<0.000000e+00> : vector<32x512xf32>
    %177 = tpu.matmul %174, %112, %cst_99 {dimension_numbers = #tpu.dot_dimension_numbers<[1], [0], [0], [1], [0, 0, 1, 1], [], []>} : vector<32x128xf32>, vector<128x512xf32>, vector<32x512xf32> -> vector<32x512xf32>
    %178 = vector.extract_strided_slice %177 {offsets = [0, 0], sizes = [32, 128], strides = [1, 1]} : vector<32x512xf32> to vector<32x128xf32>
    %179 = vector.extract_strided_slice %177 {offsets = [0, 128], sizes = [32, 128], strides = [1, 1]} : vector<32x512xf32> to vector<32x128xf32>
    %180 = vector.extract_strided_slice %177 {offsets = [0, 256], sizes = [32, 128], strides = [1, 1]} : vector<32x512xf32> to vector<32x128xf32>
    %181 = math.absf %180 : vector<32x128xf32>
    %182 = vector.extract_strided_slice %177 {offsets = [0, 384], sizes = [32, 128], strides = [1, 1]} : vector<32x512xf32> to vector<32x128xf32>
    %183 = math.absf %182 : vector<32x128xf32>
    %184 = tpu.concatenate %174, %178, %179, %181, %183 in 0 : vector<32x128xf32>, vector<32x128xf32>, vector<32x128xf32>, vector<32x128xf32>, vector<32x128xf32> -> vector<160x128xf32>
    %cst_100 = arith.constant dense<0.000000e+00> : vector<32x128xf32>
    %185 = tpu.matmul %176, %184, %cst_100 {dimension_numbers = #tpu.dot_dimension_numbers<[1], [0], [0], [1], [0, 0, 1, 1], [], []>} : vector<32x160xf32>, vector<160x128xf32>, vector<32x128xf32> -> vector<32x128xf32>
    %186 = arith.addf %185, %122 : vector<32x128xf32>
    %cst_101 = arith.constant 0.000000e+00 : f32
    %187 = vector.broadcast %cst_101 : f32 to vector<32x128xf32>
    %188 = arith.maximumf %186, %187 : vector<32x128xf32>
    %189 = vector.shape_cast %188 : vector<32x128xf32> to vector<1x32x128xf32>
    %cst_102 = arith.constant dense<0.000000e+00> : vector<1xf32>
    %190 = vector.multi_reduction <add>, %189, %cst_102 [1, 2] : vector<1x32x128xf32> to vector<1xf32>
    %191 = vector.shape_cast %190 : vector<1xf32> to vector<1x1x1xf32>
    %192 = vector.extract %191[0, 0, 0] : f32 from vector<1x1x1xf32>
    %cst_103 = arith.constant 4.096000e+03 : f32
    %193 = arith.divf %192, %cst_103 : f32
    %194 = vector.broadcast %193 : f32 to vector<32x128xf32>
    %195 = arith.subf %188, %194 : vector<32x128xf32>
    %196 = arith.mulf %195, %195 : vector<32x128xf32>
    %197 = vector.shape_cast %196 : vector<32x128xf32> to vector<1x32x128xf32>
    %cst_104 = arith.constant dense<0.000000e+00> : vector<1xf32>
    %198 = vector.multi_reduction <add>, %197, %cst_104 [1, 2] : vector<1x32x128xf32> to vector<1xf32>
    %199 = vector.shape_cast %198 : vector<1xf32> to vector<1x1x1xf32>
    %200 = vector.extract %199[0, 0, 0] : f32 from vector<1x1x1xf32>
    %cst_105 = arith.constant 4.096000e+03 : f32
    %201 = arith.divf %200, %cst_105 : f32
    %202 = vector.broadcast %193 : f32 to vector<32x128xf32>
    %203 = arith.subf %188, %202 : vector<32x128xf32>
    %cst_106 = arith.constant 9.99999974E-6 : f32
    %204 = arith.addf %201, %cst_106 : f32
    %205 = math.rsqrt %204 : f32
    %206 = vector.broadcast %205 : f32 to vector<32x128xf32>
    %207 = arith.mulf %203, %206 : vector<32x128xf32>
    %c0_107 = arith.constant 0 : index
    %c0_108 = arith.constant 0 : index
    %c0_109 = arith.constant 0 : index
    %208 = vector.load %arg15[%c0_107, %c0_108, %c0_109] : memref<2x32x1xf32, #tpu.memory_space<vmem>>, vector<1x32x1xf32>
    %209 = vector.shape_cast %208 : vector<1x32x1xf32> to vector<32x1xf32>
    %210 = vector.broadcast %209 : vector<32x1xf32> to vector<32x128xf32>
    %211 = arith.mulf %207, %210 : vector<32x128xf32>
    %c1_110 = arith.constant 1 : index
    %c0_111 = arith.constant 0 : index
    %c0_112 = arith.constant 0 : index
    %212 = vector.load %arg15[%c1_110, %c0_111, %c0_112] : memref<2x32x1xf32, #tpu.memory_space<vmem>>, vector<1x32x1xf32>
    %213 = vector.shape_cast %212 : vector<1x32x1xf32> to vector<32x1xf32>
    %214 = vector.broadcast %213 : vector<32x1xf32> to vector<32x128xf32>
    %215 = arith.addf %211, %214 : vector<32x128xf32>
    %cst_113 = arith.constant 0.000000e+00 : f32
    %216 = vector.broadcast %cst_113 : f32 to vector<32x128xf32>
    %217 = arith.maximumf %215, %216 : vector<32x128xf32>
    %c0_114 = arith.constant 0 : index
    %c0_115 = arith.constant 0 : index
    %218 = vector.load %arg5[%c0_114, %c0_115] : memref<128x64xf32, #tpu.memory_space<vmem>>, vector<128x64xf32>
    %cst_116 = arith.constant dense<0.000000e+00> : vector<32x64xf32>
    %219 = tpu.matmul %217, %218, %cst_116 {dimension_numbers = #tpu.dot_dimension_numbers<[1], [0], [0], [1], [0, 0, 1, 1], [], []>} : vector<32x128xf32>, vector<128x64xf32>, vector<32x64xf32> -> vector<32x64xf32>
    %cst_117 = arith.constant dense<0.000000e+00> : vector<32xf32>
    %220 = vector.multi_reduction <add>, %219, %cst_117 [1] : vector<32x64xf32> to vector<32xf32>
    %221 = vector.shape_cast %220 : vector<32xf32> to vector<32x1xf32>
    %cst_118 = arith.constant 6.400000e+01 : f32
    %222 = vector.broadcast %cst_118 : f32 to vector<32x1xf32>
    %223 = arith.divf %221, %222 : vector<32x1xf32>
    %c0_119 = arith.constant 0 : index
    %c0_120 = arith.constant 0 : index
    %224 = vector.load %arg16[%c0_119, %c0_120] : memref<32x32xf32, #tpu.memory_space<vmem>>, vector<32x32xf32>
    %cst_121 = arith.constant dense<0.000000e+00> : vector<32x1xf32>
    %225 = tpu.matmul %224, %223, %cst_121 {dimension_numbers = #tpu.dot_dimension_numbers<[1], [0], [0], [1], [0, 0, 1, 1], [], []>} : vector<32x32xf32>, vector<32x1xf32>, vector<32x1xf32> -> vector<32x1xf32>
    %c0_122 = arith.constant 0 : index
    %c0_123 = arith.constant 0 : index
    %226 = vector.load %arg17[%c0_122, %c0_123] : memref<32x1xf32, #tpu.memory_space<vmem>>, vector<32x1xf32>
    %227 = arith.addf %225, %226 : vector<32x1xf32>
    %cst_124 = arith.constant 0.000000e+00 : f32
    %228 = vector.broadcast %cst_124 : f32 to vector<32x1xf32>
    %229 = arith.maximumf %227, %228 : vector<32x1xf32>
    %c0_125 = arith.constant 0 : index
    %c0_126 = arith.constant 0 : index
    %230 = vector.load %arg18[%c0_125, %c0_126] : memref<4x32xf32, #tpu.memory_space<vmem>>, vector<4x32xf32>
    %cst_127 = arith.constant dense<0.000000e+00> : vector<4x1xf32>
    %231 = tpu.matmul %230, %229, %cst_127 {dimension_numbers = #tpu.dot_dimension_numbers<[1], [0], [0], [1], [0, 0, 1, 1], [], []>} : vector<4x32xf32>, vector<32x1xf32>, vector<4x1xf32> -> vector<4x1xf32>
    %c0_128 = arith.constant 0 : index
    %c0_129 = arith.constant 0 : index
    %232 = vector.load %arg19[%c0_128, %c0_129] : memref<4x1xf32, #tpu.memory_space<vmem>>, vector<4x1xf32>
    %233 = arith.addf %231, %232 : vector<4x1xf32>
    %c0_130 = arith.constant 0 : index
    %c0_131 = arith.constant 0 : index
    %c0_132 = arith.constant 0 : index
    %234 = vector.load %arg20[%c0_130, %c0_131, %c0_132] : memref<1x4x1xf32, #tpu.memory_space<vmem>>, vector<1x4x1xf32>
    %235 = vector.shape_cast %234 : vector<1x4x1xf32> to vector<4x1xf32>
    %236 = vector.shape_cast %233 : vector<4x1xf32> to vector<1x4x1xf32>
    tpu.vector_store %arg20[%c0_130, %c0_131, %c0_132], %236 {strides = array<i32>} : memref<1x4x1xf32, #tpu.memory_space<vmem>>, vector<1x4x1xf32>,
    return
  }
  func.func @transform_0(%arg0: i32) -> (i32, i32, i32) {
    %c0_i32 = arith.constant 0 : i32
    %c0_i32_0 = arith.constant 0 : i32
    %c0_i32_1 = arith.constant 0 : i32
    return %arg0, %c0_i32, %c0_i32_0 : i32, i32, i32
  }
  func.func @transform_1(%arg0: i32) -> (i32, i32, i32) {
    %c0_i32 = arith.constant 0 : i32
    %c0_i32_0 = arith.constant 0 : i32
    %c0_i32_1 = arith.constant 0 : i32
    return %arg0, %c0_i32, %c0_i32_0 : i32, i32, i32
  }
  func.func @transform_2(%arg0: i32) -> (i32, i32, i32) {
    %c0_i32 = arith.constant 0 : i32
    %c0_i32_0 = arith.constant 0 : i32
    %c0_i32_1 = arith.constant 0 : i32
    return %arg0, %c0_i32, %c0_i32_0 : i32, i32, i32
  }
  func.func @transform_3(%arg0: i32) -> (i32, i32) {
    %c0_i32 = arith.constant 0 : i32
    %c0_i32_0 = arith.constant 0 : i32
    %c0_i32_1 = arith.constant 0 : i32
    return %c0_i32, %c0_i32_0 : i32, i32
  }
  func.func @transform_4(%arg0: i32) -> (i32, i32) {
    %c0_i32 = arith.constant 0 : i32
    %c0_i32_0 = arith.constant 0 : i32
    %c0_i32_1 = arith.constant 0 : i32
    return %c0_i32, %c0_i32_0 : i32, i32
  }
  func.func @transform_5(%arg0: i32) -> (i32, i32) {
    %c0_i32 = arith.constant 0 : i32
    %c0_i32_0 = arith.constant 0 : i32
    %c0_i32_1 = arith.constant 0 : i32
    return %c0_i32, %c0_i32_0 : i32, i32
  }
  func.func @transform_6(%arg0: i32) -> (i32, i32, i32) {
    %c0_i32 = arith.constant 0 : i32
    %c0_i32_0 = arith.constant 0 : i32
    %c0_i32_1 = arith.constant 0 : i32
    %c0_i32_2 = arith.constant 0 : i32
    return %c0_i32, %c0_i32_0, %c0_i32_1 : i32, i32, i32
  }
  func.func @transform_7(%arg0: i32) -> (i32, i32, i32) {
    %c0_i32 = arith.constant 0 : i32
    %c0_i32_0 = arith.constant 0 : i32
    %c0_i32_1 = arith.constant 0 : i32
    %c0_i32_2 = arith.constant 0 : i32
    return %c0_i32, %c0_i32_0, %c0_i32_1 : i32, i32, i32
  }
  func.func @transform_8(%arg0: i32) -> (i32, i32, i32) {
    %c0_i32 = arith.constant 0 : i32
    %c0_i32_0 = arith.constant 0 : i32
    %c0_i32_1 = arith.constant 0 : i32
    %c0_i32_2 = arith.constant 0 : i32
    return %c0_i32, %c0_i32_0, %c0_i32_1 : i32, i32, i32
  }
  func.func @transform_9(%arg0: i32) -> (i32, i32, i32) {
    %c0_i32 = arith.constant 0 : i32
    %c0_i32_0 = arith.constant 0 : i32
    %c0_i32_1 = arith.constant 0 : i32
    %c0_i32_2 = arith.constant 0 : i32
    return %c0_i32, %c0_i32_0, %c0_i32_1 : i32, i32, i32
  }
  func.func @transform_10(%arg0: i32) -> (i32, i32) {
    %c0_i32 = arith.constant 0 : i32
    %c0_i32_0 = arith.constant 0 : i32
    %c0_i32_1 = arith.constant 0 : i32
    return %c0_i32, %c0_i32_0 : i32, i32
  }
  func.func @transform_11(%arg0: i32) -> (i32, i32, i32) {
    %c0_i32 = arith.constant 0 : i32
    %c0_i32_0 = arith.constant 0 : i32
    %c0_i32_1 = arith.constant 0 : i32
    %c0_i32_2 = arith.constant 0 : i32
    return %c0_i32, %c0_i32_0, %c0_i32_1 : i32, i32, i32
  }
  func.func @transform_12(%arg0: i32) -> (i32, i32, i32) {
    %c0_i32 = arith.constant 0 : i32
    %c0_i32_0 = arith.constant 0 : i32
    %c0_i32_1 = arith.constant 0 : i32
    %c0_i32_2 = arith.constant 0 : i32
    return %c0_i32, %c0_i32_0, %c0_i32_1 : i32, i32, i32
  }
  func.func @transform_13(%arg0: i32) -> (i32, i32, i32) {
    %c0_i32 = arith.constant 0 : i32
    %c0_i32_0 = arith.constant 0 : i32
    %c0_i32_1 = arith.constant 0 : i32
    %c0_i32_2 = arith.constant 0 : i32
    return %c0_i32, %c0_i32_0, %c0_i32_1 : i32, i32, i32
  }
  func.func @transform_14(%arg0: i32) -> (i32, i32, i32) {
    %c0_i32 = arith.constant 0 : i32
    %c0_i32_0 = arith.constant 0 : i32
    %c0_i32_1 = arith.constant 0 : i32
    %c0_i32_2 = arith.constant 0 : i32
    return %c0_i32, %c0_i32_0, %c0_i32_1 : i32, i32, i32
  }
  func.func @transform_15(%arg0: i32) -> (i32, i32) {
    %c0_i32 = arith.constant 0 : i32
    %c0_i32_0 = arith.constant 0 : i32
    %c0_i32_1 = arith.constant 0 : i32
    return %c0_i32, %c0_i32_0 : i32, i32
  }
  func.func @transform_16(%arg0: i32) -> (i32, i32) {
    %c0_i32 = arith.constant 0 : i32
    %c0_i32_0 = arith.constant 0 : i32
    %c0_i32_1 = arith.constant 0 : i32
    return %c0_i32, %c0_i32_0 : i32, i32
  }
  func.func @transform_17(%arg0: i32) -> (i32, i32) {
    %c0_i32 = arith.constant 0 : i32
    %c0_i32_0 = arith.constant 0 : i32
    %c0_i32_1 = arith.constant 0 : i32
    return %c0_i32, %c0_i32_0 : i32, i32
  }
  func.func @transform_18(%arg0: i32) -> (i32, i32) {
    %c0_i32 = arith.constant 0 : i32
    %c0_i32_0 = arith.constant 0 : i32
    %c0_i32_1 = arith.constant 0 : i32
    return %c0_i32, %c0_i32_0 : i32, i32
  }
  func.func @transform_19(%arg0: i32) -> (i32, i32, i32) {
    %c0_i32 = arith.constant 0 : i32
    %c0_i32_0 = arith.constant 0 : i32
    %c0_i32_1 = arith.constant 0 : i32
    return %arg0, %c0_i32, %c0_i32_0 : i32, i32, i32
  }
}

</mosaic_0001>

<bundles_post_ra>
// kernel: mesh_conv_net_forward.1
= control target key start
LH: loop header
LB: loop body
LE: loop exit
PB: predicated region body
PF: predicated region fallthrough
CT: control target
= control target key end

     0   :  { %s9079_s0 = inlined_call_operand.vmem [shape: f32[2,8,256], index: 0, kind: input, shape index: {}]   ;;  %s9080_s1 = inlined_call_operand.vmem [shape: f32[2,256,1024], index: 1, kind: input, shape index: {}]   ;;  %s9081_s2 = inlined_call_operand.vmem [shape: f32[2,128,512], index: 2, kind: input, shape index: {}]   ;;  %s9082_s3 = inlined_call_operand.vmem [shape: f32[256,128], index: 3, kind: input, shape index: {}]   ;;  %s9083_s4 = inlined_call_operand.vmem [shape: f32[128,64], index: 4, kind: input, shape index: {}]   ;;  %s9084_s5 = inlined_call_operand.vmem [shape: f32[16,40], index: 5, kind: input, shape index: {}]   ;;  %s9085_s6 = inlined_call_operand.vmem [shape: f32[3,16,80], index: 6, kind: input, shape index: {}]   ;;  %s9086_s7 = inlined_call_operand.vmem [shape: f32[3,16,1], index: 7, kind: input, shape index: {}]   ;;  %s9087_s8 = inlined_call_operand.vmem [shape: f32[3,16,1], index: 8, kind: input, shape index: {}]   ;;  %s9088_s9 = inlined_call_operand.vmem [shape: f32[2,16,1], index: 9, kind: input, shape index: {}]   ;;  %s9089_s10 = inlined_call_operand.vmem [shape: f32[32,80], index: 10, kind: input, shape index: {}]   ;;  %s9090_s11 = inlined_call_operand.vmem [shape: f32[3,32,160], index: 11, kind: input, shape index: {}]   ;;  %s9091_s12 = inlined_call_operand.vmem [shape: f32[3,32,1], index: 12, kind: input, shape index: {}]   ;;  %s9092_s13 = inlined_call_operand.vmem [shape: f32[3,32,1], index: 13, kind: input, shape index: {}]   ;;  %s9093_s14 = inlined_call_operand.vmem [shape: f32[2,32,1], index: 14, kind: input, shape index: {}]   ;;  %s9094_s15 = inlined_call_operand.vmem [shape: f32[32,32], index: 15, kind: input, shape index: {}]   ;;  %s9095_s16 = inlined_call_operand.vmem [shape: f32[32,1], index: 16, kind: input, shape index: {}]   ;;  %s9096_s17 = inlined_call_operand.vmem [shape: f32[4,32], index: 17, kind: input, shape index: {}]   ;;  %s9097_s18 = inlined_call_operand.vmem [shape: f32[4,1], index: 18, kind: input, shape index: {}]   ;;  %s9098_s19 = inlined_call_operand.vmem [shape: f32[2,4,1], index: 19, kind: output, shape index: {}]  }
   0x1   :  { %9482 = sst [smem:[#allocation175_spill]] %s9079_s0  ;;  %s5408_s0 = smov 0  }
   0x2   :  { %9483 = sst [smem:[#allocation176_spill]] %s9080_s1 }
   0x3   :  { %9484 = sst [smem:[#allocation177_spill]] %s9081_s2 }
   0x4   :  { %9485 = sst [smem:[#allocation178_spill]] %s9082_s3 }
   0x5 LB: > { %s4665_s30 = sadd.s32 4294967295, %s5303_s0   ;;  %p4669_p0 = scmp.ge.s32.totalorder %s5303_s0, 1  ;;  %s5303_s0 = sphi %s5408_s0, %s29_s0  }
   0x6   : > { %p557_p1 = scmp.lt.s32.totalorder %s5303_s0, 3 }
   0x8   : > { %p558_p2 = pnand %p4669_p0, %p557_p1 }
   0xa   : > { %561 = sbr.rel (%p558_p2) target bundleno = 5770 (0x168a), region = 96 }
   0xf   : > { %p622_p3 = scmp.lt.s32.totalorder %s4665_s30, 1  ;;  %s9486_s22 = sld [smem:[#allocation176_spill]]  ;;  %vm1189_vm0 = vcmask 326656   ;;  %vm1627_vm1 = vcmask 654336   ;;  %vm3364_vm2 = vcmask 261120   ;;  %vm4384_vm3 = vcmask 523264  }
  0x10   : > { %s9507_s3 = sld [smem:[#allocation175_spill]]  ;;  %vm5307_vm4 = vmmov 0   ;;  %vm4586_vm5 = vcmask 3072  }
  0x11   : > { %s10218_s30 = smov (!%p622_p3, %s4665_s30), 1  ;;  %s10154_s21 = sld [smem:[#allocation177_spill]] }
  0x12   : > { %s4759_s20 = sshll.u32 %s10218_s30, 11  ;;  %s4758_s23 = sshll.u32 %s10218_s30, 4 }
  0x13   : > { %s4760_s28 = sshll.u32 %s10218_s30, 9 }
  0x15   : > { %s5422_s2 = scalar_lea.vmem %s9486_s22, %s4759_s20 }
  0x16   : > { %v764_v0 = vld [vmem:[%s5422_s2 + $0x3c8] sm:$0xff]  ;;  %v766_v1 = vld [vmem:[%s5422_s2 + $0x3d8] sm:$0xff]  ;;  %v763_v2 = vld [vmem:[%s5422_s2 + $0x3c0] sm:$0xff]  ;;  %s626_s26 = scalar_lea.vmem %s9507_s3, %s4758_s23 }
  0x17   : > { %901 = vmatprep.subr.mxu0 %v764_v0  ;;  %972 = vmatprep.subr.mxu1 %v766_v1  ;;  %v765_v3 = vld [vmem:[%s5422_s2 + $0x3d0] sm:$0xff]  ;;  %v756_v4 = vld [vmem:[%s5422_s2 + $0x388] sm:$0xff]  ;;  %v758_v5 = vld [vmem:[%s5422_s2 + $0x398] sm:$0xff] }
  0x18   : > { %902 = vmatpush1.msra.mxu0 %v763_v2  ;;  %973 = vmatpush1.msra.mxu1 %v765_v3  ;;  %v755_v6 = vld [vmem:[%s5422_s2 + $0x380] sm:$0xff]  ;;  %v757_v7 = vld [vmem:[%s5422_s2 + $0x390] sm:$0xff]  ;;  %v748_v8 = vld [vmem:[%s5422_s2 + $0x348] sm:$0xff] }
  0x19   : > { %903 = vmatprep.subr.mxu0 %v756_v4  ;;  %974 = vmatprep.subr.mxu1 %v758_v5  ;;  %v750_v9 = vld [vmem:[%s5422_s2 + $0x358] sm:$0xff]  ;;  %v747_v10 = vld [vmem:[%s5422_s2 + $0x340] sm:$0xff]  ;;  %v749_v11 = vld [vmem:[%s5422_s2 + $0x350] sm:$0xff] }
  0x1a   : > { %904 = vmatpush1.msra.mxu0 %v755_v6  ;;  %975 = vmatpush1.msra.mxu1 %v757_v7  ;;  %v5437_v12 = vld [vmem:[%s5422_s2 + $0x308] sm:$0xff]  ;;  %v742_v13 = vld [vmem:[%s5422_s2 + $0x318] sm:$0xff]  ;;  %v5441_v14 = vld [vmem:[%s5422_s2 + $0x300] sm:$0xff] }
  0x1b   : > { %905 = vmatprep.subr.mxu0 %v748_v8  ;;  %976 = vmatprep.subr.mxu1 %v750_v9  ;;  %v741_v15 = vld [vmem:[%s5422_s2 + $0x310] sm:$0xff]  ;;  %v5445_v16 = vld [vmem:[%s5422_s2 + $0x2c8] sm:$0xff]  ;;  %v734_v17 = vld [vmem:[%s5422_s2 + $0x2d8] sm:$0xff] }
  0x1c   : > { %906 = vmatpush1.msra.mxu0 %v747_v10  ;;  %977 = vmatpush1.msra.mxu1 %v749_v11  ;;  %v5450_v18 = vld [vmem:[%s5422_s2 + $0x2c0] sm:$0xff]  ;;  %v733_v19 = vld [vmem:[%s5422_s2 + $0x2d0] sm:$0xff]  ;;  %v5455_v20 = vld [vmem:[%s5422_s2 + $0x288] sm:$0xff] }
  0x1d   : > { %907 = vmatprep.subr.mxu0 %v5437_v12  ;;  %978 = vmatprep.subr.mxu1 %v742_v13  ;;  %v726_v21 = vld [vmem:[%s5422_s2 + $0x298] sm:$0xff]  ;;  %v5460_v22 = vld [vmem:[%s5422_s2 + $0x280] sm:$0xff]  ;;  %v725_v23 = vld [vmem:[%s5422_s2 + $0x290] sm:$0xff] }
  0x1e   : > { %908 = vmatpush1.msra.mxu0 %v5441_v14  ;;  %979 = vmatpush1.msra.mxu1 %v741_v15  ;;  %v5465_v24 = vld [vmem:[%s5422_s2 + $0x248] sm:$0xff]  ;;  %v718_v25 = vld [vmem:[%s5422_s2 + $0x258] sm:$0xff]  ;;  %v5470_v26 = vld [vmem:[%s5422_s2 + $0x240] sm:$0xff] }
  0x1f   : > { %909 = vmatprep.subr.mxu0 %v5445_v16  ;;  %980 = vmatprep.subr.mxu1 %v734_v17  ;;  %v717_v27 = vld [vmem:[%s5422_s2 + $0x250] sm:$0xff]  ;;  %v5475_v28 = vld [vmem:[%s5422_s2 + $0x208] sm:$0xff]  ;;  %v710_v29 = vld [vmem:[%s5422_s2 + $0x218] sm:$0xff] }
  0x20   : > { %910 = vmatpush1.msra.mxu0 %v5450_v18  ;;  %981 = vmatpush1.msra.mxu1 %v733_v19  ;;  %v5480_v30 = vld [vmem:[%s5422_s2 + $0x200] sm:$0xff]  ;;  %v709_v31 = vld [vmem:[%s5422_s2 + $0x210] sm:$0xff]  ;;  %v5485_v32 = vld [vmem:[%s5422_s2 + $0x1c8] sm:$0xff] }
  0x21   : > { %911 = vmatprep.subr.mxu0 %v5455_v20  ;;  %982 = vmatprep.subr.mxu1 %v726_v21  ;;  %v702_v33 = vld [vmem:[%s5422_s2 + $0x1d8] sm:$0xff]  ;;  %v5490_v34 = vld [vmem:[%s5422_s2 + $0x1c0] sm:$0xff]  ;;  %v701_v35 = vld [vmem:[%s5422_s2 + $0x1d0] sm:$0xff] }
  0x22   : > { %912 = vmatpush1.msra.mxu0 %v5460_v22  ;;  %983 = vmatpush1.msra.mxu1 %v725_v23  ;;  %v5495_v36 = vld [vmem:[%s5422_s2 + $0x188] sm:$0xff]  ;;  %v694_v37 = vld [vmem:[%s5422_s2 + $0x198] sm:$0xff]  ;;  %v5500_v38 = vld [vmem:[%s5422_s2 + $0x180] sm:$0xff] }
  0x23   : > { %913 = vmatprep.subr.mxu0 %v5465_v24  ;;  %984 = vmatprep.subr.mxu1 %v718_v25  ;;  %v693_v39 = vld [vmem:[%s5422_s2 + $0x190] sm:$0xff]  ;;  %v5505_v40 = vld [vmem:[%s5422_s2 + $0x148] sm:$0xff]  ;;  %v686_v41 = vld [vmem:[%s5422_s2 + $0x158] sm:$0xff] }
  0x24   : > { %914 = vmatpush1.msra.mxu0 %v5470_v26  ;;  %985 = vmatpush1.msra.mxu1 %v717_v27  ;;  %v5510_v42 = vld [vmem:[%s5422_s2 + $0x140] sm:$0xff]  ;;  %v685_v43 = vld [vmem:[%s5422_s2 + $0x150] sm:$0xff]  ;;  %v5515_v44 = vld [vmem:[%s5422_s2 + $0x108] sm:$0xff] }
  0x25   : > { %915 = vmatprep.subr.mxu0 %v5475_v28  ;;  %986 = vmatprep.subr.mxu1 %v710_v29  ;;  %v678_v45 = vld [vmem:[%s5422_s2 + $0x118] sm:$0xff]  ;;  %v5520_v46 = vld [vmem:[%s5422_s2 + $0x100] sm:$0xff]  ;;  %v677_v47 = vld [vmem:[%s5422_s2 + $0x110] sm:$0xff] }
  0x26   : > { %916 = vmatpush1.msra.mxu0 %v5480_v30  ;;  %987 = vmatpush1.msra.mxu1 %v709_v31  ;;  %v5525_v48 = vld [vmem:[%s5422_s2 + $0xc8] sm:$0xff]  ;;  %v670_v49 = vld [vmem:[%s5422_s2 + $0xd8] sm:$0xff]  ;;  %v5530_v50 = vld [vmem:[%s5422_s2 + $0xc0] sm:$0xff] }
  0x27   : > { %917 = vmatprep.subr.mxu0 %v5485_v32  ;;  %988 = vmatprep.subr.mxu1 %v702_v33  ;;  %v669_v51 = vld [vmem:[%s5422_s2 + $0xd0] sm:$0xff]  ;;  %v5535_v52 = vld [vmem:[%s5422_s2 + $0x88] sm:$0xff]  ;;  %v662_v53 = vld [vmem:[%s5422_s2 + $0x98] sm:$0xff] }
  0x28   : > { %918 = vmatpush1.msra.mxu0 %v5490_v34  ;;  %989 = vmatpush1.msra.mxu1 %v701_v35  ;;  %v5540_v54 = vld [vmem:[%s5422_s2 + $0x80] sm:$0xff]  ;;  %v661_v55 = vld [vmem:[%s5422_s2 + $0x90] sm:$0xff]  ;;  %v5545_v56 = vld [vmem:[%s5422_s2 + $0x48] sm:$0xff] }
  0x29   : > { %919 = vmatprep.subr.mxu0 %v5495_v36  ;;  %990 = vmatprep.subr.mxu1 %v694_v37  ;;  %v654_v57 = vld [vmem:[%s5422_s2 + $0x58] sm:$0xff]  ;;  %v5550_v58 = vld [vmem:[%s5422_s2 + $0x40] sm:$0xff]  ;;  %v653_v59 = vld [vmem:[%s5422_s2 + $0x50] sm:$0xff] }
  0x2a   : > { %920 = vmatpush1.msra.mxu0 %v5500_v38  ;;  %991 = vmatpush1.msra.mxu1 %v693_v39  ;;  %v5555_v60 = vld [vmem:[%s5422_s2 + $0x8] sm:$0xff]  ;;  %v646_v61 = vld [vmem:[%s5422_s2 + $0x18] sm:$0xff]  ;;  %v5560_v62 = vld [vmem:[%s5422_s2] sm:$0xff] }
  0x2b   : > { %921 = vmatprep.subr.mxu0 %v5505_v40  ;;  %992 = vmatprep.subr.mxu1 %v686_v41  ;;  %v645_v63 = vld [vmem:[%s5422_s2 + $0x10] sm:$0xff]  ;;  %v5565_v0 = vld [vmem:[%s5422_s2 + $0x7c8] sm:$0xff]  ;;  %v894_v1 = vld [vmem:[%s5422_s2 + $0x7d8] sm:$0xff] }
  0x2c   : > { %922 = vmatpush1.msra.mxu0 %v5510_v42  ;;  %993 = vmatpush1.msra.mxu1 %v685_v43  ;;  %v5570_v2 = vld [vmem:[%s5422_s2 + $0x7c0] sm:$0xff]  ;;  %v893_v3 = vld [vmem:[%s5422_s2 + $0x7d0] sm:$0xff]  ;;  %v5575_v4 = vld [vmem:[%s5422_s2 + $0x788] sm:$0xff] }
  0x2d   : > { %923 = vmatprep.subr.mxu0 %v5515_v44  ;;  %994 = vmatprep.subr.mxu1 %v678_v45  ;;  %v886_v5 = vld [vmem:[%s5422_s2 + $0x798] sm:$0xff]  ;;  %v5580_v6 = vld [vmem:[%s5422_s2 + $0x780] sm:$0xff]  ;;  %v885_v7 = vld [vmem:[%s5422_s2 + $0x790] sm:$0xff] }
  0x2e   : > { %924 = vmatpush1.msra.mxu0 %v5520_v46  ;;  %995 = vmatpush1.msra.mxu1 %v677_v47  ;;  %v5585_v8 = vld [vmem:[%s5422_s2 + $0x748] sm:$0xff]  ;;  %v878_v9 = vld [vmem:[%s5422_s2 + $0x758] sm:$0xff]  ;;  %v5590_v10 = vld [vmem:[%s5422_s2 + $0x740] sm:$0xff] }
  0x2f   : > { %925 = vmatprep.subr.mxu0 %v5525_v48  ;;  %996 = vmatprep.subr.mxu1 %v670_v49  ;;  %v877_v11 = vld [vmem:[%s5422_s2 + $0x750] sm:$0xff]  ;;  %v5595_v13 = vld [vmem:[%s5422_s2 + $0x708] sm:$0xff]  ;;  %v870_v15 = vld [vmem:[%s5422_s2 + $0x718] sm:$0xff] }
  0x30   : > { %926 = vmatpush1.msra.mxu0 %v5530_v50  ;;  %997 = vmatpush1.msra.mxu1 %v669_v51  ;;  %v5600_v17 = vld [vmem:[%s5422_s2 + $0x700] sm:$0xff]  ;;  %v869_v19 = vld [vmem:[%s5422_s2 + $0x710] sm:$0xff]  ;;  %v5605_v21 = vld [vmem:[%s5422_s2 + $0x6c8] sm:$0xff] }
  0x31   : > { %927 = vmatprep.subr.mxu0 %v5535_v52  ;;  %998 = vmatprep.subr.mxu1 %v662_v53  ;;  %v862_v23 = vld [vmem:[%s5422_s2 + $0x6d8] sm:$0xff]  ;;  %v5610_v25 = vld [vmem:[%s5422_s2 + $0x6c0] sm:$0xff]  ;;  %v861_v27 = vld [vmem:[%s5422_s2 + $0x6d0] sm:$0xff] }
  0x32   : > { %928 = vmatpush1.msra.mxu0 %v5540_v54  ;;  %999 = vmatpush1.msra.mxu1 %v661_v55  ;;  %v5615_v29 = vld [vmem:[%s5422_s2 + $0x688] sm:$0xff]  ;;  %v854_v31 = vld [vmem:[%s5422_s2 + $0x698] sm:$0xff]  ;;  %v5620_v33 = vld [vmem:[%s5422_s2 + $0x680] sm:$0xff] }
  0x33   : > { %929 = vmatprep.subr.mxu0 %v5545_v56  ;;  %1000 = vmatprep.subr.mxu1 %v654_v57  ;;  %v853_v35 = vld [vmem:[%s5422_s2 + $0x690] sm:$0xff]  ;;  %v5625_v37 = vld [vmem:[%s5422_s2 + $0x648] sm:$0xff]  ;;  %v846_v39 = vld [vmem:[%s5422_s2 + $0x658] sm:$0xff] }
  0x34   : > { %930 = vmatpush1.msra.mxu0 %v5550_v58  ;;  %1001 = vmatpush1.msra.mxu1 %v653_v59  ;;  %v5630_v41 = vld [vmem:[%s5422_s2 + $0x640] sm:$0xff]  ;;  %v845_v43 = vld [vmem:[%s5422_s2 + $0x650] sm:$0xff]  ;;  %v5635_v45 = vld [vmem:[%s5422_s2 + $0x608] sm:$0xff] }
  0x35   : > { %931 = vmatprep.subr.mxu0 %v5555_v60  ;;  %1002 = vmatprep.subr.mxu1 %v646_v61  ;;  %v5638_v47 = vld [vmem:[%s5422_s2 + $0x618] sm:$0xff]  ;;  %v5642_v49 = vld [vmem:[%s5422_s2 + $0x600] sm:$0xff]  ;;  %v5645_v51 = vld [vmem:[%s5422_s2 + $0x610] sm:$0xff] }
  0x36   : > { %932 = vmatpush1.msra.mxu0 %v5560_v62  ;;  %1003 = vmatpush1.msra.mxu1 %v645_v63  ;;  %9487 = vst [vmem:[#allocation2_spill] sm:$0xff] %v5638_v47  ;;  %9488 = vst [vmem:[#allocation3_spill] sm:$0xff] %v5645_v51  ;;  %v5649_v53 = vld [vmem:[%s5422_s2 + $0x5c8] sm:$0xff]  ;;  %v5652_v55 = vld [vmem:[%s5422_s2 + $0x5d8] sm:$0xff] }
  0x37   : > { %933 = vmatprep.subr.mxu0 %v5565_v0  ;;  %1004 = vmatprep.subr.mxu1 %v894_v1  ;;  %9489 = vst [vmem:[#allocation4_spill] sm:$0xff] %v5652_v55  ;;  %v5657_v57 = vld [vmem:[%s5422_s2 + $0x5c0] sm:$0xff]  ;;  %v5660_v59 = vld [vmem:[%s5422_s2 + $0x5d0] sm:$0xff]  ;;  %v5665_v61 = vld [vmem:[%s5422_s2 + $0x588] sm:$0xff] }
  0x38   : > { %934 = vmatpush2.msra.mxu0 %v5570_v2  ;;  %1005 = vmatpush2.msra.mxu1 %v893_v3  ;;  %9490 = vst [vmem:[#allocation5_spill] sm:$0xff] %v5660_v59  ;;  %v5668_v63 = vld [vmem:[%s5422_s2 + $0x598] sm:$0xff]  ;;  %v5673_v1 = vld [vmem:[%s5422_s2 + $0x580] sm:$0xff]  ;;  %v5676_v3 = vld [vmem:[%s5422_s2 + $0x590] sm:$0xff] }
  0x39   : > { %935 = vmatprep.subr.mxu0 %v5575_v4  ;;  %1006 = vmatprep.subr.mxu1 %v886_v5  ;;  %9491 = vst [vmem:[#allocation6_spill] sm:$0xff] %v5668_v63  ;;  %9492 = vst [vmem:[#allocation7_spill] sm:$0xff] %v5676_v3  ;;  %v5681_v5 = vld [vmem:[%s5422_s2 + $0x548] sm:$0xff] }
  0x3a   : > { %936 = vmatpush2.msra.mxu0 %v5580_v6  ;;  %1007 = vmatpush2.msra.mxu1 %v885_v7  ;;  %v5684_v7 = vld [vmem:[%s5422_s2 + $0x558] sm:$0xff] }
  0x3b   : > { %937 = vmatprep.subr.mxu0 %v5585_v8  ;;  %1008 = vmatprep.subr.mxu1 %v878_v9  ;;  %9493 = vst [vmem:[#allocation8_spill] sm:$0xff] %v5684_v7  ;;  %v5689_v9 = vld [vmem:[%s5422_s2 + $0x540] sm:$0xff] }
  0x3c   : > { %938 = vmatpush2.msra.mxu0 %v5590_v10  ;;  %1009 = vmatpush2.msra.mxu1 %v877_v11  ;;  %v5692_v11 = vld [vmem:[%s5422_s2 + $0x550] sm:$0xff] }
  0x3d   : > { %939 = vmatprep.subr.mxu0 %v5595_v13  ;;  %1010 = vmatprep.subr.mxu1 %v870_v15  ;;  %9494 = vst [vmem:[#allocation9_spill] sm:$0xff] %v5692_v11  ;;  %v5697_v15 = vld [vmem:[%s5422_s2 + $0x508] sm:$0xff] }
  0x3e   : > { %940 = vmatpush2.msra.mxu0 %v5600_v17  ;;  %1011 = vmatpush2.msra.mxu1 %v869_v19  ;;  %v5700_v19 = vld [vmem:[%s5422_s2 + $0x518] sm:$0xff] }
  0x3f   : > { %941 = vmatprep.subr.mxu0 %v5605_v21  ;;  %1012 = vmatprep.subr.mxu1 %v862_v23  ;;  %9495 = vst [vmem:[#allocation10_spill] sm:$0xff] %v5700_v19  ;;  %v5705_v23 = vld [vmem:[%s5422_s2 + $0x500] sm:$0xff] }
  0x40   : > { %942 = vmatpush2.msra.mxu0 %v5610_v25  ;;  %1013 = vmatpush2.msra.mxu1 %v861_v27  ;;  %v5708_v27 = vld [vmem:[%s5422_s2 + $0x510] sm:$0xff] }
  0x41   : > { %943 = vmatprep.subr.mxu0 %v5615_v29  ;;  %1014 = vmatprep.subr.mxu1 %v854_v31  ;;  %9496 = vst [vmem:[#allocation11_spill] sm:$0xff] %v5708_v27  ;;  %v5713_v31 = vld [vmem:[%s5422_s2 + $0x4c8] sm:$0xff] }
  0x42   : > { %944 = vmatpush2.msra.mxu0 %v5620_v33  ;;  %1015 = vmatpush2.msra.mxu1 %v853_v35  ;;  %v5716_v35 = vld [vmem:[%s5422_s2 + $0x4d8] sm:$0xff] }
  0x43   : > { %945 = vmatprep.subr.mxu0 %v5625_v37  ;;  %1016 = vmatprep.subr.mxu1 %v846_v39  ;;  %9497 = vst [vmem:[#allocation12_spill] sm:$0xff] %v5716_v35  ;;  %v5721_v39 = vld [vmem:[%s5422_s2 + $0x4c0] sm:$0xff] }
  0x44   : > { %946 = vmatpush2.msra.mxu0 %v5630_v41  ;;  %1017 = vmatpush2.msra.mxu1 %v845_v43  ;;  %v5724_v43 = vld [vmem:[%s5422_s2 + $0x4d0] sm:$0xff] }
  0x45   : > { %947 = vmatprep.subr.mxu0 %v5635_v45  ;;  %1018 = vmatprep.subr.mxu1 %v5638_v47  ;;  %9498 = vst [vmem:[#allocation13_spill] sm:$0xff] %v5724_v43  ;;  %v5784_v47 = vld [vmem:[%s626_s26] sm:$0xff] }
  0x46   : > { %948 = vmatpush2.msra.mxu0 %v5642_v49  ;;  %1019 = vmatpush2.msra.mxu1 %v5645_v51  ;;  %v5776_v51 = vld [vmem:[%s5422_s2 + $0x410] sm:$0xff] }
  0x47   : > { %949 = vmatprep.subr.mxu0 %v5649_v53  ;;  %1020 = vmatprep.subr.mxu1 %v5652_v55  ;;  %v5768_v55 = vld [vmem:[%s5422_s2 + $0x418] sm:$0xff]  ;;  %9511 = vst [vmem:[#allocation25_spill] sm:$0xff] %v5776_v51 }
  0x48   : > { %950 = vmatpush2.msra.mxu0 %v5657_v57  ;;  %1021 = vmatpush2.msra.mxu1 %v5660_v59  ;;  %v5754_v59 = vld [vmem:[%s5422_s2 + $0x440] sm:$0xff]  ;;  %9509 = vst [vmem:[#allocation23_spill] sm:$0xff] %v5768_v55 }
  0x49   : > { %951 = vmatprep.subr.mxu0 %v5665_v61  ;;  %1022 = vmatprep.subr.mxu1 %v5668_v63  ;;  %v5749_v63 = vld [vmem:[%s5422_s2 + $0x458] sm:$0xff]  ;;  %9505 = vst [vmem:[#allocation20_spill] sm:$0xff] %v5754_v59 }
  0x4a   : > { %952 = vmatpush2.msra.mxu0 %v5673_v1  ;;  %1023 = vmatpush2.msra.mxu1 %v5676_v3  ;;  %v5741_v3 = vld [vmem:[%s5422_s2 + $0x490] sm:$0xff]  ;;  %9504 = vst [vmem:[#allocation19_spill] sm:$0xff] %v5749_v63 }
  0x4b   : > { %953 = vmatprep.subr.mxu0 %v5681_v5  ;;  %1024 = vmatprep.subr.mxu1 %v5684_v7  ;;  %v5732_v7 = vld [vmem:[%s5422_s2 + $0x498] sm:$0xff]  ;;  %9502 = vst [vmem:[#allocation17_spill] sm:$0xff] %v5741_v3 }
  0x4c   : > { %954 = vmatpush2.msra.mxu0 %v5689_v9  ;;  %1025 = vmatpush2.msra.mxu1 %v5692_v11  ;;  %v5729_v11 = vld [vmem:[%s5422_s2 + $0x488] sm:$0xff]  ;;  %9500 = vst [vmem:[#allocation15_spill] sm:$0xff] %v5732_v7 }
  0x4d   : > { %955 = vmatprep.subr.mxu0 %v5697_v15  ;;  %1026 = vmatprep.subr.mxu1 %v5700_v19  ;;  %9499 = vst [vmem:[#allocation14_spill] sm:$0xff] %v5729_v11  ;;  %v5738_v19 = vld [vmem:[%s5422_s2 + $0x480] sm:$0xff] }
  0x4e   : > { %956 = vmatpush2.msra.mxu0 %v5705_v23  ;;  %1027 = vmatpush2.msra.mxu1 %v5708_v27  ;;  %9501 = vst [vmem:[#allocation16_spill] sm:$0xff] %v5738_v19  ;;  %v5746_v27 = vld [vmem:[%s5422_s2 + $0x448] sm:$0xff] }
  0x4f   : > { %957 = vmatprep.subr.mxu0 %v5713_v31  ;;  %1028 = vmatprep.subr.mxu1 %v5716_v35  ;;  %9503 = vst [vmem:[#allocation18_spill] sm:$0xff] %v5746_v27  ;;  %v5757_v35 = vld [vmem:[%s5422_s2 + $0x450] sm:$0xff] }
  0x50   : > { %958 = vmatpush2.msra.mxu0 %v5721_v39  ;;  %1029 = vmatpush2.msra.mxu1 %v5724_v43  ;;  %9506 = vst [vmem:[#allocation21_spill] sm:$0xff] %v5757_v35  ;;  %v5765_v43 = vld [vmem:[%s5422_s2 + $0x408] sm:$0xff] }
  0x51   : > { %959 = vmatprep.subr.mxu0 %v5729_v11  ;;  %1030 = vmatprep.subr.mxu1 %v5732_v7  ;;  %9508 = vst [vmem:[#allocation22_spill] sm:$0xff] %v5765_v43  ;;  %v5773_v7 = vld [vmem:[%s5422_s2 + $0x400] sm:$0xff]  ;;  %v5832_v11 = vld [vmem:[%s5422_s2 + $0x370] sm:$0xff] }
  0x52   : > { %960 = vmatpush2.msra.mxu0 %v5738_v19  ;;  %1031 = vmatpush2.msra.mxu1 %v5741_v3  ;;  %9510 = vst [vmem:[#allocation24_spill] sm:$0xff] %v5773_v7  ;;  %v5780_v3 = vld [vmem:[%s626_s26 + $0x8] sm:$0xff]  ;;  %v5824_v19 = vld [vmem:[%s5422_s2 + $0x378] sm:$0xff]  ;;  %9523 = vst [vmem:[#allocation37_spill] sm:$0xff] %v5832_v11  ;;  %s10153_s26 = sld [smem:[#allocation178_spill]] }
  0x53   : > { %961 = vmatprep.subr.mxu0 %v5746_v27  ;;  %1032 = vmatprep.subr.mxu1 %v5749_v63  ;;  %v5787_v63 = vld [vmem:[%s5422_s2 + $0x3e8] sm:$0xff]  ;;  %v5816_v27 = vld [vmem:[%s5422_s2 + $0x3b0] sm:$0xff]  ;;  %9521 = vst [vmem:[#allocation35_spill] sm:$0xff] %v5824_v19 }
  0x54   : > { %962 = vmatpush2.msra.mxu0 %v5754_v59  ;;  %1033 = vmatpush2.msra.mxu1 %v5757_v35  ;;  %9512 = vst [vmem:[#allocation26_spill] sm:$0xff] %v5787_v63  ;;  %v5792_v59 = vld [vmem:[%s5422_s2 + $0x3f8] sm:$0xff]  ;;  %v5797_v35 = vld [vmem:[%s5422_s2 + $0x3e0] sm:$0xff]  ;;  %9519 = vst [vmem:[#allocation33_spill] sm:$0xff] %v5816_v27 }
  0x55   : > { %963 = vmatprep.subr.mxu0 %v5765_v43  ;;  %1034 = vmatprep.subr.mxu1 %v5768_v55  ;;  %9513 = vst [vmem:[#allocation27_spill] sm:$0xff] %v5792_v59  ;;  %9514 = vst [vmem:[#allocation28_spill] sm:$0xff] %v5797_v35  ;;  %v5800_v55 = vld [vmem:[%s5422_s2 + $0x3f0] sm:$0xff]  ;;  %v5813_v43 = vld [vmem:[%s5422_s2 + $0x3a0] sm:$0xff] }
  0x56   : > { %964 = vmatpush2.msra.mxu0 %v5773_v7  ;;  %1035 = vmatpush2.msra.mxu1 %v5776_v51  ;;  %9515 = vst [vmem:[#allocation29_spill] sm:$0xff] %v5800_v55  ;;  %v5805_v7 = vld [vmem:[%s5422_s2 + $0x3a8] sm:$0xff]  ;;  %v5808_v51 = vld [vmem:[%s5422_s2 + $0x3b8] sm:$0xff]  ;;  %9518 = vst [vmem:[#allocation32_spill] sm:$0xff] %v5813_v43 }
  0x57   : > { %1036 = vmatprep.mubr.f32.mxu1 %v5780_v3  ;;  %965 = vmatprep.mubr.f32.mxu0 %v5780_v3  ;;  %9516 = vst [vmem:[#allocation30_spill] sm:$0xff] %v5805_v7  ;;  %9517 = vst [vmem:[#allocation31_spill] sm:$0xff] %v5808_v51 }
  0x58   : > { %1037 = vmatmul.mubr.f32.vlgmr.msra.gmra.mxu1 %v5784_v47  ;;  %1043 = vmatprep.subr.mxu0 %v5787_v63  ;;  %v5821_v63 = vld [vmem:[%s5422_s2 + $0x368] sm:$0xff] }
  0x59   : > { %1114 = vmatprep.subr.mxu1 %v5792_v59  ;;  %966 = vmatmul.mubr.f32.vlgmr.msra.gmra.mxu0 %v5784_v47  ;;  %9520 = vst [vmem:[#allocation34_spill] sm:$0xff] %v5821_v63  ;;  %v5829_v59 = vld [vmem:[%s5422_s2 + $0x360] sm:$0xff] }
  0x5a   : > { %1044 = vmatpush1.msra.mxu0 %v5797_v35  ;;  %1115 = vmatpush1.msra.mxu1 %v5800_v55  ;;  %9522 = vst [vmem:[#allocation36_spill] sm:$0xff] %v5829_v59  ;;  %v5837_v55 = vld [vmem:[%s5422_s2 + $0x328] sm:$0xff]  ;;  %v5840_v35 = vld [vmem:[%s5422_s2 + $0x338] sm:$0xff] }
  0x5b   : > { %1045 = vmatprep.subr.mxu0 %v5805_v7  ;;  %1116 = vmatprep.subr.mxu1 %v5808_v51  ;;  %9524 = vst [vmem:[#allocation38_spill] sm:$0xff] %v5837_v55  ;;  %9525 = vst [vmem:[#allocation39_spill] sm:$0xff] %v5840_v35  ;;  %v5845_v51 = vld [vmem:[%s5422_s2 + $0x320] sm:$0xff]  ;;  %v5848_v7 = vld [vmem:[%s5422_s2 + $0x330] sm:$0xff] }
  0x5c   : > { %1046 = vmatpush1.msra.mxu0 %v5813_v43  ;;  %1117 = vmatpush1.msra.mxu1 %v5816_v27  ;;  %9526 = vst [vmem:[#allocation40_spill] sm:$0xff] %v5845_v51  ;;  %9527 = vst [vmem:[#allocation41_spill] sm:$0xff] %v5848_v7  ;;  %v5853_v27 = vld [vmem:[%s5422_s2 + $0x2e8] sm:$0xff]  ;;  %v5856_v43 = vld [vmem:[%s5422_s2 + $0x2f8] sm:$0xff] }
  0x5d   : > { %1047 = vmatprep.subr.mxu0 %v5821_v63  ;;  %1118 = vmatprep.subr.mxu1 %v5824_v19  ;;  %9528 = vst [vmem:[#allocation42_spill] sm:$0xff] %v5853_v27  ;;  %9529 = vst [vmem:[#allocation43_spill] sm:$0xff] %v5856_v43  ;;  %v5861_v19 = vld [vmem:[%s5422_s2 + $0x2e0] sm:$0xff]  ;;  %v5864_v63 = vld [vmem:[%s5422_s2 + $0x2f0] sm:$0xff] }
  0x5e   : > { %1048 = vmatpush1.msra.mxu0 %v5829_v59  ;;  %1119 = vmatpush1.msra.mxu1 %v5832_v11  ;;  %9530 = vst [vmem:[#allocation44_spill] sm:$0xff] %v5861_v19  ;;  %9531 = vst [vmem:[#allocation45_spill] sm:$0xff] %v5864_v63  ;;  %v5869_v11 = vld [vmem:[%s5422_s2 + $0x2a8] sm:$0xff]  ;;  %v5872_v59 = vld [vmem:[%s5422_s2 + $0x2b8] sm:$0xff] }
  0x5f   : > { %1049 = vmatprep.subr.mxu0 %v5837_v55  ;;  %1120 = vmatprep.subr.mxu1 %v5840_v35  ;;  %9532 = vst [vmem:[#allocation46_spill] sm:$0xff] %v5869_v11  ;;  %9533 = vst [vmem:[#allocation47_spill] sm:$0xff] %v5872_v59  ;;  %v5877_v35 = vld [vmem:[%s5422_s2 + $0x2a0] sm:$0xff]  ;;  %v5880_v55 = vld [vmem:[%s5422_s2 + $0x2b0] sm:$0xff] }
  0x60   : > { %1050 = vmatpush1.msra.mxu0 %v5845_v51  ;;  %1121 = vmatpush1.msra.mxu1 %v5848_v7  ;;  %9534 = vst [vmem:[#allocation48_spill] sm:$0xff] %v5877_v35  ;;  %9535 = vst [vmem:[#allocation49_spill] sm:$0xff] %v5880_v55  ;;  %v5885_v7 = vld [vmem:[%s5422_s2 + $0x268] sm:$0xff]  ;;  %v5888_v51 = vld [vmem:[%s5422_s2 + $0x278] sm:$0xff] }
  0x61   : > { %1051 = vmatprep.subr.mxu0 %v5853_v27  ;;  %1122 = vmatprep.subr.mxu1 %v5856_v43  ;;  %9536 = vst [vmem:[#allocation50_spill] sm:$0xff] %v5885_v7  ;;  %9537 = vst [vmem:[#allocation51_spill] sm:$0xff] %v5888_v51  ;;  %v5893_v43 = vld [vmem:[%s5422_s2 + $0x260] sm:$0xff]  ;;  %v5896_v27 = vld [vmem:[%s5422_s2 + $0x270] sm:$0xff] }
  0x62   : > { %1052 = vmatpush1.msra.mxu0 %v5861_v19  ;;  %1123 = vmatpush1.msra.mxu1 %v5864_v63  ;;  %9538 = vst [vmem:[#allocation52_spill] sm:$0xff] %v5893_v43  ;;  %9539 = vst [vmem:[#allocation53_spill] sm:$0xff] %v5896_v27  ;;  %v5901_v63 = vld [vmem:[%s5422_s2 + $0x228] sm:$0xff]  ;;  %v5904_v19 = vld [vmem:[%s5422_s2 + $0x238] sm:$0xff] }
  0x63   : > { %1053 = vmatprep.subr.mxu0 %v5869_v11  ;;  %1124 = vmatprep.subr.mxu1 %v5872_v59  ;;  %9540 = vst [vmem:[#allocation54_spill] sm:$0xff] %v5901_v63  ;;  %9541 = vst [vmem:[#allocation55_spill] sm:$0xff] %v5904_v19  ;;  %v5909_v59 = vld [vmem:[%s5422_s2 + $0x220] sm:$0xff]  ;;  %v5912_v11 = vld [vmem:[%s5422_s2 + $0x230] sm:$0xff] }
  0x64   : > { %1054 = vmatpush1.msra.mxu0 %v5877_v35  ;;  %1125 = vmatpush1.msra.mxu1 %v5880_v55  ;;  %9542 = vst [vmem:[#allocation56_spill] sm:$0xff] %v5909_v59  ;;  %9543 = vst [vmem:[#allocation57_spill] sm:$0xff] %v5912_v11  ;;  %v5917_v55 = vld [vmem:[%s5422_s2 + $0x1e8] sm:$0xff]  ;;  %v5920_v35 = vld [vmem:[%s5422_s2 + $0x1f8] sm:$0xff] }
  0x65   : > { %1055 = vmatprep.subr.mxu0 %v5885_v7  ;;  %1126 = vmatprep.subr.mxu1 %v5888_v51  ;;  %9544 = vst [vmem:[#allocation58_spill] sm:$0xff] %v5917_v55  ;;  %9545 = vst [vmem:[#allocation59_spill] sm:$0xff] %v5920_v35  ;;  %v5925_v51 = vld [vmem:[%s5422_s2 + $0x1e0] sm:$0xff]  ;;  %v5928_v7 = vld [vmem:[%s5422_s2 + $0x1f0] sm:$0xff] }
  0x66   : > { %1056 = vmatpush1.msra.mxu0 %v5893_v43  ;;  %1127 = vmatpush1.msra.mxu1 %v5896_v27  ;;  %9546 = vst [vmem:[#allocation60_spill] sm:$0xff] %v5925_v51  ;;  %9547 = vst [vmem:[#allocation61_spill] sm:$0xff] %v5928_v7  ;;  %v5933_v27 = vld [vmem:[%s5422_s2 + $0x1a8] sm:$0xff]  ;;  %v5936_v43 = vld [vmem:[%s5422_s2 + $0x1b8] sm:$0xff] }
  0x67   : > { %1057 = vmatprep.subr.mxu0 %v5901_v63  ;;  %1128 = vmatprep.subr.mxu1 %v5904_v19  ;;  %9548 = vst [vmem:[#allocation62_spill] sm:$0xff] %v5933_v27  ;;  %9549 = vst [vmem:[#allocation63_spill] sm:$0xff] %v5936_v43  ;;  %v5941_v19 = vld [vmem:[%s5422_s2 + $0x1a0] sm:$0xff]  ;;  %v5944_v63 = vld [vmem:[%s5422_s2 + $0x1b0] sm:$0xff] }
  0x68   : > { %1058 = vmatpush1.msra.mxu0 %v5909_v59  ;;  %1129 = vmatpush1.msra.mxu1 %v5912_v11  ;;  %9550 = vst [vmem:[#allocation64_spill] sm:$0xff] %v5941_v19  ;;  %9551 = vst [vmem:[#allocation65_spill] sm:$0xff] %v5944_v63  ;;  %v5949_v11 = vld [vmem:[%s5422_s2 + $0x168] sm:$0xff]  ;;  %v5952_v59 = vld [vmem:[%s5422_s2 + $0x178] sm:$0xff] }
  0x69   : > { %1059 = vmatprep.subr.mxu0 %v5917_v55  ;;  %1130 = vmatprep.subr.mxu1 %v5920_v35  ;;  %9552 = vst [vmem:[#allocation66_spill] sm:$0xff] %v5949_v11  ;;  %9553 = vst [vmem:[#allocation67_spill] sm:$0xff] %v5952_v59  ;;  %v5957_v35 = vld [vmem:[%s5422_s2 + $0x160] sm:$0xff]  ;;  %v5960_v55 = vld [vmem:[%s5422_s2 + $0x170] sm:$0xff] }
  0x6a   : > { %1060 = vmatpush1.msra.mxu0 %v5925_v51  ;;  %1131 = vmatpush1.msra.mxu1 %v5928_v7  ;;  %9554 = vst [vmem:[#allocation68_spill] sm:$0xff] %v5957_v35  ;;  %9555 = vst [vmem:[#allocation69_spill] sm:$0xff] %v5960_v55  ;;  %v5965_v7 = vld [vmem:[%s5422_s2 + $0x128] sm:$0xff]  ;;  %v5968_v51 = vld [vmem:[%s5422_s2 + $0x138] sm:$0xff] }
  0x6b   : > { %1061 = vmatprep.subr.mxu0 %v5933_v27  ;;  %1132 = vmatprep.subr.mxu1 %v5936_v43  ;;  %9556 = vst [vmem:[#allocation70_spill] sm:$0xff] %v5965_v7  ;;  %9557 = vst [vmem:[#allocation71_spill] sm:$0xff] %v5968_v51  ;;  %v5973_v43 = vld [vmem:[%s5422_s2 + $0x120] sm:$0xff]  ;;  %v5976_v27 = vld [vmem:[%s5422_s2 + $0x130] sm:$0xff] }
  0x6c   : > { %1062 = vmatpush1.msra.mxu0 %v5941_v19  ;;  %1133 = vmatpush1.msra.mxu1 %v5944_v63  ;;  %9558 = vst [vmem:[#allocation72_spill] sm:$0xff] %v5973_v43  ;;  %9559 = vst [vmem:[#allocation73_spill] sm:$0xff] %v5976_v27  ;;  %v5981_v63 = vld [vmem:[%s5422_s2 + $0xe8] sm:$0xff]  ;;  %v5984_v19 = vld [vmem:[%s5422_s2 + $0xf8] sm:$0xff] }
  0x6d   : > { %1063 = vmatprep.subr.mxu0 %v5949_v11  ;;  %1134 = vmatprep.subr.mxu1 %v5952_v59  ;;  %9560 = vst [vmem:[#allocation74_spill] sm:$0xff] %v5981_v63  ;;  %9561 = vst [vmem:[#allocation75_spill] sm:$0xff] %v5984_v19  ;;  %v5989_v59 = vld [vmem:[%s5422_s2 + $0xe0] sm:$0xff]  ;;  %v5992_v11 = vld [vmem:[%s5422_s2 + $0xf0] sm:$0xff] }
  0x6e   : > { %1064 = vmatpush1.msra.mxu0 %v5957_v35  ;;  %1135 = vmatpush1.msra.mxu1 %v5960_v55  ;;  %9562 = vst [vmem:[#allocation76_spill] sm:$0xff] %v5989_v59  ;;  %9563 = vst [vmem:[#allocation77_spill] sm:$0xff] %v5992_v11  ;;  %v5997_v55 = vld [vmem:[%s5422_s2 + $0xa8] sm:$0xff]  ;;  %v6000_v35 = vld [vmem:[%s5422_s2 + $0xb8] sm:$0xff] }
  0x6f   : > { %1065 = vmatprep.subr.mxu0 %v5965_v7  ;;  %1136 = vmatprep.subr.mxu1 %v5968_v51  ;;  %9564 = vst [vmem:[#allocation78_spill] sm:$0xff] %v5997_v55  ;;  %9565 = vst [vmem:[#allocation79_spill] sm:$0xff] %v6000_v35  ;;  %v6005_v51 = vld [vmem:[%s5422_s2 + $0xa0] sm:$0xff]  ;;  %v6008_v7 = vld [vmem:[%s5422_s2 + $0xb0] sm:$0xff] }
  0x70   : > { %1066 = vmatpush1.msra.mxu0 %v5973_v43  ;;  %1137 = vmatpush1.msra.mxu1 %v5976_v27  ;;  %9566 = vst [vmem:[#allocation80_spill] sm:$0xff] %v6005_v51  ;;  %9567 = vst [vmem:[#allocation81_spill] sm:$0xff] %v6008_v7  ;;  %v6013_v27 = vld [vmem:[%s5422_s2 + $0x68] sm:$0xff]  ;;  %v6016_v43 = vld [vmem:[%s5422_s2 + $0x78] sm:$0xff] }
  0x71   : > { %1067 = vmatprep.subr.mxu0 %v5981_v63  ;;  %1138 = vmatprep.subr.mxu1 %v5984_v19  ;;  %9568 = vst [vmem:[#allocation82_spill] sm:$0xff] %v6013_v27  ;;  %9569 = vst [vmem:[#allocation83_spill] sm:$0xff] %v6016_v43  ;;  %v6021_v19 = vld [vmem:[%s5422_s2 + $0x60] sm:$0xff]  ;;  %v6024_v63 = vld [vmem:[%s5422_s2 + $0x70] sm:$0xff] }
  0x72   : > { %1068 = vmatpush1.msra.mxu0 %v5989_v59  ;;  %1139 = vmatpush1.msra.mxu1 %v5992_v11  ;;  %9570 = vst [vmem:[#allocation84_spill] sm:$0xff] %v6021_v19  ;;  %9571 = vst [vmem:[#allocation85_spill] sm:$0xff] %v6024_v63  ;;  %v6029_v11 = vld [vmem:[%s5422_s2 + $0x28] sm:$0xff]  ;;  %v6032_v59 = vld [vmem:[%s5422_s2 + $0x38] sm:$0xff] }
  0x73   : > { %1069 = vmatprep.subr.mxu0 %v5997_v55  ;;  %1140 = vmatprep.subr.mxu1 %v6000_v35  ;;  %9572 = vst [vmem:[#allocation86_spill] sm:$0xff] %v6029_v11  ;;  %9573 = vst [vmem:[#allocation87_spill] sm:$0xff] %v6032_v59  ;;  %v6037_v35 = vld [vmem:[%s5422_s2 + $0x20] sm:$0xff]  ;;  %v6040_v55 = vld [vmem:[%s5422_s2 + $0x30] sm:$0xff] }
  0x74   : > { %1070 = vmatpush1.msra.mxu0 %v6005_v51  ;;  %1141 = vmatpush1.msra.mxu1 %v6008_v7  ;;  %9574 = vst [vmem:[#allocation88_spill] sm:$0xff] %v6037_v35  ;;  %9575 = vst [vmem:[#allocation89_spill] sm:$0xff] %v6040_v55  ;;  %v6045_v7 = vld [vmem:[%s5422_s2 + $0x7e8] sm:$0xff]  ;;  %v6048_v51 = vld [vmem:[%s5422_s2 + $0x7f8] sm:$0xff] }
  0x75   : > { %1071 = vmatprep.subr.mxu0 %v6013_v27  ;;  %1142 = vmatprep.subr.mxu1 %v6016_v43  ;;  %9576 = vst [vmem:[#allocation90_spill] sm:$0xff] %v6045_v7  ;;  %9577 = vst [vmem:[#allocation91_spill] sm:$0xff] %v6048_v51  ;;  %v6053_v43 = vld [vmem:[%s5422_s2 + $0x7e0] sm:$0xff]  ;;  %v6056_v27 = vld [vmem:[%s5422_s2 + $0x7f0] sm:$0xff] }
  0x76   : > { %1072 = vmatpush1.msra.mxu0 %v6021_v19  ;;  %1143 = vmatpush1.msra.mxu1 %v6024_v63  ;;  %9578 = vst [vmem:[#allocation92_spill] sm:$0xff] %v6053_v43  ;;  %9579 = vst [vmem:[#allocation93_spill] sm:$0xff] %v6056_v27  ;;  %v6061_v63 = vld [vmem:[%s5422_s2 + $0x7a8] sm:$0xff]  ;;  %v6064_v19 = vld [vmem:[%s5422_s2 + $0x7b8] sm:$0xff] }
  0x77   : > { %1073 = vmatprep.subr.mxu0 %v6029_v11  ;;  %1144 = vmatprep.subr.mxu1 %v6032_v59  ;;  %9580 = vst [vmem:[#allocation94_spill] sm:$0xff] %v6061_v63  ;;  %9581 = vst [vmem:[#allocation95_spill] sm:$0xff] %v6064_v19  ;;  %v6069_v59 = vld [vmem:[%s5422_s2 + $0x7a0] sm:$0xff]  ;;  %v6072_v11 = vld [vmem:[%s5422_s2 + $0x7b0] sm:$0xff] }
  0x78   : > { %1074 = vmatpush1.msra.mxu0 %v6037_v35  ;;  %1145 = vmatpush1.msra.mxu1 %v6040_v55  ;;  %9582 = vst [vmem:[#allocation96_spill] sm:$0xff] %v6069_v59  ;;  %9583 = vst [vmem:[#allocation97_spill] sm:$0xff] %v6072_v11  ;;  %v6077_v55 = vld [vmem:[%s5422_s2 + $0x768] sm:$0xff]  ;;  %v6080_v35 = vld [vmem:[%s5422_s2 + $0x778] sm:$0xff] }
  0x79   : > { %1075 = vmatprep.subr.mxu0 %v6045_v7  ;;  %1146 = vmatprep.subr.mxu1 %v6048_v51  ;;  %9584 = vst [vmem:[#allocation98_spill] sm:$0xff] %v6077_v55  ;;  %9585 = vst [vmem:[#allocation99_spill] sm:$0xff] %v6080_v35  ;;  %v6085_v51 = vld [vmem:[%s5422_s2 + $0x760] sm:$0xff]  ;;  %v6088_v7 = vld [vmem:[%s5422_s2 + $0x770] sm:$0xff] }
  0x7a   : > { %1076 = vmatpush2.msra.mxu0 %v6053_v43  ;;  %1147 = vmatpush2.msra.mxu1 %v6056_v27  ;;  %9586 = vst [vmem:[#allocation100_spill] sm:$0xff] %v6085_v51  ;;  %9587 = vst [vmem:[#allocation101_spill] sm:$0xff] %v6088_v7  ;;  %v6093_v27 = vld [vmem:[%s5422_s2 + $0x728] sm:$0xff]  ;;  %v6096_v43 = vld [vmem:[%s5422_s2 + $0x738] sm:$0xff] }
  0x7b   : > { %1077 = vmatprep.subr.mxu0 %v6061_v63  ;;  %1148 = vmatprep.subr.mxu1 %v6064_v19  ;;  %9588 = vst [vmem:[#allocation102_spill] sm:$0xff] %v6093_v27  ;;  %9589 = vst [vmem:[#allocation103_spill] sm:$0xff] %v6096_v43  ;;  %v6101_v19 = vld [vmem:[%s5422_s2 + $0x720] sm:$0xff]  ;;  %v6104_v63 = vld [vmem:[%s5422_s2 + $0x730] sm:$0xff] }
  0x7c   : > { %1078 = vmatpush2.msra.mxu0 %v6069_v59  ;;  %1149 = vmatpush2.msra.mxu1 %v6072_v11  ;;  %9590 = vst [vmem:[#allocation104_spill] sm:$0xff] %v6101_v19  ;;  %9591 = vst [vmem:[#allocation105_spill] sm:$0xff] %v6104_v63  ;;  %v6109_v11 = vld [vmem:[%s5422_s2 + $0x6e8] sm:$0xff]  ;;  %v6112_v59 = vld [vmem:[%s5422_s2 + $0x6f8] sm:$0xff] }
  0x7d   : > { %1079 = vmatprep.subr.mxu0 %v6077_v55  ;;  %1150 = vmatprep.subr.mxu1 %v6080_v35  ;;  %9592 = vst [vmem:[#allocation106_spill] sm:$0xff] %v6109_v11  ;;  %9593 = vst [vmem:[#allocation107_spill] sm:$0xff] %v6112_v59  ;;  %v6117_v35 = vld [vmem:[%s5422_s2 + $0x6e0] sm:$0xff]  ;;  %v6120_v55 = vld [vmem:[%s5422_s2 + $0x6f0] sm:$0xff] }
  0x7e   : > { %1080 = vmatpush2.msra.mxu0 %v6085_v51  ;;  %1151 = vmatpush2.msra.mxu1 %v6088_v7  ;;  %9594 = vst [vmem:[#allocation108_spill] sm:$0xff] %v6117_v35  ;;  %9595 = vst [vmem:[#allocation109_spill] sm:$0xff] %v6120_v55  ;;  %v6125_v7 = vld [vmem:[%s5422_s2 + $0x6a8] sm:$0xff]  ;;  %v6128_v51 = vld [vmem:[%s5422_s2 + $0x6b8] sm:$0xff] }
  0x7f   : > { %1081 = vmatprep.subr.mxu0 %v6093_v27  ;;  %1152 = vmatprep.subr.mxu1 %v6096_v43  ;;  %9596 = vst [vmem:[#allocation110_spill] sm:$0xff] %v6125_v7  ;;  %9597 = vst [vmem:[#allocation111_spill] sm:$0xff] %v6128_v51  ;;  %v6133_v43 = vld [vmem:[%s5422_s2 + $0x6a0] sm:$0xff]  ;;  %v6136_v27 = vld [vmem:[%s5422_s2 + $0x6b0] sm:$0xff] }
  0x80   : > { %1082 = vmatpush2.msra.mxu0 %v6101_v19  ;;  %1153 = vmatpush2.msra.mxu1 %v6104_v63  ;;  %9598 = vst [vmem:[#allocation112_spill] sm:$0xff] %v6133_v43  ;;  %9599 = vst [vmem:[#allocation113_spill] sm:$0xff] %v6136_v27  ;;  %v6141_v63 = vld [vmem:[%s5422_s2 + $0x668] sm:$0xff]  ;;  %v6144_v19 = vld [vmem:[%s5422_s2 + $0x678] sm:$0xff] }
  0x81   : > { %1083 = vmatprep.subr.mxu0 %v6109_v11  ;;  %1154 = vmatprep.subr.mxu1 %v6112_v59  ;;  %9600 = vst [vmem:[#allocation114_spill] sm:$0xff] %v6141_v63  ;;  %9601 = vst [vmem:[#allocation115_spill] sm:$0xff] %v6144_v19  ;;  %v6149_v59 = vld [vmem:[%s5422_s2 + $0x660] sm:$0xff]  ;;  %v6152_v11 = vld [vmem:[%s5422_s2 + $0x670] sm:$0xff] }
  0x82   : > { %1084 = vmatpush2.msra.mxu0 %v6117_v35  ;;  %1155 = vmatpush2.msra.mxu1 %v6120_v55  ;;  %9602 = vst [vmem:[#allocation116_spill] sm:$0xff] %v6149_v59  ;;  %9603 = vst [vmem:[#allocation117_spill] sm:$0xff] %v6152_v11  ;;  %v6157_v55 = vld [vmem:[%s5422_s2 + $0x628] sm:$0xff]  ;;  %v6160_v35 = vld [vmem:[%s5422_s2 + $0x638] sm:$0xff] }
  0x83   : > { %1085 = vmatprep.subr.mxu0 %v6125_v7  ;;  %1156 = vmatprep.subr.mxu1 %v6128_v51  ;;  %9604 = vst [vmem:[#allocation118_spill] sm:$0xff] %v6157_v55  ;;  %9605 = vst [vmem:[#allocation119_spill] sm:$0xff] %v6160_v35  ;;  %v6165_v51 = vld [vmem:[%s5422_s2 + $0x620] sm:$0xff]  ;;  %v6168_v7 = vld [vmem:[%s5422_s2 + $0x630] sm:$0xff] }
  0x84   : > { %1086 = vmatpush2.msra.mxu0 %v6133_v43  ;;  %1157 = vmatpush2.msra.mxu1 %v6136_v27  ;;  %9606 = vst [vmem:[#allocation120_spill] sm:$0xff] %v6165_v51  ;;  %9607 = vst [vmem:[#allocation121_spill] sm:$0xff] %v6168_v7  ;;  %v6173_v27 = vld [vmem:[%s5422_s2 + $0x5e8] sm:$0xff]  ;;  %v6176_v43 = vld [vmem:[%s5422_s2 + $0x5f8] sm:$0xff] }
  0x85   : > { %1087 = vmatprep.subr.mxu0 %v6141_v63  ;;  %1158 = vmatprep.subr.mxu1 %v6144_v19  ;;  %9608 = vst [vmem:[#allocation122_spill] sm:$0xff] %v6173_v27  ;;  %9609 = vst [vmem:[#allocation123_spill] sm:$0xff] %v6176_v43  ;;  %v6181_v19 = vld [vmem:[%s5422_s2 + $0x5e0] sm:$0xff]  ;;  %v6184_v63 = vld [vmem:[%s5422_s2 + $0x5f0] sm:$0xff] }
  0x86   : > { %1088 = vmatpush2.msra.mxu0 %v6149_v59  ;;  %1159 = vmatpush2.msra.mxu1 %v6152_v11  ;;  %9610 = vst [vmem:[#allocation124_spill] sm:$0xff] %v6181_v19  ;;  %9611 = vst [vmem:[#allocation125_spill] sm:$0xff] %v6184_v63  ;;  %v6189_v11 = vld [vmem:[%s5422_s2 + $0x5a8] sm:$0xff]  ;;  %v6192_v59 = vld [vmem:[%s5422_s2 + $0x5b8] sm:$0xff] }
  0x87   : > { %1089 = vmatprep.subr.mxu0 %v6157_v55  ;;  %1160 = vmatprep.subr.mxu1 %v6160_v35  ;;  %9612 = vst [vmem:[#allocation126_spill] sm:$0xff] %v6189_v11  ;;  %9613 = vst [vmem:[#allocation127_spill] sm:$0xff] %v6192_v59  ;;  %v6197_v35 = vld [vmem:[%s5422_s2 + $0x5a0] sm:$0xff]  ;;  %v6200_v55 = vld [vmem:[%s5422_s2 + $0x5b0] sm:$0xff] }
  0x88   : > { %1090 = vmatpush2.msra.mxu0 %v6165_v51  ;;  %1161 = vmatpush2.msra.mxu1 %v6168_v7  ;;  %9614 = vst [vmem:[#allocation128_spill] sm:$0xff] %v6197_v35  ;;  %9615 = vst [vmem:[#allocation129_spill] sm:$0xff] %v6200_v55  ;;  %v6205_v7 = vld [vmem:[%s5422_s2 + $0x568] sm:$0xff]  ;;  %v6208_v51 = vld [vmem:[%s5422_s2 + $0x578] sm:$0xff] }
  0x89   : > { %1091 = vmatprep.subr.mxu0 %v6173_v27  ;;  %1162 = vmatprep.subr.mxu1 %v6176_v43  ;;  %9616 = vst [vmem:[#allocation130_spill] sm:$0xff] %v6205_v7  ;;  %9617 = vst [vmem:[#allocation131_spill] sm:$0xff] %v6208_v51  ;;  %v6213_v43 = vld [vmem:[%s5422_s2 + $0x560] sm:$0xff]  ;;  %v6216_v27 = vld [vmem:[%s5422_s2 + $0x570] sm:$0xff] }
  0x8a   : > { %1092 = vmatpush2.msra.mxu0 %v6181_v19  ;;  %1163 = vmatpush2.msra.mxu1 %v6184_v63  ;;  %9618 = vst [vmem:[#allocation132_spill] sm:$0xff] %v6213_v43  ;;  %9619 = vst [vmem:[#allocation133_spill] sm:$0xff] %v6216_v27  ;;  %v6221_v63 = vld [vmem:[%s5422_s2 + $0x528] sm:$0xff]  ;;  %v6224_v19 = vld [vmem:[%s5422_s2 + $0x538] sm:$0xff] }
  0x8b   : > { %1093 = vmatprep.subr.mxu0 %v6189_v11  ;;  %1164 = vmatprep.subr.mxu1 %v6192_v59  ;;  %9620 = vst [vmem:[#allocation134_spill] sm:$0xff] %v6221_v63  ;;  %9621 = vst [vmem:[#allocation135_spill] sm:$0xff] %v6224_v19  ;;  %v6229_v59 = vld [vmem:[%s5422_s2 + $0x520] sm:$0xff]  ;;  %v6232_v11 = vld [vmem:[%s5422_s2 + $0x530] sm:$0xff] }
  0x8c   : > { %1094 = vmatpush2.msra.mxu0 %v6197_v35  ;;  %1165 = vmatpush2.msra.mxu1 %v6200_v55  ;;  %9622 = vst [vmem:[#allocation136_spill] sm:$0xff] %v6229_v59  ;;  %9623 = vst [vmem:[#allocation137_spill] sm:$0xff] %v6232_v11  ;;  %v6237_v55 = vld [vmem:[%s5422_s2 + $0x4e8] sm:$0xff]  ;;  %v6240_v35 = vld [vmem:[%s5422_s2 + $0x4f8] sm:$0xff] }
  0x8d   : > { %1095 = vmatprep.subr.mxu0 %v6205_v7  ;;  %1166 = vmatprep.subr.mxu1 %v6208_v51  ;;  %9624 = vst [vmem:[#allocation138_spill] sm:$0xff] %v6237_v55  ;;  %9625 = vst [vmem:[#allocation139_spill] sm:$0xff] %v6240_v35  ;;  %v6245_v51 = vld [vmem:[%s5422_s2 + $0x4e0] sm:$0xff]  ;;  %v6248_v7 = vld [vmem:[%s5422_s2 + $0x4f0] sm:$0xff] }
  0x8e   : > { %1096 = vmatpush2.msra.mxu0 %v6213_v43  ;;  %1167 = vmatpush2.msra.mxu1 %v6216_v27  ;;  %9626 = vst [vmem:[#allocation140_spill] sm:$0xff] %v6245_v51  ;;  %9627 = vst [vmem:[#allocation141_spill] sm:$0xff] %v6248_v7  ;;  %v6253_v27 = vld [vmem:[%s5422_s2 + $0x4a8] sm:$0xff]  ;;  %v6256_v43 = vld [vmem:[%s5422_s2 + $0x4b8] sm:$0xff] }
  0x8f   : > { %1097 = vmatprep.subr.mxu0 %v6221_v63  ;;  %1168 = vmatprep.subr.mxu1 %v6224_v19  ;;  %9628 = vst [vmem:[#allocation142_spill] sm:$0xff] %v6253_v27  ;;  %v6261_v19 = vld [vmem:[%s5422_s2 + $0x4a0] sm:$0xff]  ;;  %v6264_v63 = vld [vmem:[%s5422_s2 + $0x4b0] sm:$0xff] }
  0x90   : > { %1098 = vmatpush2.msra.mxu0 %v6229_v59  ;;  %1169 = vmatpush2.msra.mxu1 %v6232_v11  ;;  %9629 = vst [vmem:[#allocation143_spill] sm:$0xff] %v6261_v19  ;;  %v6269_v11 = vld [vmem:[%s5422_s2 + $0x468] sm:$0xff]  ;;  %v6272_v59 = vld [vmem:[%s5422_s2 + $0x478] sm:$0xff] }
  0x91   : > { %1099 = vmatprep.subr.mxu0 %v6237_v55  ;;  %1170 = vmatprep.subr.mxu1 %v6240_v35  ;;  %v6277_v55 = vld [vmem:[%s5422_s2 + $0x460] sm:$0xff]  ;;  %v6280_v35 = vld [vmem:[%s5422_s2 + $0x470] sm:$0xff] }
  0x92   : > { %1100 = vmatpush2.msra.mxu0 %v6245_v51  ;;  %1171 = vmatpush2.msra.mxu1 %v6248_v7  ;;  %9630 = vst [vmem:[#allocation144_spill] sm:$0xff] %v6277_v55  ;;  %9631 = vst [vmem:[#allocation145_spill] sm:$0xff] %v6280_v35  ;;  %v6285_v51 = vld [vmem:[%s5422_s2 + $0x428] sm:$0xff]  ;;  %v6288_v7 = vld [vmem:[%s5422_s2 + $0x438] sm:$0xff] }
  0x93   : > { %1101 = vmatprep.subr.mxu0 %v6253_v27  ;;  %1172 = vmatprep.subr.mxu1 %v6256_v43  ;;  %9632 = vst [vmem:[#allocation146_spill] sm:$0xff] %v6285_v51  ;;  %9633 = vst [vmem:[#allocation147_spill] sm:$0xff] %v6288_v7  ;;  %v6293_v27 = vld [vmem:[%s5422_s2 + $0x420] sm:$0xff] }
  0x94   : > { %1102 = vmatpush2.msra.mxu0 %v6261_v19  ;;  %1173 = vmatpush2.msra.mxu1 %v6264_v63  ;;  %9634 = vst [vmem:[#allocation148_spill] sm:$0xff] %v6293_v27  ;;  %v6298_v19 = vld [vmem:[%s5422_s2 + $0x430] sm:$0xff] }
  0x95   : > { %1103 = vmatprep.subr.mxu0 %v6269_v11  ;;  %1174 = vmatprep.subr.mxu1 %v6272_v59  ;;  %9635 = vst [vmem:[#allocation149_spill] sm:$0xff] %v6298_v19 }
  0x96   : > { %1104 = vmatpush2.msra.mxu0 %v6277_v55  ;;  %1175 = vmatpush2.msra.mxu1 %v6280_v35  ;;  %v6309_v35 = vld [vmem:[%s5422_s2 + $0x3c8] sm:$0xff]  ;;  %v6329_v55 = vld [vmem:[%s5422_s2 + $0x340] sm:$0xff] }
  0x97   : > { %1105 = vmatprep.subr.mxu0 %v6285_v51  ;;  %1176 = vmatprep.subr.mxu1 %v6288_v7  ;;  %v6313_v51 = vld [vmem:[%s5422_s2 + $0x3c0] sm:$0xff] }
  0x98   : > { %1106 = vmatpush2.msra.mxu0 %v6293_v27  ;;  %1107 = vmatprep.mubr.f32.mxu0 %v5780_v3  ;;  %v6317_v27 = vld [vmem:[%s5422_s2 + $0x388] sm:$0xff]  ;;  %v6321_v7 = vld [vmem:[%s5422_s2 + $0x380] sm:$0xff] }
  0x99   : > { %1177 = vmatpush2.msra.mxu1 %v6298_v19  ;;  %1178 = vmatprep.mubr.f32.mxu1 %v5780_v3  ;;  %v6325_v19 = vld [vmem:[%s5422_s2 + $0x348] sm:$0xff] }
  0x9a   : > { %1108 = vmatmul.mubr.f32.vlgmr.msra.gmra.mxu0 %v5784_v47  ;;  %1179 = vmatmul.mubr.f32.vlgmr.msra.gmra.mxu1 %v5784_v47 }
  0x9b   : > { %1311 = vmatprep.subr.mxu1 %v6309_v35 }
  0x9c   : > { %1312 = vmatpush1.msra.mxu1 %v6313_v51 }
  0x9d   : > { %1313 = vmatprep.subr.mxu1 %v6317_v27 }
  0x9e   : > { %1314 = vmatpush1.msra.mxu1 %v6321_v7 }
  0x9f   : > { %1315 = vmatprep.subr.mxu1 %v6325_v19 }
  0xa0   : > { %1316 = vmatpush1.msra.mxu1 %v6329_v55 }
  0xa1   : > { %1317 = vmatprep.subr.mxu1 %v5437_v12  ;;  %v9636_v12 = vld [vmem:[#allocation14_spill] sm:$0xff] }
  0xa2   : > { %1318 = vmatpush1.msra.mxu1 %v5441_v14  ;;  %v9637_v14 = vld [vmem:[#allocation16_spill] sm:$0xff] }
  0xa3   : > { %1319 = vmatprep.subr.mxu1 %v5445_v16  ;;  %v9638_v16 = vld [vmem:[#allocation18_spill] sm:$0xff] }
  0xa4   : > { %1320 = vmatpush1.msra.mxu1 %v5450_v18  ;;  %v9639_v18 = vld [vmem:[#allocation20_spill] sm:$0xff] }
  0xa5   : > { %1321 = vmatprep.subr.mxu1 %v5455_v20  ;;  %v9640_v20 = vld [vmem:[#allocation22_spill] sm:$0xff] }
  0xa6   : > { %1322 = vmatpush1.msra.mxu1 %v5460_v22  ;;  %v9641_v22 = vld [vmem:[#allocation24_spill] sm:$0xff] }
  0xa7   : > { %1323 = vmatprep.subr.mxu1 %v5465_v24  ;;  %v9642_v24 = vld [vmem:[#allocation26_spill] sm:$0xff] }
  0xa8   : > { %1324 = vmatpush1.msra.mxu1 %v5470_v26  ;;  %v9248_v26 = vmov 0.0  }
  0xa9   : > { %1325 = vmatprep.subr.mxu1 %v5475_v28  ;;  %1260 = vmatprep.mubr.f32.mxu0 %v9248_v26  ;;  %v1277_v28 = vld [vmem:[%s9086_s7] sm:$0xff] }
  0xaa   : > { %1326 = vmatpush1.msra.mxu1 %v5480_v30  ;;  %v5306_v30 = vmov 0  }
  0xab   : > { %1327 = vmatprep.subr.mxu1 %v5485_v32  ;;  %4958 = vset.pattern.permute.xlu0 %v5306_v30  ;;  %v1278_v32 = vld [vmem:[%s9086_s7 + $0x8] sm:$0xff] }
  0xac   : > { %1328 = vmatpush1.msra.mxu1 %v5490_v34  ;;  %4959 = vset.pattern.permute.xlu1 %v5306_v30  ;;  %v1293_v34 = vld [vmem:[%s9087_s8] sm:$0xff]  ;;  %v6546_v30 = vld [vmem:[%s5422_s2 + $0x90] sm:$0xff] }
  0xad   : > { %1329 = vmatprep.subr.mxu1 %v5495_v36  ;;  %1281 = vperm.xlu0 %4958, %v1277_v28   ;;  %v1294_v36 = vld [vmem:[%s9087_s8 + $0x8] sm:$0xff]  ;;  %v6542_v28 = vld [vmem:[%s5422_s2 + $0x98] sm:$0xff] }
  0xae   : > { %1330 = vmatpush1.msra.mxu1 %v5500_v38  ;;  %1286 = vperm.xlu1 %4959, %v1278_v32   ;;  %v4681_v38 = vld [vmem:[%s9086_s7 + $0x10] sm:$0xff]  ;;  %v6550_v32 = vld [vmem:[%s5422_s2 + $0x58] sm:$0xff] }
  0xaf   : > { %1331 = vmatprep.subr.mxu1 %v5505_v40  ;;  %v4683_v40 = vld [vmem:[%s9087_s8 + $0x10] sm:$0xff] }
  0xb0   : > { %1332 = vmatpush1.msra.mxu1 %v5510_v42  ;;  %v4682_v42 = vld [vmem:[%s9086_s7 + $0x18] sm:$0xff] }
  0xb1   : > { %1333 = vmatprep.subr.mxu1 %v5515_v44  ;;  %1297 = vperm.xlu0 %4958, %v1293_v34   ;;  %v4684_v44 = vld [vmem:[%s9087_s8 + $0x18] sm:$0xff]  ;;  %v6554_v34 = vld [vmem:[%s5422_s2 + $0x50] sm:$0xff] }
  0xb2   : > { %1334 = vmatpush1.msra.mxu1 %v5520_v46  ;;  %1302 = vperm.xlu1 %4959, %v1294_v36   ;;  %v4689_v46 = vld [vmem:[%s9086_s7 + $0x20] sm:$0xff]  ;;  %v6558_v36 = vld [vmem:[%s5422_s2 + $0x18] sm:$0xff] }
  0xb3   : > { %1335 = vmatprep.subr.mxu1 %v5525_v48  ;;  %v4691_v48 = vld [vmem:[%s9087_s8 + $0x20] sm:$0xff] }
  0xb4   : > { %1336 = vmatpush1.msra.mxu1 %v5530_v50  ;;  %v4690_v50 = vld [vmem:[%s9086_s7 + $0x28] sm:$0xff] }
  0xb5   : > { %1337 = vmatprep.subr.mxu1 %v5535_v52  ;;  %1720 = vperm.xlu0 %4958, %v4681_v38   ;;  %v4692_v52 = vld [vmem:[%s9087_s8 + $0x28] sm:$0xff]  ;;  %v6562_v38 = vld [vmem:[%s5422_s2 + $0x10] sm:$0xff] }
  0xb6   : > { %1338 = vmatpush1.msra.mxu1 %v5540_v54  ;;  %1737 = vperm.xlu1 %4959, %v4683_v40   ;;  %v6566_v40 = vld [vmem:[%s5422_s2 + $0x7d8] sm:$0xff] }
  0xb7   : > { %1339 = vmatprep.subr.mxu1 %v5545_v56 }
  0xb8   : > { %1340 = vmatpush1.msra.mxu1 %v5550_v58 }
  0xb9   : > { %1341 = vmatprep.subr.mxu1 %v5555_v60  ;;  %1725 = vperm.xlu0 %4958, %v4682_v42   ;;  %v6570_v42 = vld [vmem:[%s5422_s2 + $0x7d0] sm:$0xff] }
  0xba   : > { %1342 = vmatpush1.msra.mxu1 %v5560_v62  ;;  %1742 = vperm.xlu1 %4959, %v4684_v44   ;;  %v6574_v44 = vld [vmem:[%s5422_s2 + $0x798] sm:$0xff] }
  0xbb   : > { %1343 = vmatprep.subr.mxu1 %v5565_v0 }
  0xbc   : > { %1344 = vmatpush2.msra.mxu1 %v5570_v2 }
  0xbd   : > { %1345 = vmatprep.subr.mxu1 %v5575_v4  ;;  %2160 = vperm.xlu0 %4958, %v4689_v46   ;;  %v6578_v46 = vld [vmem:[%s5422_s2 + $0x790] sm:$0xff] }
  0xbe   : > { %1346 = vmatpush2.msra.mxu1 %v5580_v6  ;;  %2177 = vperm.xlu1 %4959, %v4691_v48   ;;  %9643 = vst [vmem:[#allocation14_spill] sm:$0xff] %v6578_v46  ;;  %v6582_v48 = vld [vmem:[%s5422_s2 + $0x758] sm:$0xff] }
  0xbf   : > { %1347 = vmatprep.subr.mxu1 %v5585_v8  ;;  %9644 = vst [vmem:[#allocation16_spill] sm:$0xff] %v6582_v48 }
  0xc0   : > { %1348 = vmatpush2.msra.mxu1 %v5590_v10 }
  0xc1   : > { %1349 = vmatprep.subr.mxu1 %v5595_v13  ;;  %2165 = vperm.xlu0 %4958, %v4690_v50   ;;  %v6586_v50 = vld [vmem:[%s5422_s2 + $0x750] sm:$0xff] }
  0xc2   : > { %1350 = vmatpush2.msra.mxu1 %v5600_v17  ;;  %2182 = vperm.xlu1 %4959, %v4692_v52   ;;  %v899_v17 = vld [vmem:[%s9084_s5] sm:$0xff]  ;;  %9645 = vst [vmem:[#allocation18_spill] sm:$0xff] %v6586_v50  ;;  %v6590_v52 = vld [vmem:[%s5422_s2 + $0x718] sm:$0xff] }
  0xc3   : > { %1351 = vmatprep.subr.mxu1 %v5605_v21  ;;  %v6434_v21 = vld [vmem:[%s5422_s2 + $0x3d8] sm:$0xff]  ;;  %9646 = vst [vmem:[#allocation20_spill] sm:$0xff] %v6590_v52 }
  0xc4   : > { %1352 = vmatpush2.msra.mxu1 %v5610_v25  ;;  %v900_v25 = vld [vmem:[%s9084_s5 + $0x8] sm:$0xff] }
  0xc5   : > { %1353 = vmatprep.subr.mxu1 %v5615_v29  ;;  %v6442_v29 = vld [vmem:[%s5422_s2 + $0x3d0] sm:$0xff] }
  0xc6   : > { %1354 = vmatpush2.msra.mxu1 %v5620_v33  ;;  %v6446_v33 = vld [vmem:[%s5422_s2 + $0x398] sm:$0xff] }
  0xc7   : > { %1355 = vmatprep.subr.mxu1 %v5625_v37  ;;  %v6450_v37 = vld [vmem:[%s5422_s2 + $0x390] sm:$0xff] }
  0xc8   : > { %1356 = vmatpush2.msra.mxu1 %v5630_v41  ;;  %v6454_v41 = vld [vmem:[%s5422_s2 + $0x358] sm:$0xff] }
  0xc9   : > { %1357 = vmatprep.subr.mxu1 %v5635_v45  ;;  %v6458_v45 = vld [vmem:[%s5422_s2 + $0x350] sm:$0xff] }
  0xca   : > { %1358 = vmatpush2.msra.mxu1 %v5642_v49  ;;  %v6466_v49 = vld [vmem:[%s5422_s2 + $0x310] sm:$0xff] }
  0xcb   : > { %1359 = vmatprep.subr.mxu1 %v5649_v53  ;;  %v6470_v53 = vld [vmem:[%s5422_s2 + $0x2d8] sm:$0xff] }
  0xcc   : > { %1360 = vmatpush2.msra.mxu1 %v5657_v57  ;;  %v6474_v57 = vld [vmem:[%s5422_s2 + $0x2d0] sm:$0xff] }
  0xcd   : > { %1361 = vmatprep.subr.mxu1 %v5665_v61  ;;  %v6478_v61 = vld [vmem:[%s5422_s2 + $0x298] sm:$0xff] }
  0xce   : > { %1362 = vmatpush2.msra.mxu1 %v5673_v1  ;;  %v6482_v1 = vld [vmem:[%s5422_s2 + $0x290] sm:$0xff] }
  0xcf   : > { %1363 = vmatprep.subr.mxu1 %v5681_v5  ;;  %v6490_v5 = vld [vmem:[%s5422_s2 + $0x250] sm:$0xff] }
  0xd0   : > { %1364 = vmatpush2.msra.mxu1 %v5689_v9  ;;  %v6494_v9 = vld [vmem:[%s5422_s2 + $0x218] sm:$0xff] }
  0xd1   : > { %1365 = vmatprep.subr.mxu1 %v5697_v15  ;;  %v6498_v15 = vld [vmem:[%s5422_s2 + $0x210] sm:$0xff] }
  0xd2   : > { %1366 = vmatpush2.msra.mxu1 %v5705_v23  ;;  %v6502_v23 = vld [vmem:[%s5422_s2 + $0x1d8] sm:$0xff] }
  0xd3   : > { %1367 = vmatprep.subr.mxu1 %v5713_v31  ;;  %v6506_v31 = vld [vmem:[%s5422_s2 + $0x1d0] sm:$0xff] }
  0xd4   : > { %1368 = vmatpush2.msra.mxu1 %v5721_v39  ;;  %v6510_v39 = vld [vmem:[%s5422_s2 + $0x198] sm:$0xff] }
  0xd5   : > { %1369 = vmatprep.subr.mxu1 %v9636_v12  ;;  %v6514_v12 = vld [vmem:[%s5422_s2 + $0x190] sm:$0xff] }
  0xd6   : > { %1370 = vmatpush2.msra.mxu1 %v9637_v14  ;;  %v6518_v14 = vld [vmem:[%s5422_s2 + $0x158] sm:$0xff] }
  0xd7   : > { %1371 = vmatprep.subr.mxu1 %v9638_v16  ;;  %v6522_v16 = vld [vmem:[%s5422_s2 + $0x150] sm:$0xff] }
  0xd8   : > { %1372 = vmatpush2.msra.mxu1 %v9639_v18  ;;  %v6526_v18 = vld [vmem:[%s5422_s2 + $0x118] sm:$0xff] }
  0xd9   : > { %1373 = vmatprep.subr.mxu1 %v9640_v20  ;;  %v6530_v20 = vld [vmem:[%s5422_s2 + $0x110] sm:$0xff] }
  0xda   : > { %1374 = vmatpush2.msra.mxu1 %v9641_v22  ;;  %v6534_v22 = vld [vmem:[%s5422_s2 + $0xd8] sm:$0xff] }
  0xdb   : > { %1465 = vmatprep.subr.mxu1 %v9642_v24  ;;  %v6538_v24 = vld [vmem:[%s5422_s2 + $0xd0] sm:$0xff] }
 0x118   : > { %v1038_v54 = vpop.f32.mrf.mxu1 }
 0x119   : > { %v967_v56 = vpop.f32.mrf.mxu0 }
 0x11a   : > { %v1040_v58 = vpop.f32.mrf.mxu1 }
 0x11b   : > { %v969_v60 = vpop.f32.mrf.mxu0 }
 0x15a   : > { %v1109_v62 = vpop.f32.mrf.mxu0  ;;  %v1180_v0 = vpop.f32.mrf.mxu1 }
 0x15b   : > { %v1187_v8 = vand.u32 2147483647, %v1180_v0  ;;  %v1185_v13 = vand.u32 2147483647, %v1109_v62  ;;  %v6610_v62 = vld [vmem:[%s5422_s2 + $0x690] sm:$0xff]  ;;  %v6614_v0 = vld [vmem:[%s5422_s2 + $0x658] sm:$0xff] }
 0x15c   : > { %v1111_v2 = vpop.f32.mrf.mxu0  ;;  %v1182_v4 = vpop.f32.mrf.mxu1  ;;  %9651 = vst [vmem:[#allocation151_spill] sm:$0xff] %v6610_v62  ;;  %9652 = vst [vmem:[#allocation152_spill] sm:$0xff] %v6614_v0 }
 0x15d   : > { %v1188_v6 = vand.u32 2147483647, %v1182_v4  ;;  %v1186_v10 = vand.u32 2147483647, %v1111_v2  ;;  %v6618_v2 = vld [vmem:[%s5422_s2 + $0x650] sm:$0xff]  ;;  %v9654_v4 = vld [vmem:[#allocation2_spill] sm:$0xff] }
 0x15e   : > { %9653 = vst [vmem:[#allocation153_spill] sm:$0xff] %v6618_v2 }
 0x15f   : > { %1218 = vmatprep.subr.mxu0 %v1188_v6  ;;  %v9655_v6 = vld [vmem:[#allocation3_spill] sm:$0xff] }
 0x160   : > { %1219 = vmatpush1.msra.mxu0 %v1187_v8  ;;  %v9656_v8 = vld [vmem:[#allocation4_spill] sm:$0xff] }
 0x161   : > { %1220 = vmatprep.subr.mxu0 %v1186_v10  ;;  %v9657_v10 = vld [vmem:[#allocation5_spill] sm:$0xff] }
 0x162   : > { %1221 = vmatpush1.msra.mxu0 %v1185_v13  ;;  %v9658_v13 = vld [vmem:[#allocation6_spill] sm:$0xff] }
 0x163   : > { %1222 = vmatprep.subr.mxu0 %v1040_v58  ;;  %v6602_v58 = vld [vmem:[%s5422_s2 + $0x6d0] sm:$0xff] }
 0x164   : > { %1223 = vmatpush1.msra.mxu0 %v1038_v54  ;;  %v6594_v54 = vld [vmem:[%s5422_s2 + $0x710] sm:$0xff]  ;;  %9649 = vst [vmem:[#allocation26_spill] sm:$0xff] %v6602_v58 }
 0x165   : > { %1224 = vmatprep.subr.mxu0 %v969_v60  ;;  %9647 = vst [vmem:[#allocation22_spill] sm:$0xff] %v6594_v54  ;;  %v6606_v60 = vld [vmem:[%s5422_s2 + $0x698] sm:$0xff] }
 0x166   : > { %1225 = vmatpush1.msra.mxu0 %v967_v56  ;;  %v6598_v56 = vld [vmem:[%s5422_s2 + $0x6d8] sm:$0xff]  ;;  %9650 = vst [vmem:[#allocation150_spill] sm:$0xff] %v6606_v60 }
 0x167   : > { %1226 = vmatprep.subr.mxu0 %v5780_v3  ;;  %v6486_v3 = vld [vmem:[%s5422_s2 + $0x258] sm:$0xff]  ;;  %9648 = vst [vmem:[#allocation24_spill] sm:$0xff] %v6598_v56 }
 0x168   : > { %1227 = vmatpush1.msra.mxu0 %v5784_v47  ;;  %v6462_v47 = vld [vmem:[%s5422_s2 + $0x318] sm:$0xff] }
 0x169   : > { %4677 = vmatmul.mubr.msk.f32.vlgmr.msra.gmra.mxu0 %vm1189_vm0, %v899_v17  ;;  %1388 = vmatprep.subr.mxu0 %v6434_v21  ;;  %v9659_v17 = vld [vmem:[#allocation7_spill] sm:$0xff] }
 0x16a   : > { %1266 = vmatprep.mubr.f32.mxu0 %v9248_v26  ;;  %1389 = vmatpush1.msra.mxu0 %v6442_v29  ;;  %v9661_v26 = vld [vmem:[#allocation9_spill] sm:$0xff] }
 0x16b   : > { %1390 = vmatprep.subr.mxu0 %v6446_v33 }
 0x16c   : > { %1391 = vmatpush1.msra.mxu0 %v6450_v37 }
 0x16d   : > { %4678 = vmatmul.mubr.msk.f32.gmra.mxu0 %vm1189_vm0, %v900_v25  ;;  %1392 = vmatprep.subr.mxu0 %v6454_v41  ;;  %v9660_v25 = vld [vmem:[#allocation8_spill] sm:$0xff] }
 0x16e   : > { %1393 = vmatpush1.msra.mxu0 %v6458_v45 }
 0x16f   : > { %1394 = vmatprep.subr.mxu0 %v6462_v47 }
 0x170   : > { %1395 = vmatpush1.msra.mxu0 %v6466_v49 }
 0x171   : > { %1396 = vmatprep.subr.mxu0 %v6470_v53 }
 0x172   : > { %1397 = vmatpush1.msra.mxu0 %v6474_v57 }
 0x173   : > { %1398 = vmatprep.subr.mxu0 %v6478_v61 }
 0x174   : > { %1399 = vmatpush1.msra.mxu0 %v6482_v1 }
 0x175   : > { %1400 = vmatprep.subr.mxu0 %v6486_v3 }
 0x176   : > { %1401 = vmatpush1.msra.mxu0 %v6490_v5 }
 0x177   : > { %1402 = vmatprep.subr.mxu0 %v6494_v9 }
 0x178   : > { %1403 = vmatpush1.msra.mxu0 %v6498_v15 }
 0x179   : > { %1404 = vmatprep.subr.mxu0 %v6502_v23 }
 0x17a   : > { %1405 = vmatpush1.msra.mxu0 %v6506_v31 }
 0x17b   : > { %1406 = vmatprep.subr.mxu0 %v6510_v39 }
 0x17c   : > { %1407 = vmatpush1.msra.mxu0 %v6514_v12 }
 0x17d   : > { %1408 = vmatprep.subr.mxu0 %v6518_v14 }
 0x17e   : > { %1409 = vmatpush1.msra.mxu0 %v6522_v16 }
 0x17f   : > { %1410 = vmatprep.subr.mxu0 %v6526_v18 }
 0x180   : > { %1411 = vmatpush1.msra.mxu0 %v6530_v20 }
 0x181   : > { %1412 = vmatprep.subr.mxu0 %v6534_v22 }
 0x182   : > { %1413 = vmatpush1.msra.mxu0 %v6538_v24 }
 0x183   : > { %1414 = vmatprep.subr.mxu0 %v6542_v28 }
 0x184   : > { %1415 = vmatpush1.msra.mxu0 %v6546_v30 }
 0x185   : > { %1416 = vmatprep.subr.mxu0 %v6550_v32 }
 0x186   : > { %1417 = vmatpush1.msra.mxu0 %v6554_v34 }
 0x187   : > { %1418 = vmatprep.subr.mxu0 %v6558_v36 }
 0x188   : > { %1419 = vmatpush1.msra.mxu0 %v6562_v38 }
 0x189   : > { %1420 = vmatprep.subr.mxu0 %v6566_v40 }
 0x18a   : > { %1421 = vmatpush2.msra.mxu0 %v6570_v42 }
 0x18b   : > { %1422 = vmatprep.subr.mxu0 %v6574_v44 }
 0x18c   : > { %1423 = vmatpush2.msra.mxu0 %v6578_v46 }
 0x18d   : > { %1424 = vmatprep.subr.mxu0 %v6582_v48 }
 0x18e   : > { %1425 = vmatpush2.msra.mxu0 %v6586_v50 }
 0x18f   : > { %1426 = vmatprep.subr.mxu0 %v6590_v52 }
 0x190   : > { %1427 = vmatpush2.msra.mxu0 %v6594_v54 }
 0x191   : > { %1428 = vmatprep.subr.mxu0 %v6598_v56 }
 0x192   : > { %1429 = vmatpush2.msra.mxu0 %v6602_v58 }
 0x193   : > { %1430 = vmatprep.subr.mxu0 %v6606_v60 }
 0x194   : > { %1431 = vmatpush2.msra.mxu0 %v6610_v62  ;;  %v9663_v62 = vld [vmem:[#allocation11_spill] sm:$0xff] }
 0x195   : > { %1432 = vmatprep.subr.mxu0 %v6614_v0  ;;  %v9662_v0 = vld [vmem:[#allocation10_spill] sm:$0xff] }
 0x196   : > { %1433 = vmatpush2.msra.mxu0 %v6618_v2  ;;  %v9664_v2 = vld [vmem:[#allocation12_spill] sm:$0xff] }
 0x197   : > { %1434 = vmatprep.subr.mxu0 %v9654_v4  ;;  %v9665_v4 = vld [vmem:[#allocation13_spill] sm:$0xff] }
 0x198   : > { %1435 = vmatpush2.msra.mxu0 %v9655_v6  ;;  %v9666_v6 = vld [vmem:[#allocation15_spill] sm:$0xff] }
 0x199   : > { %1436 = vmatprep.subr.mxu0 %v9656_v8  ;;  %v9667_v8 = vld [vmem:[#allocation17_spill] sm:$0xff] }
 0x19a   : > { %1437 = vmatpush2.msra.mxu0 %v9657_v10  ;;  %v9668_v10 = vld [vmem:[#allocation19_spill] sm:$0xff] }
 0x19b   : > { %1438 = vmatprep.subr.mxu0 %v9658_v13  ;;  %v9669_v13 = vld [vmem:[#allocation21_spill] sm:$0xff] }
 0x19c   : > { %1439 = vmatpush2.msra.mxu0 %v9659_v17  ;;  %v9670_v17 = vld [vmem:[#allocation23_spill] sm:$0xff] }
 0x19d   : > { %1440 = vmatprep.subr.mxu0 %v9660_v25  ;;  %v9671_v25 = vld [vmem:[#allocation25_spill] sm:$0xff] }
 0x19e   : > { %1441 = vmatpush2.msra.mxu0 %v9661_v26  ;;  %v9672_v26 = vld [vmem:[#allocation27_spill] sm:$0xff] }
 0x19f   : > { %1442 = vmatprep.subr.mxu0 %v9662_v0  ;;  %v1282_v0 = vpop.permute.xlu0 %1281 }
 0x1a0   : > { %1443 = vmatpush2.msra.mxu0 %v9663_v62 }
 0x1a1   : > { %1444 = vmatprep.subr.mxu0 %v9664_v2 }
 0x1a2   : > { %1445 = vmatpush2.msra.mxu0 %v9665_v4 }
 0x1a3   : > { %1446 = vmatprep.subr.mxu0 %v9666_v6  ;;  %v1287_v6 = vpop.permute.xlu1 %1286  ;;  %v1298_v58 = vpop.permute.xlu0 %1297 }
 0x1a4   : > { %1447 = vmatpush2.msra.mxu0 %v9667_v8 }
 0x1a5   : > { %1448 = vmatprep.subr.mxu0 %v9668_v10 }
 0x1a6   : > { %1449 = vmatpush2.msra.mxu0 %v9669_v13 }
 0x1a7   : > { %1450 = vmatprep.subr.mxu0 %v9670_v17  ;;  %v1303_v52 = vpop.permute.xlu1 %1302 }
 0x1a8   : > { %1451 = vmatpush2.msra.mxu0 %v9671_v25 }
 0x1a9   : > { %1542 = vmatprep.subr.mxu0 %v9672_v26 }
 0x229   : > { %v6640_v62 = vpop.f32.mrf.mxu0 }
 0x22a   : > { %9673 = vst [vmem:[#allocation2_spill] sm:$0xff] %v6640_v62  ;;  %v1273_v2 = vmax.f32 %v6640_v62, 0.0 }
 0x22b   : > { %v6643_v4 = vpop.f32.mrf.mxu0 }
 0x22c   : > { %9674 = vst [vmem:[#allocation3_spill] sm:$0xff] %v6643_v4  ;;  %v1274_v8 = vmax.f32 %v6643_v4, 0.0  ;;  %v1289_v60 = vmul.f32 %v1282_v0, %v1273_v2  ;;  %v6890_v4 = vld [vmem:[%s5422_s2 + $0x88] sm:$0xff] }
 0x22d   : > { %v6646_v10 = vpop.f32.mrf.mxu0 }
 0x22e   : > { %9675 = vst [vmem:[#allocation4_spill] sm:$0xff] %v6646_v10  ;;  %v1290_v13 = vmul.f32 %v1282_v0, %v1274_v8  ;;  %v1275_v17 = vmax.f32 %v6646_v10, 0.0  ;;  %v6654_v54 = vadd.f32 %v1298_v58, %v1289_v60  ;;  %v9677_v8 = vld [vmem:[#allocation28_spill] sm:$0xff]  ;;  %v9680_v60 = vld [vmem:[#allocation31_spill] sm:$0xff]  ;;  %v9682_v10 = vld [vmem:[#allocation33_spill] sm:$0xff] }
 0x22f   : > { %v6649_v25 = vpop.f32.mrf.mxu0  ;;  %9820 = vst [vmem:[#allocation33_spill] sm:$0xff] %v6890_v4 }
 0x230   : > { %9676 = vst [vmem:[#allocation5_spill] sm:$0xff] %v6649_v25  ;;  %v6651_v26 = vadd.f32 %v1298_v58, %v1290_v13  ;;  %v1276_v56 = vmax.f32 %v6649_v25, 0.0  ;;  %v1291_v62 = vmul.f32 %v1287_v6, %v1275_v17  ;;  %v9678_v13 = vld [vmem:[#allocation29_spill] sm:$0xff]  ;;  %v9679_v58 = vld [vmem:[#allocation30_spill] sm:$0xff]  ;;  %v9681_v17 = vld [vmem:[#allocation32_spill] sm:$0xff] }
 0x232   : > { %1375 = vmatprep.mubr.f32.mxu1 %v6651_v26  ;;  %1452 = vmatprep.mubr.f32.mxu0 %v6651_v26  ;;  %v1292_v2 = vmul.f32 %v1287_v6, %v1276_v56  ;;  %v6664_v25 = vadd.f32 %v1303_v52, %v1291_v62  ;;  %v9683_v56 = vld [vmem:[#allocation34_spill] sm:$0xff]  ;;  %v9684_v6 = vld [vmem:[#allocation35_spill] sm:$0xff]  ;;  %v9686_v62 = vld [vmem:[#allocation37_spill] sm:$0xff] }
 0x233   : > { %1376 = vmatmul.mubr.f32.vlgmr.msra.gmra.mxu1 %v6654_v54  ;;  %1453 = vmatmul.mubr.f32.vlgmr.msra.gmra.mxu0 %v6654_v54 }
 0x234   : > { %v6660_v0 = vadd.f32 %v1303_v52, %v1292_v2  ;;  %1466 = vmatpush1.msra.mxu1 %v9677_v8  ;;  %1543 = vmatpush1.msra.mxu0 %v9678_v13  ;;  %v9685_v52 = vld [vmem:[#allocation36_spill] sm:$0xff]  ;;  %v9687_v2 = vld [vmem:[#allocation38_spill] sm:$0xff]  ;;  %v9690_v13 = vld [vmem:[#allocation41_spill] sm:$0xff] }
 0x235   : > { %1467 = vmatprep.subr.mxu1 %v9679_v58  ;;  %1544 = vmatprep.subr.mxu0 %v9680_v60  ;;  %v9689_v8 = vld [vmem:[#allocation40_spill] sm:$0xff]  ;;  %v9691_v58 = vld [vmem:[#allocation42_spill] sm:$0xff]  ;;  %v9692_v60 = vld [vmem:[#allocation43_spill] sm:$0xff] }
 0x236   : > { %1468 = vmatpush1.msra.mxu1 %v9681_v17  ;;  %1545 = vmatpush1.msra.mxu0 %v9682_v10  ;;  %v9688_v10 = vld [vmem:[#allocation39_spill] sm:$0xff]  ;;  %v9693_v17 = vld [vmem:[#allocation44_spill] sm:$0xff] }
 0x237   : > { %1381 = vmatprep.mubr.f32.mxu1 %v6660_v0  ;;  %1458 = vmatprep.mubr.f32.mxu0 %v6660_v0 }
 0x238   : > { %1469 = vmatprep.subr.mxu1 %v9683_v56  ;;  %1546 = vmatprep.subr.mxu0 %v9684_v6  ;;  %v9694_v56 = vld [vmem:[#allocation45_spill] sm:$0xff]  ;;  %v9695_v6 = vld [vmem:[#allocation46_spill] sm:$0xff] }
 0x239   : > { %1382 = vmatmul.mubr.f32.gmra.mxu1 %v6664_v25  ;;  %1459 = vmatmul.mubr.f32.gmra.mxu0 %v6664_v25 }
 0x23a   : > { %1470 = vmatpush1.msra.mxu1 %v9685_v52  ;;  %1547 = vmatpush1.msra.mxu0 %v9686_v62  ;;  %v9696_v52 = vld [vmem:[#allocation47_spill] sm:$0xff]  ;;  %v9697_v62 = vld [vmem:[#allocation48_spill] sm:$0xff] }
 0x23b   : > { %1471 = vmatprep.subr.mxu1 %v9687_v2  ;;  %1529 = vmatprep.mubr.f32.mxu1 %v6651_v26  ;;  %v9698_v2 = vld [vmem:[#allocation49_spill] sm:$0xff] }
 0x23c   : > { %1548 = vmatprep.subr.mxu0 %v9688_v10  ;;  %1606 = vmatprep.mubr.f32.mxu0 %v6651_v26  ;;  %v9699_v10 = vld [vmem:[#allocation50_spill] sm:$0xff] }
 0x23d   : > { %1472 = vmatpush1.msra.mxu1 %v9689_v8  ;;  %1549 = vmatpush1.msra.mxu0 %v9690_v13  ;;  %v9700_v8 = vld [vmem:[#allocation51_spill] sm:$0xff]  ;;  %v9701_v13 = vld [vmem:[#allocation52_spill] sm:$0xff] }
 0x23e   : > { %1473 = vmatprep.subr.mxu1 %v9691_v58  ;;  %1550 = vmatprep.subr.mxu0 %v9692_v60  ;;  %v9702_v58 = vld [vmem:[#allocation53_spill] sm:$0xff]  ;;  %v9703_v60 = vld [vmem:[#allocation54_spill] sm:$0xff] }
 0x23f   : > { %1474 = vmatpush1.msra.mxu1 %v9693_v17  ;;  %1551 = vmatpush1.msra.mxu0 %v9694_v56  ;;  %v9704_v17 = vld [vmem:[#allocation55_spill] sm:$0xff]  ;;  %v9705_v56 = vld [vmem:[#allocation56_spill] sm:$0xff] }
 0x240   : > { %1475 = vmatprep.subr.mxu1 %v9695_v6  ;;  %1552 = vmatprep.subr.mxu0 %v9696_v52  ;;  %v9706_v6 = vld [vmem:[#allocation57_spill] sm:$0xff]  ;;  %v9707_v52 = vld [vmem:[#allocation58_spill] sm:$0xff] }
 0x241   : > { %1476 = vmatpush1.msra.mxu1 %v9697_v62  ;;  %1553 = vmatpush1.msra.mxu0 %v9698_v2  ;;  %v9708_v62 = vld [vmem:[#allocation59_spill] sm:$0xff]  ;;  %v9709_v2 = vld [vmem:[#allocation60_spill] sm:$0xff] }
 0x242   : > { %1477 = vmatprep.subr.mxu1 %v9699_v10  ;;  %1554 = vmatprep.subr.mxu0 %v9700_v8  ;;  %v9710_v10 = vld [vmem:[#allocation61_spill] sm:$0xff]  ;;  %v9711_v8 = vld [vmem:[#allocation62_spill] sm:$0xff] }
 0x243   : > { %1478 = vmatpush1.msra.mxu1 %v9701_v13  ;;  %1555 = vmatpush1.msra.mxu0 %v9702_v58  ;;  %v9712_v13 = vld [vmem:[#allocation63_spill] sm:$0xff]  ;;  %v9713_v58 = vld [vmem:[#allocation64_spill] sm:$0xff] }
 0x244   : > { %1479 = vmatprep.subr.mxu1 %v9703_v60  ;;  %1556 = vmatprep.subr.mxu0 %v9704_v17  ;;  %v9714_v60 = vld [vmem:[#allocation65_spill] sm:$0xff]  ;;  %v9715_v17 = vld [vmem:[#allocation66_spill] sm:$0xff] }
 0x245   : > { %1480 = vmatpush1.msra.mxu1 %v9705_v56  ;;  %1557 = vmatpush1.msra.mxu0 %v9706_v6  ;;  %v9716_v56 = vld [vmem:[#allocation67_spill] sm:$0xff]  ;;  %v9717_v6 = vld [vmem:[#allocation68_spill] sm:$0xff] }
 0x246   : > { %1481 = vmatprep.subr.mxu1 %v9707_v52  ;;  %1558 = vmatprep.subr.mxu0 %v9708_v62  ;;  %v9718_v52 = vld [vmem:[#allocation69_spill] sm:$0xff]  ;;  %v9719_v62 = vld [vmem:[#allocation70_spill] sm:$0xff] }
 0x247   : > { %1482 = vmatpush1.msra.mxu1 %v9709_v2  ;;  %1559 = vmatpush1.msra.mxu0 %v9710_v10  ;;  %v9720_v2 = vld [vmem:[#allocation71_spill] sm:$0xff]  ;;  %v9721_v10 = vld [vmem:[#allocation72_spill] sm:$0xff] }
 0x248   : > { %1483 = vmatprep.subr.mxu1 %v9711_v8  ;;  %1560 = vmatprep.subr.mxu0 %v9712_v13  ;;  %v9722_v8 = vld [vmem:[#allocation73_spill] sm:$0xff]  ;;  %v9723_v13 = vld [vmem:[#allocation74_spill] sm:$0xff] }
 0x249   : > { %1484 = vmatpush1.msra.mxu1 %v9713_v58  ;;  %1561 = vmatpush1.msra.mxu0 %v9714_v60  ;;  %v9724_v58 = vld [vmem:[#allocation75_spill] sm:$0xff]  ;;  %v9725_v60 = vld [vmem:[#allocation76_spill] sm:$0xff] }
 0x24a   : > { %1485 = vmatprep.subr.mxu1 %v9715_v17  ;;  %1562 = vmatprep.subr.mxu0 %v9716_v56  ;;  %v9726_v17 = vld [vmem:[#allocation77_spill] sm:$0xff]  ;;  %v9727_v56 = vld [vmem:[#allocation78_spill] sm:$0xff] }
 0x24b   : > { %1486 = vmatpush1.msra.mxu1 %v9717_v6  ;;  %1563 = vmatpush1.msra.mxu0 %v9718_v52  ;;  %v9728_v6 = vld [vmem:[#allocation79_spill] sm:$0xff]  ;;  %v9729_v52 = vld [vmem:[#allocation80_spill] sm:$0xff] }
 0x24c   : > { %1487 = vmatprep.subr.mxu1 %v9719_v62  ;;  %1564 = vmatprep.subr.mxu0 %v9720_v2  ;;  %v9730_v62 = vld [vmem:[#allocation81_spill] sm:$0xff]  ;;  %v9731_v2 = vld [vmem:[#allocation82_spill] sm:$0xff] }
 0x24d   : > { %1488 = vmatpush1.msra.mxu1 %v9721_v10  ;;  %1565 = vmatpush1.msra.mxu0 %v9722_v8  ;;  %v9732_v10 = vld [vmem:[#allocation83_spill] sm:$0xff]  ;;  %v9733_v8 = vld [vmem:[#allocation84_spill] sm:$0xff] }
 0x24e   : > { %1489 = vmatprep.subr.mxu1 %v9723_v13  ;;  %1566 = vmatprep.subr.mxu0 %v9724_v58  ;;  %v9734_v13 = vld [vmem:[#allocation85_spill] sm:$0xff]  ;;  %v9735_v58 = vld [vmem:[#allocation86_spill] sm:$0xff] }
 0x24f   : > { %1490 = vmatpush1.msra.mxu1 %v9725_v60  ;;  %1567 = vmatpush1.msra.mxu0 %v9726_v17  ;;  %v9736_v60 = vld [vmem:[#allocation87_spill] sm:$0xff]  ;;  %v9737_v17 = vld [vmem:[#allocation88_spill] sm:$0xff] }
 0x250   : > { %1491 = vmatprep.subr.mxu1 %v9727_v56  ;;  %1568 = vmatprep.subr.mxu0 %v9728_v6  ;;  %v9738_v56 = vld [vmem:[#allocation89_spill] sm:$0xff]  ;;  %v9739_v6 = vld [vmem:[#allocation90_spill] sm:$0xff] }
 0x251   : > { %1492 = vmatpush1.msra.mxu1 %v9729_v52  ;;  %1569 = vmatpush1.msra.mxu0 %v9730_v62  ;;  %v9740_v52 = vld [vmem:[#allocation91_spill] sm:$0xff]  ;;  %v9741_v62 = vld [vmem:[#allocation92_spill] sm:$0xff] }
 0x252   : > { %1493 = vmatprep.subr.mxu1 %v9731_v2  ;;  %1570 = vmatprep.subr.mxu0 %v9732_v10  ;;  %v9742_v2 = vld [vmem:[#allocation93_spill] sm:$0xff]  ;;  %v9743_v10 = vld [vmem:[#allocation94_spill] sm:$0xff] }
 0x253   : > { %1494 = vmatpush1.msra.mxu1 %v9733_v8  ;;  %1571 = vmatpush1.msra.mxu0 %v9734_v13  ;;  %v9744_v8 = vld [vmem:[#allocation95_spill] sm:$0xff]  ;;  %v9745_v13 = vld [vmem:[#allocation96_spill] sm:$0xff] }
 0x254   : > { %1495 = vmatprep.subr.mxu1 %v9735_v58  ;;  %1572 = vmatprep.subr.mxu0 %v9736_v60  ;;  %v9746_v58 = vld [vmem:[#allocation97_spill] sm:$0xff]  ;;  %v9747_v60 = vld [vmem:[#allocation98_spill] sm:$0xff] }
 0x255   : > { %1496 = vmatpush1.msra.mxu1 %v9737_v17  ;;  %1573 = vmatpush1.msra.mxu0 %v9738_v56  ;;  %v9748_v17 = vld [vmem:[#allocation99_spill] sm:$0xff]  ;;  %v9749_v56 = vld [vmem:[#allocation100_spill] sm:$0xff] }
 0x256   : > { %1497 = vmatprep.subr.mxu1 %v9739_v6  ;;  %1574 = vmatprep.subr.mxu0 %v9740_v52  ;;  %v9750_v6 = vld [vmem:[#allocation101_spill] sm:$0xff]  ;;  %v9751_v52 = vld [vmem:[#allocation102_spill] sm:$0xff] }
 0x257   : > { %1498 = vmatpush2.msra.mxu1 %v9741_v62  ;;  %1575 = vmatpush2.msra.mxu0 %v9742_v2  ;;  %v9752_v62 = vld [vmem:[#allocation103_spill] sm:$0xff]  ;;  %v9753_v2 = vld [vmem:[#allocation104_spill] sm:$0xff] }
 0x258   : > { %1499 = vmatprep.subr.mxu1 %v9743_v10  ;;  %1576 = vmatprep.subr.mxu0 %v9744_v8  ;;  %v9754_v10 = vld [vmem:[#allocation105_spill] sm:$0xff]  ;;  %v9755_v8 = vld [vmem:[#allocation106_spill] sm:$0xff] }
 0x259   : > { %1500 = vmatpush2.msra.mxu1 %v9745_v13  ;;  %1577 = vmatpush2.msra.mxu0 %v9746_v58  ;;  %v9756_v13 = vld [vmem:[#allocation107_spill] sm:$0xff]  ;;  %v9757_v58 = vld [vmem:[#allocation108_spill] sm:$0xff] }
 0x25a   : > { %1501 = vmatprep.subr.mxu1 %v9747_v60  ;;  %1578 = vmatprep.subr.mxu0 %v9748_v17  ;;  %v9758_v60 = vld [vmem:[#allocation109_spill] sm:$0xff]  ;;  %v9759_v17 = vld [vmem:[#allocation110_spill] sm:$0xff] }
 0x25b   : > { %1502 = vmatpush2.msra.mxu1 %v9749_v56  ;;  %1579 = vmatpush2.msra.mxu0 %v9750_v6  ;;  %v9760_v56 = vld [vmem:[#allocation111_spill] sm:$0xff]  ;;  %v9761_v6 = vld [vmem:[#allocation112_spill] sm:$0xff] }
 0x25c   : > { %1503 = vmatprep.subr.mxu1 %v9751_v52  ;;  %1580 = vmatprep.subr.mxu0 %v9752_v62  ;;  %v9762_v52 = vld [vmem:[#allocation113_spill] sm:$0xff]  ;;  %v9763_v62 = vld [vmem:[#allocation114_spill] sm:$0xff] }
 0x25d   : > { %1504 = vmatpush2.msra.mxu1 %v9753_v2  ;;  %1581 = vmatpush2.msra.mxu0 %v9754_v10  ;;  %v9764_v2 = vld [vmem:[#allocation115_spill] sm:$0xff]  ;;  %v9765_v10 = vld [vmem:[#allocation116_spill] sm:$0xff] }
 0x25e   : > { %1505 = vmatprep.subr.mxu1 %v9755_v8  ;;  %1582 = vmatprep.subr.mxu0 %v9756_v13  ;;  %v9766_v8 = vld [vmem:[#allocation117_spill] sm:$0xff]  ;;  %v9767_v13 = vld [vmem:[#allocation118_spill] sm:$0xff] }
 0x25f   : > { %1506 = vmatpush2.msra.mxu1 %v9757_v58  ;;  %1583 = vmatpush2.msra.mxu0 %v9758_v60  ;;  %v9768_v58 = vld [vmem:[#allocation119_spill] sm:$0xff]  ;;  %v9769_v60 = vld [vmem:[#allocation120_spill] sm:$0xff] }
 0x260   : > { %1507 = vmatprep.subr.mxu1 %v9759_v17  ;;  %1584 = vmatprep.subr.mxu0 %v9760_v56  ;;  %v9770_v17 = vld [vmem:[#allocation121_spill] sm:$0xff]  ;;  %v9771_v56 = vld [vmem:[#allocation122_spill] sm:$0xff] }
 0x261   : > { %1508 = vmatpush2.msra.mxu1 %v9761_v6  ;;  %1585 = vmatpush2.msra.mxu0 %v9762_v52  ;;  %v9772_v6 = vld [vmem:[#allocation123_spill] sm:$0xff]  ;;  %v9773_v52 = vld [vmem:[#allocation124_spill] sm:$0xff] }
 0x262   : > { %1509 = vmatprep.subr.mxu1 %v9763_v62  ;;  %1586 = vmatprep.subr.mxu0 %v9764_v2  ;;  %v9774_v62 = vld [vmem:[#allocation125_spill] sm:$0xff]  ;;  %v9775_v2 = vld [vmem:[#allocation126_spill] sm:$0xff] }
 0x263   : > { %1510 = vmatpush2.msra.mxu1 %v9765_v10  ;;  %1587 = vmatpush2.msra.mxu0 %v9766_v8  ;;  %v9776_v10 = vld [vmem:[#allocation127_spill] sm:$0xff]  ;;  %v9777_v8 = vld [vmem:[#allocation128_spill] sm:$0xff] }
 0x264   : > { %1511 = vmatprep.subr.mxu1 %v9767_v13  ;;  %1588 = vmatprep.subr.mxu0 %v9768_v58  ;;  %v9778_v13 = vld [vmem:[#allocation129_spill] sm:$0xff]  ;;  %v9779_v58 = vld [vmem:[#allocation130_spill] sm:$0xff] }
 0x265   : > { %1512 = vmatpush2.msra.mxu1 %v9769_v60  ;;  %1589 = vmatpush2.msra.mxu0 %v9770_v17  ;;  %v9780_v60 = vld [vmem:[#allocation131_spill] sm:$0xff]  ;;  %v9781_v17 = vld [vmem:[#allocation132_spill] sm:$0xff] }
 0x266   : > { %1513 = vmatprep.subr.mxu1 %v9771_v56  ;;  %1590 = vmatprep.subr.mxu0 %v9772_v6  ;;  %v9782_v56 = vld [vmem:[#allocation133_spill] sm:$0xff]  ;;  %v9783_v6 = vld [vmem:[#allocation134_spill] sm:$0xff] }
 0x267   : > { %1514 = vmatpush2.msra.mxu1 %v9773_v52  ;;  %1591 = vmatpush2.msra.mxu0 %v9774_v62  ;;  %v9784_v52 = vld [vmem:[#allocation135_spill] sm:$0xff]  ;;  %v9785_v62 = vld [vmem:[#allocation136_spill] sm:$0xff] }
 0x268   : > { %1515 = vmatprep.subr.mxu1 %v9775_v2  ;;  %1592 = vmatprep.subr.mxu0 %v9776_v10  ;;  %v9786_v2 = vld [vmem:[#allocation137_spill] sm:$0xff]  ;;  %v9787_v10 = vld [vmem:[#allocation138_spill] sm:$0xff] }
 0x269   : > { %1516 = vmatpush2.msra.mxu1 %v9777_v8  ;;  %1593 = vmatpush2.msra.mxu0 %v9778_v13  ;;  %v9788_v8 = vld [vmem:[#allocation139_spill] sm:$0xff]  ;;  %v9789_v13 = vld [vmem:[#allocation140_spill] sm:$0xff] }
 0x26a   : > { %1517 = vmatprep.subr.mxu1 %v9779_v58  ;;  %1594 = vmatprep.subr.mxu0 %v9780_v60  ;;  %v9790_v58 = vld [vmem:[#allocation141_spill] sm:$0xff]  ;;  %v9791_v60 = vld [vmem:[#allocation142_spill] sm:$0xff] }
 0x26b   : > { %1518 = vmatpush2.msra.mxu1 %v9781_v17  ;;  %1595 = vmatpush2.msra.mxu0 %v9782_v56  ;;  %v9792_v17 = vld [vmem:[#allocation143_spill] sm:$0xff]  ;;  %v9793_v56 = vld [vmem:[#allocation144_spill] sm:$0xff] }
 0x26c   : > { %1519 = vmatprep.subr.mxu1 %v9783_v6  ;;  %1596 = vmatprep.subr.mxu0 %v9784_v52  ;;  %v9794_v6 = vld [vmem:[#allocation145_spill] sm:$0xff]  ;;  %v9795_v52 = vld [vmem:[#allocation146_spill] sm:$0xff] }
 0x26d   : > { %1520 = vmatpush2.msra.mxu1 %v9785_v62  ;;  %1597 = vmatpush2.msra.mxu0 %v9786_v2  ;;  %v9796_v62 = vld [vmem:[#allocation147_spill] sm:$0xff]  ;;  %v9797_v2 = vld [vmem:[#allocation148_spill] sm:$0xff] }
 0x26e   : > { %1521 = vmatprep.subr.mxu1 %v9787_v10  ;;  %1598 = vmatprep.subr.mxu0 %v9788_v8  ;;  %v6842_v10 = vld [vmem:[%s5422_s2 + $0x208] sm:$0xff]  ;;  %v6846_v8 = vld [vmem:[%s5422_s2 + $0x200] sm:$0xff] }
 0x26f   : > { %1522 = vmatpush2.msra.mxu1 %v9789_v13  ;;  %1599 = vmatpush2.msra.mxu0 %v9790_v58  ;;  %9808 = vst [vmem:[#allocation15_spill] sm:$0xff] %v6842_v10  ;;  %9809 = vst [vmem:[#allocation17_spill] sm:$0xff] %v6846_v8  ;;  %v6850_v13 = vld [vmem:[%s5422_s2 + $0x1c8] sm:$0xff]  ;;  %v6854_v58 = vld [vmem:[%s5422_s2 + $0x1c0] sm:$0xff] }
 0x270   : > { %1523 = vmatprep.subr.mxu1 %v9791_v60  ;;  %1600 = vmatprep.subr.mxu0 %v6256_v43  ;;  %v9798_v43 = vld [vmem:[#allocation149_spill] sm:$0xff]  ;;  %9810 = vst [vmem:[#allocation19_spill] sm:$0xff] %v6850_v13  ;;  %9811 = vst [vmem:[#allocation21_spill] sm:$0xff] %v6854_v58  ;;  %v6858_v60 = vld [vmem:[%s5422_s2 + $0x188] sm:$0xff] }
 0x271   : > { %1524 = vmatpush2.msra.mxu1 %v9792_v17  ;;  %1601 = vmatpush2.msra.mxu0 %v6264_v63  ;;  %v6810_v63 = vld [vmem:[%s5422_s2 + $0x308] sm:$0xff]  ;;  %9812 = vst [vmem:[#allocation23_spill] sm:$0xff] %v6858_v60  ;;  %v6862_v17 = vld [vmem:[%s5422_s2 + $0x180] sm:$0xff] }
 0x272   : > { %1525 = vmatprep.subr.mxu1 %v6269_v11  ;;  %1602 = vmatprep.subr.mxu0 %v6272_v59  ;;  %v9799_v59 = vmov 0.0   ;;  %9800 = vst [vmem:[#allocation6_spill] sm:$0xff] %v6810_v63  ;;  %v6818_v11 = vld [vmem:[%s5422_s2 + $0x2c8] sm:$0xff]  ;;  %9813 = vst [vmem:[#allocation25_spill] sm:$0xff] %v6862_v17 }
 0x273   : > { %1526 = vmatpush2.msra.mxu1 %v9793_v56  ;;  %1603 = vmatpush2.msra.mxu0 %v9794_v6  ;;  %9802 = vst [vmem:[#allocation8_spill] sm:$0xff] %v6818_v11  ;;  %v6866_v56 = vld [vmem:[%s5422_s2 + $0x148] sm:$0xff]  ;;  %v6870_v6 = vld [vmem:[%s5422_s2 + $0x140] sm:$0xff] }
 0x274   : > { %1527 = vmatprep.subr.mxu1 %v9795_v52  ;;  %1604 = vmatprep.subr.mxu0 %v9796_v62  ;;  %9814 = vst [vmem:[#allocation27_spill] sm:$0xff] %v6866_v56  ;;  %9815 = vst [vmem:[#allocation28_spill] sm:$0xff] %v6870_v6  ;;  %v6874_v52 = vld [vmem:[%s5422_s2 + $0x108] sm:$0xff]  ;;  %v6878_v62 = vld [vmem:[%s5422_s2 + $0x100] sm:$0xff] }
 0x275   : > { %1528 = vmatpush2.msra.mxu1 %v9797_v2  ;;  %1605 = vmatpush2.msra.mxu0 %v9798_v43  ;;  %9816 = vst [vmem:[#allocation29_spill] sm:$0xff] %v6874_v52  ;;  %9817 = vst [vmem:[#allocation30_spill] sm:$0xff] %v6878_v62  ;;  %v6882_v2 = vld [vmem:[%s5422_s2 + $0xc8] sm:$0xff]  ;;  %v6886_v43 = vld [vmem:[%s5422_s2 + $0xc0] sm:$0xff] }
 0x276   : > { %1530 = vmatmul.mubr.f32.vlgmr.msra.gmra.mxu1 %v6654_v54  ;;  %1607 = vmatmul.mubr.f32.vlgmr.msra.gmra.mxu0 %v6654_v54  ;;  %9818 = vst [vmem:[#allocation31_spill] sm:$0xff] %v6882_v2  ;;  %9819 = vst [vmem:[#allocation32_spill] sm:$0xff] %v6886_v43 }
 0x277   : > { %1535 = vmatprep.mubr.f32.mxu1 %v6660_v0  ;;  %1612 = vmatprep.mubr.f32.mxu0 %v6660_v0 }
 0x278   : > { %1752 = vmatprep.subr.mxu0 %v6309_v35  ;;  %v6838_v35 = vld [vmem:[%s5422_s2 + $0x240] sm:$0xff] }
 0x279   : > { %1753 = vmatpush1.msra.mxu0 %v6313_v51  ;;  %v6814_v51 = vld [vmem:[%s5422_s2 + $0x300] sm:$0xff]  ;;  %9807 = vst [vmem:[#allocation13_spill] sm:$0xff] %v6838_v35 }
 0x27a   : > { %1536 = vmatmul.mubr.f32.gmra.mxu1 %v6664_v25  ;;  %1613 = vmatmul.mubr.f32.gmra.mxu0 %v6664_v25  ;;  %9801 = vst [vmem:[#allocation7_spill] sm:$0xff] %v6814_v51 }
 0x27b   : > { %1698 = vmatprep.mubr.f32.mxu1 %v9799_v59  ;;  %1754 = vmatprep.subr.mxu0 %v6317_v27  ;;  %v6834_v27 = vld [vmem:[%s5422_s2 + $0x248] sm:$0xff] }
 0x27c   : > { %1755 = vmatpush1.msra.mxu0 %v6321_v7  ;;  %v6822_v7 = vld [vmem:[%s5422_s2 + $0x2c0] sm:$0xff]  ;;  %9806 = vst [vmem:[#allocation12_spill] sm:$0xff] %v6834_v27 }
 0x27d   : > { %1756 = vmatprep.subr.mxu0 %v6325_v19  ;;  %9803 = vst [vmem:[#allocation9_spill] sm:$0xff] %v6822_v7  ;;  %v6830_v19 = vld [vmem:[%s5422_s2 + $0x280] sm:$0xff] }
 0x27e   : > { %1757 = vmatpush1.msra.mxu0 %v6329_v55  ;;  %v6826_v55 = vld [vmem:[%s5422_s2 + $0x288] sm:$0xff]  ;;  %9805 = vst [vmem:[#allocation11_spill] sm:$0xff] %v6830_v19 }
 0x27f   : > { %1758 = vmatprep.subr.mxu0 %v6810_v63  ;;  %9804 = vst [vmem:[#allocation10_spill] sm:$0xff] %v6826_v55 }
 0x280   : > { %1759 = vmatpush1.msra.mxu0 %v6814_v51 }
 0x281   : > { %1760 = vmatprep.subr.mxu0 %v6818_v11 }
 0x282   : > { %1761 = vmatpush1.msra.mxu0 %v6822_v7 }
 0x283   : > { %1762 = vmatprep.subr.mxu0 %v6826_v55 }
 0x284   : > { %1763 = vmatpush1.msra.mxu0 %v6830_v19 }
 0x285   : > { %1764 = vmatprep.subr.mxu0 %v6834_v27 }
 0x286   : > { %1765 = vmatpush1.msra.mxu0 %v6838_v35 }
 0x287   : > { %1766 = vmatprep.subr.mxu0 %v6842_v10 }
 0x288   : > { %1767 = vmatpush1.msra.mxu0 %v6846_v8 }
 0x289   : > { %1768 = vmatprep.subr.mxu0 %v6850_v13 }
 0x28a   : > { %1769 = vmatpush1.msra.mxu0 %v6854_v58 }
 0x28b   : > { %1770 = vmatprep.subr.mxu0 %v6858_v60 }
 0x28c   : > { %1771 = vmatpush1.msra.mxu0 %v6862_v17 }
 0x28d   : > { %1772 = vmatprep.subr.mxu0 %v6866_v56 }
 0x28e   : > { %1773 = vmatpush1.msra.mxu0 %v6870_v6  ;;  %v7022_v6 = vld [vmem:[%s5422_s2 + $0x480] sm:$0xff] }
 0x28f   : > { %1774 = vmatprep.subr.mxu0 %v6874_v52  ;;  %v6894_v52 = vld [vmem:[%s5422_s2 + $0x80] sm:$0xff]  ;;  %9853 = vst [vmem:[#allocation66_spill] sm:$0xff] %v7022_v6 }
 0x290   : > { %1775 = vmatpush1.msra.mxu0 %v6878_v62  ;;  %9821 = vst [vmem:[#allocation34_spill] sm:$0xff] %v6894_v52  ;;  %v6898_v62 = vld [vmem:[%s5422_s2 + $0x48] sm:$0xff] }
 0x291   : > { %1776 = vmatprep.subr.mxu0 %v6882_v2  ;;  %9822 = vst [vmem:[#allocation35_spill] sm:$0xff] %v6898_v62  ;;  %v6902_v2 = vld [vmem:[%s5422_s2 + $0x40] sm:$0xff] }
 0x292   : > { %1777 = vmatpush1.msra.mxu0 %v6886_v43  ;;  %9823 = vst [vmem:[#allocation36_spill] sm:$0xff] %v6902_v2  ;;  %v6906_v43 = vld [vmem:[%s5422_s2 + $0x8] sm:$0xff] }
 0x293   : > { %1778 = vmatprep.subr.mxu0 %v6890_v4  ;;  %9824 = vst [vmem:[#allocation37_spill] sm:$0xff] %v6906_v43  ;;  %v6910_v4 = vld [vmem:[%s5422_s2] sm:$0xff] }
 0x294   : > { %1779 = vmatpush1.msra.mxu0 %v6894_v52  ;;  %9825 = vst [vmem:[#allocation38_spill] sm:$0xff] %v6910_v4  ;;  %v6914_v52 = vld [vmem:[%s5422_s2 + $0x7c8] sm:$0xff] }
 0x295   : > { %1780 = vmatprep.subr.mxu0 %v6898_v62  ;;  %9826 = vst [vmem:[#allocation39_spill] sm:$0xff] %v6914_v52  ;;  %v6918_v62 = vld [vmem:[%s5422_s2 + $0x7c0] sm:$0xff] }
 0x296   : > { %1781 = vmatpush1.msra.mxu0 %v6902_v2  ;;  %9827 = vst [vmem:[#allocation40_spill] sm:$0xff] %v6918_v62  ;;  %v6922_v2 = vld [vmem:[%s5422_s2 + $0x788] sm:$0xff] }
 0x297   : > { %1782 = vmatprep.subr.mxu0 %v6906_v43  ;;  %9828 = vst [vmem:[#allocation41_spill] sm:$0xff] %v6922_v2  ;;  %v6926_v43 = vld [vmem:[%s5422_s2 + $0x780] sm:$0xff] }
 0x298   : > { %1783 = vmatpush1.msra.mxu0 %v6910_v4  ;;  %9829 = vst [vmem:[#allocation42_spill] sm:$0xff] %v6926_v43  ;;  %v6930_v4 = vld [vmem:[%s5422_s2 + $0x748] sm:$0xff] }
 0x299   : > { %1784 = vmatprep.subr.mxu0 %v6914_v52  ;;  %9830 = vst [vmem:[#allocation43_spill] sm:$0xff] %v6930_v4  ;;  %v6934_v52 = vld [vmem:[%s5422_s2 + $0x740] sm:$0xff] }
 0x29a   : > { %1785 = vmatpush2.msra.mxu0 %v6918_v62  ;;  %9831 = vst [vmem:[#allocation44_spill] sm:$0xff] %v6934_v52  ;;  %v6938_v62 = vld [vmem:[%s5422_s2 + $0x708] sm:$0xff] }
 0x29b   : > { %1786 = vmatprep.subr.mxu0 %v6922_v2  ;;  %9832 = vst [vmem:[#allocation45_spill] sm:$0xff] %v6938_v62  ;;  %v6942_v2 = vld [vmem:[%s5422_s2 + $0x700] sm:$0xff] }
 0x29c   : > { %1787 = vmatpush2.msra.mxu0 %v6926_v43  ;;  %9833 = vst [vmem:[#allocation46_spill] sm:$0xff] %v6942_v2  ;;  %v6946_v43 = vld [vmem:[%s5422_s2 + $0x6c8] sm:$0xff] }
 0x29d   : > { %1788 = vmatprep.subr.mxu0 %v6930_v4  ;;  %9834 = vst [vmem:[#allocation47_spill] sm:$0xff] %v6946_v43  ;;  %v6950_v4 = vld [vmem:[%s5422_s2 + $0x6c0] sm:$0xff] }
 0x29e   : > { %1789 = vmatpush2.msra.mxu0 %v6934_v52  ;;  %9835 = vst [vmem:[#allocation48_spill] sm:$0xff] %v6950_v4  ;;  %v6954_v52 = vld [vmem:[%s5422_s2 + $0x688] sm:$0xff] }
 0x29f   : > { %1790 = vmatprep.subr.mxu0 %v6938_v62  ;;  %9836 = vst [vmem:[#allocation49_spill] sm:$0xff] %v6954_v52  ;;  %v6958_v62 = vld [vmem:[%s5422_s2 + $0x680] sm:$0xff] }
 0x2a0   : > { %1791 = vmatpush2.msra.mxu0 %v6942_v2  ;;  %9837 = vst [vmem:[#allocation50_spill] sm:$0xff] %v6958_v62  ;;  %v6962_v2 = vld [vmem:[%s5422_s2 + $0x648] sm:$0xff] }
 0x2a1   : > { %1792 = vmatprep.subr.mxu0 %v6946_v43  ;;  %9838 = vst [vmem:[#allocation51_spill] sm:$0xff] %v6962_v2  ;;  %v6966_v43 = vld [vmem:[%s5422_s2 + $0x640] sm:$0xff] }
 0x2a2   : > { %1793 = vmatpush2.msra.mxu0 %v6950_v4  ;;  %9839 = vst [vmem:[#allocation52_spill] sm:$0xff] %v6966_v43  ;;  %v6970_v4 = vld [vmem:[%s5422_s2 + $0x608] sm:$0xff] }
 0x2a3   : > { %1794 = vmatprep.subr.mxu0 %v6954_v52  ;;  %9840 = vst [vmem:[#allocation53_spill] sm:$0xff] %v6970_v4  ;;  %v6974_v52 = vld [vmem:[%s5422_s2 + $0x600] sm:$0xff] }
 0x2a4   : > { %1795 = vmatpush2.msra.mxu0 %v6958_v62  ;;  %9841 = vst [vmem:[#allocation54_spill] sm:$0xff] %v6974_v52  ;;  %v6978_v62 = vld [vmem:[%s5422_s2 + $0x5c8] sm:$0xff] }
 0x2a5   : > { %1796 = vmatprep.subr.mxu0 %v6962_v2  ;;  %9842 = vst [vmem:[#allocation55_spill] sm:$0xff] %v6978_v62  ;;  %v6982_v2 = vld [vmem:[%s5422_s2 + $0x5c0] sm:$0xff] }
 0x2a6   : > { %1797 = vmatpush2.msra.mxu0 %v6966_v43  ;;  %9843 = vst [vmem:[#allocation56_spill] sm:$0xff] %v6982_v2  ;;  %v6986_v43 = vld [vmem:[%s5422_s2 + $0x588] sm:$0xff] }
 0x2a7   : > { %1798 = vmatprep.subr.mxu0 %v6970_v4  ;;  %9844 = vst [vmem:[#allocation57_spill] sm:$0xff] %v6986_v43  ;;  %v6990_v4 = vld [vmem:[%s5422_s2 + $0x580] sm:$0xff] }
 0x2a8   : > { %1799 = vmatpush2.msra.mxu0 %v6974_v52  ;;  %9845 = vst [vmem:[#allocation58_spill] sm:$0xff] %v6990_v4  ;;  %v6994_v52 = vld [vmem:[%s5422_s2 + $0x548] sm:$0xff] }
 0x2a9   : > { %1800 = vmatprep.subr.mxu0 %v6978_v62  ;;  %9846 = vst [vmem:[#allocation59_spill] sm:$0xff] %v6994_v52  ;;  %v6998_v62 = vld [vmem:[%s5422_s2 + $0x540] sm:$0xff] }
 0x2aa   : > { %1801 = vmatpush2.msra.mxu0 %v6982_v2  ;;  %9847 = vst [vmem:[#allocation60_spill] sm:$0xff] %v6998_v62  ;;  %v7002_v2 = vld [vmem:[%s5422_s2 + $0x508] sm:$0xff] }
 0x2ab   : > { %1802 = vmatprep.subr.mxu0 %v6986_v43  ;;  %9848 = vst [vmem:[#allocation61_spill] sm:$0xff] %v7002_v2  ;;  %v7006_v43 = vld [vmem:[%s5422_s2 + $0x500] sm:$0xff] }
 0x2ac   : > { %1803 = vmatpush2.msra.mxu0 %v6990_v4  ;;  %9849 = vst [vmem:[#allocation62_spill] sm:$0xff] %v7006_v43  ;;  %v7010_v4 = vld [vmem:[%s5422_s2 + $0x4c8] sm:$0xff] }
 0x2ad   : > { %1804 = vmatprep.subr.mxu0 %v6994_v52  ;;  %9850 = vst [vmem:[#allocation63_spill] sm:$0xff] %v7010_v4  ;;  %v7014_v52 = vld [vmem:[%s5422_s2 + $0x4c0] sm:$0xff] }
 0x2ae   : > { %1805 = vmatpush2.msra.mxu0 %v6998_v62  ;;  %9851 = vst [vmem:[#allocation64_spill] sm:$0xff] %v7014_v52  ;;  %v7018_v62 = vld [vmem:[%s5422_s2 + $0x488] sm:$0xff] }
 0x2af   : > { %1806 = vmatprep.subr.mxu0 %v7002_v2  ;;  %9852 = vst [vmem:[#allocation65_spill] sm:$0xff] %v7018_v62  ;;  %v7026_v2 = vld [vmem:[%s5422_s2 + $0x448] sm:$0xff] }
 0x2b0   : > { %1807 = vmatpush2.msra.mxu0 %v7006_v43  ;;  %9854 = vst [vmem:[#allocation67_spill] sm:$0xff] %v7026_v2  ;;  %v7030_v43 = vld [vmem:[%s5422_s2 + $0x440] sm:$0xff] }
 0x2b1   : > { %1808 = vmatprep.subr.mxu0 %v7010_v4  ;;  %9855 = vst [vmem:[#allocation68_spill] sm:$0xff] %v7030_v43  ;;  %v7034_v4 = vld [vmem:[%s5422_s2 + $0x408] sm:$0xff] }
 0x2b2   : > { %1809 = vmatpush2.msra.mxu0 %v7014_v52  ;;  %9856 = vst [vmem:[#allocation69_spill] sm:$0xff] %v7034_v4  ;;  %v7038_v52 = vld [vmem:[%s5422_s2 + $0x400] sm:$0xff] }
 0x2b3   : > { %1810 = vmatprep.subr.mxu0 %v7018_v62  ;;  %9857 = vst [vmem:[#allocation70_spill] sm:$0xff] %v7038_v52  ;;  %v7042_v62 = vld [vmem:[%s5422_s2 + $0x3e8] sm:$0xff] }
 0x2b4   : > { %1811 = vmatpush2.msra.mxu0 %v7022_v6  ;;  %9858 = vst [vmem:[#allocation71_spill] sm:$0xff] %v7042_v62 }
 0x2b5   : > { %1812 = vmatprep.subr.mxu0 %v7026_v2 }
 0x2b6   : > { %1813 = vmatpush2.msra.mxu0 %v7030_v43 }
 0x2b7   : > { %1814 = vmatprep.subr.mxu0 %v7034_v4 }
 0x2b8   : > { %1815 = vmatpush2.msra.mxu0 %v7038_v52 }
 0x2b9   : > { %1906 = vmatprep.subr.mxu0 %v7042_v62 }
 0x2f3   : > { %v1377_v6 = vpop.f32.mrf.mxu1  ;;  %v1454_v56 = vpop.f32.mrf.mxu0 }
 0x2f5   : > { %v1379_v17 = vpop.f32.mrf.mxu1  ;;  %v1456_v2 = vpop.f32.mrf.mxu0 }
 0x2f9   : > { %v1383_v60 = vpop.f32.mrf.mxu1  ;;  %v1460_v58 = vpop.f32.mrf.mxu0 }
 0x2fb   : > { %v1385_v13 = vpop.f32.mrf.mxu1  ;;  %v1462_v43 = vpop.f32.mrf.mxu0 }
 0x336   : > { %v1531_v8 = vpop.f32.mrf.mxu1  ;;  %v1608_v10 = vpop.f32.mrf.mxu0 }
 0x337   : > { %v1623_v62 = vand.u32 2147483647, %v1608_v10  ;;  %v1619_v46 = vand.u32 2147483647, %v1531_v8  ;;  %v7191_v10 = vld [vmem:[%s5422_s2 + $0x3e0] sm:$0xff]  ;;  %v7195_v8 = vld [vmem:[%s5422_s2 + $0x3f0] sm:$0xff] }
 0x338   : > { %v1533_v35 = vpop.f32.mrf.mxu1  ;;  %v1610_v4 = vpop.f32.mrf.mxu0 }
 0x339   : > { %v1624_v51 = vand.u32 2147483647, %v1610_v4  ;;  %v1620_v48 = vand.u32 2147483647, %v1533_v35  ;;  %v1309_v4 = vld [vmem:[%s9085_s6] sm:$0xff] }
 0x33a   : > { %v1537_v27 = vpop.f32.mrf.mxu1  ;;  %v1614_v19 = vpop.f32.mrf.mxu0 }
 0x33b   : > { %v1625_v7 = vand.u32 2147483647, %v1614_v19  ;;  %v1621_v50 = vand.u32 2147483647, %v1537_v27 }
 0x33c   : > { %v1616_v55 = vpop.f32.mrf.mxu0  ;;  %v1539_v11 = vpop.f32.mrf.mxu1 }
 0x33d   : > { %v1626_v52 = vand.u32 2147483647, %v1616_v55  ;;  %v1622_v63 = vand.u32 2147483647, %v1539_v11 }
 0x33f   : > { %1646 = vmatprep.subr.mxu1 %v1626_v52  ;;  %v7223_v52 = vld [vmem:[%s5422_s2 + $0x378] sm:$0xff] }
 0x340   : > { %1647 = vmatpush1.msra.mxu1 %v1625_v7 }
 0x341   : > { %1648 = vmatprep.subr.mxu1 %v1624_v51 }
 0x342   : > { %1649 = vmatpush1.msra.mxu1 %v1623_v62  ;;  %v7229_v62 = vld [vmem:[%s5422_s2 + $0x360] sm:$0xff] }
 0x343   : > { %1650 = vmatprep.subr.mxu1 %v1622_v63 }
 0x344   : > { %1651 = vmatpush1.msra.mxu1 %v1621_v50 }
 0x345   : > { %1652 = vmatprep.subr.mxu1 %v1620_v48  ;;  %v1738_v48 = vpop.permute.xlu1 %1737 }
 0x346   : > { %1653 = vmatpush1.msra.mxu1 %v1619_v46  ;;  %v1310_v46 = vld [vmem:[%s9085_s6 + $0x8] sm:$0xff] }
 0x347   : > { %1654 = vmatprep.subr.mxu1 %v1462_v43  ;;  %v7237_v43 = vld [vmem:[%s5422_s2 + $0x328] sm:$0xff] }
 0x348   : > { %1655 = vmatpush1.msra.mxu1 %v1460_v58  ;;  %v7203_v58 = vld [vmem:[%s5422_s2 + $0x3b8] sm:$0xff] }
 0x349   : > { %1656 = vmatprep.subr.mxu1 %v1456_v2  ;;  %v1743_v19 = vpop.permute.xlu1 %1742  ;;  %v7233_v2 = vld [vmem:[%s5422_s2 + $0x370] sm:$0xff] }
 0x34a   : > { %1657 = vmatpush1.msra.mxu1 %v1454_v56 }
 0x34b   : > { %1658 = vmatprep.subr.mxu1 %v1385_v13  ;;  %v7199_v13 = vld [vmem:[%s5422_s2 + $0x3a8] sm:$0xff] }
 0x34c   : > { %1659 = vmatpush1.msra.mxu1 %v1383_v60  ;;  %v7207_v60 = vld [vmem:[%s5422_s2 + $0x3a0] sm:$0xff] }
 0x34d   : > { %1660 = vmatprep.subr.mxu1 %v1379_v17  ;;  %v7211_v17 = vld [vmem:[%s5422_s2 + $0x3b0] sm:$0xff] }
 0x34e   : > { %1661 = vmatpush1.msra.mxu1 %v1377_v6  ;;  %v7219_v6 = vld [vmem:[%s5422_s2 + $0x368] sm:$0xff] }
 0x34f   : > { %1662 = vmatprep.subr.mxu1 %v6660_v0 }
 0x350   : > { %1663 = vmatpush1.msra.mxu1 %v6664_v25 }
 0x351   : > { %1664 = vmatprep.subr.mxu1 %v6651_v26 }
 0x352   : > { %1665 = vmatpush1.msra.mxu1 %v6654_v54 }
 0x353   : > { %4679 = vmatmul.mubr.msk.f32.vlgmr.msra.gmra.mxu1 %vm1627_vm1, %v1309_v4  ;;  %1829 = vmatprep.subr.mxu1 %v6434_v21  ;;  %v9859_v21 = vld [vmem:[#allocation14_spill] sm:$0xff]  ;;  %v7242_v4 = vld [vmem:[%s5422_s2 + $0x338] sm:$0xff] }
 0x354   : > { %1704 = vmatprep.mubr.f32.mxu1 %v9799_v59  ;;  %1830 = vmatpush1.msra.mxu1 %v6442_v29  ;;  %v9860_v29 = vld [vmem:[#allocation16_spill] sm:$0xff] }
 0x355   : > { %1831 = vmatprep.subr.mxu1 %v6446_v33  ;;  %v9861_v33 = vld [vmem:[#allocation18_spill] sm:$0xff] }
 0x356   : > { %1832 = vmatpush1.msra.mxu1 %v6450_v37  ;;  %v9862_v37 = vld [vmem:[#allocation20_spill] sm:$0xff] }
 0x357   : > { %4680 = vmatmul.mubr.msk.f32.gmra.mxu1 %vm1627_vm1, %v1310_v46  ;;  %1833 = vmatprep.subr.mxu1 %v6454_v41  ;;  %v9863_v41 = vld [vmem:[#allocation22_spill] sm:$0xff] }
 0x358   : > { %1834 = vmatpush1.msra.mxu1 %v6458_v45  ;;  %v9864_v45 = vld [vmem:[#allocation24_spill] sm:$0xff]  ;;  %v7247_v46 = vld [vmem:[%s5422_s2 + $0x320] sm:$0xff] }
 0x359   : > { %1835 = vmatprep.subr.mxu1 %v6462_v47  ;;  %v9865_v47 = vld [vmem:[#allocation26_spill] sm:$0xff] }
 0x35a   : > { %1836 = vmatpush1.msra.mxu1 %v6466_v49  ;;  %v9866_v49 = vld [vmem:[#allocation150_spill] sm:$0xff] }
 0x35b   : > { %1837 = vmatprep.subr.mxu1 %v6470_v53  ;;  %v9867_v53 = vld [vmem:[#allocation151_spill] sm:$0xff] }
 0x35c   : > { %1838 = vmatpush1.msra.mxu1 %v6474_v57  ;;  %v9868_v57 = vld [vmem:[#allocation152_spill] sm:$0xff] }
 0x35d   : > { %1839 = vmatprep.subr.mxu1 %v6478_v61  ;;  %v9869_v61 = vld [vmem:[#allocation153_spill] sm:$0xff] }
 0x35e   : > { %1840 = vmatpush1.msra.mxu1 %v6482_v1  ;;  %v7105_v1 = vld [vmem:[%s5422_s2 + $0x618] sm:$0xff] }
 0x35f   : > { %1841 = vmatprep.subr.mxu1 %v6486_v3  ;;  %v7109_v3 = vld [vmem:[%s5422_s2 + $0x610] sm:$0xff] }
 0x360   : > { %1842 = vmatpush1.msra.mxu1 %v6490_v5  ;;  %v7113_v5 = vld [vmem:[%s5422_s2 + $0x5d8] sm:$0xff] }
 0x361   : > { %1843 = vmatprep.subr.mxu1 %v6494_v9  ;;  %v7117_v9 = vld [vmem:[%s5422_s2 + $0x5d0] sm:$0xff] }
 0x362   : > { %1844 = vmatpush1.msra.mxu1 %v6498_v15  ;;  %v7121_v15 = vld [vmem:[%s5422_s2 + $0x598] sm:$0xff] }
 0x363   : > { %1845 = vmatprep.subr.mxu1 %v6502_v23  ;;  %v7125_v23 = vld [vmem:[%s5422_s2 + $0x590] sm:$0xff] }
 0x364   : > { %1846 = vmatpush1.msra.mxu1 %v6506_v31  ;;  %v7129_v31 = vld [vmem:[%s5422_s2 + $0x558] sm:$0xff] }
 0x365   : > { %1847 = vmatprep.subr.mxu1 %v6510_v39  ;;  %v7133_v39 = vld [vmem:[%s5422_s2 + $0x550] sm:$0xff] }
 0x366   : > { %1848 = vmatpush1.msra.mxu1 %v6514_v12  ;;  %v7137_v12 = vld [vmem:[%s5422_s2 + $0x518] sm:$0xff] }
 0x367   : > { %1849 = vmatprep.subr.mxu1 %v6518_v14  ;;  %v7141_v14 = vld [vmem:[%s5422_s2 + $0x510] sm:$0xff] }
 0x368   : > { %1850 = vmatpush1.msra.mxu1 %v6522_v16  ;;  %v7145_v16 = vld [vmem:[%s5422_s2 + $0x4d8] sm:$0xff] }
 0x369   : > { %1851 = vmatprep.subr.mxu1 %v6526_v18  ;;  %v7149_v18 = vld [vmem:[%s5422_s2 + $0x4d0] sm:$0xff] }
 0x36a   : > { %1852 = vmatpush1.msra.mxu1 %v6530_v20  ;;  %v7153_v20 = vld [vmem:[%s5422_s2 + $0x498] sm:$0xff] }
 0x36b   : > { %1853 = vmatprep.subr.mxu1 %v6534_v22  ;;  %v7157_v22 = vld [vmem:[%s5422_s2 + $0x490] sm:$0xff] }
 0x36c   : > { %1854 = vmatpush1.msra.mxu1 %v6538_v24  ;;  %v7161_v24 = vld [vmem:[%s5422_s2 + $0x458] sm:$0xff] }
 0x36d   : > { %1855 = vmatprep.subr.mxu1 %v6542_v28  ;;  %v7165_v28 = vld [vmem:[%s5422_s2 + $0x450] sm:$0xff] }
 0x36e   : > { %1856 = vmatpush1.msra.mxu1 %v6546_v30  ;;  %v7169_v30 = vld [vmem:[%s5422_s2 + $0x418] sm:$0xff] }
 0x36f   : > { %1857 = vmatprep.subr.mxu1 %v6550_v32  ;;  %v7173_v32 = vld [vmem:[%s5422_s2 + $0x410] sm:$0xff] }
 0x370   : > { %1858 = vmatpush1.msra.mxu1 %v6554_v34  ;;  %v7177_v34 = vld [vmem:[%s5422_s2 + $0x3f8] sm:$0xff] }
 0x371   : > { %1859 = vmatprep.subr.mxu1 %v6558_v36 }
 0x372   : > { %1860 = vmatpush1.msra.mxu1 %v6562_v38 }
 0x373   : > { %1861 = vmatprep.subr.mxu1 %v6566_v40  ;;  %v1721_v40 = vpop.permute.xlu0 %1720 }
 0x374   : > { %1862 = vmatpush2.msra.mxu1 %v6570_v42 }
 0x375   : > { %1863 = vmatprep.subr.mxu1 %v6574_v44 }
 0x376   : > { %1864 = vmatpush2.msra.mxu1 %v9859_v21  ;;  %v7251_v21 = vld [vmem:[%s5422_s2 + $0x330] sm:$0xff] }
 0x377   : > { %1865 = vmatprep.subr.mxu1 %v9860_v29  ;;  %v1726_v11 = vpop.permute.xlu0 %1725  ;;  %v7255_v29 = vld [vmem:[%s5422_s2 + $0x2e8] sm:$0xff] }
 0x378   : > { %1866 = vmatpush2.msra.mxu1 %v9861_v33  ;;  %v7259_v33 = vld [vmem:[%s5422_s2 + $0x2f8] sm:$0xff] }
 0x379   : > { %1867 = vmatprep.subr.mxu1 %v9862_v37  ;;  %v7263_v37 = vld [vmem:[%s5422_s2 + $0x2e0] sm:$0xff] }
 0x37a   : > { %1868 = vmatpush2.msra.mxu1 %v9863_v41  ;;  %9870 = vst [vmem:[#allocation72_spill] sm:$0xff] %v7263_v37  ;;  %v7267_v41 = vld [vmem:[%s5422_s2 + $0x2f0] sm:$0xff] }
 0x37b   : > { %1869 = vmatprep.subr.mxu1 %v9864_v45  ;;  %9871 = vst [vmem:[#allocation73_spill] sm:$0xff] %v7267_v41  ;;  %v7271_v45 = vld [vmem:[%s5422_s2 + $0x2a8] sm:$0xff] }
 0x37c   : > { %1870 = vmatpush2.msra.mxu1 %v9865_v47  ;;  %9872 = vst [vmem:[#allocation74_spill] sm:$0xff] %v7271_v45  ;;  %v7275_v47 = vld [vmem:[%s5422_s2 + $0x2b8] sm:$0xff] }
 0x37d   : > { %1871 = vmatprep.subr.mxu1 %v9866_v49  ;;  %9873 = vst [vmem:[#allocation75_spill] sm:$0xff] %v7275_v47  ;;  %v7279_v49 = vld [vmem:[%s5422_s2 + $0x2a0] sm:$0xff] }
 0x37e   : > { %1872 = vmatpush2.msra.mxu1 %v9867_v53  ;;  %9874 = vst [vmem:[#allocation76_spill] sm:$0xff] %v7279_v49  ;;  %v7283_v53 = vld [vmem:[%s5422_s2 + $0x2b0] sm:$0xff] }
 0x37f   : > { %1873 = vmatprep.subr.mxu1 %v9868_v57  ;;  %9875 = vst [vmem:[#allocation77_spill] sm:$0xff] %v7283_v53  ;;  %v7287_v57 = vld [vmem:[%s5422_s2 + $0x268] sm:$0xff] }
 0x380   : > { %1874 = vmatpush2.msra.mxu1 %v9869_v61  ;;  %9876 = vst [vmem:[#allocation78_spill] sm:$0xff] %v7287_v57  ;;  %v7291_v61 = vld [vmem:[%s5422_s2 + $0x278] sm:$0xff] }
 0x381   : > { %1875 = vmatprep.subr.mxu1 %v7105_v1  ;;  %9877 = vst [vmem:[#allocation79_spill] sm:$0xff] %v7291_v61 }
 0x382   : > { %1876 = vmatpush2.msra.mxu1 %v7109_v3 }
 0x383   : > { %1877 = vmatprep.subr.mxu1 %v7113_v5 }
 0x384   : > { %1878 = vmatpush2.msra.mxu1 %v7117_v9 }
 0x385   : > { %1879 = vmatprep.subr.mxu1 %v7121_v15 }
 0x386   : > { %1880 = vmatpush2.msra.mxu1 %v7125_v23 }
 0x387   : > { %1881 = vmatprep.subr.mxu1 %v7129_v31 }
 0x388   : > { %1882 = vmatpush2.msra.mxu1 %v7133_v39 }
 0x389   : > { %1883 = vmatprep.subr.mxu1 %v7137_v12 }
 0x38a   : > { %1884 = vmatpush2.msra.mxu1 %v7141_v14 }
 0x38b   : > { %1885 = vmatprep.subr.mxu1 %v7145_v16 }
 0x38c   : > { %1886 = vmatpush2.msra.mxu1 %v7149_v18 }
 0x38d   : > { %1887 = vmatprep.subr.mxu1 %v7153_v20 }
 0x38e   : > { %1888 = vmatpush2.msra.mxu1 %v7157_v22 }
 0x38f   : > { %1889 = vmatprep.subr.mxu1 %v7161_v24 }
 0x390   : > { %1890 = vmatpush2.msra.mxu1 %v7165_v28 }
 0x391   : > { %1891 = vmatprep.subr.mxu1 %v7169_v30 }
 0x392   : > { %1892 = vmatpush2.msra.mxu1 %v7173_v32 }
 0x393   : > { %1983 = vmatprep.subr.mxu1 %v7177_v34 }
 0x413   : > { %v1700_v36 = vpop.f32.mrf.mxu1 }
 0x414   : > { %v1711_v38 = vmax.f32 %v1700_v36, 0.0  ;;  %v7295_v36 = vld [vmem:[%s5422_s2 + $0x260] sm:$0xff] }
 0x415   : > { %v1702_v42 = vpop.f32.mrf.mxu1  ;;  %9878 = vst [vmem:[#allocation80_spill] sm:$0xff] %v7295_v36 }
 0x416   : > { %v1712_v44 = vmax.f32 %v1702_v42, 0.0  ;;  %v1728_v50 = vmul.f32 %v1721_v40, %v1711_v38  ;;  %v7299_v38 = vld [vmem:[%s5422_s2 + $0x270] sm:$0xff]  ;;  %v7307_v42 = vld [vmem:[%s5422_s2 + $0x238] sm:$0xff] }
 0x417   : > { %v1706_v54 = vpop.f32.mrf.mxu1  ;;  %9879 = vst [vmem:[#allocation81_spill] sm:$0xff] %v7299_v38  ;;  %9881 = vst [vmem:[#allocation83_spill] sm:$0xff] %v7307_v42 }
 0x418   : > { %v1729_v25 = vmul.f32 %v1721_v40, %v1712_v44  ;;  %v1713_v26 = vmax.f32 %v1706_v54, 0.0  ;;  %v7182_v7 = vadd.f32 %v1738_v48, %v1728_v50  ;;  %v7303_v40 = vld [vmem:[%s5422_s2 + $0x228] sm:$0xff]  ;;  %v7311_v44 = vld [vmem:[%s5422_s2 + $0x220] sm:$0xff]  ;;  %v7323_v54 = vld [vmem:[%s5422_s2 + $0x1f8] sm:$0xff] }
 0x419   : > { %v1708_v0 = vpop.f32.mrf.mxu1  ;;  %9880 = vst [vmem:[#allocation82_spill] sm:$0xff] %v7303_v40  ;;  %9882 = vst [vmem:[#allocation84_spill] sm:$0xff] %v7311_v44  ;;  %v7319_v50 = vld [vmem:[%s5422_s2 + $0x1e8] sm:$0xff] }
 0x41a   : > { %v7180_v63 = vadd.f32 %v1738_v48, %v1729_v25  ;;  %v1714_v51 = vmax.f32 %v1708_v0, 0.0  ;;  %v1730_v27 = vmul.f32 %v1726_v11, %v1713_v26  ;;  %v7315_v48 = vld [vmem:[%s5422_s2 + $0x230] sm:$0xff]  ;;  %9884 = vst [vmem:[#allocation86_spill] sm:$0xff] %v7319_v50  ;;  %9885 = vst [vmem:[#allocation87_spill] sm:$0xff] %v7323_v54  ;;  %v7327_v25 = vld [vmem:[%s5422_s2 + $0x1e0] sm:$0xff] }
 0x41b   : > { %9883 = vst [vmem:[#allocation85_spill] sm:$0xff] %v7315_v48  ;;  %9886 = vst [vmem:[#allocation88_spill] sm:$0xff] %v7327_v25  ;;  %v7331_v26 = vld [vmem:[%s5422_s2 + $0x1f0] sm:$0xff]  ;;  %v7335_v0 = vld [vmem:[%s5422_s2 + $0x1a8] sm:$0xff] }
 0x41c   : > { %v1731_v55 = vmul.f32 %v1726_v11, %v1714_v51  ;;  %1816 = vmatprep.mubr.f32.mxu0 %v7180_v63  ;;  %1893 = vmatprep.mubr.f32.mxu1 %v7180_v63  ;;  %v7214_v56 = vadd.f32 %v1743_v19, %v1730_v27  ;;  %9887 = vst [vmem:[#allocation89_spill] sm:$0xff] %v7331_v26  ;;  %9888 = vst [vmem:[#allocation90_spill] sm:$0xff] %v7335_v0  ;;  %v7339_v51 = vld [vmem:[%s5422_s2 + $0x1b8] sm:$0xff]  ;;  %v7343_v11 = vld [vmem:[%s5422_s2 + $0x1a0] sm:$0xff] }
 0x41d   : > { %1817 = vmatmul.mubr.f32.vlgmr.msra.gmra.mxu0 %v7182_v7  ;;  %1894 = vmatmul.mubr.f32.vlgmr.msra.gmra.mxu1 %v7182_v7  ;;  %9889 = vst [vmem:[#allocation91_spill] sm:$0xff] %v7339_v51  ;;  %9890 = vst [vmem:[#allocation92_spill] sm:$0xff] %v7343_v11  ;;  %v7355_v27 = vld [vmem:[%s5422_s2 + $0x178] sm:$0xff] }
 0x41e   : > { %v7188_v35 = vadd.f32 %v1743_v19, %v1731_v55  ;;  %1907 = vmatpush1.msra.mxu0 %v7191_v10  ;;  %1984 = vmatpush1.msra.mxu1 %v7195_v8  ;;  %v7347_v55 = vld [vmem:[%s5422_s2 + $0x1b0] sm:$0xff]  ;;  %v7351_v19 = vld [vmem:[%s5422_s2 + $0x168] sm:$0xff]  ;;  %9893 = vst [vmem:[#allocation95_spill] sm:$0xff] %v7355_v27 }
 0x41f   : > { %1908 = vmatprep.subr.mxu0 %v7199_v13  ;;  %1985 = vmatprep.subr.mxu1 %v7203_v58  ;;  %9891 = vst [vmem:[#allocation93_spill] sm:$0xff] %v7347_v55  ;;  %9892 = vst [vmem:[#allocation94_spill] sm:$0xff] %v7351_v19 }
 0x420   : > { %1909 = vmatpush1.msra.mxu0 %v7207_v60  ;;  %1986 = vmatpush1.msra.mxu1 %v7211_v17 }
 0x421   : > { %1822 = vmatprep.mubr.f32.mxu0 %v7188_v35  ;;  %1899 = vmatprep.mubr.f32.mxu1 %v7188_v35 }
 0x422   : > { %1910 = vmatprep.subr.mxu0 %v7219_v6  ;;  %1987 = vmatprep.subr.mxu1 %v7223_v52 }
 0x423   : > { %1823 = vmatmul.mubr.f32.gmra.mxu0 %v7214_v56  ;;  %1900 = vmatmul.mubr.f32.gmra.mxu1 %v7214_v56 }
 0x424   : > { %1911 = vmatpush1.msra.mxu0 %v7229_v62  ;;  %1988 = vmatpush1.msra.mxu1 %v7233_v2 }
 0x425   : > { %1912 = vmatprep.subr.mxu0 %v7237_v43  ;;  %1970 = vmatprep.mubr.f32.mxu0 %v7180_v63 }
 0x426   : > { %1989 = vmatprep.subr.mxu1 %v7242_v4  ;;  %2047 = vmatprep.mubr.f32.mxu1 %v7180_v63 }
 0x427   : > { %1913 = vmatpush1.msra.mxu0 %v7247_v46  ;;  %1990 = vmatpush1.msra.mxu1 %v7251_v21 }
 0x428   : > { %1914 = vmatprep.subr.mxu0 %v7255_v29  ;;  %1991 = vmatprep.subr.mxu1 %v7259_v33 }
 0x429   : > { %1915 = vmatpush1.msra.mxu0 %v7263_v37  ;;  %1992 = vmatpush1.msra.mxu1 %v7267_v41 }
 0x42a   : > { %1916 = vmatprep.subr.mxu0 %v7271_v45  ;;  %1993 = vmatprep.subr.mxu1 %v7275_v47 }
 0x42b   : > { %1917 = vmatpush1.msra.mxu0 %v7279_v49  ;;  %1994 = vmatpush1.msra.mxu1 %v7283_v53 }
 0x42c   : > { %1918 = vmatprep.subr.mxu0 %v7287_v57  ;;  %1995 = vmatprep.subr.mxu1 %v7291_v61 }
 0x42d   : > { %1919 = vmatpush1.msra.mxu0 %v7295_v36  ;;  %1996 = vmatpush1.msra.mxu1 %v7299_v38 }
 0x42e   : > { %1920 = vmatprep.subr.mxu0 %v7303_v40  ;;  %1997 = vmatprep.subr.mxu1 %v7307_v42 }
 0x42f   : > { %1921 = vmatpush1.msra.mxu0 %v7311_v44  ;;  %1998 = vmatpush1.msra.mxu1 %v7315_v48  ;;  %v9986_v48 = vld [vmem:[#allocation12_spill] sm:$0xff] }
 0x430   : > { %1922 = vmatprep.subr.mxu0 %v7319_v50  ;;  %1999 = vmatprep.subr.mxu1 %v7323_v54  ;;  %v9984_v54 = vld [vmem:[#allocation10_spill] sm:$0xff]  ;;  %v9985_v50 = vld [vmem:[#allocation11_spill] sm:$0xff] }
 0x431   : > { %1923 = vmatpush1.msra.mxu0 %v7327_v25  ;;  %2000 = vmatpush1.msra.mxu1 %v7331_v26  ;;  %v9980_v26 = vld [vmem:[#allocation6_spill] sm:$0xff]  ;;  %v9981_v25 = vld [vmem:[#allocation7_spill] sm:$0xff] }
 0x432   : > { %1924 = vmatprep.subr.mxu0 %v7335_v0  ;;  %2001 = vmatprep.subr.mxu1 %v7339_v51  ;;  %v7359_v51 = vld [vmem:[%s5422_s2 + $0x160] sm:$0xff] }
 0x433   : > { %1925 = vmatpush1.msra.mxu0 %v7343_v11  ;;  %2002 = vmatpush1.msra.mxu1 %v7347_v55  ;;  %9894 = vst [vmem:[#allocation96_spill] sm:$0xff] %v7359_v51  ;;  %v7363_v11 = vld [vmem:[%s5422_s2 + $0x170] sm:$0xff]  ;;  %v7367_v55 = vld [vmem:[%s5422_s2 + $0x128] sm:$0xff]  ;;  %v7679_v0 = vld [vmem:[%s5422_s2 + $0x460] sm:$0xff] }
 0x434   : > { %1926 = vmatprep.subr.mxu0 %v7351_v19  ;;  %2003 = vmatprep.subr.mxu1 %v7355_v27  ;;  %9895 = vst [vmem:[#allocation97_spill] sm:$0xff] %v7363_v11  ;;  %9896 = vst [vmem:[#allocation98_spill] sm:$0xff] %v7367_v55  ;;  %v7371_v19 = vld [vmem:[%s5422_s2 + $0x138] sm:$0xff]  ;;  %v7375_v27 = vld [vmem:[%s5422_s2 + $0x120] sm:$0xff] }
 0x435   : > { %1927 = vmatpush1.msra.mxu0 %v7359_v51  ;;  %2004 = vmatpush1.msra.mxu1 %v7363_v11  ;;  %9897 = vst [vmem:[#allocation99_spill] sm:$0xff] %v7371_v19  ;;  %9898 = vst [vmem:[#allocation100_spill] sm:$0xff] %v7375_v27  ;;  %v7379_v51 = vld [vmem:[%s5422_s2 + $0x130] sm:$0xff]  ;;  %v7383_v11 = vld [vmem:[%s5422_s2 + $0xe8] sm:$0xff] }
 0x436   : > { %1928 = vmatprep.subr.mxu0 %v7367_v55  ;;  %2005 = vmatprep.subr.mxu1 %v7371_v19  ;;  %9899 = vst [vmem:[#allocation101_spill] sm:$0xff] %v7379_v51  ;;  %9900 = vst [vmem:[#allocation102_spill] sm:$0xff] %v7383_v11  ;;  %v7387_v55 = vld [vmem:[%s5422_s2 + $0xf8] sm:$0xff]  ;;  %v7391_v19 = vld [vmem:[%s5422_s2 + $0xe0] sm:$0xff] }
 0x437   : > { %1929 = vmatpush1.msra.mxu0 %v7375_v27  ;;  %2006 = vmatpush1.msra.mxu1 %v7379_v51  ;;  %9901 = vst [vmem:[#allocation103_spill] sm:$0xff] %v7387_v55  ;;  %9902 = vst [vmem:[#allocation104_spill] sm:$0xff] %v7391_v19  ;;  %v7395_v27 = vld [vmem:[%s5422_s2 + $0xf0] sm:$0xff]  ;;  %v7399_v51 = vld [vmem:[%s5422_s2 + $0xa8] sm:$0xff] }
 0x438   : > { %1930 = vmatprep.subr.mxu0 %v7383_v11  ;;  %2007 = vmatprep.subr.mxu1 %v7387_v55  ;;  %9903 = vst [vmem:[#allocation105_spill] sm:$0xff] %v7395_v27  ;;  %9904 = vst [vmem:[#allocation106_spill] sm:$0xff] %v7399_v51  ;;  %v7403_v11 = vld [vmem:[%s5422_s2 + $0xb8] sm:$0xff]  ;;  %v7407_v55 = vld [vmem:[%s5422_s2 + $0xa0] sm:$0xff] }
 0x439   : > { %1931 = vmatpush1.msra.mxu0 %v7391_v19  ;;  %2008 = vmatpush1.msra.mxu1 %v7395_v27  ;;  %9905 = vst [vmem:[#allocation107_spill] sm:$0xff] %v7403_v11  ;;  %9906 = vst [vmem:[#allocation108_spill] sm:$0xff] %v7407_v55  ;;  %v7411_v19 = vld [vmem:[%s5422_s2 + $0xb0] sm:$0xff]  ;;  %v7415_v27 = vld [vmem:[%s5422_s2 + $0x68] sm:$0xff] }
 0x43a   : > { %1932 = vmatprep.subr.mxu0 %v7399_v51  ;;  %2009 = vmatprep.subr.mxu1 %v7403_v11  ;;  %9907 = vst [vmem:[#allocation109_spill] sm:$0xff] %v7411_v19  ;;  %9908 = vst [vmem:[#allocation110_spill] sm:$0xff] %v7415_v27  ;;  %v7419_v51 = vld [vmem:[%s5422_s2 + $0x78] sm:$0xff]  ;;  %v7423_v11 = vld [vmem:[%s5422_s2 + $0x60] sm:$0xff] }
 0x43b   : > { %1933 = vmatpush1.msra.mxu0 %v7407_v55  ;;  %2010 = vmatpush1.msra.mxu1 %v7411_v19  ;;  %9909 = vst [vmem:[#allocation111_spill] sm:$0xff] %v7419_v51  ;;  %9910 = vst [vmem:[#allocation112_spill] sm:$0xff] %v7423_v11  ;;  %v7427_v55 = vld [vmem:[%s5422_s2 + $0x70] sm:$0xff]  ;;  %v7431_v19 = vld [vmem:[%s5422_s2 + $0x28] sm:$0xff] }
 0x43c   : > { %1934 = vmatprep.subr.mxu0 %v7415_v27  ;;  %2011 = vmatprep.subr.mxu1 %v7419_v51  ;;  %9911 = vst [vmem:[#allocation113_spill] sm:$0xff] %v7427_v55  ;;  %9912 = vst [vmem:[#allocation114_spill] sm:$0xff] %v7431_v19  ;;  %v7435_v27 = vld [vmem:[%s5422_s2 + $0x38] sm:$0xff]  ;;  %v7439_v51 = vld [vmem:[%s5422_s2 + $0x20] sm:$0xff] }
 0x43d   : > { %1935 = vmatpush1.msra.mxu0 %v7423_v11  ;;  %2012 = vmatpush1.msra.mxu1 %v7427_v55  ;;  %9913 = vst [vmem:[#allocation115_spill] sm:$0xff] %v7435_v27  ;;  %9914 = vst [vmem:[#allocation116_spill] sm:$0xff] %v7439_v51  ;;  %v7443_v11 = vld [vmem:[%s5422_s2 + $0x30] sm:$0xff]  ;;  %v7447_v55 = vld [vmem:[%s5422_s2 + $0x7e8] sm:$0xff] }
 0x43e   : > { %1936 = vmatprep.subr.mxu0 %v7431_v19  ;;  %2013 = vmatprep.subr.mxu1 %v7435_v27  ;;  %9915 = vst [vmem:[#allocation117_spill] sm:$0xff] %v7443_v11  ;;  %9916 = vst [vmem:[#allocation118_spill] sm:$0xff] %v7447_v55  ;;  %v7451_v19 = vld [vmem:[%s5422_s2 + $0x7f8] sm:$0xff]  ;;  %v7455_v27 = vld [vmem:[%s5422_s2 + $0x7e0] sm:$0xff] }
 0x43f   : > { %1937 = vmatpush1.msra.mxu0 %v7439_v51  ;;  %2014 = vmatpush1.msra.mxu1 %v7443_v11  ;;  %9917 = vst [vmem:[#allocation119_spill] sm:$0xff] %v7451_v19  ;;  %9918 = vst [vmem:[#allocation120_spill] sm:$0xff] %v7455_v27  ;;  %v7459_v51 = vld [vmem:[%s5422_s2 + $0x7f0] sm:$0xff]  ;;  %v7463_v11 = vld [vmem:[%s5422_s2 + $0x7a8] sm:$0xff] }
 0x440   : > { %1938 = vmatprep.subr.mxu0 %v7447_v55  ;;  %2015 = vmatprep.subr.mxu1 %v7451_v19  ;;  %9919 = vst [vmem:[#allocation121_spill] sm:$0xff] %v7459_v51  ;;  %9920 = vst [vmem:[#allocation122_spill] sm:$0xff] %v7463_v11  ;;  %v7467_v55 = vld [vmem:[%s5422_s2 + $0x7b8] sm:$0xff]  ;;  %v7471_v19 = vld [vmem:[%s5422_s2 + $0x7a0] sm:$0xff] }
 0x441   : > { %1939 = vmatpush2.msra.mxu0 %v7455_v27  ;;  %2016 = vmatpush2.msra.mxu1 %v7459_v51  ;;  %9921 = vst [vmem:[#allocation123_spill] sm:$0xff] %v7467_v55  ;;  %9922 = vst [vmem:[#allocation124_spill] sm:$0xff] %v7471_v19  ;;  %v7475_v27 = vld [vmem:[%s5422_s2 + $0x7b0] sm:$0xff]  ;;  %v7479_v51 = vld [vmem:[%s5422_s2 + $0x768] sm:$0xff] }
 0x442   : > { %1940 = vmatprep.subr.mxu0 %v7463_v11  ;;  %2017 = vmatprep.subr.mxu1 %v7467_v55  ;;  %9923 = vst [vmem:[#allocation125_spill] sm:$0xff] %v7475_v27  ;;  %9924 = vst [vmem:[#allocation126_spill] sm:$0xff] %v7479_v51  ;;  %v7483_v11 = vld [vmem:[%s5422_s2 + $0x778] sm:$0xff]  ;;  %v7487_v55 = vld [vmem:[%s5422_s2 + $0x760] sm:$0xff] }
 0x443   : > { %1941 = vmatpush2.msra.mxu0 %v7471_v19  ;;  %2018 = vmatpush2.msra.mxu1 %v7475_v27  ;;  %9925 = vst [vmem:[#allocation127_spill] sm:$0xff] %v7483_v11  ;;  %9926 = vst [vmem:[#allocation128_spill] sm:$0xff] %v7487_v55  ;;  %v7491_v19 = vld [vmem:[%s5422_s2 + $0x770] sm:$0xff]  ;;  %v7495_v27 = vld [vmem:[%s5422_s2 + $0x728] sm:$0xff] }
 0x444   : > { %1942 = vmatprep.subr.mxu0 %v7479_v51  ;;  %2019 = vmatprep.subr.mxu1 %v7483_v11  ;;  %9927 = vst [vmem:[#allocation129_spill] sm:$0xff] %v7491_v19  ;;  %9928 = vst [vmem:[#allocation130_spill] sm:$0xff] %v7495_v27  ;;  %v7499_v51 = vld [vmem:[%s5422_s2 + $0x738] sm:$0xff]  ;;  %v7503_v11 = vld [vmem:[%s5422_s2 + $0x720] sm:$0xff] }
 0x445   : > { %1943 = vmatpush2.msra.mxu0 %v7487_v55  ;;  %2020 = vmatpush2.msra.mxu1 %v7491_v19  ;;  %9929 = vst [vmem:[#allocation131_spill] sm:$0xff] %v7499_v51  ;;  %9930 = vst [vmem:[#allocation132_spill] sm:$0xff] %v7503_v11  ;;  %v7507_v55 = vld [vmem:[%s5422_s2 + $0x730] sm:$0xff]  ;;  %v7511_v19 = vld [vmem:[%s5422_s2 + $0x6e8] sm:$0xff] }
 0x446   : > { %1944 = vmatprep.subr.mxu0 %v7495_v27  ;;  %2021 = vmatprep.subr.mxu1 %v7499_v51  ;;  %9931 = vst [vmem:[#allocation133_spill] sm:$0xff] %v7507_v55  ;;  %9932 = vst [vmem:[#allocation134_spill] sm:$0xff] %v7511_v19  ;;  %v7515_v27 = vld [vmem:[%s5422_s2 + $0x6f8] sm:$0xff]  ;;  %v7519_v51 = vld [vmem:[%s5422_s2 + $0x6e0] sm:$0xff] }
 0x447   : > { %1945 = vmatpush2.msra.mxu0 %v7503_v11  ;;  %2022 = vmatpush2.msra.mxu1 %v7507_v55  ;;  %9933 = vst [vmem:[#allocation135_spill] sm:$0xff] %v7515_v27  ;;  %9934 = vst [vmem:[#allocation136_spill] sm:$0xff] %v7519_v51  ;;  %v7523_v11 = vld [vmem:[%s5422_s2 + $0x6f0] sm:$0xff]  ;;  %v7527_v55 = vld [vmem:[%s5422_s2 + $0x6a8] sm:$0xff] }
 0x448   : > { %1946 = vmatprep.subr.mxu0 %v7511_v19  ;;  %2023 = vmatprep.subr.mxu1 %v7515_v27  ;;  %9935 = vst [vmem:[#allocation137_spill] sm:$0xff] %v7523_v11  ;;  %9936 = vst [vmem:[#allocation138_spill] sm:$0xff] %v7527_v55  ;;  %v7531_v19 = vld [vmem:[%s5422_s2 + $0x6b8] sm:$0xff]  ;;  %v7535_v27 = vld [vmem:[%s5422_s2 + $0x6a0] sm:$0xff] }
 0x449   : > { %1947 = vmatpush2.msra.mxu0 %v7519_v51  ;;  %2024 = vmatpush2.msra.mxu1 %v7523_v11  ;;  %9937 = vst [vmem:[#allocation139_spill] sm:$0xff] %v7531_v19  ;;  %9938 = vst [vmem:[#allocation140_spill] sm:$0xff] %v7535_v27  ;;  %v7539_v51 = vld [vmem:[%s5422_s2 + $0x6b0] sm:$0xff]  ;;  %v7543_v11 = vld [vmem:[%s5422_s2 + $0x668] sm:$0xff] }
 0x44a   : > { %1948 = vmatprep.subr.mxu0 %v7527_v55  ;;  %2025 = vmatprep.subr.mxu1 %v7531_v19  ;;  %9939 = vst [vmem:[#allocation141_spill] sm:$0xff] %v7539_v51  ;;  %9940 = vst [vmem:[#allocation142_spill] sm:$0xff] %v7543_v11  ;;  %v7547_v55 = vld [vmem:[%s5422_s2 + $0x678] sm:$0xff]  ;;  %v7551_v19 = vld [vmem:[%s5422_s2 + $0x660] sm:$0xff] }
 0x44b   : > { %1949 = vmatpush2.msra.mxu0 %v7535_v27  ;;  %2026 = vmatpush2.msra.mxu1 %v7539_v51  ;;  %9941 = vst [vmem:[#allocation143_spill] sm:$0xff] %v7547_v55  ;;  %9942 = vst [vmem:[#allocation144_spill] sm:$0xff] %v7551_v19  ;;  %v7555_v27 = vld [vmem:[%s5422_s2 + $0x670] sm:$0xff]  ;;  %v7559_v51 = vld [vmem:[%s5422_s2 + $0x628] sm:$0xff] }
 0x44c   : > { %1950 = vmatprep.subr.mxu0 %v7543_v11  ;;  %2027 = vmatprep.subr.mxu1 %v7547_v55  ;;  %9943 = vst [vmem:[#allocation145_spill] sm:$0xff] %v7555_v27  ;;  %9944 = vst [vmem:[#allocation146_spill] sm:$0xff] %v7559_v51  ;;  %v7563_v11 = vld [vmem:[%s5422_s2 + $0x638] sm:$0xff]  ;;  %v7567_v55 = vld [vmem:[%s5422_s2 + $0x620] sm:$0xff] }
 0x44d   : > { %1951 = vmatpush2.msra.mxu0 %v7551_v19  ;;  %2028 = vmatpush2.msra.mxu1 %v7555_v27  ;;  %9945 = vst [vmem:[#allocation147_spill] sm:$0xff] %v7563_v11  ;;  %9946 = vst [vmem:[#allocation148_spill] sm:$0xff] %v7567_v55  ;;  %v7571_v19 = vld [vmem:[%s5422_s2 + $0x630] sm:$0xff]  ;;  %v7575_v27 = vld [vmem:[%s5422_s2 + $0x5e8] sm:$0xff] }
 0x44e   : > { %1952 = vmatprep.subr.mxu0 %v7559_v51  ;;  %2029 = vmatprep.subr.mxu1 %v7563_v11  ;;  %9947 = vst [vmem:[#allocation149_spill] sm:$0xff] %v7571_v19  ;;  %9948 = vst [vmem:[#allocation14_spill] sm:$0xff] %v7575_v27  ;;  %v7579_v51 = vld [vmem:[%s5422_s2 + $0x5f8] sm:$0xff]  ;;  %v7583_v11 = vld [vmem:[%s5422_s2 + $0x5e0] sm:$0xff] }
 0x44f   : > { %1953 = vmatpush2.msra.mxu0 %v7567_v55  ;;  %2030 = vmatpush2.msra.mxu1 %v7571_v19  ;;  %9949 = vst [vmem:[#allocation16_spill] sm:$0xff] %v7579_v51  ;;  %9950 = vst [vmem:[#allocation18_spill] sm:$0xff] %v7583_v11  ;;  %v7587_v55 = vld [vmem:[%s5422_s2 + $0x5f0] sm:$0xff]  ;;  %v7591_v19 = vld [vmem:[%s5422_s2 + $0x5a8] sm:$0xff] }
 0x450   : > { %1954 = vmatprep.subr.mxu0 %v7575_v27  ;;  %2031 = vmatprep.subr.mxu1 %v7579_v51  ;;  %9951 = vst [vmem:[#allocation20_spill] sm:$0xff] %v7587_v55  ;;  %9952 = vst [vmem:[#allocation22_spill] sm:$0xff] %v7591_v19  ;;  %v7595_v27 = vld [vmem:[%s5422_s2 + $0x5b8] sm:$0xff]  ;;  %v7599_v51 = vld [vmem:[%s5422_s2 + $0x5a0] sm:$0xff] }
 0x451   : > { %1955 = vmatpush2.msra.mxu0 %v7583_v11  ;;  %2032 = vmatpush2.msra.mxu1 %v7587_v55  ;;  %9953 = vst [vmem:[#allocation24_spill] sm:$0xff] %v7595_v27  ;;  %9954 = vst [vmem:[#allocation26_spill] sm:$0xff] %v7599_v51  ;;  %v7603_v11 = vld [vmem:[%s5422_s2 + $0x5b0] sm:$0xff]  ;;  %v7607_v55 = vld [vmem:[%s5422_s2 + $0x568] sm:$0xff] }
 0x452   : > { %1956 = vmatprep.subr.mxu0 %v7591_v19  ;;  %2033 = vmatprep.subr.mxu1 %v7595_v27  ;;  %9955 = vst [vmem:[#allocation150_spill] sm:$0xff] %v7603_v11  ;;  %9956 = vst [vmem:[#allocation151_spill] sm:$0xff] %v7607_v55  ;;  %v7611_v19 = vld [vmem:[%s5422_s2 + $0x578] sm:$0xff]  ;;  %v7615_v27 = vld [vmem:[%s5422_s2 + $0x560] sm:$0xff] }
 0x453   : > { %1957 = vmatpush2.msra.mxu0 %v7599_v51  ;;  %2034 = vmatpush2.msra.mxu1 %v7603_v11  ;;  %9957 = vst [vmem:[#allocation152_spill] sm:$0xff] %v7611_v19  ;;  %9958 = vst [vmem:[#allocation153_spill] sm:$0xff] %v7615_v27  ;;  %v7619_v51 = vld [vmem:[%s5422_s2 + $0x570] sm:$0xff]  ;;  %v7623_v11 = vld [vmem:[%s5422_s2 + $0x528] sm:$0xff] }
 0x454   : > { %1958 = vmatprep.subr.mxu0 %v7607_v55  ;;  %2035 = vmatprep.subr.mxu1 %v7611_v19  ;;  %9959 = vst [vmem:[#allocation154_spill] sm:$0xff] %v7619_v51  ;;  %9960 = vst [vmem:[#allocation155_spill] sm:$0xff] %v7623_v11  ;;  %v7627_v55 = vld [vmem:[%s5422_s2 + $0x538] sm:$0xff]  ;;  %v7631_v19 = vld [vmem:[%s5422_s2 + $0x520] sm:$0xff] }
 0x455   : > { %1959 = vmatpush2.msra.mxu0 %v7615_v27  ;;  %2036 = vmatpush2.msra.mxu1 %v7619_v51  ;;  %9961 = vst [vmem:[#allocation156_spill] sm:$0xff] %v7627_v55  ;;  %9962 = vst [vmem:[#allocation157_spill] sm:$0xff] %v7631_v19  ;;  %v7635_v27 = vld [vmem:[%s5422_s2 + $0x530] sm:$0xff]  ;;  %v7639_v51 = vld [vmem:[%s5422_s2 + $0x4e8] sm:$0xff] }
 0x456   : > { %1960 = vmatprep.subr.mxu0 %v7623_v11  ;;  %2037 = vmatprep.subr.mxu1 %v7627_v55  ;;  %9963 = vst [vmem:[#allocation158_spill] sm:$0xff] %v7635_v27  ;;  %9964 = vst [vmem:[#allocation159_spill] sm:$0xff] %v7639_v51  ;;  %v7643_v11 = vld [vmem:[%s5422_s2 + $0x4f8] sm:$0xff]  ;;  %v7647_v55 = vld [vmem:[%s5422_s2 + $0x4e0] sm:$0xff] }
 0x457   : > { %1961 = vmatpush2.msra.mxu0 %v7631_v19  ;;  %2038 = vmatpush2.msra.mxu1 %v7635_v27  ;;  %9965 = vst [vmem:[#allocation160_spill] sm:$0xff] %v7643_v11  ;;  %9966 = vst [vmem:[#allocation161_spill] sm:$0xff] %v7647_v55  ;;  %v7651_v19 = vld [vmem:[%s5422_s2 + $0x4f0] sm:$0xff]  ;;  %v7655_v27 = vld [vmem:[%s5422_s2 + $0x4a8] sm:$0xff] }
 0x458   : > { %1962 = vmatprep.subr.mxu0 %v7639_v51  ;;  %2039 = vmatprep.subr.mxu1 %v7643_v11  ;;  %9967 = vst [vmem:[#allocation162_spill] sm:$0xff] %v7651_v19  ;;  %9968 = vst [vmem:[#allocation163_spill] sm:$0xff] %v7655_v27  ;;  %v7659_v51 = vld [vmem:[%s5422_s2 + $0x4b8] sm:$0xff]  ;;  %v7663_v11 = vld [vmem:[%s5422_s2 + $0x4a0] sm:$0xff] }
 0x459   : > { %1963 = vmatpush2.msra.mxu0 %v7647_v55  ;;  %2040 = vmatpush2.msra.mxu1 %v7651_v19  ;;  %9969 = vst [vmem:[#allocation164_spill] sm:$0xff] %v7659_v51  ;;  %9970 = vst [vmem:[#allocation165_spill] sm:$0xff] %v7663_v11  ;;  %v7667_v55 = vld [vmem:[%s5422_s2 + $0x4b0] sm:$0xff]  ;;  %v7671_v19 = vld [vmem:[%s5422_s2 + $0x468] sm:$0xff] }
 0x45a   : > { %1964 = vmatprep.subr.mxu0 %v7655_v27  ;;  %2041 = vmatprep.subr.mxu1 %v7659_v51  ;;  %9971 = vst [vmem:[#allocation166_spill] sm:$0xff] %v7667_v55  ;;  %9972 = vst [vmem:[#allocation167_spill] sm:$0xff] %v7671_v19  ;;  %v7675_v27 = vld [vmem:[%s5422_s2 + $0x478] sm:$0xff]  ;;  %v7683_v51 = vld [vmem:[%s5422_s2 + $0x470] sm:$0xff] }
 0x45b   : > { %1965 = vmatpush2.msra.mxu0 %v7663_v11  ;;  %2042 = vmatpush2.msra.mxu1 %v7667_v55  ;;  %9973 = vst [vmem:[#allocation168_spill] sm:$0xff] %v7675_v27  ;;  %9974 = vst [vmem:[#allocation169_spill] sm:$0xff] %v7679_v0  ;;  %v7687_v11 = vld [vmem:[%s5422_s2 + $0x428] sm:$0xff]  ;;  %v7691_v55 = vld [vmem:[%s5422_s2 + $0x438] sm:$0xff] }
 0x45c   : > { %1966 = vmatprep.subr.mxu0 %v7671_v19  ;;  %2043 = vmatprep.subr.mxu1 %v7675_v27  ;;  %9975 = vst [vmem:[#allocation170_spill] sm:$0xff] %v7683_v51  ;;  %9976 = vst [vmem:[#allocation171_spill] sm:$0xff] %v7687_v11  ;;  %v7695_v27 = vld [vmem:[%s5422_s2 + $0x420] sm:$0xff] }
 0x45d   : > { %1967 = vmatpush2.msra.mxu0 %v7679_v0  ;;  %2044 = vmatpush2.msra.mxu1 %v7683_v51  ;;  %9977 = vst [vmem:[#allocation172_spill] sm:$0xff] %v7691_v55  ;;  %9978 = vst [vmem:[#allocation173_spill] sm:$0xff] %v7695_v27  ;;  %v7699_v0 = vld [vmem:[%s5422_s2 + $0x430] sm:$0xff]  ;;  %v5224_v51 = vld [vmem:[%s5422_s2 + $0x348] sm:$0xff] }
 0x45e   : > { %1968 = vmatprep.subr.mxu0 %v7687_v11  ;;  %2045 = vmatprep.subr.mxu1 %v7691_v55  ;;  %9979 = vst [vmem:[#allocation174_spill] sm:$0xff] %v7699_v0  ;;  %v5220_v55 = vld [vmem:[%s5422_s2 + $0x3c8] sm:$0xff]  ;;  %v5221_v11 = vld [vmem:[%s5422_s2 + $0x3c0] sm:$0xff] }
 0x45f   : > { %1969 = vmatpush2.msra.mxu0 %v7695_v27  ;;  %2046 = vmatpush2.msra.mxu1 %v7699_v0  ;;  %v5222_v0 = vld [vmem:[%s5422_s2 + $0x388] sm:$0xff]  ;;  %v5223_v27 = vld [vmem:[%s5422_s2 + $0x380] sm:$0xff] }
 0x460   : > { %1971 = vmatmul.mubr.f32.vlgmr.msra.gmra.mxu0 %v7182_v7  ;;  %2048 = vmatmul.mubr.f32.vlgmr.msra.gmra.mxu1 %v7182_v7  ;;  %v5225_v19 = vld [vmem:[%s5422_s2 + $0x340] sm:$0xff] }
 0x461   : > { %1976 = vmatprep.mubr.f32.mxu0 %v7188_v35  ;;  %2053 = vmatprep.mubr.f32.mxu1 %v7188_v35 }
 0x462   : > { %2192 = vmatprep.subr.mxu1 %v5220_v55  ;;  %v9982_v55 = vld [vmem:[#allocation8_spill] sm:$0xff] }
 0x463   : > { %2193 = vmatpush1.msra.mxu1 %v5221_v11  ;;  %v9983_v11 = vld [vmem:[#allocation9_spill] sm:$0xff] }
 0x464   : > { %1977 = vmatmul.mubr.f32.gmra.mxu0 %v7214_v56  ;;  %2054 = vmatmul.mubr.f32.gmra.mxu1 %v7214_v56 }
 0x465   : > { %2138 = vmatprep.mubr.f32.mxu0 %v9799_v59  ;;  %2194 = vmatprep.subr.mxu1 %v5222_v0  ;;  %v9987_v0 = vld [vmem:[#allocation13_spill] sm:$0xff] }
 0x466   : > { %2195 = vmatpush1.msra.mxu1 %v5223_v27  ;;  %v9988_v27 = vld [vmem:[#allocation15_spill] sm:$0xff] }
 0x467   : > { %2196 = vmatprep.subr.mxu1 %v5224_v51  ;;  %v9989_v51 = vld [vmem:[#allocation17_spill] sm:$0xff] }
 0x468   : > { %2197 = vmatpush1.msra.mxu1 %v5225_v19  ;;  %v9990_v19 = vld [vmem:[#allocation19_spill] sm:$0xff] }
 0x469   : > { %2198 = vmatprep.subr.mxu1 %v9980_v26  ;;  %v9991_v26 = vld [vmem:[#allocation21_spill] sm:$0xff] }
 0x46a   : > { %2199 = vmatpush1.msra.mxu1 %v9981_v25  ;;  %v9992_v25 = vld [vmem:[#allocation23_spill] sm:$0xff] }
 0x46b   : > { %2200 = vmatprep.subr.mxu1 %v9982_v55  ;;  %v9993_v55 = vld [vmem:[#allocation25_spill] sm:$0xff] }
 0x46c   : > { %2201 = vmatpush1.msra.mxu1 %v9983_v11  ;;  %v9994_v11 = vld [vmem:[#allocation27_spill] sm:$0xff] }
 0x46d   : > { %2202 = vmatprep.subr.mxu1 %v9984_v54  ;;  %v9995_v54 = vld [vmem:[#allocation28_spill] sm:$0xff] }
 0x46e   : > { %2203 = vmatpush1.msra.mxu1 %v9985_v50  ;;  %v9996_v50 = vld [vmem:[#allocation29_spill] sm:$0xff] }
 0x46f   : > { %2204 = vmatprep.subr.mxu1 %v9986_v48  ;;  %v9997_v48 = vld [vmem:[#allocation30_spill] sm:$0xff] }
 0x470   : > { %2205 = vmatpush1.msra.mxu1 %v9987_v0  ;;  %v9998_v0 = vld [vmem:[#allocation31_spill] sm:$0xff] }
 0x471   : > { %2206 = vmatprep.subr.mxu1 %v9988_v27  ;;  %v9999_v27 = vld [vmem:[#allocation32_spill] sm:$0xff] }
 0x472   : > { %2207 = vmatpush1.msra.mxu1 %v9989_v51  ;;  %v10000_v51 = vld [vmem:[#allocation33_spill] sm:$0xff] }
 0x473   : > { %2208 = vmatprep.subr.mxu1 %v9990_v19  ;;  %v10001_v19 = vld [vmem:[#allocation34_spill] sm:$0xff] }
 0x474   : > { %2209 = vmatpush1.msra.mxu1 %v9991_v26  ;;  %v10002_v26 = vld [vmem:[#allocation35_spill] sm:$0xff] }
 0x475   : > { %2210 = vmatprep.subr.mxu1 %v9992_v25  ;;  %v10003_v25 = vld [vmem:[#allocation36_spill] sm:$0xff] }
 0x476   : > { %2211 = vmatpush1.msra.mxu1 %v9993_v55  ;;  %v10004_v55 = vld [vmem:[#allocation37_spill] sm:$0xff] }
 0x477   : > { %2212 = vmatprep.subr.mxu1 %v9994_v11  ;;  %v10005_v11 = vld [vmem:[#allocation38_spill] sm:$0xff] }
 0x478   : > { %2213 = vmatpush1.msra.mxu1 %v9995_v54  ;;  %v10006_v54 = vld [vmem:[#allocation39_spill] sm:$0xff] }
 0x479   : > { %2214 = vmatprep.subr.mxu1 %v9996_v50  ;;  %v10007_v50 = vld [vmem:[#allocation40_spill] sm:$0xff] }
 0x47a   : > { %2215 = vmatpush1.msra.mxu1 %v9997_v48  ;;  %v10008_v48 = vld [vmem:[#allocation41_spill] sm:$0xff] }
 0x47b   : > { %2216 = vmatprep.subr.mxu1 %v9998_v0  ;;  %v10009_v0 = vld [vmem:[#allocation42_spill] sm:$0xff] }
 0x47c   : > { %2217 = vmatpush1.msra.mxu1 %v9999_v27  ;;  %v10010_v27 = vld [vmem:[#allocation43_spill] sm:$0xff] }
 0x47d   : > { %2218 = vmatprep.subr.mxu1 %v10000_v51  ;;  %v10011_v51 = vld [vmem:[#allocation44_spill] sm:$0xff] }
 0x47e   : > { %2219 = vmatpush1.msra.mxu1 %v10001_v19  ;;  %v10012_v19 = vld [vmem:[#allocation45_spill] sm:$0xff] }
 0x47f   : > { %2220 = vmatprep.subr.mxu1 %v10002_v26  ;;  %v10013_v26 = vld [vmem:[#allocation46_spill] sm:$0xff] }
 0x480   : > { %2221 = vmatpush1.msra.mxu1 %v10003_v25  ;;  %v10014_v25 = vld [vmem:[#allocation47_spill] sm:$0xff] }
 0x481   : > { %2222 = vmatprep.subr.mxu1 %v10004_v55  ;;  %v10015_v55 = vld [vmem:[#allocation48_spill] sm:$0xff] }
 0x482   : > { %2223 = vmatpush1.msra.mxu1 %v10005_v11  ;;  %v10016_v11 = vld [vmem:[#allocation49_spill] sm:$0xff] }
 0x483   : > { %2224 = vmatprep.subr.mxu1 %v10006_v54  ;;  %v10017_v54 = vld [vmem:[#allocation50_spill] sm:$0xff] }
 0x484   : > { %2225 = vmatpush2.msra.mxu1 %v10007_v50  ;;  %v10018_v50 = vld [vmem:[#allocation51_spill] sm:$0xff] }
 0x485   : > { %2226 = vmatprep.subr.mxu1 %v10008_v48  ;;  %v10019_v48 = vld [vmem:[#allocation52_spill] sm:$0xff] }
 0x486   : > { %2227 = vmatpush2.msra.mxu1 %v10009_v0  ;;  %v10020_v0 = vld [vmem:[#allocation53_spill] sm:$0xff] }
 0x487   : > { %2228 = vmatprep.subr.mxu1 %v10010_v27  ;;  %v10021_v27 = vld [vmem:[#allocation54_spill] sm:$0xff] }
 0x488   : > { %2229 = vmatpush2.msra.mxu1 %v10011_v51  ;;  %v10022_v51 = vld [vmem:[#allocation55_spill] sm:$0xff] }
 0x489   : > { %2230 = vmatprep.subr.mxu1 %v10012_v19  ;;  %v10023_v19 = vld [vmem:[#allocation56_spill] sm:$0xff] }
 0x48a   : > { %2231 = vmatpush2.msra.mxu1 %v10013_v26  ;;  %v10024_v26 = vld [vmem:[#allocation57_spill] sm:$0xff] }
 0x48b   : > { %2232 = vmatprep.subr.mxu1 %v10014_v25  ;;  %v10025_v25 = vld [vmem:[#allocation58_spill] sm:$0xff] }
 0x48c   : > { %2233 = vmatpush2.msra.mxu1 %v10015_v55  ;;  %v10026_v55 = vld [vmem:[#allocation59_spill] sm:$0xff] }
 0x48d   : > { %2234 = vmatprep.subr.mxu1 %v10016_v11  ;;  %v10027_v11 = vld [vmem:[#allocation60_spill] sm:$0xff] }
 0x48e   : > { %2235 = vmatpush2.msra.mxu1 %v10017_v54  ;;  %v10028_v54 = vld [vmem:[#allocation61_spill] sm:$0xff] }
 0x48f   : > { %2236 = vmatprep.subr.mxu1 %v10018_v50  ;;  %v10029_v50 = vld [vmem:[#allocation62_spill] sm:$0xff] }
 0x490   : > { %2237 = vmatpush2.msra.mxu1 %v10019_v48  ;;  %v10030_v48 = vld [vmem:[#allocation63_spill] sm:$0xff] }
 0x491   : > { %2238 = vmatprep.subr.mxu1 %v10020_v0  ;;  %v10031_v0 = vld [vmem:[#allocation64_spill] sm:$0xff] }
 0x492   : > { %2239 = vmatpush2.msra.mxu1 %v10021_v27  ;;  %v10032_v27 = vld [vmem:[#allocation65_spill] sm:$0xff] }
 0x493   : > { %2240 = vmatprep.subr.mxu1 %v10022_v51  ;;  %v10033_v51 = vld [vmem:[#allocation66_spill] sm:$0xff] }
 0x494   : > { %2241 = vmatpush2.msra.mxu1 %v10023_v19  ;;  %v10034_v19 = vld [vmem:[#allocation67_spill] sm:$0xff] }
 0x495   : > { %2242 = vmatprep.subr.mxu1 %v10024_v26  ;;  %v10035_v26 = vld [vmem:[#allocation68_spill] sm:$0xff] }
 0x496   : > { %2243 = vmatpush2.msra.mxu1 %v10025_v25  ;;  %v10036_v25 = vld [vmem:[#allocation69_spill] sm:$0xff] }
 0x497   : > { %2244 = vmatprep.subr.mxu1 %v10026_v55  ;;  %v10037_v55 = vld [vmem:[#allocation70_spill] sm:$0xff] }
 0x498   : > { %2245 = vmatpush2.msra.mxu1 %v10027_v11  ;;  %v10038_v11 = vld [vmem:[#allocation71_spill] sm:$0xff] }
 0x499   : > { %2246 = vmatprep.subr.mxu1 %v10028_v54 }
 0x49a   : > { %2247 = vmatpush2.msra.mxu1 %v10029_v50 }
 0x49b   : > { %2248 = vmatprep.subr.mxu1 %v10030_v48 }
 0x49c   : > { %2249 = vmatpush2.msra.mxu1 %v10031_v0 }
 0x49d   : > { %2250 = vmatprep.subr.mxu1 %v10032_v27 }
 0x49e   : > { %2251 = vmatpush2.msra.mxu1 %v10033_v51 }
 0x49f   : > { %2252 = vmatprep.subr.mxu1 %v10034_v19 }
 0x4a0   : > { %2253 = vmatpush2.msra.mxu1 %v10035_v26 }
 0x4a1   : > { %2254 = vmatprep.subr.mxu1 %v10036_v25 }
 0x4a2   : > { %2255 = vmatpush2.msra.mxu1 %v10037_v55 }
 0x4a3   : > { %2346 = vmatprep.subr.mxu1 %v10038_v11 }
 0x4dd   : > { %v1818_v54 = vpop.f32.mrf.mxu0  ;;  %v1895_v50 = vpop.f32.mrf.mxu1 }
 0x4df   : > { %v1820_v44 = vpop.f32.mrf.mxu0  ;;  %v1897_v48 = vpop.f32.mrf.mxu1 }
 0x4e3   : > { %v1824_v42 = vpop.f32.mrf.mxu0  ;;  %v1901_v0 = vpop.f32.mrf.mxu1 }
 0x4e5   : > { %v1826_v40 = vpop.f32.mrf.mxu0  ;;  %v1903_v27 = vpop.f32.mrf.mxu1 }
 0x520   : > { %v1972_v38 = vpop.f32.mrf.mxu0  ;;  %v2049_v51 = vpop.f32.mrf.mxu1 }
 0x521   : > { %v2064_v11 = vand.u32 2147483647, %v2049_v51  ;;  %v2060_v37 = vand.u32 2147483647, %v1972_v38  ;;  %v5237_v38 = vld [vmem:[%s5422_s2 + $0x290] sm:$0xff]  ;;  %v5246_v51 = vld [vmem:[%s5422_s2 + $0x158] sm:$0xff] }
 0x522   : > { %v1974_v36 = vpop.f32.mrf.mxu0  ;;  %v2051_v19 = vpop.f32.mrf.mxu1 }
 0x523   : > { %v2065_v49 = vand.u32 2147483647, %v2051_v19  ;;  %v2061_v41 = vand.u32 2147483647, %v1974_v36  ;;  %v5236_v36 = vld [vmem:[%s5422_s2 + $0x298] sm:$0xff]  ;;  %v5247_v19 = vld [vmem:[%s5422_s2 + $0x150] sm:$0xff] }
 0x524   : > { %v1978_v61 = vpop.f32.mrf.mxu0  ;;  %v2055_v26 = vpop.f32.mrf.mxu1 }
 0x525   : > { %v2066_v53 = vand.u32 2147483647, %v2055_v26  ;;  %v2062_v45 = vand.u32 2147483647, %v1978_v61  ;;  %v5235_v61 = vld [vmem:[%s5422_s2 + $0x2d0] sm:$0xff]  ;;  %v5248_v26 = vld [vmem:[%s5422_s2 + $0x118] sm:$0xff] }
 0x526   : > { %v2057_v57 = vpop.f32.mrf.mxu1  ;;  %v1980_v55 = vpop.f32.mrf.mxu0 }
 0x527   : > { %v2067_v25 = vand.u32 2147483647, %v2057_v57  ;;  %v2063_v47 = vand.u32 2147483647, %v1980_v55  ;;  %v5234_v57 = vld [vmem:[%s5422_s2 + $0x2d8] sm:$0xff] }
 0x528   : > { %v5250_v55 = vld [vmem:[%s5422_s2 + $0xd8] sm:$0xff] }
 0x529   : > { %2086 = vmatprep.subr.mxu0 %v2067_v25  ;;  %v5249_v25 = vld [vmem:[%s5422_s2 + $0x110] sm:$0xff] }
 0x52a   : > { %2087 = vmatpush1.msra.mxu0 %v2066_v53  ;;  %v5233_v53 = vld [vmem:[%s5422_s2 + $0x310] sm:$0xff] }
 0x52b   : > { %2088 = vmatprep.subr.mxu0 %v2065_v49  ;;  %v5232_v49 = vld [vmem:[%s5422_s2 + $0x318] sm:$0xff] }
 0x52c   : > { %2089 = vmatpush1.msra.mxu0 %v2064_v11  ;;  %v5251_v11 = vld [vmem:[%s5422_s2 + $0xd0] sm:$0xff] }
 0x52d   : > { %2090 = vmatprep.subr.mxu0 %v2063_v47  ;;  %v5231_v47 = vld [vmem:[%s5422_s2 + $0x350] sm:$0xff] }
 0x52e   : > { %2091 = vmatpush1.msra.mxu0 %v2062_v45  ;;  %v5230_v45 = vld [vmem:[%s5422_s2 + $0x358] sm:$0xff] }
 0x52f   : > { %2092 = vmatprep.subr.mxu0 %v2061_v41  ;;  %v5226_v41 = vld [vmem:[%s5422_s2 + $0x3d8] sm:$0xff] }
 0x530   : > { %2093 = vmatpush1.msra.mxu0 %v2060_v37  ;;  %v4685_v37 = vld [vmem:[%s9085_s6 + $0x10] sm:$0xff] }
 0x531   : > { %2094 = vmatprep.subr.mxu0 %v1903_v27  ;;  %v5245_v27 = vld [vmem:[%s5422_s2 + $0x190] sm:$0xff] }
 0x532   : > { %2095 = vmatpush1.msra.mxu0 %v1901_v0  ;;  %v5244_v0 = vld [vmem:[%s5422_s2 + $0x198] sm:$0xff] }
 0x533   : > { %2096 = vmatprep.subr.mxu0 %v1897_v48  ;;  %v5243_v48 = vld [vmem:[%s5422_s2 + $0x1d0] sm:$0xff] }
 0x534   : > { %2097 = vmatpush1.msra.mxu0 %v1895_v50  ;;  %v5242_v50 = vld [vmem:[%s5422_s2 + $0x1d8] sm:$0xff] }
 0x535   : > { %2098 = vmatprep.subr.mxu0 %v1826_v40  ;;  %v5238_v40 = vld [vmem:[%s5422_s2 + $0x258] sm:$0xff] }
 0x536   : > { %2099 = vmatpush1.msra.mxu0 %v1824_v42  ;;  %v5239_v42 = vld [vmem:[%s5422_s2 + $0x250] sm:$0xff] }
 0x537   : > { %2100 = vmatprep.subr.mxu0 %v1820_v44  ;;  %v5240_v44 = vld [vmem:[%s5422_s2 + $0x218] sm:$0xff] }
 0x538   : > { %2101 = vmatpush1.msra.mxu0 %v1818_v54  ;;  %v5241_v54 = vld [vmem:[%s5422_s2 + $0x210] sm:$0xff] }
 0x539   : > { %2102 = vmatprep.subr.mxu0 %v7188_v35  ;;  %v4686_v35 = vld [vmem:[%s9085_s6 + $0x18] sm:$0xff] }
 0x53a   : > { %2103 = vmatpush1.msra.mxu0 %v7214_v56  ;;  %v5227_v56 = vld [vmem:[%s5422_s2 + $0x3d0] sm:$0xff] }
 0x53b   : > { %2104 = vmatprep.subr.mxu0 %v7180_v63  ;;  %v5228_v63 = vld [vmem:[%s5422_s2 + $0x398] sm:$0xff] }
 0x53c   : > { %2105 = vmatpush1.msra.mxu0 %v7182_v7  ;;  %v5229_v7 = vld [vmem:[%s5422_s2 + $0x390] sm:$0xff] }
 0x53d   : > { %4687 = vmatmul.mubr.msk.f32.vlgmr.msra.gmra.mxu0 %vm1627_vm1, %v4685_v37  ;;  %2269 = vmatprep.subr.mxu0 %v5226_v41  ;;  %v5252_v37 = vld [vmem:[%s5422_s2 + $0x98] sm:$0xff]  ;;  %v5253_v41 = vld [vmem:[%s5422_s2 + $0x90] sm:$0xff] }
 0x53e   : > { %2144 = vmatprep.mubr.f32.mxu0 %v9799_v59  ;;  %2270 = vmatpush1.msra.mxu0 %v5227_v56  ;;  %v5255_v56 = vld [vmem:[%s5422_s2 + $0x50] sm:$0xff] }
 0x53f   : > { %2271 = vmatprep.subr.mxu0 %v5228_v63  ;;  %v5256_v63 = vld [vmem:[%s5422_s2 + $0x18] sm:$0xff] }
 0x540   : > { %2272 = vmatpush1.msra.mxu0 %v5229_v7  ;;  %v5257_v7 = vld [vmem:[%s5422_s2 + $0x10] sm:$0xff] }
 0x541   : > { %4688 = vmatmul.mubr.msk.f32.gmra.mxu0 %vm1627_vm1, %v4686_v35  ;;  %2273 = vmatprep.subr.mxu0 %v5230_v45  ;;  %v5254_v35 = vld [vmem:[%s5422_s2 + $0x58] sm:$0xff] }
 0x542   : > { %2274 = vmatpush1.msra.mxu0 %v5231_v47  ;;  %v5258_v45 = vld [vmem:[%s5422_s2 + $0x7d8] sm:$0xff]  ;;  %v5259_v47 = vld [vmem:[%s5422_s2 + $0x7d0] sm:$0xff] }
 0x543   : > { %2275 = vmatprep.subr.mxu0 %v5232_v49  ;;  %v5260_v49 = vld [vmem:[%s5422_s2 + $0x798] sm:$0xff] }
 0x544   : > { %2276 = vmatpush1.msra.mxu0 %v5233_v53  ;;  %v5261_v53 = vld [vmem:[%s5422_s2 + $0x790] sm:$0xff] }
 0x545   : > { %2277 = vmatprep.subr.mxu0 %v5234_v57  ;;  %v5262_v57 = vld [vmem:[%s5422_s2 + $0x758] sm:$0xff] }
 0x546   : > { %2278 = vmatpush1.msra.mxu0 %v5235_v61  ;;  %v5263_v61 = vld [vmem:[%s5422_s2 + $0x750] sm:$0xff] }
 0x547   : > { %2279 = vmatprep.subr.mxu0 %v5236_v36  ;;  %v5264_v36 = vld [vmem:[%s5422_s2 + $0x718] sm:$0xff] }
 0x548   : > { %2280 = vmatpush1.msra.mxu0 %v5237_v38  ;;  %v5265_v38 = vld [vmem:[%s5422_s2 + $0x710] sm:$0xff] }
 0x549   : > { %2281 = vmatprep.subr.mxu0 %v5238_v40  ;;  %v5266_v40 = vld [vmem:[%s5422_s2 + $0x6d8] sm:$0xff] }
 0x54a   : > { %2282 = vmatpush1.msra.mxu0 %v5239_v42  ;;  %v5267_v42 = vld [vmem:[%s5422_s2 + $0x6d0] sm:$0xff] }
 0x54b   : > { %2283 = vmatprep.subr.mxu0 %v5240_v44  ;;  %v5268_v44 = vld [vmem:[%s5422_s2 + $0x698] sm:$0xff] }
 0x54c   : > { %2284 = vmatpush1.msra.mxu0 %v5241_v54  ;;  %v5269_v54 = vld [vmem:[%s5422_s2 + $0x690] sm:$0xff] }
 0x54d   : > { %2285 = vmatprep.subr.mxu0 %v5242_v50  ;;  %v5270_v50 = vld [vmem:[%s5422_s2 + $0x658] sm:$0xff] }
 0x54e   : > { %2286 = vmatpush1.msra.mxu0 %v5243_v48  ;;  %v5271_v48 = vld [vmem:[%s5422_s2 + $0x650] sm:$0xff] }
 0x54f   : > { %2287 = vmatprep.subr.mxu0 %v5244_v0 }
 0x550   : > { %2288 = vmatpush1.msra.mxu0 %v5245_v27  ;;  %v10055_v27 = vld [vmem:[#allocation88_spill] sm:$0xff] }
 0x551   : > { %2289 = vmatprep.subr.mxu0 %v5246_v51  ;;  %v10056_v51 = vld [vmem:[#allocation89_spill] sm:$0xff] }
 0x552   : > { %2290 = vmatpush1.msra.mxu0 %v5247_v19  ;;  %v10057_v19 = vld [vmem:[#allocation90_spill] sm:$0xff] }
 0x553   : > { %2291 = vmatprep.subr.mxu0 %v5248_v26  ;;  %v10058_v26 = vld [vmem:[#allocation91_spill] sm:$0xff] }
 0x554   : > { %2292 = vmatpush1.msra.mxu0 %v5249_v25  ;;  %v10059_v25 = vld [vmem:[#allocation92_spill] sm:$0xff] }
 0x555   : > { %2293 = vmatprep.subr.mxu0 %v5250_v55  ;;  %v10060_v55 = vld [vmem:[#allocation93_spill] sm:$0xff] }
 0x556   : > { %2294 = vmatpush1.msra.mxu0 %v5251_v11  ;;  %v10061_v11 = vld [vmem:[#allocation94_spill] sm:$0xff] }
 0x557   : > { %2295 = vmatprep.subr.mxu0 %v5252_v37  ;;  %v10062_v37 = vld [vmem:[#allocation95_spill] sm:$0xff] }
 0x558   : > { %2296 = vmatpush1.msra.mxu0 %v5253_v41  ;;  %v10063_v41 = vld [vmem:[#allocation96_spill] sm:$0xff] }
 0x559   : > { %2297 = vmatprep.subr.mxu0 %v5254_v35  ;;  %v10064_v35 = vld [vmem:[#allocation97_spill] sm:$0xff] }
 0x55a   : > { %2298 = vmatpush1.msra.mxu0 %v5255_v56  ;;  %v10065_v56 = vld [vmem:[#allocation98_spill] sm:$0xff] }
 0x55b   : > { %2299 = vmatprep.subr.mxu0 %v5256_v63  ;;  %v10066_v63 = vld [vmem:[#allocation99_spill] sm:$0xff] }
 0x55c   : > { %2300 = vmatpush1.msra.mxu0 %v5257_v7  ;;  %v10067_v7 = vld [vmem:[#allocation100_spill] sm:$0xff] }
 0x55d   : > { %2301 = vmatprep.subr.mxu0 %v5258_v45  ;;  %v10068_v45 = vld [vmem:[#allocation101_spill] sm:$0xff] }
 0x55e   : > { %2302 = vmatpush2.msra.mxu0 %v5259_v47  ;;  %v10069_v47 = vld [vmem:[#allocation102_spill] sm:$0xff] }
 0x55f   : > { %2303 = vmatprep.subr.mxu0 %v5260_v49  ;;  %v10070_v49 = vld [vmem:[#allocation103_spill] sm:$0xff] }
 0x560   : > { %2304 = vmatpush2.msra.mxu0 %v5261_v53  ;;  %v10071_v53 = vld [vmem:[#allocation104_spill] sm:$0xff] }
 0x561   : > { %2305 = vmatprep.subr.mxu0 %v5262_v57  ;;  %v10072_v57 = vld [vmem:[#allocation105_spill] sm:$0xff] }
 0x562   : > { %2306 = vmatpush2.msra.mxu0 %v5263_v61  ;;  %v10073_v61 = vld [vmem:[#allocation106_spill] sm:$0xff] }
 0x563   : > { %2307 = vmatprep.subr.mxu0 %v5264_v36  ;;  %v10074_v36 = vld [vmem:[#allocation107_spill] sm:$0xff] }
 0x564   : > { %2308 = vmatpush2.msra.mxu0 %v5265_v38  ;;  %v10075_v38 = vld [vmem:[#allocation108_spill] sm:$0xff] }
 0x565   : > { %2309 = vmatprep.subr.mxu0 %v5266_v40  ;;  %v10076_v40 = vld [vmem:[#allocation109_spill] sm:$0xff] }
 0x566   : > { %2310 = vmatpush2.msra.mxu0 %v5267_v42  ;;  %v10077_v42 = vld [vmem:[#allocation110_spill] sm:$0xff] }
 0x567   : > { %2311 = vmatprep.subr.mxu0 %v5268_v44  ;;  %v10078_v44 = vld [vmem:[#allocation111_spill] sm:$0xff] }
 0x568   : > { %2312 = vmatpush2.msra.mxu0 %v5269_v54  ;;  %v10079_v54 = vld [vmem:[#allocation112_spill] sm:$0xff] }
 0x569   : > { %2313 = vmatprep.subr.mxu0 %v5270_v50  ;;  %v10080_v50 = vld [vmem:[#allocation113_spill] sm:$0xff] }
 0x56a   : > { %2314 = vmatpush2.msra.mxu0 %v5271_v48  ;;  %v10081_v48 = vld [vmem:[#allocation114_spill] sm:$0xff] }
 0x56b   : > { %2315 = vmatprep.subr.mxu0 %v7105_v1 }
 0x56c   : > { %2316 = vmatpush2.msra.mxu0 %v7109_v3 }
 0x56d   : > { %2317 = vmatprep.subr.mxu0 %v7113_v5  ;;  %v2161_v5 = vpop.permute.xlu0 %2160 }
 0x56e   : > { %2318 = vmatpush2.msra.mxu0 %v7117_v9 }
 0x56f   : > { %2319 = vmatprep.subr.mxu0 %v7121_v15 }
 0x570   : > { %2320 = vmatpush2.msra.mxu0 %v7125_v23  ;;  %v2178_v23 = vpop.permute.xlu1 %2177 }
 0x571   : > { %2321 = vmatprep.subr.mxu0 %v7129_v31 }
 0x572   : > { %2322 = vmatpush2.msra.mxu0 %v7133_v39 }
 0x573   : > { %2323 = vmatprep.subr.mxu0 %v7137_v12 }
 0x574   : > { %2324 = vmatpush2.msra.mxu0 %v7141_v14 }
 0x575   : > { %2325 = vmatprep.subr.mxu0 %v7145_v16 }
 0x576   : > { %2326 = vmatpush2.msra.mxu0 %v7149_v18 }
 0x577   : > { %2327 = vmatprep.subr.mxu0 %v7153_v20 }
 0x578   : > { %2328 = vmatpush2.msra.mxu0 %v7157_v22  ;;  %v2166_v22 = vpop.permute.xlu0 %2165 }
 0x579   : > { %2329 = vmatprep.subr.mxu0 %v7161_v24 }
 0x57a   : > { %2330 = vmatpush2.msra.mxu0 %v7165_v28 }
 0x57b   : > { %2331 = vmatprep.subr.mxu0 %v7169_v30  ;;  %v2183_v30 = vpop.permute.xlu1 %2182 }
 0x57c   : > { %2332 = vmatpush2.msra.mxu0 %v7173_v32 }
 0x57d   : > { %2423 = vmatprep.subr.mxu0 %v7177_v34 }
 0x5fd   : > { %v2140_v1 = vpop.f32.mrf.mxu0 }
 0x5fe   : > { %v2151_v3 = vmax.f32 %v2140_v1, 0.0  ;;  %v10082_v1 = vld [vmem:[#allocation115_spill] sm:$0xff] }
 0x5ff   : > { %v2142_v9 = vpop.f32.mrf.mxu0 }
 0x600   : > { %v2152_v15 = vmax.f32 %v2142_v9, 0.0  ;;  %v2168_v31 = vmul.f32 %v2161_v5, %v2151_v3  ;;  %v10083_v3 = vld [vmem:[#allocation116_spill] sm:$0xff]  ;;  %v10085_v9 = vld [vmem:[#allocation118_spill] sm:$0xff] }
 0x601   : > { %v2146_v39 = vpop.f32.mrf.mxu0 }
 0x602   : > { %v2169_v12 = vmul.f32 %v2161_v5, %v2152_v15  ;;  %v2153_v14 = vmax.f32 %v2146_v39, 0.0  ;;  %v7854_v24 = vadd.f32 %v2178_v23, %v2168_v31  ;;  %v10084_v5 = vld [vmem:[#allocation117_spill] sm:$0xff]  ;;  %v10086_v15 = vld [vmem:[#allocation119_spill] sm:$0xff]  ;;  %v10089_v39 = vld [vmem:[#allocation122_spill] sm:$0xff] }
 0x603   : > { %v2148_v16 = vpop.f32.mrf.mxu0  ;;  %v10088_v31 = vld [vmem:[#allocation121_spill] sm:$0xff] }
 0x604   : > { %v7852_v18 = vadd.f32 %v2178_v23, %v2169_v12  ;;  %v2154_v20 = vmax.f32 %v2148_v16, 0.0  ;;  %v2170_v32 = vmul.f32 %v2166_v22, %v2153_v14  ;;  %v10087_v23 = vld [vmem:[#allocation120_spill] sm:$0xff]  ;;  %v10090_v12 = vld [vmem:[#allocation123_spill] sm:$0xff]  ;;  %v10092_v16 = vld [vmem:[#allocation125_spill] sm:$0xff] }
 0x605   : > { %v10091_v14 = vld [vmem:[#allocation124_spill] sm:$0xff] }
 0x606   : > { %v2171_v28 = vmul.f32 %v2166_v22, %v2154_v20  ;;  %2256 = vmatprep.mubr.f32.mxu1 %v7852_v18  ;;  %2333 = vmatprep.mubr.f32.mxu0 %v7852_v18  ;;  %v7868_v0 = vadd.f32 %v2183_v30, %v2170_v32  ;;  %v10093_v20 = vld [vmem:[#allocation126_spill] sm:$0xff]  ;;  %v10094_v22 = vld [vmem:[#allocation127_spill] sm:$0xff] }
 0x607   : > { %2257 = vmatmul.mubr.f32.vlgmr.msra.gmra.mxu1 %v7854_v24  ;;  %2334 = vmatmul.mubr.f32.vlgmr.msra.gmra.mxu0 %v7854_v24  ;;  %v10097_v32 = vld [vmem:[#allocation130_spill] sm:$0xff] }
 0x608   : > { %v7860_v34 = vadd.f32 %v2183_v30, %v2171_v28  ;;  %2347 = vmatpush1.msra.mxu1 %v7191_v10  ;;  %2424 = vmatpush1.msra.mxu0 %v7195_v8  ;;  %v10039_v10 = vld [vmem:[#allocation72_spill] sm:$0xff]  ;;  %v10040_v8 = vld [vmem:[#allocation73_spill] sm:$0xff] }
 0x609   : > { %2348 = vmatprep.subr.mxu1 %v7199_v13  ;;  %2425 = vmatprep.subr.mxu0 %v7203_v58  ;;  %v10041_v13 = vld [vmem:[#allocation74_spill] sm:$0xff]  ;;  %v10042_v58 = vld [vmem:[#allocation75_spill] sm:$0xff]  ;;  %v10095_v28 = vld [vmem:[#allocation128_spill] sm:$0xff] }
 0x60a   : > { %2349 = vmatpush1.msra.mxu1 %v7207_v60  ;;  %2426 = vmatpush1.msra.mxu0 %v7211_v17  ;;  %v10043_v60 = vld [vmem:[#allocation76_spill] sm:$0xff]  ;;  %v10044_v17 = vld [vmem:[#allocation77_spill] sm:$0xff] }
 0x60b   : > { %2262 = vmatprep.mubr.f32.mxu1 %v7860_v34  ;;  %2339 = vmatprep.mubr.f32.mxu0 %v7860_v34  ;;  %v10096_v30 = vld [vmem:[#allocation129_spill] sm:$0xff] }
 0x60c   : > { %2350 = vmatprep.subr.mxu1 %v7219_v6  ;;  %2427 = vmatprep.subr.mxu0 %v7223_v52  ;;  %v10045_v6 = vld [vmem:[#allocation78_spill] sm:$0xff]  ;;  %v10046_v52 = vld [vmem:[#allocation79_spill] sm:$0xff] }
 0x60d   : > { %2263 = vmatmul.mubr.f32.gmra.mxu1 %v7868_v0  ;;  %2340 = vmatmul.mubr.f32.gmra.mxu0 %v7868_v0 }
 0x60e   : > { %2351 = vmatpush1.msra.mxu1 %v7229_v62  ;;  %2428 = vmatpush1.msra.mxu0 %v7233_v2  ;;  %v10047_v62 = vld [vmem:[#allocation80_spill] sm:$0xff]  ;;  %v10048_v2 = vld [vmem:[#allocation81_spill] sm:$0xff] }
 0x60f   : > { %2352 = vmatprep.subr.mxu1 %v7237_v43  ;;  %2410 = vmatprep.mubr.f32.mxu1 %v7852_v18  ;;  %v10049_v43 = vld [vmem:[#allocation82_spill] sm:$0xff] }
 0x610   : > { %2429 = vmatprep.subr.mxu0 %v7242_v4  ;;  %2487 = vmatprep.mubr.f32.mxu0 %v7852_v18  ;;  %v10050_v4 = vld [vmem:[#allocation83_spill] sm:$0xff] }
 0x611   : > { %2353 = vmatpush1.msra.mxu1 %v7247_v46  ;;  %2430 = vmatpush1.msra.mxu0 %v7251_v21  ;;  %v10051_v46 = vld [vmem:[#allocation84_spill] sm:$0xff]  ;;  %v10052_v21 = vld [vmem:[#allocation85_spill] sm:$0xff] }
 0x612   : > { %2354 = vmatprep.subr.mxu1 %v7255_v29  ;;  %2431 = vmatprep.subr.mxu0 %v7259_v33  ;;  %v10053_v29 = vld [vmem:[#allocation86_spill] sm:$0xff]  ;;  %v10054_v33 = vld [vmem:[#allocation87_spill] sm:$0xff] }
 0x613   : > { %2355 = vmatpush1.msra.mxu1 %v10039_v10  ;;  %2432 = vmatpush1.msra.mxu0 %v10040_v8  ;;  %v10098_v10 = vld [vmem:[#allocation131_spill] sm:$0xff]  ;;  %v10099_v8 = vld [vmem:[#allocation132_spill] sm:$0xff] }
 0x614   : > { %2356 = vmatprep.subr.mxu1 %v10041_v13  ;;  %2433 = vmatprep.subr.mxu0 %v10042_v58  ;;  %v10100_v13 = vld [vmem:[#allocation133_spill] sm:$0xff]  ;;  %v10101_v58 = vld [vmem:[#allocation134_spill] sm:$0xff] }
 0x615   : > { %2357 = vmatpush1.msra.mxu1 %v10043_v60  ;;  %2434 = vmatpush1.msra.mxu0 %v10044_v17  ;;  %v10102_v60 = vld [vmem:[#allocation135_spill] sm:$0xff]  ;;  %v10103_v17 = vld [vmem:[#allocation136_spill] sm:$0xff] }
 0x616   : > { %2358 = vmatprep.subr.mxu1 %v10045_v6  ;;  %2435 = vmatprep.subr.mxu0 %v10046_v52  ;;  %v10104_v6 = vld [vmem:[#allocation137_spill] sm:$0xff]  ;;  %v10105_v52 = vld [vmem:[#allocation138_spill] sm:$0xff] }
 0x617   : > { %2359 = vmatpush1.msra.mxu1 %v10047_v62  ;;  %2436 = vmatpush1.msra.mxu0 %v10048_v2  ;;  %v10106_v62 = vld [vmem:[#allocation139_spill] sm:$0xff]  ;;  %v10107_v2 = vld [vmem:[#allocation140_spill] sm:$0xff] }
 0x618   : > { %2360 = vmatprep.subr.mxu1 %v10049_v43  ;;  %2437 = vmatprep.subr.mxu0 %v10050_v4  ;;  %v10108_v43 = vld [vmem:[#allocation141_spill] sm:$0xff]  ;;  %v10109_v4 = vld [vmem:[#allocation142_spill] sm:$0xff] }
 0x619   : > { %2361 = vmatpush1.msra.mxu1 %v10051_v46  ;;  %2438 = vmatpush1.msra.mxu0 %v10052_v21  ;;  %v10110_v46 = vld [vmem:[#allocation143_spill] sm:$0xff]  ;;  %v10111_v21 = vld [vmem:[#allocation144_spill] sm:$0xff] }
 0x61a   : > { %2362 = vmatprep.subr.mxu1 %v10053_v29  ;;  %2439 = vmatprep.subr.mxu0 %v10054_v33  ;;  %v10112_v29 = vld [vmem:[#allocation145_spill] sm:$0xff]  ;;  %v10113_v33 = vld [vmem:[#allocation146_spill] sm:$0xff] }
 0x61b   : > { %2363 = vmatpush1.msra.mxu1 %v10055_v27  ;;  %2440 = vmatpush1.msra.mxu0 %v10056_v51  ;;  %v10114_v27 = vld [vmem:[#allocation147_spill] sm:$0xff]  ;;  %v10115_v51 = vld [vmem:[#allocation148_spill] sm:$0xff] }
 0x61c   : > { %2364 = vmatprep.subr.mxu1 %v10057_v19  ;;  %2441 = vmatprep.subr.mxu0 %v10058_v26  ;;  %v10116_v19 = vld [vmem:[#allocation149_spill] sm:$0xff]  ;;  %v10117_v26 = vld [vmem:[#allocation14_spill] sm:$0xff] }
 0x61d   : > { %2365 = vmatpush1.msra.mxu1 %v10059_v25  ;;  %2442 = vmatpush1.msra.mxu0 %v10060_v55  ;;  %v10118_v25 = vld [vmem:[#allocation16_spill] sm:$0xff]  ;;  %v10119_v55 = vld [vmem:[#allocation18_spill] sm:$0xff] }
 0x61e   : > { %2366 = vmatprep.subr.mxu1 %v10061_v11  ;;  %2443 = vmatprep.subr.mxu0 %v10062_v37  ;;  %v10120_v11 = vld [vmem:[#allocation20_spill] sm:$0xff]  ;;  %v10121_v37 = vld [vmem:[#allocation22_spill] sm:$0xff] }
 0x61f   : > { %2367 = vmatpush1.msra.mxu1 %v10063_v41  ;;  %2444 = vmatpush1.msra.mxu0 %v10064_v35  ;;  %v10122_v41 = vld [vmem:[#allocation24_spill] sm:$0xff]  ;;  %v10123_v35 = vld [vmem:[#allocation26_spill] sm:$0xff] }
 0x620   : > { %2368 = vmatprep.subr.mxu1 %v10065_v56  ;;  %2445 = vmatprep.subr.mxu0 %v10066_v63  ;;  %v10124_v56 = vld [vmem:[#allocation150_spill] sm:$0xff]  ;;  %v10125_v63 = vld [vmem:[#allocation151_spill] sm:$0xff] }
 0x621   : > { %2369 = vmatpush1.msra.mxu1 %v10067_v7  ;;  %2446 = vmatpush1.msra.mxu0 %v10068_v45  ;;  %v10126_v7 = vld [vmem:[#allocation152_spill] sm:$0xff]  ;;  %v10127_v45 = vld [vmem:[#allocation153_spill] sm:$0xff] }
 0x622   : > { %2370 = vmatprep.subr.mxu1 %v10069_v47  ;;  %2447 = vmatprep.subr.mxu0 %v10070_v49  ;;  %v10128_v47 = vld [vmem:[#allocation154_spill] sm:$0xff]  ;;  %v10129_v49 = vld [vmem:[#allocation155_spill] sm:$0xff] }
 0x623   : > { %2371 = vmatpush1.msra.mxu1 %v10071_v53  ;;  %2448 = vmatpush1.msra.mxu0 %v10072_v57  ;;  %v10130_v53 = vld [vmem:[#allocation156_spill] sm:$0xff]  ;;  %v10131_v57 = vld [vmem:[#allocation157_spill] sm:$0xff] }
 0x624   : > { %2372 = vmatprep.subr.mxu1 %v10073_v61  ;;  %2449 = vmatprep.subr.mxu0 %v10074_v36  ;;  %v10132_v61 = vld [vmem:[#allocation158_spill] sm:$0xff]  ;;  %v10133_v36 = vld [vmem:[#allocation159_spill] sm:$0xff] }
 0x625   : > { %2373 = vmatpush1.msra.mxu1 %v10075_v38  ;;  %2450 = vmatpush1.msra.mxu0 %v10076_v40  ;;  %v10134_v38 = vld [vmem:[#allocation160_spill] sm:$0xff]  ;;  %v10135_v40 = vld [vmem:[#allocation161_spill] sm:$0xff] }
 0x626   : > { %2374 = vmatprep.subr.mxu1 %v10077_v42  ;;  %2451 = vmatprep.subr.mxu0 %v10078_v44  ;;  %v10136_v42 = vld [vmem:[#allocation162_spill] sm:$0xff]  ;;  %v10137_v44 = vld [vmem:[#allocation163_spill] sm:$0xff] }
 0x627   : > { %2375 = vmatpush1.msra.mxu1 %v10079_v54  ;;  %2452 = vmatpush1.msra.mxu0 %v10080_v50  ;;  %v10138_v54 = vld [vmem:[#allocation164_spill] sm:$0xff]  ;;  %v10139_v50 = vld [vmem:[#allocation165_spill] sm:$0xff] }
 0x628   : > { %2376 = vmatprep.subr.mxu1 %v10081_v48  ;;  %2453 = vmatprep.subr.mxu0 %v10082_v1  ;;  %v10140_v48 = vld [vmem:[#allocation166_spill] sm:$0xff]  ;;  %v10141_v1 = vld [vmem:[#allocation167_spill] sm:$0xff] }
 0x629   : > { %2377 = vmatpush1.msra.mxu1 %v10083_v3  ;;  %2454 = vmatpush1.msra.mxu0 %v10084_v5  ;;  %v10142_v3 = vld [vmem:[#allocation168_spill] sm:$0xff]  ;;  %v10143_v5 = vld [vmem:[#allocation169_spill] sm:$0xff] }
 0x62a   : > { %2378 = vmatprep.subr.mxu1 %v10085_v9  ;;  %2455 = vmatprep.subr.mxu0 %v10086_v15  ;;  %v10144_v9 = vld [vmem:[#allocation170_spill] sm:$0xff]  ;;  %v10145_v15 = vld [vmem:[#allocation171_spill] sm:$0xff] }
 0x62b   : > { %2379 = vmatpush2.msra.mxu1 %v10087_v23  ;;  %2456 = vmatpush2.msra.mxu0 %v10088_v31  ;;  %v10146_v23 = vld [vmem:[#allocation172_spill] sm:$0xff]  ;;  %v10147_v31 = vld [vmem:[#allocation173_spill] sm:$0xff] }
 0x62c   : > { %2380 = vmatprep.subr.mxu1 %v10089_v39  ;;  %2457 = vmatprep.subr.mxu0 %v10090_v12  ;;  %v10148_v39 = vld [vmem:[#allocation174_spill] sm:$0xff] }
 0x62d   : > { %2381 = vmatpush2.msra.mxu1 %v10091_v14  ;;  %2458 = vmatpush2.msra.mxu0 %v10092_v16 }
 0x62e   : > { %2382 = vmatprep.subr.mxu1 %v10093_v20  ;;  %2459 = vmatprep.subr.mxu0 %v10094_v22 }
 0x62f   : > { %2383 = vmatpush2.msra.mxu1 %v10095_v28  ;;  %2460 = vmatpush2.msra.mxu0 %v10096_v30 }
 0x630   : > { %2384 = vmatprep.subr.mxu1 %v10097_v32  ;;  %2461 = vmatprep.subr.mxu0 %v10098_v10 }
 0x631   : > { %2385 = vmatpush2.msra.mxu1 %v10099_v8  ;;  %2462 = vmatpush2.msra.mxu0 %v10100_v13 }
 0x632   : > { %2386 = vmatprep.subr.mxu1 %v10101_v58  ;;  %2463 = vmatprep.subr.mxu0 %v10102_v60 }
 0x633   : > { %2387 = vmatpush2.msra.mxu1 %v10103_v17  ;;  %2464 = vmatpush2.msra.mxu0 %v10104_v6 }
 0x634   : > { %2388 = vmatprep.subr.mxu1 %v10105_v52  ;;  %2465 = vmatprep.subr.mxu0 %v10106_v62 }
 0x635   : > { %2389 = vmatpush2.msra.mxu1 %v10107_v2  ;;  %2466 = vmatpush2.msra.mxu0 %v10108_v43 }
 0x636   : > { %2390 = vmatprep.subr.mxu1 %v10109_v4  ;;  %2467 = vmatprep.subr.mxu0 %v10110_v46 }
 0x637   : > { %2391 = vmatpush2.msra.mxu1 %v10111_v21  ;;  %2468 = vmatpush2.msra.mxu0 %v10112_v29 }
 0x638   : > { %2392 = vmatprep.subr.mxu1 %v10113_v33  ;;  %2469 = vmatprep.subr.mxu0 %v10114_v27  ;;  %v4693_v27 = vld [vmem:[%s9085_s6 + $0x20] sm:$0xff] }
 0x639   : > { %2393 = vmatpush2.msra.mxu1 %v10115_v51  ;;  %2470 = vmatpush2.msra.mxu0 %v10116_v19  ;;  %v4694_v51 = vld [vmem:[%s9085_s6 + $0x28] sm:$0xff] }
 0x63a   : > { %2394 = vmatprep.subr.mxu1 %v10117_v26  ;;  %2471 = vmatprep.subr.mxu0 %v10118_v25  ;;  %v10150_v25 = vld [vmem:[#allocation3_spill] sm:$0xff] }
 0x63b   : > { %2395 = vmatpush2.msra.mxu1 %v10119_v55  ;;  %2472 = vmatpush2.msra.mxu0 %v10120_v11 }
 0x63c   : > { %2396 = vmatprep.subr.mxu1 %v10121_v37  ;;  %2473 = vmatprep.subr.mxu0 %v10122_v41  ;;  %v10151_v37 = vld [vmem:[#allocation4_spill] sm:$0xff] }
 0x63d   : > { %2397 = vmatpush2.msra.mxu1 %v10123_v35  ;;  %2474 = vmatpush2.msra.mxu0 %v10124_v56 }
 0x63e   : > { %2398 = vmatprep.subr.mxu1 %v10125_v63  ;;  %2475 = vmatprep.subr.mxu0 %v10126_v7  ;;  %v10152_v7 = vld [vmem:[#allocation5_spill] sm:$0xff] }
 0x63f   : > { %2399 = vmatpush2.msra.mxu1 %v10127_v45  ;;  %2476 = vmatpush2.msra.mxu0 %v10128_v47 }
 0x640   : > { %2400 = vmatprep.subr.mxu1 %v10129_v49  ;;  %2477 = vmatprep.subr.mxu0 %v10130_v53 }
 0x641   : > { %2401 = vmatpush2.msra.mxu1 %v10131_v57  ;;  %2478 = vmatpush2.msra.mxu0 %v10132_v61  ;;  %v2643_v57 = vld [vmem:[%s9088_s9] sm:$0xff]  ;;  %v2644_v61 = vld [vmem:[%s9088_s9 + $0x8] sm:$0xff] }
 0x642   : > { %2402 = vmatprep.subr.mxu1 %v10133_v36  ;;  %2479 = vmatprep.subr.mxu0 %v10134_v38  ;;  %v3114_v36 = vld [vmem:[%s9091_s12] sm:$0xff]  ;;  %v3115_v38 = vld [vmem:[%s9091_s12 + $0x8] sm:$0xff] }
 0x643   : > { %2403 = vmatpush2.msra.mxu1 %v10135_v40  ;;  %2480 = vmatpush2.msra.mxu0 %v10136_v42  ;;  %v3116_v40 = vld [vmem:[%s9091_s12 + $0x10] sm:$0xff]  ;;  %v3117_v42 = vld [vmem:[%s9091_s12 + $0x18] sm:$0xff] }
 0x644   : > { %2404 = vmatprep.subr.mxu1 %v10137_v44  ;;  %2481 = vmatprep.subr.mxu0 %v10138_v54  ;;  %v4707_v44 = vld [vmem:[%s9091_s12 + $0x20] sm:$0xff]  ;;  %v4708_v54 = vld [vmem:[%s9091_s12 + $0x28] sm:$0xff] }
 0x645   : > { %2405 = vmatpush2.msra.mxu1 %v10139_v50  ;;  %2482 = vmatpush2.msra.mxu0 %v10140_v48  ;;  %v4709_v50 = vld [vmem:[%s9091_s12 + $0x30] sm:$0xff]  ;;  %v4710_v48 = vld [vmem:[%s9091_s12 + $0x38] sm:$0xff] }
 0x646   : > { %2406 = vmatprep.subr.mxu1 %v10141_v1  ;;  %2483 = vmatprep.subr.mxu0 %v10142_v3  ;;  %v4727_v1 = vld [vmem:[%s9091_s12 + $0x40] sm:$0xff]  ;;  %v4728_v3 = vld [vmem:[%s9091_s12 + $0x48] sm:$0xff] }
 0x647   : > { %2407 = vmatpush2.msra.mxu1 %v10143_v5  ;;  %2484 = vmatpush2.msra.mxu0 %v10144_v9  ;;  %v4729_v5 = vld [vmem:[%s9091_s12 + $0x50] sm:$0xff]  ;;  %v4730_v9 = vld [vmem:[%s9091_s12 + $0x58] sm:$0xff] }
 0x648   : > { %2408 = vmatprep.subr.mxu1 %v10145_v15  ;;  %2485 = vmatprep.subr.mxu0 %v10146_v23 }
 0x649   : > { %2409 = vmatpush2.msra.mxu1 %v10147_v31  ;;  %2486 = vmatpush2.msra.mxu0 %v10148_v39 }
 0x64a   : > { %2411 = vmatmul.mubr.f32.vlgmr.msra.gmra.mxu1 %v7854_v24  ;;  %2488 = vmatmul.mubr.f32.vlgmr.msra.gmra.mxu0 %v7854_v24 }
 0x64b   : > { %2416 = vmatprep.mubr.f32.mxu1 %v7860_v34  ;;  %2493 = vmatprep.mubr.f32.mxu0 %v7860_v34 }
 0x64e   : > { %2417 = vmatmul.mubr.f32.gmra.mxu1 %v7868_v0  ;;  %2494 = vmatmul.mubr.f32.gmra.mxu0 %v7868_v0 }
 0x64f   : > { %2578 = vmatprep.mubr.f32.mxu1 %v9799_v59 }
 0x6c7   : > { %v2258_v12 = vpop.f32.mrf.mxu1  ;;  %v2335_v14 = vpop.f32.mrf.mxu0 }
 0x6c9   : > { %v2260_v16 = vpop.f32.mrf.mxu1  ;;  %v2337_v20 = vpop.f32.mrf.mxu0 }
 0x6cd   : > { %v2264_v22 = vpop.f32.mrf.mxu1  ;;  %v2341_v28 = vpop.f32.mrf.mxu0 }
 0x6cf   : > { %v2266_v30 = vpop.f32.mrf.mxu1  ;;  %v2343_v32 = vpop.f32.mrf.mxu0 }
 0x70a   : > { %v2412_v10 = vpop.f32.mrf.mxu1  ;;  %v2489_v8 = vpop.f32.mrf.mxu0 }
 0x70b   : > { %v2504_v4 = vand.u32 2147483647, %v2489_v8  ;;  %v2500_v33 = vand.u32 2147483647, %v2412_v10 }
 0x70c   : > { %v2414_v13 = vpop.f32.mrf.mxu1  ;;  %v2491_v58 = vpop.f32.mrf.mxu0 }
 0x70d   : > { %v2505_v43 = vand.u32 2147483647, %v2491_v58  ;;  %v2501_v29 = vand.u32 2147483647, %v2414_v13 }
 0x70e   : > { %v2418_v60 = vpop.f32.mrf.mxu1  ;;  %v2495_v17 = vpop.f32.mrf.mxu0 }
 0x70f   : > { %v2506_v62 = vand.u32 2147483647, %v2495_v17  ;;  %v2502_v21 = vand.u32 2147483647, %v2418_v60 }
 0x710   : > { %v2497_v6 = vpop.f32.mrf.mxu0  ;;  %v2420_v2 = vpop.f32.mrf.mxu1 }
 0x711   : > { %v2507_v52 = vand.u32 2147483647, %v2497_v6  ;;  %v2503_v46 = vand.u32 2147483647, %v2420_v2  ;;  %v3142_v2 = vld [vmem:[%s9092_s13] sm:$0xff] }
 0x713   : > { %2526 = vmatprep.subr.mxu1 %v2507_v52  ;;  %v4697_v52 = vld [vmem:[%s9088_s9 + $0x10] sm:$0xff] }
 0x714   : > { %2527 = vmatpush1.msra.mxu1 %v2506_v62  ;;  %v4698_v62 = vld [vmem:[%s9088_s9 + $0x18] sm:$0xff] }
 0x715   : > { %2528 = vmatprep.subr.mxu1 %v2505_v43  ;;  %v3143_v43 = vld [vmem:[%s9092_s13 + $0x8] sm:$0xff] }
 0x716   : > { %2529 = vmatpush1.msra.mxu1 %v2504_v4  ;;  %v3144_v4 = vld [vmem:[%s9092_s13 + $0x10] sm:$0xff] }
 0x717   : > { %2530 = vmatprep.subr.mxu1 %v2503_v46  ;;  %v3145_v46 = vld [vmem:[%s9092_s13 + $0x18] sm:$0xff] }
 0x718   : > { %2531 = vmatpush1.msra.mxu1 %v2502_v21  ;;  %v4711_v21 = vld [vmem:[%s9092_s13 + $0x20] sm:$0xff] }
 0x719   : > { %2532 = vmatprep.subr.mxu1 %v2501_v29  ;;  %v4712_v29 = vld [vmem:[%s9092_s13 + $0x28] sm:$0xff] }
 0x71a   : > { %2533 = vmatpush1.msra.mxu1 %v2500_v33  ;;  %v4713_v33 = vld [vmem:[%s9092_s13 + $0x30] sm:$0xff] }
 0x71b   : > { %2534 = vmatprep.subr.mxu1 %v2343_v32 }
 0x71c   : > { %2535 = vmatpush1.msra.mxu1 %v2341_v28 }
 0x71d   : > { %2536 = vmatprep.subr.mxu1 %v2337_v20 }
 0x71e   : > { %2537 = vmatpush1.msra.mxu1 %v2335_v14 }
 0x71f   : > { %2538 = vmatprep.subr.mxu1 %v2266_v30 }
 0x720   : > { %2539 = vmatpush1.msra.mxu1 %v2264_v22 }
 0x721   : > { %2540 = vmatprep.subr.mxu1 %v2260_v16 }
 0x722   : > { %2541 = vmatpush1.msra.mxu1 %v2258_v12 }
 0x723   : > { %2542 = vmatprep.subr.mxu1 %v7860_v34 }
 0x724   : > { %2543 = vmatpush1.msra.mxu1 %v7868_v0  ;;  %v10149_v0 = vld [vmem:[#allocation2_spill] sm:$0xff] }
 0x725   : > { %2544 = vmatprep.subr.mxu1 %v7852_v18 }
 0x726   : > { %2545 = vmatpush1.msra.mxu1 %v7854_v24 }
 0x727   : > { %4695 = vmatmul.mubr.msk.f32.vlgmr.msra.gmra.mxu1 %vm1627_vm1, %v4693_v27  ;;  %v4714_v27 = vld [vmem:[%s9092_s13 + $0x38] sm:$0xff] }
 0x728   : > { %2584 = vmatprep.mubr.f32.mxu1 %v9799_v59 }
 0x72b   : > { %4696 = vmatmul.mubr.msk.f32.gmra.mxu1 %vm1627_vm1, %v4694_v51  ;;  %v4731_v51 = vld [vmem:[%s9092_s13 + $0x40] sm:$0xff] }
 0x72c   : > { %2919 = vmatprep.mubr.f32.mxu1 %v9799_v59 }
 0x7e7   : > { %v2580_v34 = vpop.f32.mrf.mxu1 }
 0x7e8   : > { %v2581_v19 = vadd.f32 %v2580_v34, %v10149_v0  ;;  %v4732_v34 = vld [vmem:[%s9092_s13 + $0x48] sm:$0xff]  ;;  %v4733_v0 = vld [vmem:[%s9092_s13 + $0x50] sm:$0xff] }
 0x7e9   : > { %v2582_v26 = vpop.f32.mrf.mxu1 }
 0x7ea   : > { %v2583_v18 = vadd.f32 %v2582_v26, %v10150_v25  ;;  %v2591_v24 = vmax.f32 %v2581_v19, 0.0  ;;  %v4734_v19 = vld [vmem:[%s9092_s13 + $0x58] sm:$0xff] }
 0x7eb   : > { %v2586_v55 = vpop.f32.mrf.mxu1  ;;  %v2711_v26 = vld [vmem:[%s10153_s26 + $0xf8] sm:$0xff] }
 0x7ec   : > { %v2592_v11 = vmax.f32 %v2583_v18, 0.0  ;;  %v2587_v41 = vadd.f32 %v2586_v55, %v10151_v37  ;;  %v2695_v25 = vld [vmem:[%s10153_s26 + $0x78] sm:$0xff]  ;;  %v2710_v18 = vld [vmem:[%s10153_s26 + $0xf0] sm:$0xff]  ;;  %4761 = vmatprep.subr.mxu0 %v2711_v26  ;;  %v2708_v37 = vld [vmem:[%s10153_s26 + $0xe0] sm:$0xff] }
 0x7ed   : > { %v2588_v35 = vpop.f32.mrf.mxu1  ;;  %v2694_v55 = vld [vmem:[%s10153_s26 + $0x70] sm:$0xff]  ;;  %4762 = vmatpush3.msra.mxu0 %v2695_v25 }
 0x7ee   : > { %v2595_v56 = vadd.f32 %v2592_v11, %v2591_v24  ;;  %v2593_v63 = vmax.f32 %v2587_v41, 0.0  ;;  %v2589_v45 = vadd.f32 %v2588_v35, %v10152_v7  ;;  %4763 = vmatprep.subr.mxu0 %v2710_v18  ;;  %v2692_v41 = vld [vmem:[%s10153_s26 + $0x60] sm:$0xff]  ;;  %v2707_v35 = vld [vmem:[%s10153_s26 + $0xd8] sm:$0xff]  ;;  %v2690_v7 = vld [vmem:[%s10153_s26 + $0x50] sm:$0xff] }
 0x7ef   : > { %4764 = vmatpush3.msra.mxu0 %v2694_v55 }
 0x7f0   : > { %v2596_v47 = vadd.f32 %v2595_v56, %v2593_v63  ;;  %v2594_v49 = vmax.f32 %v2589_v45, 0.0  ;;  %v2691_v56 = vld [vmem:[%s10153_s26 + $0x58] sm:$0xff]  ;;  %v2705_v45 = vld [vmem:[%s10153_s26 + $0xc8] sm:$0xff] }
 0x7f2   : > { %v2597_v53 = vadd.f32 %v2596_v47, %v2594_v49  ;;  %v2689_v47 = vld [vmem:[%s10153_s26 + $0x48] sm:$0xff] }
 0x7f4   : > { %2598 = vadd.xlane.f32.xlu0 %v2597_v53  ;;  %v2688_v53 = vld [vmem:[%s10153_s26 + $0x40] sm:$0xff] }
 0x80a   : > { %2647 = vperm.xlu0 %4958, %v2643_v57   ;;  %v2703_v57 = vld [vmem:[%s10153_s26 + $0xb8] sm:$0xff] }
 0x80e   : > { %2652 = vperm.xlu0 %4958, %v2644_v61   ;;  %v2687_v61 = vld [vmem:[%s10153_s26 + $0x38] sm:$0xff] }
 0x812   : > { %3120 = vperm.xlu0 %4958, %v3114_v36   ;;  %v2702_v36 = vld [vmem:[%s10153_s26 + $0xb0] sm:$0xff] }
 0x816   : > { %3125 = vperm.xlu0 %4958, %v3115_v38   ;;  %v2686_v38 = vld [vmem:[%s10153_s26 + $0x30] sm:$0xff] }
 0x81a   : > { %3130 = vperm.xlu0 %4958, %v3116_v40   ;;  %v2701_v40 = vld [vmem:[%s10153_s26 + $0xa8] sm:$0xff] }
 0x81e   : > { %3135 = vperm.xlu0 %4958, %v3117_v42  }
 0x822   : > { %3473 = vperm.xlu0 %4958, %v4707_v44  }
 0x826   : > { %3478 = vperm.xlu0 %4958, %v4708_v54   ;;  %v2685_v54 = vld [vmem:[%s10153_s26 + $0x28] sm:$0xff] }
 0x82a   : > { %3483 = vperm.xlu0 %4958, %v4709_v50  }
 0x82e   : > { %3488 = vperm.xlu0 %4958, %v4710_v48   ;;  %v2700_v48 = vld [vmem:[%s10153_s26 + $0xa0] sm:$0xff] }
 0x832   : > { %3827 = vperm.xlu0 %4958, %v4727_v1   ;;  %v2684_v1 = vld [vmem:[%s10153_s26 + $0x20] sm:$0xff] }
 0x836   : > { %3832 = vperm.xlu0 %4958, %v4728_v3  }
 0x83a   : > { %3837 = vperm.xlu0 %4958, %v4729_v5   ;;  %v2699_v5 = vld [vmem:[%s10153_s26 + $0x98] sm:$0xff] }
 0x83e   : > { %3842 = vperm.xlu0 %4958, %v4730_v9   ;;  %v2683_v9 = vld [vmem:[%s10153_s26 + $0x18] sm:$0xff] }
 0x87d   : > { %v2599_v15 = vpop.xlane.xlu0 %2598 }
 0x87e   : > { %v2600_v23 = vrot.slane %v2599_v15, 4 }
 0x880   : > { %v2601_v31 = vadd.f32 %v2600_v23, %v2599_v15  ;;  %v2698_v23 = vld [vmem:[%s10153_s26 + $0x90] sm:$0xff] }
 0x882   : > { %v2602_v39 = vrot.slane %v2601_v31, 2 }
 0x884   : > { %v2603_v12 = vadd.f32 %v2602_v39, %v2601_v31  ;;  %v2682_v31 = vld [vmem:[%s10153_s26 + $0x10] sm:$0xff] }
 0x886   : > { %v2604_v14 = vrot.slane %v2603_v12, 1 }
 0x888   : > { %v2605_v16 = vadd.f32 %v2604_v14, %v2603_v12  ;;  %v2697_v12 = vld [vmem:[%s10153_s26 + $0x88] sm:$0xff] }
 0x889   : > { %v2681_v14 = vld [vmem:[%s10153_s26 + $0x8] sm:$0xff] }
 0x88a   : > { %4935 = vpush %v2605_v16 }
 0x8bb   : > { %s4936_s1 = spop %4935 }
 0x8bc   : > { %s2609_s22 = smul.f32 0.00024414063, %s4936_s1  ;;  %s8221_s1 = scalar_lea.vmem %s10154_s21, %s4760_s28 }
 0x8bd   : > { %v8302_v26 = vld [vmem:[%s8221_s1 + $0xc0] sm:$0xff]  ;;  %v8306_v25 = vld [vmem:[%s8221_s1 + $0xa8] sm:$0xff] }
 0x8be   : > { %v2610_v20 = vstv %s2609_s22  ;;  %v8310_v18 = vld [vmem:[%s8221_s1 + $0xa0] sm:$0xff]  ;;  %v8314_v55 = vld [vmem:[%s8221_s1 + $0x88] sm:$0xff] }
 0x8bf   : > { %v8063_v22 = vsub.f32 %v2591_v24, %v2610_v20  ;;  %v8065_v28 = vsub.f32 %v2592_v11, %v2610_v20  ;;  %v8067_v30 = vsub.f32 %v2593_v63, %v2610_v20  ;;  %v8069_v32 = vsub.f32 %v2594_v49, %v2610_v20  ;;  %v2709_v24 = vld [vmem:[%s10153_s26 + $0xe8] sm:$0xff]  ;;  %v2706_v63 = vld [vmem:[%s10153_s26 + $0xd0] sm:$0xff]  ;;  %v2704_v49 = vld [vmem:[%s10153_s26 + $0xc0] sm:$0xff] }
 0x8c0   : > { %v2693_v11 = vld [vmem:[%s10153_s26 + $0x68] sm:$0xff]  ;;  %4765 = vmatprep.subr.mxu0 %v2709_v24  ;;  %v2696_v20 = vld [vmem:[%s10153_s26 + $0x80] sm:$0xff] }
 0x8c1   : > { %v2615_v10 = vmul.f32 %v8063_v22, %v8063_v22  ;;  %v2616_v8 = vmul.f32 %v8065_v28, %v8065_v28  ;;  %v2617_v13 = vmul.f32 %v8067_v30, %v8067_v30  ;;  %v2618_v60 = vmul.f32 %v8069_v32, %v8069_v32  ;;  %4766 = vmatpush3.msra.mxu0 %v2693_v11  ;;  %v8318_v24 = vld [vmem:[%s8221_s1 + $0x80] sm:$0xff]  ;;  %v8322_v11 = vld [vmem:[%s8221_s1 + $0x68] sm:$0xff] }
 0x8c2   : > { %4767 = vmatprep.subr.mxu0 %v2708_v37  ;;  %10156 = vst [vmem:[#allocation7_spill] sm:$0xff] %v8322_v11  ;;  %v8326_v37 = vld [vmem:[%s8221_s1 + $0x60] sm:$0xff] }
 0x8c3   : > { %v2619_v58 = vadd.f32 %v2616_v8, %v2615_v10  ;;  %4768 = vmatpush3.msra.mxu0 %v2692_v41  ;;  %v2680_v10 = vld [vmem:[%s10153_s26] sm:$0xff]  ;;  %v8224_v8 = vld [vmem:[%s8221_s1 + $0x1e8] sm:$0xff]  ;;  %10157 = vst [vmem:[#allocation8_spill] sm:$0xff] %v8326_v37 }
 0x8c4   : > { %4769 = vmatprep.subr.mxu0 %v2707_v35  ;;  %10155 = vst [vmem:[#allocation6_spill] sm:$0xff] %v8224_v8  ;;  %2855 = vmatprep.subr.mxu1 %v8224_v8  ;;  %v8330_v41 = vld [vmem:[%s8221_s1 + $0x48] sm:$0xff] }
 0x8c5   : > { %v2620_v17 = vadd.f32 %v2619_v58, %v2617_v13  ;;  %4770 = vmatpush3.msra.mxu0 %v2691_v56  ;;  %v8227_v13 = vld [vmem:[%s8221_s1 + $0x1f8] sm:$0xff]  ;;  %v8230_v58 = vld [vmem:[%s8221_s1 + $0x1e0] sm:$0xff]  ;;  %10158 = vst [vmem:[#allocation9_spill] sm:$0xff] %v8330_v41 }
 0x8c6   : > { %4771 = vmatprep.subr.mxu0 %v2706_v63  ;;  %2856 = vmatpush1.msra.mxu1 %v8230_v58  ;;  %v2648_v63 = vpop.permute.xlu0 %2647 }
 0x8c7   : > { %v2621_v6 = vadd.f32 %v2620_v17, %v2618_v60  ;;  %4772 = vmatpush3.msra.mxu0 %v2690_v7  ;;  %v8235_v60 = vld [vmem:[%s8221_s1 + $0x1c8] sm:$0xff]  ;;  %v8239_v17 = vld [vmem:[%s8221_s1 + $0x1c0] sm:$0xff] }
 0x8c8   : > { %4773 = vmatprep.subr.mxu0 %v2705_v45  ;;  %2857 = vmatprep.subr.mxu1 %v8235_v60 }
 0x8c9   : > { %2622 = vadd.xlane.f32.xlu1 %v2621_v6  ;;  %4774 = vmatpush3.msra.mxu0 %v2689_v47  ;;  %v8242_v6 = vld [vmem:[%s8221_s1 + $0x1a8] sm:$0xff] }
 0x8ca   : > { %4775 = vmatprep.subr.mxu0 %v2704_v49  ;;  %2858 = vmatpush1.msra.mxu1 %v8239_v17 }
 0x8cb   : > { %4776 = vmatpush3.msra.mxu0 %v2688_v53  ;;  %2859 = vmatprep.subr.mxu1 %v8242_v6 }
 0x8cc   : > { %4777 = vmatprep.subr.mxu0 %v2703_v57 }
 0x8cd   : > { %4778 = vmatpush3.msra.mxu0 %v2687_v61  ;;  %v2653_v61 = vpop.permute.xlu0 %2652 }
 0x8ce   : > { %4779 = vmatprep.subr.mxu0 %v2702_v36 }
 0x8cf   : > { %4780 = vmatpush3.msra.mxu0 %v2686_v38 }
 0x8d0   : > { %4781 = vmatprep.subr.mxu0 %v2701_v40 }
 0x8d1   : > { %4782 = vmatpush3.msra.mxu0 %v2685_v54 }
 0x8d2   : > { %4783 = vmatprep.subr.mxu0 %v2700_v48 }
 0x8d3   : > { %4784 = vmatpush3.msra.mxu0 %v2684_v1 }
 0x8d4   : > { %4785 = vmatprep.subr.mxu0 %v2699_v5  ;;  %v8346_v5 = vld [vmem:[%s8221_s1 + $0x1d0] sm:$0xff] }
 0x8d5   : > { %4786 = vmatpush3.msra.mxu0 %v2683_v9  ;;  %v8350_v9 = vld [vmem:[%s8221_s1 + $0x1b8] sm:$0xff] }
 0x8d6   : > { %4787 = vmatprep.subr.mxu0 %v2698_v23  ;;  %v8354_v23 = vld [vmem:[%s8221_s1 + $0x1b0] sm:$0xff] }
 0x8d7   : > { %4788 = vmatpush3.msra.mxu0 %v2682_v31  ;;  %v8358_v31 = vld [vmem:[%s8221_s1 + $0x198] sm:$0xff] }
 0x8d8   : > { %4789 = vmatprep.subr.mxu0 %v2697_v12  ;;  %v8366_v12 = vld [vmem:[%s8221_s1 + $0x178] sm:$0xff] }
 0x8d9   : > { %4790 = vmatpush3.msra.mxu0 %v2681_v14  ;;  %v8371_v14 = vld [vmem:[%s8221_s1 + $0x170] sm:$0xff] }
 0x8da   : > { %2664 = vperm.xlu1 %4959, %v4697_v52   ;;  %4791 = vmatprep.subr.mxu0 %v2696_v20  ;;  %v8246_v52 = vld [vmem:[%s8221_s1 + $0x1a0] sm:$0xff]  ;;  %v8379_v20 = vld [vmem:[%s8221_s1 + $0x150] sm:$0xff] }
 0x8db   : > { %4792 = vmatpush3.msra.mxu0 %v2680_v10  ;;  %2860 = vmatpush1.msra.mxu1 %v8246_v52  ;;  %v8383_v10 = vld [vmem:[%s8221_s1 + $0x138] sm:$0xff] }
 0x8dc   : > { %2932 = vmatprep.subr.mxu0 %v8227_v13 }
 0x8de   : > { %2669 = vperm.xlu1 %4959, %v4698_v62   ;;  %v8250_v62 = vld [vmem:[%s8221_s1 + $0x188] sm:$0xff] }
 0x8df   : > { %2861 = vmatprep.subr.mxu1 %v8250_v62 }
 0x8e2   : > { %3148 = vperm.xlu1 %4959, %v3142_v2   ;;  %v8254_v2 = vld [vmem:[%s8221_s1 + $0x180] sm:$0xff] }
 0x8e3   : > { %2862 = vmatpush1.msra.mxu1 %v8254_v2 }
 0x8e6   : > { %3153 = vperm.xlu1 %4959, %v3143_v43   ;;  %v8258_v43 = vld [vmem:[%s8221_s1 + $0x168] sm:$0xff] }
 0x8e7   : > { %2863 = vmatprep.subr.mxu1 %v8258_v43 }
 0x8ea   : > { %3158 = vperm.xlu1 %4959, %v3144_v4   ;;  %v8262_v4 = vld [vmem:[%s8221_s1 + $0x160] sm:$0xff] }
 0x8eb   : > { %2864 = vmatpush1.msra.mxu1 %v8262_v4 }
 0x8ee   : > { %3163 = vperm.xlu1 %4959, %v3145_v46   ;;  %v8266_v46 = vld [vmem:[%s8221_s1 + $0x148] sm:$0xff] }
 0x8ef   : > { %2865 = vmatprep.subr.mxu1 %v8266_v46 }
 0x8f2   : > { %3502 = vperm.xlu1 %4959, %v4711_v21   ;;  %v8270_v21 = vld [vmem:[%s8221_s1 + $0x140] sm:$0xff] }
 0x8f3   : > { %2866 = vmatpush1.msra.mxu1 %v8270_v21 }
 0x8f6   : > { %3507 = vperm.xlu1 %4959, %v4712_v29   ;;  %v8274_v29 = vld [vmem:[%s8221_s1 + $0x128] sm:$0xff] }
 0x8f7   : > { %2867 = vmatprep.subr.mxu1 %v8274_v29 }
 0x8fa   : > { %3512 = vperm.xlu1 %4959, %v4713_v33   ;;  %v8278_v33 = vld [vmem:[%s8221_s1 + $0x120] sm:$0xff] }
 0x8fb   : > { %2868 = vmatpush1.msra.mxu1 %v8278_v33 }
 0x8fe   : > { %3517 = vperm.xlu1 %4959, %v4714_v27   ;;  %v8282_v27 = vld [vmem:[%s8221_s1 + $0x108] sm:$0xff] }
 0x8ff   : > { %2869 = vmatprep.subr.mxu1 %v8282_v27 }
 0x902   : > { %3856 = vperm.xlu1 %4959, %v4731_v51   ;;  %v8286_v51 = vld [vmem:[%s8221_s1 + $0x100] sm:$0xff] }
 0x903   : > { %2870 = vmatpush1.msra.mxu1 %v8286_v51 }
 0x906   : > { %3861 = vperm.xlu1 %4959, %v4732_v34   ;;  %v8290_v34 = vld [vmem:[%s8221_s1 + $0xe8] sm:$0xff] }
 0x907   : > { %2871 = vmatprep.subr.mxu1 %v8290_v34 }
 0x90a   : > { %3866 = vperm.xlu1 %4959, %v4733_v0   ;;  %v8294_v0 = vld [vmem:[%s8221_s1 + $0xe0] sm:$0xff] }
 0x90b   : > { %2872 = vmatpush1.msra.mxu1 %v8294_v0 }
 0x90e   : > { %3871 = vperm.xlu1 %4959, %v4734_v19   ;;  %v8298_v19 = vld [vmem:[%s8221_s1 + $0xc8] sm:$0xff] }
 0x90f   : > { %2873 = vmatprep.subr.mxu1 %v8298_v19 }
 0x910   : > { %2874 = vmatpush1.msra.mxu1 %v8302_v26 }
 0x911   : > { %2875 = vmatprep.subr.mxu1 %v8306_v25 }
 0x912   : > { %2876 = vmatpush1.msra.mxu1 %v8310_v18 }
 0x913   : > { %2877 = vmatprep.subr.mxu1 %v8314_v55 }
 0x914   : > { %2878 = vmatpush1.msra.mxu1 %v8318_v24 }
 0x915   : > { %2879 = vmatprep.subr.mxu1 %v8322_v11 }
 0x916   : > { %2880 = vmatpush1.msra.mxu1 %v8326_v37 }
 0x917   : > { %2881 = vmatprep.subr.mxu1 %v8330_v41 }
 0x952   : > { %v2623_v42 = vpop.xlane.xlu1 %2622 }
 0x953   : > { %v2624_v44 = vrot.slane %v2623_v42, 4 }
 0x955   : > { %v2625_v50 = vadd.f32 %v2624_v44, %v2623_v42 }
 0x956   : > { %v2665_v7 = vpop.permute.xlu1 %2664 }
 0x957   : > { %v2626_v3 = vrot.slane %v2625_v50, 2 }
 0x959   : > { %v2627_v15 = vadd.f32 %v2626_v3, %v2625_v50  ;;  %v8343_v3 = vld [vmem:[%s8221_s1 + $0x1d8] sm:$0xff] }
 0x95a   : > { %v2670_v42 = vpop.permute.xlu1 %2669 }
 0x95b   : > { %v2628_v39 = vrot.slane %v2627_v15, 1 }
 0x95d   : > { %v2629_v16 = vadd.f32 %v2628_v39, %v2627_v15  ;;  %v8362_v39 = vld [vmem:[%s8221_s1 + $0x190] sm:$0xff] }
 0x95f   : > { %4937 = vpush %v2629_v16  ;;  %v8375_v16 = vld [vmem:[%s8221_s1 + $0x158] sm:$0xff] }
 0x990   : > { %s4938_s22 = spop %4937 }
 0x991   : > { %s2633_s23 = smul.f32 0.00024414063, %s4938_s22 }
 0x993   : > { %s2634_s24 = sadd.f32 1e-05, %s2633_s23 }
 0x995   : > { %v2635_v35 = vstv %s2634_s24 }
 0x996   : > { %4960 = vrsqrt.f32 %v2635_v35  ;;  %v8387_v35 = vld [vmem:[%s8221_s1 + $0x130] sm:$0xff] }
 0x9a3   : > { %v4961_v56 = vpop.eup %4960 }
 0x9a4   : > { %4939 = vpush %v4961_v56  ;;  %v8391_v56 = vld [vmem:[%s8221_s1 + $0x118] sm:$0xff] }
 0x9d5   : > { %s4940_s25 = spop %4939 }
 0x9d6   : > { %v2638_v45 = vstv %s4940_s25  ;;  %s4676_s25 = sshll.u32 %s10218_s30, 2 }
 0x9d7   : > { %v2639_v47 = vmul.f32 %v2638_v45, %v8063_v22  ;;  %v2640_v49 = vmul.f32 %v2638_v45, %v8065_v28  ;;  %v2641_v53 = vmul.f32 %v2638_v45, %v8067_v30  ;;  %v2642_v57 = vmul.f32 %v2638_v45, %v8069_v32  ;;  %v8340_v30 = vld [vmem:[%s8221_s1 + $0x1f0] sm:$0xff] }
 0x9d8   : > { %v8403_v45 = vld [vmem:[%s8221_s1 + $0xf0] sm:$0xff] }
 0x9d9   : > { %v2655_v36 = vmul.f32 %v2648_v63, %v2639_v47  ;;  %v2656_v38 = vmul.f32 %v2648_v63, %v2640_v49  ;;  %v2658_v40 = vmul.f32 %v2653_v61, %v2642_v57  ;;  %v2657_v44 = vmul.f32 %v2653_v61, %v2641_v53  ;;  %v8395_v63 = vld [vmem:[%s8221_s1 + $0x110] sm:$0xff]  ;;  %10159 = vst [vmem:[#allocation10_spill] sm:$0xff] %v8403_v45  ;;  %v8407_v47 = vld [vmem:[%s8221_s1 + $0xd8] sm:$0xff] }
 0x9da   : > { %10160 = vst [vmem:[#allocation11_spill] sm:$0xff] %v8407_v47  ;;  %v8411_v49 = vld [vmem:[%s8221_s1 + $0xd0] sm:$0xff]  ;;  %v8415_v53 = vld [vmem:[%s8221_s1 + $0xb8] sm:$0xff] }
 0x9db   : > { %v2672_v54 = vadd.f32 %v2665_v7, %v2655_v36  ;;  %v2673_v50 = vadd.f32 %v2665_v7, %v2656_v38  ;;  %v2675_v22 = vadd.f32 %v2670_v42, %v2658_v40  ;;  %v2674_v1 = vadd.f32 %v2670_v42, %v2657_v44  ;;  %v8399_v7 = vld [vmem:[%s8221_s1 + $0xf8] sm:$0xff]  ;;  %10161 = vst [vmem:[#allocation12_spill] sm:$0xff] %v8411_v49  ;;  %v8419_v57 = vld [vmem:[%s8221_s1 + $0xb0] sm:$0xff]  ;;  %v8445_v44 = vld [vmem:[%s8221_s1 + $0x40] sm:$0xff] }
 0x9dc   : > { %10162 = vst [vmem:[#allocation13_spill] sm:$0xff] %v8415_v53  ;;  %10163 = vst [vmem:[#allocation15_spill] sm:$0xff] %v8419_v57  ;;  %v8423_v61 = vld [vmem:[%s8221_s1 + $0x98] sm:$0xff]  ;;  %v8427_v36 = vld [vmem:[%s8221_s1 + $0x90] sm:$0xff]  ;;  %2882 = vmatpush1.msra.mxu1 %v8445_v44 }
 0x9dd   : > { %v2676_v48 = vmax.f32 %v2672_v54, 0.0  ;;  %v2677_v28 = vmax.f32 %v2673_v50, 0.0  ;;  %v2679_v32 = vmax.f32 %v2675_v22, 0.0  ;;  %v2678_v15 = vmax.f32 %v2674_v1, 0.0  ;;  %10164 = vst [vmem:[#allocation17_spill] sm:$0xff] %v8423_v61  ;;  %10165 = vst [vmem:[#allocation19_spill] sm:$0xff] %v8427_v36 }
 0x9de   : > { %v8431_v38 = vld [vmem:[%s8221_s1 + $0x78] sm:$0xff]  ;;  %v8435_v40 = vld [vmem:[%s8221_s1 + $0x70] sm:$0xff]  ;;  %10169 = vst [vmem:[#allocation27_spill] sm:$0xff] %v8445_v44  ;;  %v8453_v50 = vld [vmem:[%s8221_s1 + $0x28] sm:$0xff] }
 0x9df   : > { %2776 = vmatprep.mubr.f32.mxu0 %v2677_v28  ;;  %10166 = vst [vmem:[#allocation21_spill] sm:$0xff] %v8431_v38  ;;  %10167 = vst [vmem:[#allocation23_spill] sm:$0xff] %v8435_v40  ;;  %v8439_v42 = vld [vmem:[%s8221_s1 + $0x58] sm:$0xff]  ;;  %v8448_v54 = vld [vmem:[%s8221_s1 + $0x50] sm:$0xff]  ;;  %2883 = vmatprep.subr.mxu1 %v8453_v50 }
 0x9e0   : > { %2777 = vmatmul.mubr.f32.vlgmr.msra.gmra.mxu0 %v2676_v48  ;;  %10168 = vst [vmem:[#allocation25_spill] sm:$0xff] %v8439_v42  ;;  %10170 = vst [vmem:[#allocation28_spill] sm:$0xff] %v8448_v54  ;;  %v8456_v22 = vld [vmem:[%s8221_s1 + $0x38] sm:$0xff]  ;;  %v8461_v48 = vld [vmem:[%s8221_s1 + $0x20] sm:$0xff] }
 0x9e1   : > { %2781 = vmatprep.mubr.f32.mxu0 %v2679_v32  ;;  %2933 = vmatpush1.msra.mxu0 %v8340_v30  ;;  %10171 = vst [vmem:[#allocation29_spill] sm:$0xff] %v8453_v50  ;;  %10172 = vst [vmem:[#allocation30_spill] sm:$0xff] %v8456_v22  ;;  %v8464_v28 = vld [vmem:[%s8221_s1 + $0x30] sm:$0xff]  ;;  %v8469_v1 = vld [vmem:[%s8221_s1 + $0x8] sm:$0xff] }
 0x9e2   : > { %2934 = vmatprep.subr.mxu0 %v8343_v3  ;;  %10173 = vst [vmem:[#allocation31_spill] sm:$0xff] %v8461_v48  ;;  %10174 = vst [vmem:[#allocation32_spill] sm:$0xff] %v8464_v28  ;;  %2884 = vmatpush1.msra.mxu1 %v8461_v48  ;;  %v8472_v32 = vld [vmem:[%s8221_s1 + $0x18] sm:$0xff]  ;;  %v8480_v50 = vld [vmem:[%s8221_s1 + $0x10] sm:$0xff] }
 0x9e3   : > { %2935 = vmatpush1.msra.mxu0 %v8346_v5  ;;  %10175 = vst [vmem:[#allocation33_spill] sm:$0xff] %v8469_v1  ;;  %10176 = vst [vmem:[#allocation34_spill] sm:$0xff] %v8472_v32  ;;  %2885 = vmatprep.subr.mxu1 %v8469_v1 }
 0x9e4   : > { %2782 = vmatmul.mubr.f32.gmra.mxu0 %v2678_v15  ;;  %2936 = vmatprep.subr.mxu0 %v8350_v9  ;;  %v8477_v15 = vld [vmem:[%s8221_s1] sm:$0xff]  ;;  %10178 = vst [vmem:[#allocation36_spill] sm:$0xff] %v8480_v50 }
 0x9e5   : > { %2937 = vmatpush1.msra.mxu0 %v8354_v23  ;;  %2996 = vmatprep.mubr.f32.mxu0 %v9799_v59  ;;  %10177 = vst [vmem:[#allocation35_spill] sm:$0xff] %v8477_v15 }
 0x9e6   : > { %2938 = vmatprep.subr.mxu0 %v8358_v31  ;;  %2886 = vmatpush1.msra.mxu1 %v8477_v15 }
 0x9e7   : > { %2939 = vmatpush1.msra.mxu0 %v8362_v39 }
 0x9e8   : > { %2940 = vmatprep.subr.mxu0 %v8366_v12 }
 0x9e9   : > { %2941 = vmatpush1.msra.mxu0 %v8371_v14 }
 0x9ea   : > { %2942 = vmatprep.subr.mxu0 %v8375_v16 }
 0x9eb   : > { %2943 = vmatpush1.msra.mxu0 %v8379_v20 }
 0x9ec   : > { %2944 = vmatprep.subr.mxu0 %v8383_v10 }
 0x9ed   : > { %2945 = vmatpush1.msra.mxu0 %v8387_v35 }
 0x9ee   : > { %2946 = vmatprep.subr.mxu0 %v8391_v56 }
 0x9ef   : > { %2947 = vmatpush1.msra.mxu0 %v8395_v63 }
 0x9f0   : > { %2948 = vmatprep.subr.mxu0 %v8399_v7 }
 0x9f1   : > { %2949 = vmatpush1.msra.mxu0 %v8403_v45 }
 0x9f2   : > { %2950 = vmatprep.subr.mxu0 %v8407_v47 }
 0x9f3   : > { %2951 = vmatpush1.msra.mxu0 %v8411_v49 }
 0x9f4   : > { %2952 = vmatprep.subr.mxu0 %v8415_v53 }
 0x9f5   : > { %2953 = vmatpush1.msra.mxu0 %v8419_v57 }
 0x9f6   : > { %2954 = vmatprep.subr.mxu0 %v8423_v61 }
 0x9f7   : > { %2955 = vmatpush1.msra.mxu0 %v8427_v36 }
 0x9f8   : > { %2956 = vmatprep.subr.mxu0 %v8431_v38 }
 0x9f9   : > { %2957 = vmatpush1.msra.mxu0 %v8435_v40 }
 0x9fa   : > { %2958 = vmatprep.subr.mxu0 %v8439_v42 }
 0x9fb   : > { %2959 = vmatpush1.msra.mxu0 %v8448_v54 }
 0x9fc   : > { %2960 = vmatprep.subr.mxu0 %v8456_v22 }
 0x9fd   : > { %2961 = vmatpush1.msra.mxu0 %v8464_v28 }
 0x9fe   : > { %2962 = vmatprep.subr.mxu0 %v8472_v32 }
 0x9ff   : > { %2963 = vmatpush1.msra.mxu0 %v8480_v50 }
 0xa00   : > { %3267 = vmatprep.subr.mxu0 %v8227_v13 }
 0xaa0   : > { %v4793_v48 = vpop.f32.mrf.mxu0 }
 0xaa2   : > { %v4794_v44 = vpop.f32.mrf.mxu0 }
 0xaa3   : > { %v8485_v41 = vadd.f32 %v4794_v44, %v4793_v48 }
 0xaa4   : > { %v4796_v37 = vpop.f32.mrf.mxu0 }
 0xaa5   : > { %2920 = vmatmul.mubr.f32.vlgmr.msra.gmra.mxu1 %v8485_v41  ;;  %2997 = vmatmul.mubr.f32.vlgmr.msra.gmra.mxu0 %v8485_v41 }
 0xaa6   : > { %v4797_v1 = vpop.f32.mrf.mxu0  ;;  %2925 = vmatprep.mubr.f32.mxu1 %v9799_v59  ;;  %3002 = vmatprep.mubr.f32.mxu0 %v9799_v59 }
 0xaa7   : > { %v8491_v11 = vadd.f32 %v4797_v1, %v4796_v37  ;;  %3268 = vmatpush1.msra.mxu0 %v8340_v30  ;;  %v2851_v37 = vld [vmem:[%s9089_s10] sm:$0xff] }
 0xaa8   : > { %3269 = vmatprep.subr.mxu0 %v8343_v3 }
 0xaa9   : > { %2926 = vmatmul.mubr.f32.gmra.mxu1 %v8491_v11  ;;  %3003 = vmatmul.mubr.f32.gmra.mxu0 %v8491_v11 }
 0xaaa   : > { %3270 = vmatpush1.msra.mxu0 %v8346_v5  ;;  %3331 = vmatprep.mubr.f32.mxu0 %v9799_v59 }
 0xaab   : > { %3271 = vmatprep.subr.mxu0 %v8350_v9  ;;  %4866 = vmatprep.mubr.msk.f32.mxu1 %vm1627_vm1, %v2851_v37  ;;  %v3149_v37 = vpop.permute.xlu1 %3148 }
 0xaac   : > { %3272 = vmatpush1.msra.mxu0 %v8354_v23 }
 0xaad   : > { %3273 = vmatprep.subr.mxu0 %v8358_v31 }
 0xaae   : > { %3274 = vmatpush1.msra.mxu0 %v8362_v39 }
 0xaaf   : > { %3275 = vmatprep.subr.mxu0 %v8366_v12 }
 0xab0   : > { %3276 = vmatpush1.msra.mxu0 %v8371_v14 }
 0xab1   : > { %3277 = vmatprep.subr.mxu0 %v8375_v16 }
 0xab2   : > { %3278 = vmatpush1.msra.mxu0 %v8379_v20 }
 0xab3   : > { %3279 = vmatprep.subr.mxu0 %v8383_v10 }
 0xab4   : > { %3280 = vmatpush1.msra.mxu0 %v8387_v35 }
 0xab5   : > { %3281 = vmatprep.subr.mxu0 %v8391_v56 }
 0xab6   : > { %3282 = vmatpush1.msra.mxu0 %v8395_v63 }
 0xab7   : > { %3283 = vmatprep.subr.mxu0 %v8399_v7 }
 0xab8   : > { %3284 = vmatpush1.msra.mxu0 %v8403_v45 }
 0xab9   : > { %3285 = vmatprep.subr.mxu0 %v8407_v47 }
 0xaba   : > { %3286 = vmatpush1.msra.mxu0 %v8411_v49 }
 0xabb   : > { %3287 = vmatprep.subr.mxu0 %v8415_v53 }
 0xabc   : > { %3288 = vmatpush1.msra.mxu0 %v8419_v57 }
 0xabd   : > { %3289 = vmatprep.subr.mxu0 %v8423_v61  ;;  %v3154_v61 = vpop.permute.xlu1 %3153 }
 0xabe   : > { %3290 = vmatpush1.msra.mxu0 %v8427_v36 }
 0xabf   : > { %3291 = vmatprep.subr.mxu0 %v8431_v38 }
 0xac0   : > { %3292 = vmatpush1.msra.mxu0 %v8435_v40 }
 0xac1   : > { %3293 = vmatprep.subr.mxu0 %v8439_v42 }
 0xac2   : > { %3294 = vmatpush1.msra.mxu0 %v8448_v54 }
 0xac3   : > { %3295 = vmatprep.subr.mxu0 %v8456_v22 }
 0xac4   : > { %3296 = vmatpush1.msra.mxu0 %v8464_v28 }
 0xac5   : > { %3297 = vmatprep.subr.mxu0 %v8472_v32 }
 0xac6   : > { %3298 = vmatpush1.msra.mxu0 %v8480_v50 }
 0xac7   : > { %3533 = vmatprep.subr.mxu0 %v8224_v8 }
 0xb65   : > { %v2998_v44 = vpop.f32.mrf.mxu0  ;;  %v2921_v1 = vpop.f32.mrf.mxu1 }
 0xb66   : > { %v3009_v38 = vand.u32 2147483647, %v2998_v44 }
 0xb67   : > { %v3000_v48 = vpop.f32.mrf.mxu0  ;;  %v2923_v40 = vpop.f32.mrf.mxu1 }
 0xb68   : > { %v3011_v28 = vand.u32 2147483647, %v3000_v48 }
 0xb69   : > { %v3004_v54 = vpop.f32.mrf.mxu0  ;;  %v2927_v50 = vpop.f32.mrf.mxu1 }
 0xb6a   : > { %v3010_v32 = vand.u32 2147483647, %v3004_v54  ;;  %v10182_v54 = vld [vmem:[#allocation27_spill] sm:$0xff] }
 0xb6b   : > { %v3006_v42 = vpop.f32.mrf.mxu0  ;;  %v2929_v36 = vpop.f32.mrf.mxu1 }
 0xb6c   : > { %v3012_v22 = vand.u32 2147483647, %v3006_v42  ;;  %v2852_v42 = vld [vmem:[%s9089_s10 + $0x8] sm:$0xff] }
 0xb6e   : > { %4846 = vmatprep.subr.mxu1 %v3012_v22 }
 0xb6f   : > { %4847 = vmatpush3.msra.mxu1 %v3012_v22  ;;  %v10184_v22 = vld [vmem:[#allocation31_spill] sm:$0xff] }
 0xb70   : > { %4848 = vmatprep.subr.mxu1 %v3011_v28 }
 0xb71   : > { %4849 = vmatpush3.msra.mxu1 %v3011_v28  ;;  %v10185_v28 = vld [vmem:[#allocation33_spill] sm:$0xff] }
 0xb72   : > { %4850 = vmatprep.subr.mxu1 %v3010_v32 }
 0xb73   : > { %4851 = vmatpush3.msra.mxu1 %v3010_v32  ;;  %v3121_v32 = vpop.permute.xlu0 %3120 }
 0xb74   : > { %4852 = vmatprep.subr.mxu1 %v3009_v38 }
 0xb75   : > { %4853 = vmatpush3.msra.mxu1 %v3009_v38  ;;  %v10180_v38 = vld [vmem:[#allocation8_spill] sm:$0xff] }
 0xb76   : > { %4854 = vmatprep.subr.mxu1 %v2929_v36 }
 0xb77   : > { %4855 = vmatpush3.msra.mxu1 %v2929_v36  ;;  %v2853_v36 = vld [vmem:[%s9089_s10 + $0x10] sm:$0xff]  ;;  %v3126_v48 = vpop.permute.xlu0 %3125 }
 0xb78   : > { %4856 = vmatprep.subr.mxu1 %v2923_v40 }
 0xb79   : > { %4857 = vmatpush3.msra.mxu1 %v2923_v40  ;;  %v10181_v40 = vld [vmem:[#allocation9_spill] sm:$0xff] }
 0xb7a   : > { %4858 = vmatprep.subr.mxu1 %v2927_v50 }
 0xb7b   : > { %4859 = vmatpush3.msra.mxu1 %v2927_v50  ;;  %v10183_v50 = vld [vmem:[#allocation29_spill] sm:$0xff]  ;;  %v3131_v45 = vpop.permute.xlu0 %3130 }
 0xb7c   : > { %4860 = vmatprep.subr.mxu1 %v2921_v1 }
 0xb7d   : > { %4861 = vmatpush3.msra.mxu1 %v2921_v1 }
 0xb7e   : > { %4862 = vmatprep.subr.mxu1 %v8491_v11 }
 0xb7f   : > { %4863 = vmatpush3.msra.mxu1 %v8491_v11  ;;  %v2854_v11 = vld [vmem:[%s9089_s10 + $0x18] sm:$0xff] }
 0xb80   : > { %4864 = vmatprep.subr.mxu1 %v8485_v41 }
 0xb81   : > { %4865 = vmatpush3.msra.mxu1 %v8485_v41  ;;  %v10179_v41 = vld [vmem:[#allocation7_spill] sm:$0xff] }
 0xb82   : > { %4867 = vmatmul.mubr.msk.f32.vlgmr.msra.gmra.mxu1 %vm1627_vm1, %v2852_v42  ;;  %3178 = vmatprep.subr.mxu1 %v8224_v8 }
 0xb83   : > { %4869 = vmatprep.mubr.msk.f32.mxu1 %vm1627_vm1, %v2853_v36  ;;  %3179 = vmatpush1.msra.mxu1 %v8230_v58 }
 0xb84   : > { %3180 = vmatprep.subr.mxu1 %v8235_v60 }
 0xb85   : > { %3181 = vmatpush1.msra.mxu1 %v8239_v17 }
 0xb86   : > { %4870 = vmatmul.mubr.msk.f32.gmra.mxu1 %vm1627_vm1, %v2854_v11  ;;  %3182 = vmatprep.subr.mxu1 %v8242_v6 }
 0xb87   : > { %3183 = vmatpush1.msra.mxu1 %v8246_v52  ;;  %3242 = vmatprep.mubr.f32.mxu1 %v9799_v59 }
 0xb88   : > { %3184 = vmatprep.subr.mxu1 %v8250_v62 }
 0xb89   : > { %3185 = vmatpush1.msra.mxu1 %v8254_v2 }
 0xb8a   : > { %3186 = vmatprep.subr.mxu1 %v8258_v43 }
 0xb8b   : > { %3187 = vmatpush1.msra.mxu1 %v8262_v4 }
 0xb8c   : > { %3188 = vmatprep.subr.mxu1 %v8266_v46 }
 0xb8d   : > { %3189 = vmatpush1.msra.mxu1 %v8270_v21 }
 0xb8e   : > { %3190 = vmatprep.subr.mxu1 %v8274_v29 }
 0xb8f   : > { %3191 = vmatpush1.msra.mxu1 %v8278_v33 }
 0xb90   : > { %3192 = vmatprep.subr.mxu1 %v8282_v27 }
 0xb91   : > { %3193 = vmatpush1.msra.mxu1 %v8286_v51 }
 0xb92   : > { %3194 = vmatprep.subr.mxu1 %v8290_v34 }
 0xb93   : > { %3195 = vmatpush1.msra.mxu1 %v8294_v0 }
 0xb94   : > { %3196 = vmatprep.subr.mxu1 %v8298_v19 }
 0xb95   : > { %3197 = vmatpush1.msra.mxu1 %v8302_v26 }
 0xb96   : > { %3198 = vmatprep.subr.mxu1 %v8306_v25 }
 0xb97   : > { %3199 = vmatpush1.msra.mxu1 %v8310_v18 }
 0xb98   : > { %3200 = vmatprep.subr.mxu1 %v8314_v55 }
 0xb99   : > { %3201 = vmatpush1.msra.mxu1 %v8318_v24 }
 0xb9a   : > { %3202 = vmatprep.subr.mxu1 %v10179_v41 }
 0xb9b   : > { %3203 = vmatpush1.msra.mxu1 %v10180_v38 }
 0xb9c   : > { %3204 = vmatprep.subr.mxu1 %v10181_v40 }
 0xb9d   : > { %3205 = vmatpush1.msra.mxu1 %v10182_v54 }
 0xb9e   : > { %3206 = vmatprep.subr.mxu1 %v10183_v50 }
 0xb9f   : > { %3207 = vmatpush1.msra.mxu1 %v10184_v22 }
 0xba0   : > { %3208 = vmatprep.subr.mxu1 %v10185_v28 }
 0xba1   : > { %3209 = vmatpush1.msra.mxu1 %v8477_v15 }
 0xba2   : > { %3377 = vmatprep.subr.mxu1 %v9799_v59 }
 0xc42   : > { %v8582_v44 = vpop.f32.mrf.mxu1 }
 0xc43   : > { %10186 = vst [vmem:[#allocation37_spill] sm:$0xff] %v8582_v44  ;;  %v3111_v42 = vmax.f32 %v8582_v44, 0.0 }
 0xc44   : > { %v8584_v1 = vpop.f32.mrf.mxu1 }
 0xc45   : > { %10187 = vst [vmem:[#allocation38_spill] sm:$0xff] %v8584_v1  ;;  %v3110_v36 = vmax.f32 %v8584_v1, 0.0  ;;  %v3139_v53 = vmul.f32 %v3126_v48, %v3111_v42 }
 0xc46   : > { %v8588_v11 = vpop.f32.mrf.mxu1 }
 0xc47   : > { %10188 = vst [vmem:[#allocation39_spill] sm:$0xff] %v8588_v11  ;;  %v3138_v8 = vmul.f32 %v3121_v32, %v3110_v36  ;;  %v3113_v1 = vmax.f32 %v8588_v11, 0.0  ;;  %v8600_v36 = vadd.f32 %v3154_v61, %v3139_v53  ;;  %v3171_v53 = vld [vmem:[%s9090_s11 + $0x8] sm:$0xff] }
 0xc48   : > { %v8590_v57 = vpop.f32.mrf.mxu1 }
 0xc49   : > { %10189 = vst [vmem:[#allocation40_spill] sm:$0xff] %v8590_v57  ;;  %v8592_v49 = vadd.f32 %v3149_v37, %v3138_v8  ;;  %v3112_v47 = vmax.f32 %v8590_v57, 0.0  ;;  %v3159_v8 = vpop.permute.xlu1 %3158  ;;  %v3136_v37 = vpop.permute.xlu0 %3135 }
 0xc4a   : > { %v3141_v48 = vmul.f32 %v3136_v37, %v3113_v1 }
 0xc4b   : > { %3243 = vmatmul.mubr.f32.vlgmr.msra.gmra.mxu1 %v8592_v49  ;;  %3332 = vmatmul.mubr.f32.vlgmr.msra.gmra.mxu0 %v8592_v49  ;;  %v3140_v32 = vmul.f32 %v3131_v45, %v3112_v47 }
 0xc4c   : > { %3248 = vmatprep.mubr.f32.mxu1 %v9799_v59  ;;  %3337 = vmatprep.mubr.f32.mxu0 %v9799_v59 }
 0xc4d   : > { %3534 = vmatpush1.msra.mxu0 %v8230_v58  ;;  %v8608_v42 = vadd.f32 %v3159_v8, %v3140_v32  ;;  %v3164_v45 = vpop.permute.xlu1 %3163 }
 0xc4e   : > { %3535 = vmatprep.subr.mxu0 %v8235_v60  ;;  %v8616_v47 = vadd.f32 %v3164_v45, %v3141_v48 }
 0xc4f   : > { %3249 = vmatmul.mubr.f32.gmra.mxu1 %v8600_v36  ;;  %3338 = vmatmul.mubr.f32.gmra.mxu0 %v8600_v36 }
 0xc50   : > { %3254 = vmatprep.mubr.f32.mxu1 %v9799_v59  ;;  %3343 = vmatprep.mubr.f32.mxu0 %v9799_v59 }
 0xc51   : > { %3536 = vmatpush1.msra.mxu0 %v8239_v17 }
 0xc52   : > { %3537 = vmatprep.subr.mxu0 %v8242_v6 }
 0xc53   : > { %3255 = vmatmul.mubr.f32.gmra.mxu1 %v8608_v42  ;;  %3344 = vmatmul.mubr.f32.gmra.mxu0 %v8608_v42 }
 0xc54   : > { %3260 = vmatprep.mubr.f32.mxu1 %v9799_v59  ;;  %3349 = vmatprep.mubr.f32.mxu0 %v9799_v59 }
 0xc55   : > { %3538 = vmatpush1.msra.mxu0 %v8246_v52 }
 0xc56   : > { %3539 = vmatprep.subr.mxu0 %v8250_v62 }
 0xc57   : > { %3261 = vmatmul.mubr.f32.gmra.mxu1 %v8616_v47  ;;  %3350 = vmatmul.mubr.f32.gmra.mxu0 %v8616_v47 }
 0xc58   : > { %3540 = vmatpush1.msra.mxu0 %v8254_v2  ;;  %3597 = vmatprep.mubr.f32.mxu0 %v9799_v59 }
 0xc59   : > { %3541 = vmatprep.subr.mxu0 %v8258_v43  ;;  %4703 = vmatprep.mubr.msk.f32.mxu1 %vm3364_vm2, %v3171_v53 }
 0xc5a   : > { %3542 = vmatpush1.msra.mxu0 %v8262_v4 }
 0xc5b   : > { %3543 = vmatprep.subr.mxu0 %v8266_v46 }
 0xc5c   : > { %3544 = vmatpush1.msra.mxu0 %v8270_v21 }
 0xc5d   : > { %3545 = vmatprep.subr.mxu0 %v8274_v29 }
 0xc5e   : > { %3546 = vmatpush1.msra.mxu0 %v8278_v33 }
 0xc5f   : > { %3547 = vmatprep.subr.mxu0 %v8282_v27 }
 0xc60   : > { %3548 = vmatpush1.msra.mxu0 %v8286_v51 }
 0xc61   : > { %3549 = vmatprep.subr.mxu0 %v8290_v34 }
 0xc62   : > { %3550 = vmatpush1.msra.mxu0 %v8294_v0 }
 0xc63   : > { %3551 = vmatprep.subr.mxu0 %v8298_v19 }
 0xc64   : > { %3552 = vmatpush1.msra.mxu0 %v8302_v26 }
 0xc65   : > { %3553 = vmatprep.subr.mxu0 %v8306_v25 }
 0xc66   : > { %3554 = vmatpush1.msra.mxu0 %v8310_v18 }
 0xc67   : > { %3555 = vmatprep.subr.mxu0 %v8314_v55 }
 0xc68   : > { %3556 = vmatpush1.msra.mxu0 %v8318_v24 }
 0xc69   : > { %3557 = vmatprep.subr.mxu0 %v10179_v41 }
 0xc6a   : > { %3558 = vmatpush1.msra.mxu0 %v10180_v38 }
 0xc6b   : > { %3559 = vmatprep.subr.mxu0 %v10181_v40 }
 0xc6c   : > { %3560 = vmatpush1.msra.mxu0 %v10182_v54 }
 0xc6d   : > { %3561 = vmatprep.subr.mxu0 %v10183_v50 }
 0xc6e   : > { %3562 = vmatpush1.msra.mxu0 %v10184_v22 }
 0xc6f   : > { %3563 = vmatprep.subr.mxu0 %v10185_v28 }
 0xc70   : > { %3564 = vmatpush1.msra.mxu0 %v8477_v15 }
 0xc71   : > { %3622 = vmatprep.subr.mxu0 %v8227_v13 }
 0xd0b   : > { %v3244_v61 = vpop.f32.mrf.mxu1  ;;  %v3333_v1 = vpop.f32.mrf.mxu0 }
 0xd0c   : > { %v3356_v40 = vand.u32 2147483647, %v3333_v1 }
 0xd0d   : > { %v3246_v32 = vpop.f32.mrf.mxu1  ;;  %v3335_v8 = vpop.f32.mrf.mxu0 }
 0xd0f   : > { %v3250_v37 = vpop.f32.mrf.mxu1  ;;  %v3339_v48 = vpop.f32.mrf.mxu0 }
 0xd10   : > { %v3357_v54 = vand.u32 2147483647, %v3339_v48 }
 0xd11   : > { %v3252_v45 = vpop.f32.mrf.mxu1  ;;  %v3341_v11 = vpop.f32.mrf.mxu0 }
 0xd13   : > { %v3345_v57 = vpop.f32.mrf.mxu0  ;;  %v3256_v44 = vpop.f32.mrf.mxu1 }
 0xd14   : > { %v3358_v50 = vand.u32 2147483647, %v3345_v57 }
 0xd15   : > { %v3347_v15 = vpop.f32.mrf.mxu0  ;;  %v3258_v22 = vpop.f32.mrf.mxu1 }
 0xd17   : > { %v3351_v28 = vpop.f32.mrf.mxu0  ;;  %v3262_v53 = vpop.f32.mrf.mxu1 }
 0xd18   : > { %v3359_v13 = vand.u32 2147483647, %v3351_v28  ;;  %v3175_v28 = vld [vmem:[%s9090_s11 + $0x28] sm:$0xff] }
 0xd19   : > { %v3264_v38 = vpop.f32.mrf.mxu1  ;;  %v3353_v57 = vpop.f32.mrf.mxu0 }
 0xd1a   : > { %3378 = vmatpush1.msra.mxu1 %v3359_v13 }
 0xd1b   : > { %3379 = vmatprep.subr.mxu1 %v9799_v59 }
 0xd1c   : > { %3380 = vmatpush1.msra.mxu1 %v3358_v50  ;;  %v3360_v50 = vand.u32 2147483647, %v3335_v8 }
 0xd1d   : > { %3381 = vmatprep.subr.mxu1 %v9799_v59 }
 0xd1e   : > { %3382 = vmatpush1.msra.mxu1 %v3357_v54  ;;  %v3361_v54 = vand.u32 2147483647, %v3341_v11  ;;  %v3177_v11 = vld [vmem:[%s9090_s11 + $0x38] sm:$0xff] }
 0xd1f   : > { %3383 = vmatprep.subr.mxu1 %v9799_v59 }
 0xd20   : > { %3384 = vmatpush1.msra.mxu1 %v3356_v40  ;;  %v3362_v40 = vand.u32 2147483647, %v3347_v15  ;;  %v3172_v15 = vld [vmem:[%s9090_s11 + $0x10] sm:$0xff] }
 0xd21   : > { %3385 = vmatprep.subr.mxu1 %v9799_v59 }
 0xd22   : > { %3386 = vmatpush1.msra.mxu1 %v3264_v38  ;;  %v3363_v38 = vand.u32 2147483647, %v3353_v57 }
 0xd23   : > { %3387 = vmatprep.subr.mxu1 %v9799_v59 }
 0xd24   : > { %3388 = vmatpush1.msra.mxu1 %v3258_v22  ;;  %v3170_v22 = vld [vmem:[%s9090_s11] sm:$0xff] }
 0xd25   : > { %3389 = vmatprep.subr.mxu1 %v9799_v59 }
 0xd26   : > { %3390 = vmatpush1.msra.mxu1 %v3252_v45 }
 0xd27   : > { %3391 = vmatprep.subr.mxu1 %v9799_v59 }
 0xd28   : > { %3392 = vmatpush1.msra.mxu1 %v3246_v32 }
 0xd29   : > { %3393 = vmatprep.subr.mxu1 %v9799_v59 }
 0xd2a   : > { %3394 = vmatpush1.msra.mxu1 %v3262_v53 }
 0xd2b   : > { %3395 = vmatprep.subr.mxu1 %v9799_v59 }
 0xd2c   : > { %3396 = vmatpush1.msra.mxu1 %v3256_v44  ;;  %v3174_v44 = vld [vmem:[%s9090_s11 + $0x20] sm:$0xff] }
 0xd2d   : > { %3397 = vmatprep.subr.mxu1 %v9799_v59 }
 0xd2e   : > { %3398 = vmatpush1.msra.mxu1 %v3250_v37 }
 0xd2f   : > { %3399 = vmatprep.subr.mxu1 %v9799_v59 }
 0xd30   : > { %3400 = vmatpush1.msra.mxu1 %v3244_v61 }
 0xd31   : > { %3401 = vmatprep.subr.mxu1 %v9799_v59 }
 0xd32   : > { %3402 = vmatpush1.msra.mxu1 %v8616_v47  ;;  %v3503_v47 = vpop.permute.xlu1 %3502 }
 0xd33   : > { %3403 = vmatprep.subr.mxu1 %v9799_v59 }
 0xd34   : > { %3404 = vmatpush1.msra.mxu1 %v8608_v42  ;;  %v3474_v42 = vpop.permute.xlu0 %3473 }
 0xd35   : > { %3405 = vmatprep.subr.mxu1 %v9799_v59 }
 0xd36   : > { %3406 = vmatpush1.msra.mxu1 %v8600_v36  ;;  %v3176_v36 = vld [vmem:[%s9090_s11 + $0x30] sm:$0xff]  ;;  %v3508_v48 = vpop.permute.xlu1 %3507 }
 0xd37   : > { %3407 = vmatprep.subr.mxu1 %v9799_v59 }
 0xd38   : > { %3408 = vmatpush1.msra.mxu1 %v8592_v49  ;;  %v3173_v49 = vld [vmem:[%s9090_s11 + $0x18] sm:$0xff]  ;;  %v3479_v32 = vpop.permute.xlu0 %3478 }
 0xd39   : > { %3433 = vmatprep.subr.mxu1 %v9799_v59 }
 0xd3a   : > { %3434 = vmatpush2.msra.mxu1 %v3363_v38 }
 0xd3b   : > { %3435 = vmatprep.subr.mxu1 %v9799_v59 }
 0xd3c   : > { %3436 = vmatpush2.msra.mxu1 %v3362_v40  ;;  %v3484_v40 = vpop.permute.xlu0 %3483 }
 0xd3d   : > { %3437 = vmatprep.subr.mxu1 %v9799_v59 }
 0xd3e   : > { %3438 = vmatpush2.msra.mxu1 %v3361_v54 }
 0xd3f   : > { %3439 = vmatprep.subr.mxu1 %v9799_v59 }
 0xd40   : > { %3440 = vmatpush2.msra.mxu1 %v3360_v50 }
 0xd41   : > { %3442 = vmatmul.mubr.f32.vlgmr.msra.gmra.mxu1 %v3170_v22  ;;  %3731 = vmatprep.subr.mxu1 %v9799_v59 }
 0xd42   : > { %4704 = vmatprep.mubr.msk.f32.mxu1 %vm3364_vm2, %v3173_v49  ;;  %v3513_v49 = vpop.permute.xlu1 %3512 }
 0xd45   : > { %3447 = vmatmul.mubr.f32.gmra.mxu1 %v3172_v15 }
 0xd46   : > { %4705 = vmatprep.mubr.msk.f32.mxu1 %vm3364_vm2, %v3175_v28 }
 0xd49   : > { %3452 = vmatmul.mubr.f32.gmra.mxu1 %v3174_v44 }
 0xd4a   : > { %4706 = vmatprep.mubr.msk.f32.mxu1 %vm3364_vm2, %v3177_v11  ;;  %v3489_v11 = vpop.permute.xlu0 %3488 }
 0xd4d   : > { %3457 = vmatmul.mubr.f32.gmra.mxu1 %v3176_v36 }
 0xe01   : > { %v3443_v61 = vpop.f32.mrf.mxu1 }
 0xe02   : > { %v3462_v1 = vmax.f32 %v3443_v61, 0.0  ;;  %v10203_v61 = vld [vmem:[#allocation34_spill] sm:$0xff] }
 0xe03   : > { %v3445_v8 = vpop.f32.mrf.mxu1 }
 0xe04   : > { %v3491_v37 = vmul.f32 %v3474_v42, %v3462_v1  ;;  %v10201_v42 = vld [vmem:[#allocation30_spill] sm:$0xff]  ;;  %v10204_v1 = vld [vmem:[#allocation36_spill] sm:$0xff] }
 0xe05   : > { %v3448_v45 = vpop.f32.mrf.mxu1 }
 0xe06   : > { %v8701_v13 = vadd.f32 %v3503_v47, %v3491_v37  ;;  %v3463_v53 = vmax.f32 %v3448_v45, 0.0  ;;  %v10202_v47 = vld [vmem:[#allocation32_spill] sm:$0xff] }
 0xe07   : > { %v3450_v57 = vpop.f32.mrf.mxu1 }
 0xe08   : > { %v3492_v38 = vmul.f32 %v3479_v32, %v3463_v53  ;;  %3598 = vmatmul.mubr.f32.vlgmr.msra.gmra.mxu0 %v8701_v13  ;;  %v10205_v32 = vld [vmem:[#allocation6_spill] sm:$0xff] }
 0xe09   : > { %3623 = vmatpush1.msra.mxu0 %v8340_v30  ;;  %v3453_v54 = vpop.f32.mrf.mxu1  ;;  %3603 = vmatprep.mubr.f32.mxu0 %v9799_v59 }
 0xe0a   : > { %v3464_v50 = vmax.f32 %v3453_v54, 0.0  ;;  %3624 = vmatprep.subr.mxu0 %v8343_v3  ;;  %v8707_v22 = vadd.f32 %v3508_v48, %v3492_v38  ;;  %v4715_v54 = vld [vmem:[%s9090_s11 + $0x40] sm:$0xff] }
 0xe0b   : > { %3625 = vmatpush1.msra.mxu0 %v8346_v5  ;;  %v3455_v15 = vpop.f32.mrf.mxu1 }
 0xe0c   : > { %v3493_v28 = vmul.f32 %v3484_v40, %v3464_v50  ;;  %3626 = vmatprep.subr.mxu0 %v8350_v9  ;;  %3604 = vmatmul.mubr.f32.gmra.mxu0 %v8707_v22  ;;  %v3518_v9 = vpop.permute.xlu1 %3517  ;;  %v5272_v50 = vld [vmem:[%s8221_s1 + $0x1f8] sm:$0xff]  ;;  %v4720_v15 = vld [vmem:[%s9090_s11 + $0x68] sm:$0xff] }
 0xe0d   : > { %3627 = vmatpush1.msra.mxu0 %v8354_v23  ;;  %v3458_v30 = vpop.f32.mrf.mxu1  ;;  %3609 = vmatprep.mubr.f32.mxu0 %v9799_v59 }
 0xe0e   : > { %v3465_v44 = vmax.f32 %v3458_v30, 0.0  ;;  %3628 = vmatprep.subr.mxu0 %v8358_v31  ;;  %v8715_v3 = vadd.f32 %v3513_v49, %v3493_v28  ;;  %v10190_v31 = vld [vmem:[#allocation10_spill] sm:$0xff]  ;;  %v5273_v49 = vld [vmem:[%s8221_s1 + $0x1f0] sm:$0xff]  ;;  %v5274_v28 = vld [vmem:[%s8221_s1 + $0x1d8] sm:$0xff] }
 0xe0f   : > { %3629 = vmatpush1.msra.mxu0 %v8362_v39  ;;  %v3460_v5 = vpop.f32.mrf.mxu1  ;;  %v10191_v39 = vld [vmem:[#allocation11_spill] sm:$0xff]  ;;  %v5275_v30 = vld [vmem:[%s8221_s1 + $0x1d0] sm:$0xff] }
 0xe10   : > { %v3494_v36 = vmul.f32 %v3489_v11, %v3465_v44  ;;  %3630 = vmatprep.subr.mxu0 %v8366_v12  ;;  %3610 = vmatmul.mubr.f32.gmra.mxu0 %v8715_v3  ;;  %v10192_v12 = vld [vmem:[#allocation12_spill] sm:$0xff]  ;;  %v5276_v44 = vld [vmem:[%s8221_s1 + $0x1b8] sm:$0xff] }
 0xe11   : > { %3631 = vmatpush1.msra.mxu0 %v8371_v14  ;;  %3615 = vmatprep.mubr.f32.mxu0 %v9799_v59  ;;  %v10193_v14 = vld [vmem:[#allocation13_spill] sm:$0xff]  ;;  %v5277_v11 = vld [vmem:[%s8221_s1 + $0x1b0] sm:$0xff] }
 0xe12   : > { %3632 = vmatprep.subr.mxu0 %v8375_v16  ;;  %v8723_v23 = vadd.f32 %v3518_v9, %v3494_v36  ;;  %v10194_v16 = vld [vmem:[#allocation15_spill] sm:$0xff]  ;;  %v4722_v5 = vld [vmem:[%s9090_s11 + $0x78] sm:$0xff]  ;;  %v5279_v9 = vld [vmem:[%s8221_s1 + $0x190] sm:$0xff] }
 0xe13   : > { %3633 = vmatpush1.msra.mxu0 %v8379_v20  ;;  %v10195_v20 = vld [vmem:[#allocation17_spill] sm:$0xff] }
 0xe14   : > { %3634 = vmatprep.subr.mxu0 %v8383_v10  ;;  %3616 = vmatmul.mubr.f32.gmra.mxu0 %v8723_v23  ;;  %v10196_v10 = vld [vmem:[#allocation19_spill] sm:$0xff]  ;;  %v5278_v36 = vld [vmem:[%s8221_s1 + $0x198] sm:$0xff] }
 0xe15   : > { %3635 = vmatpush1.msra.mxu0 %v8387_v35  ;;  %3686 = vmatprep.mubr.f32.mxu0 %v9799_v59  ;;  %v10197_v35 = vld [vmem:[#allocation21_spill] sm:$0xff] }
 0xe16   : > { %3636 = vmatprep.subr.mxu0 %v8391_v56  ;;  %v10198_v56 = vld [vmem:[#allocation23_spill] sm:$0xff] }
 0xe17   : > { %3637 = vmatpush1.msra.mxu0 %v8395_v63  ;;  %v10199_v63 = vld [vmem:[#allocation25_spill] sm:$0xff] }
 0xe18   : > { %3638 = vmatprep.subr.mxu0 %v8399_v7  ;;  %v10200_v7 = vld [vmem:[#allocation28_spill] sm:$0xff] }
 0xe19   : > { %3639 = vmatpush1.msra.mxu0 %v10190_v31  ;;  %v4721_v31 = vld [vmem:[%s9090_s11 + $0x70] sm:$0xff] }
 0xe1a   : > { %3640 = vmatprep.subr.mxu0 %v10191_v39  ;;  %v5281_v39 = vld [vmem:[%s8221_s1 + $0x170] sm:$0xff] }
 0xe1b   : > { %3641 = vmatpush1.msra.mxu0 %v10192_v12  ;;  %v5282_v12 = vld [vmem:[%s8221_s1 + $0x158] sm:$0xff] }
 0xe1c   : > { %3642 = vmatprep.subr.mxu0 %v10193_v14  ;;  %v5283_v14 = vld [vmem:[%s8221_s1 + $0x150] sm:$0xff] }
 0xe1d   : > { %3643 = vmatpush1.msra.mxu0 %v10194_v16  ;;  %v5284_v16 = vld [vmem:[%s8221_s1 + $0x138] sm:$0xff] }
 0xe1e   : > { %3644 = vmatprep.subr.mxu0 %v10195_v20  ;;  %v5285_v20 = vld [vmem:[%s8221_s1 + $0x130] sm:$0xff] }
 0xe1f   : > { %3645 = vmatpush1.msra.mxu0 %v10196_v10  ;;  %v5286_v10 = vld [vmem:[%s8221_s1 + $0x118] sm:$0xff] }
 0xe20   : > { %3646 = vmatprep.subr.mxu0 %v10197_v35  ;;  %v5287_v35 = vld [vmem:[%s8221_s1 + $0x110] sm:$0xff] }
 0xe21   : > { %3647 = vmatpush1.msra.mxu0 %v10198_v56 }
 0xe22   : > { %3648 = vmatprep.subr.mxu0 %v10199_v63 }
 0xe23   : > { %3649 = vmatpush1.msra.mxu0 %v10200_v7 }
 0xe24   : > { %3650 = vmatprep.subr.mxu0 %v10201_v42 }
 0xe25   : > { %3651 = vmatpush1.msra.mxu0 %v10202_v47 }
 0xe26   : > { %3652 = vmatprep.subr.mxu0 %v10203_v61 }
 0xe27   : > { %3653 = vmatpush1.msra.mxu0 %v10204_v1 }
 0xe28   : > { %3687 = vmatmul.mubr.f32.vlgmr.msra.gmra.mxu0 %v8701_v13  ;;  %3887 = vmatprep.subr.mxu0 %v10205_v32  ;;  %v5288_v32 = vld [vmem:[%s8221_s1 + $0xf8] sm:$0xff] }
 0xe29   : > { %3692 = vmatprep.mubr.f32.mxu0 %v9799_v59  ;;  %3888 = vmatpush1.msra.mxu0 %v8230_v58  ;;  %v10206_v58 = vld [vmem:[#allocation8_spill] sm:$0xff] }
 0xe2a   : > { %3889 = vmatprep.subr.mxu0 %v8235_v60  ;;  %v10207_v60 = vld [vmem:[#allocation9_spill] sm:$0xff] }
 0xe2b   : > { %3890 = vmatpush1.msra.mxu0 %v8239_v17  ;;  %v10208_v17 = vld [vmem:[#allocation27_spill] sm:$0xff] }
 0xe2c   : > { %3693 = vmatmul.mubr.f32.gmra.mxu0 %v8707_v22  ;;  %3891 = vmatprep.subr.mxu0 %v8242_v6  ;;  %v10209_v6 = vld [vmem:[#allocation29_spill] sm:$0xff] }
 0xe2d   : > { %3698 = vmatprep.mubr.f32.mxu0 %v9799_v59  ;;  %3892 = vmatpush1.msra.mxu0 %v8246_v52  ;;  %v10210_v52 = vld [vmem:[#allocation31_spill] sm:$0xff] }
 0xe2e   : > { %3893 = vmatprep.subr.mxu0 %v8250_v62  ;;  %v10211_v62 = vld [vmem:[#allocation33_spill] sm:$0xff] }
 0xe2f   : > { %3894 = vmatpush1.msra.mxu0 %v8254_v2  ;;  %v10212_v2 = vld [vmem:[#allocation35_spill] sm:$0xff] }
 0xe30   : > { %3699 = vmatmul.mubr.f32.gmra.mxu0 %v8715_v3  ;;  %3895 = vmatprep.subr.mxu0 %v8258_v43  ;;  %v4716_v43 = vld [vmem:[%s9090_s11 + $0x48] sm:$0xff] }
 0xe31   : > { %3704 = vmatprep.mubr.f32.mxu0 %v9799_v59  ;;  %3896 = vmatpush1.msra.mxu0 %v8262_v4 }
 0xe32   : > { %3897 = vmatprep.subr.mxu0 %v8266_v46  ;;  %4723 = vmatprep.mubr.msk.f32.mxu1 %vm3364_vm2, %v4716_v43  ;;  %v5296_v43 = vld [vmem:[%s8221_s1 + $0x78] sm:$0xff] }
 0xe33   : > { %3898 = vmatpush1.msra.mxu0 %v8270_v21 }
 0xe34   : > { %3705 = vmatmul.mubr.f32.gmra.mxu0 %v8723_v23  ;;  %3899 = vmatprep.subr.mxu0 %v8274_v29 }
 0xe35   : > { %3900 = vmatpush1.msra.mxu0 %v8278_v33  ;;  %3951 = vmatprep.mubr.f32.mxu0 %v9799_v59 }
 0xe36   : > { %3901 = vmatprep.subr.mxu0 %v8282_v27 }
 0xe37   : > { %3902 = vmatpush1.msra.mxu0 %v8286_v51 }
 0xe38   : > { %3903 = vmatprep.subr.mxu0 %v8290_v34 }
 0xe39   : > { %3904 = vmatpush1.msra.mxu0 %v8294_v0 }
 0xe3a   : > { %3905 = vmatprep.subr.mxu0 %v8298_v19 }
 0xe3b   : > { %3906 = vmatpush1.msra.mxu0 %v8302_v26 }
 0xe3c   : > { %3907 = vmatprep.subr.mxu0 %v8306_v25 }
 0xe3d   : > { %3908 = vmatpush1.msra.mxu0 %v8310_v18 }
 0xe3e   : > { %3909 = vmatprep.subr.mxu0 %v8314_v55 }
 0xe3f   : > { %3910 = vmatpush1.msra.mxu0 %v8318_v24 }
 0xe40   : > { %3911 = vmatprep.subr.mxu0 %v10179_v41 }
 0xe41   : > { %3912 = vmatpush1.msra.mxu0 %v10206_v58  ;;  %v5289_v58 = vld [vmem:[%s8221_s1 + $0xf0] sm:$0xff] }
 0xe42   : > { %3913 = vmatprep.subr.mxu0 %v10207_v60  ;;  %v5290_v60 = vld [vmem:[%s8221_s1 + $0xd8] sm:$0xff] }
 0xe43   : > { %3914 = vmatpush1.msra.mxu0 %v10208_v17  ;;  %v5291_v17 = vld [vmem:[%s8221_s1 + $0xd0] sm:$0xff] }
 0xe44   : > { %3915 = vmatprep.subr.mxu0 %v10209_v6  ;;  %v5292_v6 = vld [vmem:[%s8221_s1 + $0xb8] sm:$0xff] }
 0xe45   : > { %3916 = vmatpush1.msra.mxu0 %v10210_v52  ;;  %v5293_v52 = vld [vmem:[%s8221_s1 + $0xb0] sm:$0xff] }
 0xe46   : > { %3917 = vmatprep.subr.mxu0 %v10211_v62  ;;  %v5294_v62 = vld [vmem:[%s8221_s1 + $0x98] sm:$0xff] }
 0xe47   : > { %3918 = vmatpush1.msra.mxu0 %v10212_v2  ;;  %v5295_v2 = vld [vmem:[%s8221_s1 + $0x90] sm:$0xff] }
 0xe48   : > { %4085 = vmatprep.subr.mxu0 %v9799_v59 }
 0xec8   : > { %v3599_v4 = vpop.f32.mrf.mxu0 }
 0xeca   : > { %v3601_v46 = vpop.f32.mrf.mxu0 }
 0xecc   : > { %v3605_v21 = vpop.f32.mrf.mxu0 }
 0xece   : > { %v3607_v29 = vpop.f32.mrf.mxu0 }
 0xed0   : > { %v3611_v33 = vpop.f32.mrf.mxu0 }
 0xed2   : > { %v3613_v27 = vpop.f32.mrf.mxu0 }
 0xed4   : > { %v3617_v51 = vpop.f32.mrf.mxu0 }
 0xed6   : > { %v3619_v34 = vpop.f32.mrf.mxu0 }
 0xee8   : > { %v3688_v0 = vpop.f32.mrf.mxu0 }
 0xee9   : > { %v3711_v48 = vand.u32 2147483647, %v3688_v0 }
 0xeea   : > { %v3690_v19 = vpop.f32.mrf.mxu0 }
 0xeeb   : > { %v3715_v40 = vand.u32 2147483647, %v3690_v19 }
 0xeec   : > { %v3694_v26 = vpop.f32.mrf.mxu0 }
 0xeed   : > { %v3712_v37 = vand.u32 2147483647, %v3694_v26 }
 0xeee   : > { %v3696_v25 = vpop.f32.mrf.mxu0 }
 0xeef   : > { %v3716_v38 = vand.u32 2147483647, %v3696_v25 }
 0xef0   : > { %v3700_v18 = vpop.f32.mrf.mxu0 }
 0xef1   : > { %v3713_v8 = vand.u32 2147483647, %v3700_v18 }
 0xef2   : > { %v3702_v55 = vpop.f32.mrf.mxu0 }
 0xef3   : > { %v3717_v57 = vand.u32 2147483647, %v3702_v55 }
 0xef4   : > { %v3706_v24 = vpop.f32.mrf.mxu0 }
 0xef5   : > { %v3714_v41 = vand.u32 2147483647, %v3706_v24 }
 0xef6   : > { %v3708_v45 = vpop.f32.mrf.mxu0 }
 0xef7   : > { %3732 = vmatpush1.msra.mxu1 %v3714_v41  ;;  %v3718_v53 = vand.u32 2147483647, %v3708_v45 }
 0xef8   : > { %3733 = vmatprep.subr.mxu1 %v9799_v59 }
 0xef9   : > { %3734 = vmatpush1.msra.mxu1 %v3713_v8 }
 0xefa   : > { %3735 = vmatprep.subr.mxu1 %v9799_v59 }
 0xefb   : > { %3736 = vmatpush1.msra.mxu1 %v3712_v37 }
 0xefc   : > { %3737 = vmatprep.subr.mxu1 %v9799_v59 }
 0xefd   : > { %3738 = vmatpush1.msra.mxu1 %v3711_v48 }
 0xefe   : > { %3739 = vmatprep.subr.mxu1 %v9799_v59 }
 0xeff   : > { %3740 = vmatpush1.msra.mxu1 %v3619_v34 }
 0xf00   : > { %3741 = vmatprep.subr.mxu1 %v9799_v59 }
 0xf01   : > { %3742 = vmatpush1.msra.mxu1 %v3613_v27 }
 0xf02   : > { %3743 = vmatprep.subr.mxu1 %v9799_v59 }
 0xf03   : > { %3744 = vmatpush1.msra.mxu1 %v3607_v29 }
 0xf04   : > { %3745 = vmatprep.subr.mxu1 %v9799_v59 }
 0xf05   : > { %3746 = vmatpush1.msra.mxu1 %v3601_v46  ;;  %v3857_v46 = vpop.permute.xlu1 %3856 }
 0xf06   : > { %3747 = vmatprep.subr.mxu1 %v9799_v59 }
 0xf07   : > { %3748 = vmatpush1.msra.mxu1 %v3617_v51 }
 0xf08   : > { %3749 = vmatprep.subr.mxu1 %v9799_v59 }
 0xf09   : > { %3750 = vmatpush1.msra.mxu1 %v3611_v33 }
 0xf0a   : > { %3751 = vmatprep.subr.mxu1 %v9799_v59 }
 0xf0b   : > { %3752 = vmatpush1.msra.mxu1 %v3605_v21 }
 0xf0c   : > { %3753 = vmatprep.subr.mxu1 %v9799_v59 }
 0xf0d   : > { %3754 = vmatpush1.msra.mxu1 %v3599_v4  ;;  %v3828_v4 = vpop.permute.xlu0 %3827 }
 0xf0e   : > { %3755 = vmatprep.subr.mxu1 %v9799_v59 }
 0xf0f   : > { %3756 = vmatpush1.msra.mxu1 %v8723_v23  ;;  %v5280_v23 = vld [vmem:[%s8221_s1 + $0x178] sm:$0xff] }
 0xf10   : > { %3757 = vmatprep.subr.mxu1 %v9799_v59 }
 0xf11   : > { %3758 = vmatpush1.msra.mxu1 %v8715_v3  ;;  %v4719_v3 = vld [vmem:[%s9090_s11 + $0x60] sm:$0xff]  ;;  %v3833_v33 = vpop.permute.xlu0 %3832 }
 0xf12   : > { %3759 = vmatprep.subr.mxu1 %v9799_v59 }
 0xf13   : > { %3760 = vmatpush1.msra.mxu1 %v8707_v22  ;;  %v4717_v22 = vld [vmem:[%s9090_s11 + $0x50] sm:$0xff] }
 0xf14   : > { %3761 = vmatprep.subr.mxu1 %v9799_v59 }
 0xf15   : > { %3762 = vmatpush1.msra.mxu1 %v8701_v13  ;;  %v4718_v13 = vld [vmem:[%s9090_s11 + $0x58] sm:$0xff] }
 0xf16   : > { %3787 = vmatprep.subr.mxu1 %v9799_v59 }
 0xf17   : > { %3788 = vmatpush2.msra.mxu1 %v3718_v53 }
 0xf18   : > { %3789 = vmatprep.subr.mxu1 %v9799_v59 }
 0xf19   : > { %3790 = vmatpush2.msra.mxu1 %v3717_v57  ;;  %v4736_v57 = vld [vmem:[%s9090_s11 + $0x88] sm:$0xff] }
 0xf1a   : > { %3791 = vmatprep.subr.mxu1 %v9799_v59 }
 0xf1b   : > { %3792 = vmatpush2.msra.mxu1 %v3716_v38 }
 0xf1c   : > { %3793 = vmatprep.subr.mxu1 %v9799_v59 }
 0xf1d   : > { %3794 = vmatpush2.msra.mxu1 %v3715_v40 }
 0xf1e   : > { %3796 = vmatmul.mubr.f32.vlgmr.msra.gmra.mxu1 %v4715_v54  ;;  %3976 = vmatprep.subr.mxu1 %v5272_v50 }
 0xf1f   : > { %4724 = vmatprep.mubr.msk.f32.mxu1 %vm3364_vm2, %v4718_v13  ;;  %3977 = vmatpush1.msra.mxu1 %v5273_v49 }
 0xf20   : > { %3978 = vmatprep.subr.mxu1 %v5274_v28 }
 0xf21   : > { %3979 = vmatpush1.msra.mxu1 %v5275_v30 }
 0xf22   : > { %3801 = vmatmul.mubr.f32.gmra.mxu1 %v4717_v22  ;;  %3980 = vmatprep.subr.mxu1 %v5276_v44 }
 0xf23   : > { %4725 = vmatprep.mubr.msk.f32.mxu1 %vm3364_vm2, %v4720_v15  ;;  %3981 = vmatpush1.msra.mxu1 %v5277_v11 }
 0xf24   : > { %3982 = vmatprep.subr.mxu1 %v5278_v36 }
 0xf25   : > { %3983 = vmatpush1.msra.mxu1 %v5279_v9 }
 0xf26   : > { %3806 = vmatmul.mubr.f32.gmra.mxu1 %v4719_v3  ;;  %3984 = vmatprep.subr.mxu1 %v5280_v23 }
 0xf27   : > { %4726 = vmatprep.mubr.msk.f32.mxu1 %vm3364_vm2, %v4722_v5  ;;  %3985 = vmatpush1.msra.mxu1 %v5281_v39 }
 0xf28   : > { %3986 = vmatprep.subr.mxu1 %v5282_v12 }
 0xf29   : > { %3987 = vmatpush1.msra.mxu1 %v5283_v14 }
 0xf2a   : > { %3811 = vmatmul.mubr.f32.gmra.mxu1 %v4721_v31  ;;  %3988 = vmatprep.subr.mxu1 %v5284_v16 }
 0xf2b   : > { %3989 = vmatpush1.msra.mxu1 %v5285_v20  ;;  %4040 = vmatprep.mubr.f32.mxu1 %v9799_v59 }
 0xf2c   : > { %3990 = vmatprep.subr.mxu1 %v5286_v10 }
 0xf2d   : > { %3991 = vmatpush1.msra.mxu1 %v5287_v35  ;;  %v4735_v35 = vld [vmem:[%s9090_s11 + $0x80] sm:$0xff] }
 0xf2e   : > { %3992 = vmatprep.subr.mxu1 %v5288_v32  ;;  %v4738_v32 = vld [vmem:[%s9090_s11 + $0x98] sm:$0xff] }
 0xf2f   : > { %3993 = vmatpush1.msra.mxu1 %v5289_v58  ;;  %v4737_v58 = vld [vmem:[%s9090_s11 + $0x90] sm:$0xff] }
 0xf30   : > { %3994 = vmatprep.subr.mxu1 %v5290_v60  ;;  %v4740_v60 = vld [vmem:[%s9090_s11 + $0xa8] sm:$0xff] }
 0xf31   : > { %3995 = vmatpush1.msra.mxu1 %v5291_v17  ;;  %v4739_v17 = vld [vmem:[%s9090_s11 + $0xa0] sm:$0xff] }
 0xf32   : > { %3996 = vmatprep.subr.mxu1 %v5292_v6  ;;  %v4742_v6 = vld [vmem:[%s9090_s11 + $0xb8] sm:$0xff] }
 0xf33   : > { %3997 = vmatpush1.msra.mxu1 %v5293_v52  ;;  %v4741_v52 = vld [vmem:[%s9090_s11 + $0xb0] sm:$0xff] }
 0xf34   : > { %3998 = vmatprep.subr.mxu1 %v5294_v62 }
 0xf35   : > { %3999 = vmatpush1.msra.mxu1 %v5295_v2 }
 0xf36   : > { %4000 = vmatprep.subr.mxu1 %v5296_v43 }
 0xf37   : > { %4001 = vmatpush1.msra.mxu1 %v10198_v56  ;;  %v3862_v56 = vpop.permute.xlu1 %3861 }
 0xf38   : > { %4002 = vmatprep.subr.mxu1 %v10199_v63 }
 0xf39   : > { %4003 = vmatpush1.msra.mxu1 %v10200_v7 }
 0xf3a   : > { %4004 = vmatprep.subr.mxu1 %v10201_v42 }
 0xf3b   : > { %4005 = vmatpush1.msra.mxu1 %v10202_v47  ;;  %v3838_v47 = vpop.permute.xlu0 %3837  ;;  %v3867_v26 = vpop.permute.xlu1 %3866 }
 0xf3c   : > { %4006 = vmatprep.subr.mxu1 %v10203_v61 }
 0xf3d   : > { %4007 = vmatpush1.msra.mxu1 %v10204_v1 }
 0xf3f   : > { %v3843_v8 = vpop.permute.xlu0 %3842  ;;  %v3872_v45 = vpop.permute.xlu1 %3871 }
 0xfde   : > { %v3797_v21 = vpop.f32.mrf.mxu1 }
 0xfdf   : > { %v3816_v29 = vmax.f32 %v3797_v21, 0.0 }
 0xfe0   : > { %v3799_v27 = vpop.f32.mrf.mxu1 }
 0xfe1   : > { %v3845_v51 = vmul.f32 %v3828_v4, %v3816_v29  ;;  %v10213_v4 = vld [vmem:[#allocation37_spill] sm:$0xff]  ;;  %v10214_v29 = vld [vmem:[#allocation38_spill] sm:$0xff] }
 0xfe2   : > { %v3802_v34 = vpop.f32.mrf.mxu1 }
 0xfe3   : > { %v8873_v63 = vadd.f32 %v3857_v46, %v3845_v51  ;;  %v3817_v7 = vmax.f32 %v3802_v34, 0.0 }
 0xfe4   : > { %v3804_v0 = vpop.f32.mrf.mxu1 }
 0xfe5   : > { %v3846_v42 = vmul.f32 %v3833_v33, %v3817_v7  ;;  %3952 = vmatmul.mubr.f32.vlgmr.msra.gmra.mxu0 %v8873_v63  ;;  %4041 = vmatmul.mubr.f32.vlgmr.msra.gmra.mxu1 %v8873_v63 }
 0xfe6   : > { %v3807_v61 = vpop.f32.mrf.mxu1  ;;  %3957 = vmatprep.mubr.f32.mxu0 %v9799_v59  ;;  %4046 = vmatprep.mubr.f32.mxu1 %v9799_v59 }
 0xfe7   : > { %v3818_v1 = vmax.f32 %v3807_v61, 0.0  ;;  %v8879_v19 = vadd.f32 %v3862_v56, %v3846_v42  ;;  %v10215_v56 = vld [vmem:[#allocation40_spill] sm:$0xff]  ;;  %v10216_v61 = vld [vmem:[#allocation39_spill] sm:$0xff] }
 0xfe8   : > { %v3809_v25 = vpop.f32.mrf.mxu1 }
 0xfe9   : > { %v3847_v18 = vmul.f32 %v3838_v47, %v3818_v1  ;;  %3958 = vmatmul.mubr.f32.gmra.mxu0 %v8879_v19  ;;  %4047 = vmatmul.mubr.f32.gmra.mxu1 %v8879_v19 }
 0xfea   : > { %v3812_v55 = vpop.f32.mrf.mxu1  ;;  %3963 = vmatprep.mubr.f32.mxu0 %v9799_v59  ;;  %4052 = vmatprep.mubr.f32.mxu1 %v9799_v59 }
 0xfeb   : > { %v3819_v24 = vmax.f32 %v3812_v55, 0.0  ;;  %v3876_v41 = vadd.f32 %v3867_v26, %v3847_v18  ;;  %v4222_v55 = vld [vmem:[%s9093_s14] sm:$0xff] }
 0xfec   : > { %v3814_v37 = vpop.f32.mrf.mxu1 }
 0xfed   : > { %v3848_v48 = vmul.f32 %v3843_v8, %v3819_v24  ;;  %3964 = vmatmul.mubr.f32.gmra.mxu0 %v3876_v41  ;;  %4053 = vmatmul.mubr.f32.gmra.mxu1 %v3876_v41  ;;  %v4747_v24 = vld [vmem:[%s9093_s14 + $0x20] sm:$0xff]  ;;  %v4749_v8 = vld [vmem:[%s9093_s14 + $0x30] sm:$0xff] }
 0xfee   : > { %3969 = vmatprep.mubr.f32.mxu0 %v9799_v59  ;;  %4058 = vmatprep.mubr.f32.mxu1 %v9799_v59 }
 0xfef   : > { %v3877_v53 = vadd.f32 %v3872_v45, %v3848_v48 }
 0xff1   : > { %3970 = vmatmul.mubr.f32.gmra.mxu0 %v3877_v53  ;;  %4059 = vmatmul.mubr.f32.gmra.mxu1 %v3877_v53 }
 0xff2   : > { %4743 = vmatprep.mubr.msk.f32.mxu0 %vm3364_vm2, %v4736_v57 }
0x10a5   : > { %v3953_v38 = vpop.f32.mrf.mxu0  ;;  %v4042_v40 = vpop.f32.mrf.mxu1 }
0x10a6   : > { %v4065_v31 = vand.u32 2147483647, %v4042_v40 }
0x10a7   : > { %v3955_v54 = vpop.f32.mrf.mxu0  ;;  %v4044_v13 = vpop.f32.mrf.mxu1 }
0x10a8   : > { %v4069_v10 = vand.u32 2147483647, %v4044_v13 }
0x10a9   : > { %v3959_v50 = vpop.f32.mrf.mxu0  ;;  %v4048_v22 = vpop.f32.mrf.mxu1 }
0x10aa   : > { %v4066_v9 = vand.u32 2147483647, %v4048_v22 }
0x10ab   : > { %v3961_v49 = vpop.f32.mrf.mxu0  ;;  %v4050_v15 = vpop.f32.mrf.mxu1 }
0x10ac   : > { %v4070_v20 = vand.u32 2147483647, %v4050_v15 }
0x10ad   : > { %v4054_v28 = vpop.f32.mrf.mxu1  ;;  %v3965_v30 = vpop.f32.mrf.mxu0 }
0x10ae   : > { %v4067_v36 = vand.u32 2147483647, %v4054_v28 }
0x10af   : > { %v4056_v44 = vpop.f32.mrf.mxu1  ;;  %v3967_v5 = vpop.f32.mrf.mxu0 }
0x10b0   : > { %v4071_v16 = vand.u32 2147483647, %v4056_v44 }
0x10b1   : > { %v4060_v3 = vpop.f32.mrf.mxu1  ;;  %v3971_v23 = vpop.f32.mrf.mxu0 }
0x10b2   : > { %v4068_v11 = vand.u32 2147483647, %v4060_v3 }
0x10b3   : > { %v3973_v39 = vpop.f32.mrf.mxu0  ;;  %v4062_v12 = vpop.f32.mrf.mxu1 }
0x10b4   : > { %4086 = vmatpush1.msra.mxu0 %v4068_v11  ;;  %v4072_v14 = vand.u32 2147483647, %v4062_v12  ;;  %v4297_v12 = vld [vmem:[%s9083_s4 + $0x70] sm:$0xff] }
0x10b5   : > { %4087 = vmatprep.subr.mxu0 %v9799_v59 }
0x10b6   : > { %4088 = vmatpush1.msra.mxu0 %v4067_v36  ;;  %v4223_v36 = vld [vmem:[%s9093_s14 + $0x8] sm:$0xff] }
0x10b7   : > { %4089 = vmatprep.subr.mxu0 %v9799_v59 }
0x10b8   : > { %4090 = vmatpush1.msra.mxu0 %v4066_v9  ;;  %v4748_v9 = vld [vmem:[%s9093_s14 + $0x28] sm:$0xff] }
0x10b9   : > { %4091 = vmatprep.subr.mxu0 %v9799_v59 }
0x10ba   : > { %4092 = vmatpush1.msra.mxu0 %v4065_v31  ;;  %v4750_v31 = vld [vmem:[%s9093_s14 + $0x38] sm:$0xff] }
0x10bb   : > { %4093 = vmatprep.subr.mxu0 %v9799_v59 }
0x10bc   : > { %4094 = vmatpush1.msra.mxu0 %v3973_v39  ;;  %v4298_v39 = vld [vmem:[%s9083_s4 + $0x78] sm:$0xff] }
0x10bd   : > { %4095 = vmatprep.subr.mxu0 %v9799_v59  ;;  %4872 = vmatprep.subr.mxu1 %v4298_v39 }
0x10be   : > { %4096 = vmatpush1.msra.mxu0 %v3967_v5  ;;  %4873 = vmatpush3.msra.mxu1 %v4298_v39 }
0x10bf   : > { %4097 = vmatprep.subr.mxu0 %v9799_v59  ;;  %4874 = vmatprep.subr.mxu1 %v4297_v12 }
0x10c0   : > { %4098 = vmatpush1.msra.mxu0 %v3961_v49  ;;  %4875 = vmatpush3.msra.mxu1 %v4297_v12 }
0x10c1   : > { %4099 = vmatprep.subr.mxu0 %v9799_v59 }
0x10c2   : > { %4100 = vmatpush1.msra.mxu0 %v3955_v54 }
0x10c3   : > { %4101 = vmatprep.subr.mxu0 %v9799_v59 }
0x10c4   : > { %4102 = vmatpush1.msra.mxu0 %v3971_v23  ;;  %v4225_v23 = vld [vmem:[%s9093_s14 + $0x18] sm:$0xff] }
0x10c5   : > { %4103 = vmatprep.subr.mxu0 %v9799_v59 }
0x10c6   : > { %4104 = vmatpush1.msra.mxu0 %v3965_v30 }
0x10c7   : > { %4105 = vmatprep.subr.mxu0 %v9799_v59 }
0x10c8   : > { %4106 = vmatpush1.msra.mxu0 %v3959_v50 }
0x10c9   : > { %4107 = vmatprep.subr.mxu0 %v9799_v59 }
0x10ca   : > { %4108 = vmatpush1.msra.mxu0 %v3953_v38 }
0x10cb   : > { %4109 = vmatprep.subr.mxu0 %v9799_v59 }
0x10cc   : > { %4110 = vmatpush1.msra.mxu0 %v3877_v53 }
0x10cd   : > { %4111 = vmatprep.subr.mxu0 %v9799_v59 }
0x10ce   : > { %4112 = vmatpush1.msra.mxu0 %v3876_v41  ;;  %v4224_v41 = vld [vmem:[%s9093_s14 + $0x10] sm:$0xff] }
0x10cf   : > { %4113 = vmatprep.subr.mxu0 %v9799_v59 }
0x10d0   : > { %4114 = vmatpush1.msra.mxu0 %v8879_v19 }
0x10d1   : > { %4115 = vmatprep.subr.mxu0 %v9799_v59 }
0x10d2   : > { %4116 = vmatpush1.msra.mxu0 %v8873_v63 }
0x10d3   : > { %4141 = vmatprep.subr.mxu0 %v9799_v59 }
0x10d4   : > { %4142 = vmatpush2.msra.mxu0 %v4072_v14  ;;  %v4296_v14 = vld [vmem:[%s9083_s4 + $0x68] sm:$0xff] }
0x10d5   : > { %4143 = vmatprep.subr.mxu0 %v9799_v59  ;;  %4876 = vmatprep.subr.mxu1 %v4296_v14 }
0x10d6   : > { %4144 = vmatpush2.msra.mxu0 %v4071_v16  ;;  %v4295_v16 = vld [vmem:[%s9083_s4 + $0x60] sm:$0xff]  ;;  %4877 = vmatpush3.msra.mxu1 %v4296_v14 }
0x10d7   : > { %4145 = vmatprep.subr.mxu0 %v9799_v59  ;;  %4878 = vmatprep.subr.mxu1 %v4295_v16 }
0x10d8   : > { %4146 = vmatpush2.msra.mxu0 %v4070_v20  ;;  %v4294_v20 = vld [vmem:[%s9083_s4 + $0x58] sm:$0xff]  ;;  %4879 = vmatpush3.msra.mxu1 %v4295_v16 }
0x10d9   : > { %4147 = vmatprep.subr.mxu0 %v9799_v59  ;;  %4880 = vmatprep.subr.mxu1 %v4294_v20 }
0x10da   : > { %4148 = vmatpush2.msra.mxu0 %v4069_v10  ;;  %v4293_v10 = vld [vmem:[%s9083_s4 + $0x50] sm:$0xff]  ;;  %4881 = vmatpush3.msra.mxu1 %v4294_v20  ;;  %v4403_v20 = vld [vmem:[%s9094_s15 + $0x8] sm:$0xff] }
0x10db   : > { %4150 = vmatmul.mubr.f32.vlgmr.msra.gmra.mxu0 %v4735_v35  ;;  %4924 = vmatprep.subr.mxu0 %v9799_v59  ;;  %v4292_v35 = vld [vmem:[%s9083_s4 + $0x48] sm:$0xff] }
0x10dc   : > { %4744 = vmatprep.mubr.msk.f32.mxu0 %vm3364_vm2, %v4738_v32  ;;  %4882 = vmatprep.subr.mxu1 %v4293_v10  ;;  %v4291_v32 = vld [vmem:[%s9083_s4 + $0x40] sm:$0xff] }
0x10dd   : > { %4883 = vmatpush3.msra.mxu1 %v4293_v10  ;;  %v4404_v10 = vld [vmem:[%s9094_s15 + $0x10] sm:$0xff] }
0x10de   : > { %4884 = vmatprep.subr.mxu1 %v4292_v35 }
0x10df   : > { %4155 = vmatmul.mubr.f32.gmra.mxu0 %v4737_v58  ;;  %4885 = vmatpush3.msra.mxu1 %v4292_v35  ;;  %v4290_v58 = vld [vmem:[%s9083_s4 + $0x38] sm:$0xff] }
0x10e0   : > { %4745 = vmatprep.mubr.msk.f32.mxu0 %vm3364_vm2, %v4740_v60  ;;  %4886 = vmatprep.subr.mxu1 %v4291_v32  ;;  %v4289_v60 = vld [vmem:[%s9083_s4 + $0x30] sm:$0xff]  ;;  %v4405_v35 = vld [vmem:[%s9094_s15 + $0x18] sm:$0xff] }
0x10e1   : > { %4887 = vmatpush3.msra.mxu1 %v4291_v32 }
0x10e2   : > { %4888 = vmatprep.subr.mxu1 %v4290_v58 }
0x10e3   : > { %4160 = vmatmul.mubr.f32.gmra.mxu0 %v4739_v17  ;;  %4889 = vmatpush3.msra.mxu1 %v4290_v58  ;;  %v4288_v17 = vld [vmem:[%s9083_s4 + $0x28] sm:$0xff] }
0x10e4   : > { %4746 = vmatprep.mubr.msk.f32.mxu0 %vm3364_vm2, %v4742_v6  ;;  %4890 = vmatprep.subr.mxu1 %v4289_v60 }
0x10e5   : > { %4891 = vmatpush3.msra.mxu1 %v4289_v60  ;;  %v4409_v60 = vld [vmem:[%s9095_s16 + $0x18] sm:$0xff] }
0x10e6   : > { %4892 = vmatprep.subr.mxu1 %v4288_v17 }
0x10e7   : > { %4165 = vmatmul.mubr.f32.gmra.mxu0 %v4741_v52  ;;  %4893 = vmatpush3.msra.mxu1 %v4288_v17  ;;  %v4407_v17 = vld [vmem:[%s9095_s16 + $0x8] sm:$0xff] }
0x10e8   : > { %4932 = vmatprep.mubr.msk.f32.mxu0 %vm5307_vm4, %v9799_v59 }
0x119b   : > { %v4151_v62 = vpop.f32.mrf.mxu0 }
0x119c   : > { %v4152_v33 = vadd.f32 %v4151_v62, %v10214_v29 }
0x119d   : > { %v4153_v2 = vpop.f32.mrf.mxu0 }
0x119e   : > { %v4170_v7 = vmax.f32 %v4152_v33, 0.0  ;;  %v4287_v2 = vld [vmem:[%s9083_s4 + $0x20] sm:$0xff]  ;;  %v4284_v33 = vld [vmem:[%s9083_s4 + $0x8] sm:$0xff] }
0x119f   : > { %v4156_v43 = vpop.f32.mrf.mxu0  ;;  %4894 = vmatprep.subr.mxu1 %v4287_v2 }
0x11a0   : > { %v4157_v46 = vadd.f32 %v10213_v4, %v4156_v43  ;;  %4895 = vmatpush3.msra.mxu1 %v4287_v2  ;;  %v4286_v4 = vld [vmem:[%s9083_s4 + $0x18] sm:$0xff]  ;;  %v4406_v2 = vld [vmem:[%s9095_s16] sm:$0xff] }
0x11a1   : > { %v4158_v21 = vpop.f32.mrf.mxu0  ;;  %4896 = vmatprep.subr.mxu1 %v4286_v4 }
0x11a2   : > { %v4171_v51 = vmax.f32 %v4157_v46, 0.0  ;;  %4897 = vmatpush3.msra.mxu1 %v4286_v4  ;;  %v4285_v21 = vld [vmem:[%s9083_s4 + $0x10] sm:$0xff] }
0x11a3   : > { %v4161_v27 = vpop.f32.mrf.mxu0  ;;  %4898 = vmatprep.subr.mxu1 %v4285_v21 }
0x11a4   : > { %v4162_v34 = vadd.f32 %v4161_v27, %v10215_v56  ;;  %v4174_v47 = vadd.f32 %v4171_v51, %v4170_v7  ;;  %4899 = vmatpush3.msra.mxu1 %v4285_v21 }
0x11a5   : > { %v4163_v63 = vpop.f32.mrf.mxu0  ;;  %4900 = vmatprep.subr.mxu1 %v4284_v33 }
0x11a6   : > { %v4172_v0 = vmax.f32 %v4162_v34, 0.0  ;;  %4901 = vmatpush3.msra.mxu1 %v4284_v33 }
0x11a7   : > { %v4166_v42 = vpop.f32.mrf.mxu0 }
0x11a8   : > { %v4167_v1 = vadd.f32 %v10216_v61, %v4166_v42  ;;  %v4175_v26 = vadd.f32 %v4174_v47, %v4172_v0 }
0x11a9   : > { %v4168_v19 = vpop.f32.mrf.mxu0 }
0x11aa   : > { %v4173_v25 = vmax.f32 %v4167_v1, 0.0 }
0x11ac   : > { %v4176_v18 = vadd.f32 %v4175_v26, %v4173_v25 }
0x11ae   : > { %4177 = vadd.xlane.f32.xlu0 %v4176_v18 }
0x11c4   : > { %4228 = vperm.xlu0 %4958, %v4222_v55  }
0x11c8   : > { %4257 = vperm.xlu0 %4958, %v4747_v24  }
0x11cc   : > { %4238 = vperm.xlu0 %4958, %v4224_v41  }
0x11d0   : > { %4267 = vperm.xlu0 %4958, %v4749_v8  }
0x1237   : > { %v4178_v37 = vpop.xlane.xlu0 %4177 }
0x1238   : > { %v4179_v48 = vrot.slane %v4178_v37, 4 }
0x123a   : > { %v4180_v45 = vadd.f32 %v4179_v48, %v4178_v37 }
0x123c   : > { %v4181_v53 = vrot.slane %v4180_v45, 2 }
0x123e   : > { %v4182_v57 = vadd.f32 %v4181_v53, %v4180_v45 }
0x123f   : > { %v4229_v63 = vpop.permute.xlu0 %4228 }
0x1240   : > { %v4183_v38 = vrot.slane %v4182_v57, 1 }
0x1242   : > { %v4184_v40 = vadd.f32 %v4183_v38, %v4182_v57 }
0x1244   : > { %4941 = vpush %v4184_v40 }
0x1275   : > { %s4942_s1 = spop %4941 }
0x1276   : > { %s4188_s22 = smul.f32 0.00024414063, %s4942_s1 }
0x1278   : > { %v4189_v54 = vstv %s4188_s22 }
0x1279   : > { %v8953_v13 = vsub.f32 %v4170_v7, %v4189_v54  ;;  %v8955_v50 = vsub.f32 %v4171_v51, %v4189_v54  ;;  %v8957_v22 = vsub.f32 %v4172_v0, %v4189_v54  ;;  %v8959_v49 = vsub.f32 %v4173_v25, %v4189_v54  ;;  %v4283_v51 = vld [vmem:[%s9083_s4] sm:$0xff]  ;;  %v4258_v0 = vpop.permute.xlu0 %4257 }
0x127a   : > { %4902 = vmatprep.subr.mxu1 %v4283_v51 }
0x127b   : > { %v4194_v15 = vmul.f32 %v8953_v13, %v8953_v13  ;;  %v4195_v28 = vmul.f32 %v8955_v50, %v8955_v50  ;;  %v4196_v30 = vmul.f32 %v8957_v22, %v8957_v22  ;;  %v4197_v3 = vmul.f32 %v8959_v49, %v8959_v49  ;;  %4903 = vmatpush3.msra.mxu1 %v4283_v51 }
0x127d   : > { %v4198_v44 = vadd.f32 %v4195_v28, %v4194_v15  ;;  %v4239_v47 = vpop.permute.xlu0 %4238 }
0x127f   : > { %v4199_v11 = vadd.f32 %v4198_v44, %v4196_v30 }
0x1281   : > { %v4200_v5 = vadd.f32 %v4199_v11, %v4197_v3  ;;  %v4268_v8 = vpop.permute.xlu0 %4267 }
0x1283   : > { %4201 = vadd.xlane.f32.xlu1 %v4200_v5  ;;  %v4402_v5 = vld [vmem:[%s9094_s15] sm:$0xff] }
0x1294   : > { %4233 = vperm.xlu1 %4959, %v4223_v36  }
0x1298   : > { %4262 = vperm.xlu1 %4959, %v4748_v9  }
0x129c   : > { %4243 = vperm.xlu1 %4959, %v4225_v23  }
0x12a0   : > { %4272 = vperm.xlu1 %4959, %v4750_v31  }
0x130c   : > { %v4202_v6 = vpop.xlane.xlu1 %4201 }
0x130d   : > { %v4203_v52 = vrot.slane %v4202_v6, 4 }
0x130f   : > { %v4204_v62 = vadd.f32 %v4203_v52, %v4202_v6  ;;  %v4408_v52 = vld [vmem:[%s9095_s16 + $0x10] sm:$0xff] }
0x1310   : > { %v4234_v7 = vpop.permute.xlu1 %4233 }
0x1311   : > { %v4205_v43 = vrot.slane %v4204_v62, 2 }
0x1313   : > { %v4206_v46 = vadd.f32 %v4205_v43, %v4204_v62 }
0x1314   : > { %v4263_v42 = vpop.permute.xlu1 %4262 }
0x1315   : > { %v4207_v29 = vrot.slane %v4206_v46, 1 }
0x1317   : > { %v4208_v27 = vadd.f32 %v4207_v29, %v4206_v46 }
0x1318   : > { %v4244_v1 = vpop.permute.xlu1 %4243 }
0x1319   : > { %4943 = vpush %v4208_v27 }
0x131c   : > { %v4273_v57 = vpop.permute.xlu1 %4272 }
0x134a   : > { %s4944_s2 = spop %4943 }
0x134b   : > { %s4212_s27 = smul.f32 0.00024414063, %s4944_s2 }
0x134d   : > { %s4213_s28 = sadd.f32 1e-05, %s4212_s27 }
0x134f   : > { %v4214_v56 = vstv %s4213_s28 }
0x1350   : > { %4962 = vrsqrt.f32 %v4214_v56  ;;  %v4511_v56 = vld [vmem:[%s9096_s17] sm:$0xf] }
0x135d   : > { %v4963_v34 = vpop.eup %4962 }
0x135e   : > { %4945 = vpush %v4963_v34  ;;  %v4512_v34 = vld [vmem:[%s9097_s18] sm:$0xf] }
0x138f   : > { %s4946_s29 = spop %4945 }
0x1390   : > { %v4217_v61 = vstv %s4946_s29  ;;  %s640_s29 = scalar_lea.vmem %s9098_s19, %s4676_s25 }
0x1391   : > { %v4218_v19 = vmul.f32 %v4217_v61, %v8953_v13  ;;  %v4219_v26 = vmul.f32 %v4217_v61, %v8955_v50  ;;  %v4220_v25 = vmul.f32 %v4217_v61, %v8957_v22  ;;  %v4221_v18 = vmul.f32 %v4217_v61, %v8959_v49 }
0x1393   : > { %v4246_v55 = vmul.f32 %v4229_v63, %v4218_v19  ;;  %v4247_v24 = vmul.f32 %v4234_v7, %v4219_v26  ;;  %v4248_v41 = vmul.f32 %v4239_v47, %v4220_v25  ;;  %v4249_v37 = vmul.f32 %v4244_v1, %v4221_v18 }
0x1395   : > { %v4276_v48 = vadd.f32 %v4263_v42, %v4247_v24  ;;  %v4275_v45 = vadd.f32 %v4258_v0, %v4246_v55  ;;  %v4277_v53 = vadd.f32 %v4268_v8, %v4248_v41  ;;  %v4278_v54 = vadd.f32 %v4273_v57, %v4249_v37 }
0x1397   : > { %v4280_v38 = vmax.f32 %v4276_v48, 0.0  ;;  %v4279_v40 = vmax.f32 %v4275_v45, 0.0  ;;  %v4281_v13 = vmax.f32 %v4277_v53, 0.0  ;;  %v4282_v50 = vmax.f32 %v4278_v54, 0.0 }
0x1399   : > { %4904 = vmatprep.mubr.f32.mxu1 %v4279_v40 }
0x139a   : > { %4905 = vmatmul.mubr.f32.vlgmr.msra.gmra.mxu1 %v4280_v38 }
0x139b   : > { %4907 = vmatprep.mubr.f32.mxu1 %v4281_v13 }
0x139e   : > { %4908 = vmatmul.mubr.f32.gmra.mxu1 %v4282_v50 }
0x139f   : > { %4918 = vmatprep.mubr.msk.f32.mxu1 %vm3364_vm2, %v4402_v5 }
0x145a   : > { %v4906_v22 = vpop.f32.mrf.mxu1 }
0x145b   : > { %v4388_v3 = vsel %vm4384_vm3, %v4906_v22, 0.0 }
0x145c   : > { %v4365_v49 = vpop.f32.mrf.mxu1 }
0x145d   : > { %v4385_v11 = vsel %vm4384_vm3, %v4365_v49, 0.0 }
0x145e   : > { %v4909_v15 = vpop.f32.mrf.mxu1 }
0x145f   : > { %v4394_v28 = vsel %vm4384_vm3, %v4909_v15, 0.0 }
0x1460   : > { %4395 = vadd.xlane.f32.xlu0 %v4394_v28  ;;  %v4375_v30 = vpop.f32.mrf.mxu1 }
0x1461   : > { %v4391_v44 = vsel %vm4384_vm3, %v4375_v30, 0.0 }
0x1462   : > { %4392 = vadd.xlane.f32.xlu1 %v4391_v44 }
0x1464   : > { %4389 = vadd.xlane.f32.xlu0 %v4388_v3 }
0x1468   : > { %4386 = vadd.xlane.f32.xlu0 %v4385_v11 }
0x14e9   : > { %v4396_v36 = vpop.xlane.xlu0 %4395 }
0x14ea   : > { %v4401_v9 = vmul.f32 0.015625, %v4396_v36 }
0x14eb   : > { %v4393_v23 = vpop.xlane.xlu1 %4392 }
0x14ec   : > { %v4400_v31 = vmul.f32 0.015625, %v4393_v23  ;;  %4910 = vmatprep.subr.mxu1 %v4401_v9 }
0x14ed   : > { %4911 = vmatpush3.msra.mxu1 %v4401_v9  ;;  %v4390_v39 = vpop.xlane.xlu0 %4389 }
0x14ee   : > { %v4399_v12 = vmul.f32 0.015625, %v4390_v39  ;;  %4912 = vmatprep.subr.mxu1 %v4400_v31 }
0x14ef   : > { %4913 = vmatpush3.msra.mxu1 %v4400_v31 }
0x14f0   : > { %4914 = vmatprep.subr.mxu1 %v4399_v12 }
0x14f1   : > { %v4387_v14 = vpop.xlane.xlu0 %4386  ;;  %4915 = vmatpush3.msra.mxu1 %v4399_v12 }
0x14f2   : > { %v4398_v16 = vmul.f32 0.015625, %v4387_v14 }
0x14f4   : > { %4916 = vmatprep.subr.mxu1 %v4398_v16 }
0x14f5   : > { %4917 = vmatpush3.msra.mxu1 %v4398_v16 }
0x14f6   : > { %4919 = vmatmul.mubr.msk.f32.vlgmr.msra.gmra.mxu1 %vm3364_vm2, %v4403_v20 }
0x14f7   : > { %4921 = vmatprep.mubr.msk.f32.mxu1 %vm3364_vm2, %v4404_v10 }
0x14fa   : > { %4922 = vmatmul.mubr.msk.f32.gmra.mxu1 %vm3364_vm2, %v4405_v35 }
0x15b6   : > { %v4920_v32 = vpop.f32.mrf.mxu1 }
0x15b7   : > { %v4494_v4 = vadd.f32 %v4920_v32, %v4407_v17 }
0x15b8   : > { %v4488_v58 = vpop.f32.mrf.mxu1 }
0x15b9   : > { %v4489_v29 = vadd.f32 %v4488_v58, %v4406_v2  ;;  %v4508_v27 = vmax.f32 %v4494_v4, 0.0 }
0x15ba   : > { %v4923_v6 = vpop.f32.mrf.mxu1 }
0x15bb   : > { %v4504_v62 = vadd.f32 %v4923_v6, %v4409_v60  ;;  %v4507_v51 = vmax.f32 %v4489_v29, 0.0 }
0x15bc   : > { %v4498_v43 = vpop.f32.mrf.mxu1 }
0x15bd   : > { %v4510_v46 = vmax.f32 %v4504_v62, 0.0  ;;  %v4499_v21 = vadd.f32 %v4498_v43, %v4408_v52 }
0x15bf   : > { %v4509_v33 = vmax.f32 %v4499_v21, 0.0  ;;  %4925 = vmatpush3.msra.mxu0 %v4510_v46 }
0x15c0   : > { %4926 = vmatprep.subr.mxu0 %v9799_v59 }
0x15c1   : > { %4927 = vmatpush3.msra.mxu0 %v4509_v33 }
0x15c2   : > { %4928 = vmatprep.subr.mxu0 %v9799_v59 }
0x15c3   : > { %4929 = vmatpush3.msra.mxu0 %v4508_v27 }
0x15c4   : > { %4930 = vmatprep.subr.mxu0 %v9799_v59 }
0x15c5   : > { %4931 = vmatpush3.msra.mxu0 %v4507_v51 }
0x15c6   : > { %4933 = vmatmul.mubr.msk.f32.vlgmr.msra.gmra.mxu0 %vm3364_vm2, %v4511_v56 }
0x1686   : > { %v4582_v63 = vpop.f32.mrf.mxu0 }
0x1687   : > { %v4583_v7 = vadd.f32 %v4582_v63, %v4512_v34 }
0x1688   : > { %v4934_v0 = vpop.f32.mrf.mxu0 }
0x1689   : > { %4587 = vst.msk [vmem:[%s640_s29] sm:$0xf] %vm4586_vm5, %v4583_v7 }
0x168a PF: > { %s29_s0 = sadd.s32 1, %s5303_s0  }
0x168b   : > { %p26_p4 = scmp.ge.s32.totalorder %s29_s0, 4  }
0x168d   :  { %28 = sbr.rel (!%p26_p4) target bundleno = 5 (0x5), region = 146 }

</bundles_post_ra>
